<compile_context>
chip_gen: v7x
topology: tpu7x:2x2x1
jax: 0.10.0
libtpu: 0.0.40
codegen_flags: <defaults>
</compile_context>

<pallas_src>
import jax
import jax.numpy as jnp
from jax.experimental import pallas as pl
from jax.experimental.pallas import tpu as pltpu


LANE = 128
SUBLANE = 8


def _round_up(n, m):
    return ((n + m - 1) // m) * m


# ---------------------------------------------------------------------------
# Kernel body: one batch tile of x, all (padded, bf16) weights VMEM-resident.
# ---------------------------------------------------------------------------
def _encoder_kernel(x_ref,
                    w1_ref, b1_ref,
                    w2_ref, b2_ref,
                    w3_ref, b3_ref,
                    wh_ref, bh_ref,
                    out_ref):
    # Layer 1: Linear + ReLU  (bf16 matmul, f32 accumulate)
    h = jnp.dot(x_ref[...], w1_ref[...], preferred_element_type=jnp.float32)
    h = jnp.maximum(h + b1_ref[...], 0.0).astype(jnp.bfloat16)
    # Layer 2: Linear + ReLU
    h = jnp.dot(h, w2_ref[...], preferred_element_type=jnp.float32)
    h = jnp.maximum(h + b2_ref[...], 0.0).astype(jnp.bfloat16)
    # Layer 3: Linear + ReLU
    h = jnp.dot(h, w3_ref[...], preferred_element_type=jnp.float32)
    h = jnp.maximum(h + b3_ref[...], 0.0).astype(jnp.bfloat16)
    # Fused heads: [mu | log_sigma2 | padding] in one lane-dense output slab.
    out = jnp.dot(h, wh_ref[...], preferred_element_type=jnp.float32) + bh_ref[...]
    out_ref[...] = out.astype(out_ref.dtype)


# ---------------------------------------------------------------------------
# Parameter preparation: fuse heads, pad to 128-lane multiples, cast to bf16.
# ---------------------------------------------------------------------------
def prepare_params(params):
    """params: (in,out) f32 weights, (1,out) f32 biases -> padded bf16/f32."""
    def pad_w(w):
        fi, fo = w.shape
        return jnp.pad(
            w, ((0, _round_up(fi, LANE) - fi), (0, _round_up(fo, LANE) - fo))
        ).astype(jnp.bfloat16)

    def pad_b(b):
        b = b.reshape(1, -1)
        fo = b.shape[1]
        return jnp.pad(b, ((0, 0), (0, _round_up(fo, LANE) - fo))).astype(jnp.float32)

    # Fuse the two heads into one (2000, 2*hid) weight / (1, 2*hid) bias.
    w_h = jnp.concatenate([params["w_mu"], params["w_ls"]], axis=1)
    b_h = jnp.concatenate(
        [params["b_mu"].reshape(1, -1), params["b_ls"].reshape(1, -1)], axis=1)

    return {
        "w1": pad_w(params["w1"]), "b1": pad_b(params["b1"]),
        "w2": pad_w(params["w2"]), "b2": pad_b(params["b2"]),
        "w3": pad_w(params["w3"]), "b3": pad_b(params["b3"]),
        "wh": pad_w(w_h), "bh": pad_b(b_h),
    }


# ---------------------------------------------------------------------------
# Batch-tile selection: largest tile (<= max_tb) whose zero-row padding beyond
# the mandatory 8-sublane multiple stays <= ~12.5% of the batch.
# ---------------------------------------------------------------------------
def _pick_batch_tile(B, max_tb):
    max_tb = max(SUBLANE, _round_up(max_tb, SUBLANE))
    b8 = _round_up(B, SUBLANE)
    for t in (1024, 512, 256, 128, 64, 32, 16, 8):
        if t > max_tb:
            continue
        extra = _round_up(B, t) - b8
        if extra <= b8 // 8:
            return t
    return SUBLANE


# ---------------------------------------------------------------------------
# Wrapper: batch-tiled pallas_call, single-buffered resident weights,
# lane-dense fused output slab.
# ---------------------------------------------------------------------------
def encoder_forward(x, pparams, hid_dim=10, max_tb=512):
    """x: (B, input_dim) f32. pparams: output of prepare_params()."""
    B, D = x.shape
    d_in = pparams["w1"].shape[0]      # padded input dim (e.g. 896)
    d_out = pparams["wh"].shape[1]     # padded fused-head dim (e.g. 128)

    tb = _pick_batch_tile(B, max_tb)
    b_pad = _round_up(B, tb)

    # Single pad of the bf16 cast (no zeros + dynamic-update-slice HBM pass).
    xp = jnp.pad(x.astype(jnp.bfloat16), ((0, b_pad - B), (0, d_in - D)))

    def call(single_buffer_weights):
        res_kwargs = (
            dict(pipeline_mode=pl.Buffered(1)) if single_buffer_weights else {}
        )

        def resident(shape):
            # Constant block index -> stays loaded in VMEM across all tiles;
            # single-buffered because it never changes.
            return pl.BlockSpec(shape, lambda i: (0, 0), **res_kwargs)

        return pl.pallas_call(
            _encoder_kernel,
            out_shape=jax.ShapeDtypeStruct((b_pad, d_out), jnp.float32),
            grid_spec=pltpu.PrefetchScalarGridSpec(
                num_scalar_prefetch=0,
                grid=(b_pad // tb,),
                in_specs=[
                    pl.BlockSpec((tb, d_in), lambda i: (i, 0)),
                    resident(pparams["w1"].shape), resident(pparams["b1"].shape),
                    resident(pparams["w2"].shape), resident(pparams["b2"].shape),
                    resident(pparams["w3"].shape), resident(pparams["b3"].shape),
                    resident(pparams["wh"].shape), resident(pparams["bh"].shape),
                ],
                out_specs=pl.BlockSpec((tb, d_out), lambda i: (i, 0)),
            ),
            compiler_params=pltpu.CompilerParams(
                dimension_semantics=("parallel",),   # megacore-shard batch tiles
                vmem_limit_bytes=48 << 20,           # v7x-safe (<64 MiB physical)
            ),
        )(xp,
          pparams["w1"], pparams["b1"],
          pparams["w2"], pparams["b2"],
          pparams["w3"], pparams["b3"],
          pparams["wh"], pparams["bh"])

    try:
        out = call(True)
    except Exception:
        # Fallback if single-buffered (Buffered(1)) resident blocks are not
        # supported by the installed JAX version: default double-buffering.
        out = call(False)

    mu = out[:B, :hid_dim]
    log_sigma2 = out[:B, hid_dim:2 * hid_dim]
    return mu, log_sigma2


# ---------------------------------------------------------------------------
# Parameter init + references
# ---------------------------------------------------------------------------
def init_params(key, input_dim=784, inter_dims=(500, 500, 2000), hid_dim=10):
    """Deterministic synthetic parameters (torch-Linear-like init), (in,out) layout."""
    dims = [(input_dim, inter_dims[0]),
            (inter_dims[0], inter_dims[1]),
            (inter_dims[1], inter_dims[2]),
            (inter_dims[2], hid_dim),
            (inter_dims[2], hid_dim)]
    names = ["1", "2", "3", "_mu", "_ls"]
    params = {}
    for name, (fan_in, fan_out) in zip(names, dims):
        key, kw, kb = jax.random.split(key, 3)
        bound = 1.0 / jnp.sqrt(fan_in)
        params[f"w{name}"] = jax.random.uniform(
            kw, (fan_in, fan_out), jnp.float32, -bound, bound)
        params[f"b{name}"] = jax.random.uniform(
            kb, (1, fan_out), jnp.float32, -bound, bound)
    return params


def encoder_reference_f32(x, params):
    """Full-precision plain-JAX reference of the original module."""
    h = jnp.maximum(x @ params["w1"] + params["b1"], 0.0)
    h = jnp.maximum(h @ params["w2"] + params["b2"], 0.0)
    h = jnp.maximum(h @ params["w3"] + params["b3"], 0.0)
    mu = h @ params["w_mu"] + params["b_mu"]
    ls = h @ params["w_ls"] + params["b_ls"]
    return mu, ls


def encoder_reference_bf16(x, pparams, hid_dim=10):
    """Plain-JAX reference using the SAME padded bf16 weights (f32 accumulate)."""
    d_in = pparams["w1"].shape[0]
    xp = jnp.pad(x, ((0, 0), (0, d_in - x.shape[1]))).astype(jnp.bfloat16)

    def layer(h, w, b):
        y = jnp.dot(h, w, preferred_element_type=jnp.float32) + b
        return jnp.maximum(y, 0.0).astype(jnp.bfloat16)

    h = layer(xp, pparams["w1"], pparams["b1"])
    h = layer(h, pparams["w2"], pparams["b2"])
    h = layer(h, pparams["w3"], pparams["b3"])
    out = jnp.dot(h, pparams["wh"], preferred_element_type=jnp.float32) + pparams["bh"]
    return out[:, :hid_dim], out[:, hid_dim:2 * hid_dim]


if __name__ == "__main__":
    key = jax.random.PRNGKey(0)
    kx, kp, kx2 = jax.random.split(key, 3)

    input_dim, inter_dims, hid_dim = 784, (500, 500, 2000), 10
    params = init_params(kp, input_dim, inter_dims, hid_dim)
    pparams = prepare_params(params)

    # --- small single-tile test (B = 2, grid = 1) -------------------------
    batch = 2
    x = jax.random.normal(kx, (batch, input_dim), jnp.float32)
    mu, log_sigma2 = encoder_forward(x, pparams, hid_dim=hid_dim)
    jax.block_until_ready((mu, log_sigma2))

    assert mu.shape == (batch, hid_dim) and log_sigma2.shape == (batch, hid_dim)

    # Exactness check vs. a reference using the identical bf16 weights.
    mu_b, ls_b = encoder_reference_bf16(x, pparams, hid_dim)
    assert jnp.allclose(mu, mu_b, atol=1e-2, rtol=1e-2)
    assert jnp.allclose(log_sigma2, ls_b, atol=1e-2, rtol=1e-2)

    # Loose sanity check vs. the original full-precision f32 module semantics.
    mu_f, ls_f = encoder_reference_f32(x, params)
    assert jnp.allclose(mu, mu_f, atol=1e-1, rtol=1e-1)
    assert jnp.allclose(log_sigma2, ls_f, atol=1e-1, rtol=1e-1)

    # --- multi-tile test (B > tb): exercises the batch-tiled grid and the
    # --- constant-index-map (VMEM-resident) weight blocks across steps. ----
    batch2 = 24
    x2 = jax.random.normal(kx2, (batch2, input_dim), jnp.float32)
    mu2, ls2 = encoder_forward(x2, pparams, hid_dim=hid_dim, max_tb=8)  # grid = 3
    jax.block_until_ready((mu2, ls2))
    assert mu2.shape == (batch2, hid_dim) and ls2.shape == (batch2, hid_dim)
    mu2_b, ls2_b = encoder_reference_bf16(x2, pparams, hid_dim)
    assert jnp.allclose(mu2, mu2_b, atol=1e-2, rtol=1e-2)
    assert jnp.allclose(ls2, ls2_b, atol=1e-2, rtol=1e-2)

    print("KERNEL_OK")
</pallas_src>

<mosaic_0001>
module attributes {stable_mosaic.version = 11 : i64} {
  func.func @_encoder_kernel(%arg0: i32, %arg1: memref<8x896xbf16, #tpu.memory_space<vmem>>, %arg2: memref<896x512xbf16, #tpu.memory_space<vmem>>, %arg3: memref<1x512xf32, #tpu.memory_space<vmem>>, %arg4: memref<512x512xbf16, #tpu.memory_space<vmem>>, %arg5: memref<1x512xf32, #tpu.memory_space<vmem>>, %arg6: memref<512x2048xbf16, #tpu.memory_space<vmem>>, %arg7: memref<1x2048xf32, #tpu.memory_space<vmem>>, %arg8: memref<2048x128xbf16, #tpu.memory_space<vmem>>, %arg9: memref<1x128xf32, #tpu.memory_space<vmem>>, %arg10: memref<8x128xf32, #tpu.memory_space<vmem>>) attributes {dimension_semantics = [#tpu.dimension_semantics<parallel>], iteration_bounds = array<i64: 1>, scalar_prefetch = 0 : i64, scratch_operands = 0 : i64, tpu.core_type = #tpu.core_type<tc>, window_params = [{transform_indices = @transform_0, window_bounds = array<i64: 8, 896>}, {pipeline_mode = #tpu.pipeline_mode<synchronous>, transform_indices = @transform_1, window_bounds = array<i64: 896, 512>}, {pipeline_mode = #tpu.pipeline_mode<synchronous>, transform_indices = @transform_2, window_bounds = array<i64: 1, 512>}, {pipeline_mode = #tpu.pipeline_mode<synchronous>, transform_indices = @transform_3, window_bounds = array<i64: 512, 512>}, {pipeline_mode = #tpu.pipeline_mode<synchronous>, transform_indices = @transform_4, window_bounds = array<i64: 1, 512>}, {pipeline_mode = #tpu.pipeline_mode<synchronous>, transform_indices = @transform_5, window_bounds = array<i64: 512, 2048>}, {pipeline_mode = #tpu.pipeline_mode<synchronous>, transform_indices = @transform_6, window_bounds = array<i64: 1, 2048>}, {pipeline_mode = #tpu.pipeline_mode<synchronous>, transform_indices = @transform_7, window_bounds = array<i64: 2048, 128>}, {pipeline_mode = #tpu.pipeline_mode<synchronous>, transform_indices = @transform_8, window_bounds = array<i64: 1, 128>}, {transform_indices = @transform_9, window_bounds = array<i64: 8, 128>}]} {
    %c0 = arith.constant 0 : index
    %c0_0 = arith.constant 0 : index
    %0 = vector.load %arg1[%c0, %c0_0] : memref<8x896xbf16, #tpu.memory_space<vmem>>, vector<8x896xbf16>
    %c0_1 = arith.constant 0 : index
    %c0_2 = arith.constant 0 : index
    %1 = vector.load %arg2[%c0_1, %c0_2] : memref<896x512xbf16, #tpu.memory_space<vmem>>, vector<896x512xbf16>
    %cst = arith.constant dense<0.000000e+00> : vector<8x512xf32>
    %2 = tpu.matmul %0, %1, %cst {dimension_numbers = #tpu.dot_dimension_numbers<[1], [0], [0], [1], [0, 0, 1, 1], [], []>} : vector<8x896xbf16>, vector<896x512xbf16>, vector<8x512xf32> -> vector<8x512xf32>
    %c0_3 = arith.constant 0 : index
    %c0_4 = arith.constant 0 : index
    %3 = vector.load %arg3[%c0_3, %c0_4] : memref<1x512xf32, #tpu.memory_space<vmem>>, vector<1x512xf32>
    %4 = vector.broadcast %3 : vector<1x512xf32> to vector<8x512xf32>
    %5 = arith.addf %2, %4 : vector<8x512xf32>
    %cst_5 = arith.constant 0.000000e+00 : f32
    %6 = vector.broadcast %cst_5 : f32 to vector<8x512xf32>
    %7 = arith.maximumf %5, %6 : vector<8x512xf32>
    %8 = arith.truncf %7 : vector<8x512xf32> to vector<8x512xbf16>
    %c0_6 = arith.constant 0 : index
    %c0_7 = arith.constant 0 : index
    %9 = vector.load %arg4[%c0_6, %c0_7] : memref<512x512xbf16, #tpu.memory_space<vmem>>, vector<512x512xbf16>
    %cst_8 = arith.constant dense<0.000000e+00> : vector<8x512xf32>
    %10 = tpu.matmul %8, %9, %cst_8 {dimension_numbers = #tpu.dot_dimension_numbers<[1], [0], [0], [1], [0, 0, 1, 1], [], []>} : vector<8x512xbf16>, vector<512x512xbf16>, vector<8x512xf32> -> vector<8x512xf32>
    %c0_9 = arith.constant 0 : index
    %c0_10 = arith.constant 0 : index
    %11 = vector.load %arg5[%c0_9, %c0_10] : memref<1x512xf32, #tpu.memory_space<vmem>>, vector<1x512xf32>
    %12 = vector.broadcast %11 : vector<1x512xf32> to vector<8x512xf32>
    %13 = arith.addf %10, %12 : vector<8x512xf32>
    %cst_11 = arith.constant 0.000000e+00 : f32
    %14 = vector.broadcast %cst_11 : f32 to vector<8x512xf32>
    %15 = arith.maximumf %13, %14 : vector<8x512xf32>
    %16 = arith.truncf %15 : vector<8x512xf32> to vector<8x512xbf16>
    %c0_12 = arith.constant 0 : index
    %c0_13 = arith.constant 0 : index
    %17 = vector.load %arg6[%c0_12, %c0_13] : memref<512x2048xbf16, #tpu.memory_space<vmem>>, vector<512x2048xbf16>
    %cst_14 = arith.constant dense<0.000000e+00> : vector<8x2048xf32>
    %18 = tpu.matmul %16, %17, %cst_14 {dimension_numbers = #tpu.dot_dimension_numbers<[1], [0], [0], [1], [0, 0, 1, 1], [], []>} : vector<8x512xbf16>, vector<512x2048xbf16>, vector<8x2048xf32> -> vector<8x2048xf32>
    %c0_15 = arith.constant 0 : index
    %c0_16 = arith.constant 0 : index
    %19 = vector.load %arg7[%c0_15, %c0_16] : memref<1x2048xf32, #tpu.memory_space<vmem>>, vector<1x2048xf32>
    %20 = vector.broadcast %19 : vector<1x2048xf32> to vector<8x2048xf32>
    %21 = arith.addf %18, %20 : vector<8x2048xf32>
    %cst_17 = arith.constant 0.000000e+00 : f32
    %22 = vector.broadcast %cst_17 : f32 to vector<8x2048xf32>
    %23 = arith.maximumf %21, %22 : vector<8x2048xf32>
    %24 = arith.truncf %23 : vector<8x2048xf32> to vector<8x2048xbf16>
    %c0_18 = arith.constant 0 : index
    %c0_19 = arith.constant 0 : index
    %25 = vector.load %arg8[%c0_18, %c0_19] : memref<2048x128xbf16, #tpu.memory_space<vmem>>, vector<2048x128xbf16>
    %cst_20 = arith.constant dense<0.000000e+00> : vector<8x128xf32>
    %26 = tpu.matmul %24, %25, %cst_20 {dimension_numbers = #tpu.dot_dimension_numbers<[1], [0], [0], [1], [0, 0, 1, 1], [], []>} : vector<8x2048xbf16>, vector<2048x128xbf16>, vector<8x128xf32> -> vector<8x128xf32>
    %c0_21 = arith.constant 0 : index
    %c0_22 = arith.constant 0 : index
    %27 = vector.load %arg9[%c0_21, %c0_22] : memref<1x128xf32, #tpu.memory_space<vmem>>, vector<1x128xf32>
    %28 = vector.broadcast %27 : vector<1x128xf32> to vector<8x128xf32>
    %29 = arith.addf %26, %28 : vector<8x128xf32>
    %c0_23 = arith.constant 0 : index
    %c0_24 = arith.constant 0 : index
    %30 = vector.load %arg10[%c0_23, %c0_24] : memref<8x128xf32, #tpu.memory_space<vmem>>, vector<8x128xf32>
    tpu.vector_store %arg10[%c0_23, %c0_24], %29 {strides = array<i32>} : memref<8x128xf32, #tpu.memory_space<vmem>>, vector<8x128xf32>,
    return
  }
  func.func @transform_0(%arg0: i32) -> (i32, i32) {
    %c0_i32 = arith.constant 0 : i32
    %c0_i32_0 = arith.constant 0 : i32
    return %arg0, %c0_i32 : i32, i32
  }
  func.func @transform_1(%arg0: i32) -> (i32, i32) {
    %c0_i32 = arith.constant 0 : i32
    %c0_i32_0 = arith.constant 0 : i32
    %c0_i32_1 = arith.constant 0 : i32
    return %c0_i32, %c0_i32_0 : i32, i32
  }
  func.func @transform_2(%arg0: i32) -> (i32, i32) {
    %c0_i32 = arith.constant 0 : i32
    %c0_i32_0 = arith.constant 0 : i32
    %c0_i32_1 = arith.constant 0 : i32
    return %c0_i32, %c0_i32_0 : i32, i32
  }
  func.func @transform_3(%arg0: i32) -> (i32, i32) {
    %c0_i32 = arith.constant 0 : i32
    %c0_i32_0 = arith.constant 0 : i32
    %c0_i32_1 = arith.constant 0 : i32
    return %c0_i32, %c0_i32_0 : i32, i32
  }
  func.func @transform_4(%arg0: i32) -> (i32, i32) {
    %c0_i32 = arith.constant 0 : i32
    %c0_i32_0 = arith.constant 0 : i32
    %c0_i32_1 = arith.constant 0 : i32
    return %c0_i32, %c0_i32_0 : i32, i32
  }
  func.func @transform_5(%arg0: i32) -> (i32, i32) {
    %c0_i32 = arith.constant 0 : i32
    %c0_i32_0 = arith.constant 0 : i32
    %c0_i32_1 = arith.constant 0 : i32
    return %c0_i32, %c0_i32_0 : i32, i32
  }
  func.func @transform_6(%arg0: i32) -> (i32, i32) {
    %c0_i32 = arith.constant 0 : i32
    %c0_i32_0 = arith.constant 0 : i32
    %c0_i32_1 = arith.constant 0 : i32
    return %c0_i32, %c0_i32_0 : i32, i32
  }
  func.func @transform_7(%arg0: i32) -> (i32, i32) {
    %c0_i32 = arith.constant 0 : i32
    %c0_i32_0 = arith.constant 0 : i32
    %c0_i32_1 = arith.constant 0 : i32
    return %c0_i32, %c0_i32_0 : i32, i32
  }
  func.func @transform_8(%arg0: i32) -> (i32, i32) {
    %c0_i32 = arith.constant 0 : i32
    %c0_i32_0 = arith.constant 0 : i32
    %c0_i32_1 = arith.constant 0 : i32
    return %c0_i32, %c0_i32_0 : i32, i32
  }
  func.func @transform_9(%arg0: i32) -> (i32, i32) {
    %c0_i32 = arith.constant 0 : i32
    %c0_i32_0 = arith.constant 0 : i32
    return %arg0, %c0_i32 : i32, i32
  }
}

module attributes {stable_mosaic.version = 11 : i64} {
  func.func @_encoder_kernel(%arg0: i32, %arg1: memref<8x896xbf16, #tpu.memory_space<vmem>>, %arg2: memref<896x512xbf16, #tpu.memory_space<vmem>>, %arg3: memref<1x512xf32, #tpu.memory_space<vmem>>, %arg4: memref<512x512xbf16, #tpu.memory_space<vmem>>, %arg5: memref<1x512xf32, #tpu.memory_space<vmem>>, %arg6: memref<512x2048xbf16, #tpu.memory_space<vmem>>, %arg7: memref<1x2048xf32, #tpu.memory_space<vmem>>, %arg8: memref<2048x128xbf16, #tpu.memory_space<vmem>>, %arg9: memref<1x128xf32, #tpu.memory_space<vmem>>, %arg10: memref<8x128xf32, #tpu.memory_space<vmem>>) attributes {dimension_semantics = [#tpu.dimension_semantics<parallel>], iteration_bounds = array<i64: 1>, scalar_prefetch = 0 : i64, scratch_operands = 0 : i64, tpu.core_type = #tpu.core_type<tc>, window_params = [{transform_indices = @transform_0, window_bounds = array<i64: 8, 896>}, {pipeline_mode = #tpu.pipeline_mode<synchronous>, transform_indices = @transform_1, window_bounds = array<i64: 896, 512>}, {pipeline_mode = #tpu.pipeline_mode<synchronous>, transform_indices = @transform_2, window_bounds = array<i64: 1, 512>}, {pipeline_mode = #tpu.pipeline_mode<synchronous>, transform_indices = @transform_3, window_bounds = array<i64: 512, 512>}, {pipeline_mode = #tpu.pipeline_mode<synchronous>, transform_indices = @transform_4, window_bounds = array<i64: 1, 512>}, {pipeline_mode = #tpu.pipeline_mode<synchronous>, transform_indices = @transform_5, window_bounds = array<i64: 512, 2048>}, {pipeline_mode = #tpu.pipeline_mode<synchronous>, transform_indices = @transform_6, window_bounds = array<i64: 1, 2048>}, {pipeline_mode = #tpu.pipeline_mode<synchronous>, transform_indices = @transform_7, window_bounds = array<i64: 2048, 128>}, {pipeline_mode = #tpu.pipeline_mode<synchronous>, transform_indices = @transform_8, window_bounds = array<i64: 1, 128>}, {transform_indices = @transform_9, window_bounds = array<i64: 8, 128>}]} {
    %c0 = arith.constant 0 : index
    %c0_0 = arith.constant 0 : index
    %0 = vector.load %arg1[%c0, %c0_0] : memref<8x896xbf16, #tpu.memory_space<vmem>>, vector<8x896xbf16>
    %c0_1 = arith.constant 0 : index
    %c0_2 = arith.constant 0 : index
    %1 = vector.load %arg2[%c0_1, %c0_2] : memref<896x512xbf16, #tpu.memory_space<vmem>>, vector<896x512xbf16>
    %cst = arith.constant dense<0.000000e+00> : vector<8x512xf32>
    %2 = tpu.matmul %0, %1, %cst {dimension_numbers = #tpu.dot_dimension_numbers<[1], [0], [0], [1], [0, 0, 1, 1], [], []>} : vector<8x896xbf16>, vector<896x512xbf16>, vector<8x512xf32> -> vector<8x512xf32>
    %c0_3 = arith.constant 0 : index
    %c0_4 = arith.constant 0 : index
    %3 = vector.load %arg3[%c0_3, %c0_4] : memref<1x512xf32, #tpu.memory_space<vmem>>, vector<1x512xf32>
    %4 = vector.broadcast %3 : vector<1x512xf32> to vector<8x512xf32>
    %5 = arith.addf %2, %4 : vector<8x512xf32>
    %cst_5 = arith.constant 0.000000e+00 : f32
    %6 = vector.broadcast %cst_5 : f32 to vector<8x512xf32>
    %7 = arith.maximumf %5, %6 : vector<8x512xf32>
    %8 = arith.truncf %7 : vector<8x512xf32> to vector<8x512xbf16>
    %c0_6 = arith.constant 0 : index
    %c0_7 = arith.constant 0 : index
    %9 = vector.load %arg4[%c0_6, %c0_7] : memref<512x512xbf16, #tpu.memory_space<vmem>>, vector<512x512xbf16>
    %cst_8 = arith.constant dense<0.000000e+00> : vector<8x512xf32>
    %10 = tpu.matmul %8, %9, %cst_8 {dimension_numbers = #tpu.dot_dimension_numbers<[1], [0], [0], [1], [0, 0, 1, 1], [], []>} : vector<8x512xbf16>, vector<512x512xbf16>, vector<8x512xf32> -> vector<8x512xf32>
    %c0_9 = arith.constant 0 : index
    %c0_10 = arith.constant 0 : index
    %11 = vector.load %arg5[%c0_9, %c0_10] : memref<1x512xf32, #tpu.memory_space<vmem>>, vector<1x512xf32>
    %12 = vector.broadcast %11 : vector<1x512xf32> to vector<8x512xf32>
    %13 = arith.addf %10, %12 : vector<8x512xf32>
    %cst_11 = arith.constant 0.000000e+00 : f32
    %14 = vector.broadcast %cst_11 : f32 to vector<8x512xf32>
    %15 = arith.maximumf %13, %14 : vector<8x512xf32>
    %16 = arith.truncf %15 : vector<8x512xf32> to vector<8x512xbf16>
    %c0_12 = arith.constant 0 : index
    %c0_13 = arith.constant 0 : index
    %17 = vector.load %arg6[%c0_12, %c0_13] : memref<512x2048xbf16, #tpu.memory_space<vmem>>, vector<512x2048xbf16>
    %cst_14 = arith.constant dense<0.000000e+00> : vector<8x2048xf32>
    %18 = tpu.matmul %16, %17, %cst_14 {dimension_numbers = #tpu.dot_dimension_numbers<[1], [0], [0], [1], [0, 0, 1, 1], [], []>} : vector<8x512xbf16>, vector<512x2048xbf16>, vector<8x2048xf32> -> vector<8x2048xf32>
    %c0_15 = arith.constant 0 : index
    %c0_16 = arith.constant 0 : index
    %19 = vector.load %arg7[%c0_15, %c0_16] : memref<1x2048xf32, #tpu.memory_space<vmem>>, vector<1x2048xf32>
    %20 = vector.broadcast %19 : vector<1x2048xf32> to vector<8x2048xf32>
    %21 = arith.addf %18, %20 : vector<8x2048xf32>
    %cst_17 = arith.constant 0.000000e+00 : f32
    %22 = vector.broadcast %cst_17 : f32 to vector<8x2048xf32>
    %23 = arith.maximumf %21, %22 : vector<8x2048xf32>
    %24 = arith.truncf %23 : vector<8x2048xf32> to vector<8x2048xbf16>
    %c0_18 = arith.constant 0 : index
    %c0_19 = arith.constant 0 : index
    %25 = vector.load %arg8[%c0_18, %c0_19] : memref<2048x128xbf16, #tpu.memory_space<vmem>>, vector<2048x128xbf16>
    %cst_20 = arith.constant dense<0.000000e+00> : vector<8x128xf32>
    %26 = tpu.matmul %24, %25, %cst_20 {dimension_numbers = #tpu.dot_dimension_numbers<[1], [0], [0], [1], [0, 0, 1, 1], [], []>} : vector<8x2048xbf16>, vector<2048x128xbf16>, vector<8x128xf32> -> vector<8x128xf32>
    %c0_21 = arith.constant 0 : index
    %c0_22 = arith.constant 0 : index
    %27 = vector.load %arg9[%c0_21, %c0_22] : memref<1x128xf32, #tpu.memory_space<vmem>>, vector<1x128xf32>
    %28 = vector.broadcast %27 : vector<1x128xf32> to vector<8x128xf32>
    %29 = arith.addf %26, %28 : vector<8x128xf32>
    %c0_23 = arith.constant 0 : index
    %c0_24 = arith.constant 0 : index
    %30 = vector.load %arg10[%c0_23, %c0_24] : memref<8x128xf32, #tpu.memory_space<vmem>>, vector<8x128xf32>
    tpu.vector_store %arg10[%c0_23, %c0_24], %29 {strides = array<i32>} : memref<8x128xf32, #tpu.memory_space<vmem>>, vector<8x128xf32>,
    return
  }
  func.func @transform_0(%arg0: i32) -> (i32, i32) {
    %c0_i32 = arith.constant 0 : i32
    %c0_i32_0 = arith.constant 0 : i32
    return %arg0, %c0_i32 : i32, i32
  }
  func.func @transform_1(%arg0: i32) -> (i32, i32) {
    %c0_i32 = arith.constant 0 : i32
    %c0_i32_0 = arith.constant 0 : i32
    %c0_i32_1 = arith.constant 0 : i32
    return %c0_i32, %c0_i32_0 : i32, i32
  }
  func.func @transform_2(%arg0: i32) -> (i32, i32) {
    %c0_i32 = arith.constant 0 : i32
    %c0_i32_0 = arith.constant 0 : i32
    %c0_i32_1 = arith.constant 0 : i32
    return %c0_i32, %c0_i32_0 : i32, i32
  }
  func.func @transform_3(%arg0: i32) -> (i32, i32) {
    %c0_i32 = arith.constant 0 : i32
    %c0_i32_0 = arith.constant 0 : i32
    %c0_i32_1 = arith.constant 0 : i32
    return %c0_i32, %c0_i32_0 : i32, i32
  }
  func.func @transform_4(%arg0: i32) -> (i32, i32) {
    %c0_i32 = arith.constant 0 : i32
    %c0_i32_0 = arith.constant 0 : i32
    %c0_i32_1 = arith.constant 0 : i32
    return %c0_i32, %c0_i32_0 : i32, i32
  }
  func.func @transform_5(%arg0: i32) -> (i32, i32) {
    %c0_i32 = arith.constant 0 : i32
    %c0_i32_0 = arith.constant 0 : i32
    %c0_i32_1 = arith.constant 0 : i32
    return %c0_i32, %c0_i32_0 : i32, i32
  }
  func.func @transform_6(%arg0: i32) -> (i32, i32) {
    %c0_i32 = arith.constant 0 : i32
    %c0_i32_0 = arith.constant 0 : i32
    %c0_i32_1 = arith.constant 0 : i32
    return %c0_i32, %c0_i32_0 : i32, i32
  }
  func.func @transform_7(%arg0: i32) -> (i32, i32) {
    %c0_i32 = arith.constant 0 : i32
    %c0_i32_0 = arith.constant 0 : i32
    %c0_i32_1 = arith.constant 0 : i32
    return %c0_i32, %c0_i32_0 : i32, i32
  }
  func.func @transform_8(%arg0: i32) -> (i32, i32) {
    %c0_i32 = arith.constant 0 : i32
    %c0_i32_0 = arith.constant 0 : i32
    %c0_i32_1 = arith.constant 0 : i32
    return %c0_i32, %c0_i32_0 : i32, i32
  }
  func.func @transform_9(%arg0: i32) -> (i32, i32) {
    %c0_i32 = arith.constant 0 : i32
    %c0_i32_0 = arith.constant 0 : i32
    return %arg0, %c0_i32 : i32, i32
  }
}

</mosaic_0001>

<bundles_post_ra>
// kernel: tpu_custom_call.1
= control target key start
LH: loop header
LB: loop body
LE: loop exit
PB: predicated region body
PF: predicated region fallthrough
CT: control target
= control target key end

     0   :  { %14 = vsyncpa [#allocation3], 0  ;;  %s10579_s0 = inlined_call_operand.hbm [shape: bf16[8,896], index: 0, kind: input, shape index: {}]   ;;  %s10580_s1 = inlined_call_operand.hbm [shape: bf16[896,512], index: 1, kind: input, shape index: {}]   ;;  %s10581_s2 = inlined_call_operand.hbm [shape: f32[1,512], index: 2, kind: input, shape index: {}]   ;;  %s10582_s3 = inlined_call_operand.hbm [shape: bf16[512,512], index: 3, kind: input, shape index: {}]   ;;  %s10583_s4 = inlined_call_operand.hbm [shape: f32[1,512], index: 4, kind: input, shape index: {}]   ;;  %s10584_s5 = inlined_call_operand.hbm [shape: bf16[512,2048], index: 5, kind: input, shape index: {}]   ;;  %s10585_s6 = inlined_call_operand.hbm [shape: f32[1,2048], index: 6, kind: input, shape index: {}]   ;;  %s10586_s7 = inlined_call_operand.hbm [shape: bf16[2048,128], index: 7, kind: input, shape index: {}]   ;;  %s10587_s8 = inlined_call_operand.hbm [shape: f32[1,128], index: 8, kind: input, shape index: {}]   ;;  %s10588_s9 = inlined_call_operand.hbm [shape: f32[8,128], index: 9, kind: output, shape index: {}]  }
   0x1   :  { %15 = vsyncpa [#allocation6], 0 }
   0x2   :  { %16 = vsyncpa [#allocation9], 0 }
   0x3   :  { %17 = vsyncpa [#allocation12], 0 }
   0x4   :  { %18 = vsyncpa [#allocation15], 0 }
   0x5   :  { %19 = vsyncpa [#allocation4], 0  ;;  %s10229_s30 = smov [#allocation5]   ;;  %s9997_s13 = scalar_lea.hbm %s10580_s1, 28672 }
   0x6   :  { %s35_s10 = sshll.u32 %s10229_s30, 4  ;;  %p9998_p0 = scmp.ne.s32.totalorder %s10580_s1, %s9997_s13  ;;  %s36_s10 = int_to_ptr.vmem [resolvable:$true] %s35_s10 }
   0x7   :  { %p10001_p1 = scmp.lt.u32.totalorder %s9997_s13, %s10580_s1 }
   0x9   :  { %p10003_p2 = pnand %p10001_p1, %p9998_p0 }
   0xb   :  { %10006 = shalt.err (!%p10003_p2)
}
   0xc   :  { %s10007_s18 = scalar_lea.vmem %s36_s10, 28672  ;;  %p10012_p4 = scmp.lt.s32.totalorder %s36_s10, %s36_s10 }
   0xd   :  { %p10008_p3 = scmp.ne.s32.totalorder %s36_s10, %s10007_s18  ;;  %p10013_p5 = scmp.lt.s32.totalorder %s10007_s18, %s10007_s18 }
   0xf   :  { %p10014_p6 = por %p10013_p5, %p10012_p4 }
  0x11   :  { %p10015_p7 = pnand %p10014_p6, %p10008_p3 }
  0x13   :  { %10018 = shalt.err (!%p10015_p7)
}
  0x14   :  { %s10230_s19 = smov 256   ;;  %s10231_s20 = smov 16  }
  0x15   :  { %41 = dma.hbm_to_vmem [thread:$0]  %s10580_s1, 28672, %s36_s10, [#allocation6], %s10230_s19, %s10230_s19, %s10231_s20  }
  0x16   :  { %s10232_s23 = smov [#allocation8]   ;;  %s10233_s25 = smov [#allocation11]  }
  0x17   :  { %s57_s24 = sshll.u32 %s10232_s23, 4  ;;  %s79_s26 = sshll.u32 %s10233_s25, 4  ;;  %s58_s24 = int_to_ptr.vmem [resolvable:$true] %s57_s24  ;;  %s80_s26 = int_to_ptr.vmem [resolvable:$true] %s79_s26 }
  0x18   :  { %s10019_s29 = scalar_lea.hbm %s10582_s3, 16384 }
  0x19   :  { %p10020_p8 = scmp.ne.s32.totalorder %s10582_s3, %s10019_s29  ;;  %p10023_p9 = scmp.lt.u32.totalorder %s10019_s29, %s10582_s3 }
  0x1b   :  { %p10025_p10 = pnand %p10023_p9, %p10020_p8 }
  0x1d   :  { %10028 = shalt.err (!%p10025_p10)
}
  0x1e   :  { %s10029_s1 = scalar_lea.vmem %s58_s24, 16384  ;;  %p10034_p12 = scmp.lt.s32.totalorder %s58_s24, %s58_s24 }
  0x1f   :  { %p10030_p11 = scmp.ne.s32.totalorder %s58_s24, %s10029_s1  ;;  %p10035_p13 = scmp.lt.s32.totalorder %s10029_s1, %s10029_s1 }
  0x21   :  { %p10036_p0 = por %p10035_p13, %p10034_p12 }
  0x23   :  { %p10037_p1 = pnand %p10036_p0, %p10030_p11 }
  0x25   :  { %10040 = shalt.err (!%p10037_p1)
}
  0x26   :  { %63 = dma.hbm_to_vmem [thread:$0]  %s10582_s3, 16384, %s58_s24, [#allocation9], %s10230_s19, %s10230_s19, %s10231_s20  }
  0x27   :  { %s10041_s17 = scalar_lea.hbm %s10584_s5, 65536 }
  0x28   :  { %p10042_p2 = scmp.ne.s32.totalorder %s10584_s5, %s10041_s17  ;;  %p10045_p3 = scmp.lt.u32.totalorder %s10041_s17, %s10584_s5 }
  0x2a   :  { %p10047_p4 = pnand %p10045_p3, %p10042_p2 }
  0x2c   :  { %10050 = shalt.err (!%p10047_p4)
}
  0x2d   :  { %s10051_s25 = scalar_lea.vmem %s80_s26, 65536  ;;  %p10056_p6 = scmp.lt.s32.totalorder %s80_s26, %s80_s26 }
  0x2e   :  { %p10052_p5 = scmp.ne.s32.totalorder %s80_s26, %s10051_s25  ;;  %p10057_p7 = scmp.lt.s32.totalorder %s10051_s25, %s10051_s25 }
  0x30   :  { %p10058_p8 = por %p10057_p7, %p10056_p6 }
  0x32   :  { %p10059_p9 = pnand %p10058_p8, %p10052_p5 }
  0x34   :  { %10062 = shalt.err (!%p10059_p9)
}
  0x35   :  { %s10234_s3 = smov 1024   ;;  %s10235_s19 = smov 64  }
  0x36   :  { %85 = dma.hbm_to_vmem [thread:$0]  %s10584_s5, 65536, %s80_s26, [#allocation12], %s10234_s3, %s10234_s3, %s10235_s19  }
  0x37   :  { %s10236_s27 = smov [#allocation14]   ;;  %s10063_s11 = scalar_lea.hbm %s10586_s7, 16384 }
  0x38   :  { %s101_s28 = sshll.u32 %s10236_s27, 4  ;;  %p10064_p10 = scmp.ne.s32.totalorder %s10586_s7, %s10063_s11  ;;  %s102_s28 = int_to_ptr.vmem [resolvable:$true] %s101_s28 }
  0x39   :  { %p10067_p11 = scmp.lt.u32.totalorder %s10063_s11, %s10586_s7 }
  0x3b   :  { %p10069_p12 = pnand %p10067_p11, %p10064_p10 }
  0x3d   :  { %10072 = shalt.err (!%p10069_p12)
}
  0x3e   :  { %s10073_s14 = scalar_lea.vmem %s102_s28, 16384  ;;  %p10078_p0 = scmp.lt.s32.totalorder %s102_s28, %s102_s28 }
  0x3f   :  { %p10074_p13 = scmp.ne.s32.totalorder %s102_s28, %s10073_s14  ;;  %p10079_p1 = scmp.lt.s32.totalorder %s10073_s14, %s10073_s14 }
  0x41   :  { %p10080_p2 = por %p10079_p1, %p10078_p0 }
  0x43   :  { %p10081_p3 = pnand %p10080_p2, %p10074_p13 }
  0x45   :  { %10084 = shalt.err (!%p10081_p3)
}
  0x46   :  { %s10237_s5 = smov 4   ;;  %s10238_s16 = smov [#allocation2]  }
  0x47   :  { %107 = dma.hbm_to_vmem [thread:$0]  %s10586_s7, 16384, %s102_s28, [#allocation15], %s10235_s19, %s10235_s19, %s10237_s5  }
  0x48   :  { %s26_s17 = sshll.u32 %s10238_s16, 4  ;;  %s10239_s18 = smov [#allocation7]   ;;  %s27_s17 = int_to_ptr.vmem [resolvable:$true] %s26_s17 }
  0x49   :  { %s48_s21 = sshll.u32 %s10239_s18, 4  ;;  %s10085_s25 = scalar_lea.hbm %s10579_s0, 448  ;;  %s49_s21 = int_to_ptr.vmem [resolvable:$true] %s48_s21 }
  0x4a   :  { %p10086_p4 = scmp.ne.s32.totalorder %s10579_s0, %s10085_s25  ;;  %p10089_p5 = scmp.lt.u32.totalorder %s10085_s25, %s10579_s0 }
  0x4c   :  { %p10091_p6 = pnand %p10089_p5, %p10086_p4 }
  0x4e   :  { %10094 = shalt.err (!%p10091_p6)
}
  0x4f   :  { %s10095_s7 = scalar_lea.vmem %s27_s17, 448  ;;  %p10100_p8 = scmp.lt.s32.totalorder %s27_s17, %s27_s17 }
  0x50   :  { %p10096_p7 = scmp.ne.s32.totalorder %s27_s17, %s10095_s7  ;;  %p10101_p9 = scmp.lt.s32.totalorder %s10095_s7, %s10095_s7 }
  0x52   :  { %p10102_p10 = por %p10101_p9, %p10100_p8 }
  0x54   :  { %p10103_p11 = pnand %p10102_p10, %p10096_p7 }
  0x56   :  { %10106 = shalt.err (!%p10103_p11)
}
  0x57   :  { %29 = dma.hbm_to_vmem [thread:$0]  %s10579_s0, 448, %s27_s17, [#allocation3]  }
  0x58   :  { %s10107_s11 = scalar_lea.hbm %s10581_s2, 64 }
  0x59   :  { %p10108_p12 = scmp.ne.s32.totalorder %s10581_s2, %s10107_s11  ;;  %p10111_p13 = scmp.lt.u32.totalorder %s10107_s11, %s10581_s2 }
  0x5b   :  { %p10113_p0 = pnand %p10111_p13, %p10108_p12 }
  0x5d   :  { %10116 = shalt.err (!%p10113_p0)
}
  0x5e   :  { %s10117_s14 = scalar_lea.vmem %s49_s21, 64  ;;  %p10122_p2 = scmp.lt.s32.totalorder %s49_s21, %s49_s21 }
  0x5f   :  { %p10118_p1 = scmp.ne.s32.totalorder %s49_s21, %s10117_s14  ;;  %p10123_p3 = scmp.lt.s32.totalorder %s10117_s14, %s10117_s14 }
  0x61   :  { %p10124_p4 = por %p10123_p3, %p10122_p2 }
  0x63   :  { %p10125_p5 = pnand %p10124_p4, %p10118_p1 }
  0x65   :  { %10128 = shalt.err (!%p10125_p5)
}
  0x66   :  { %51 = dma.hbm_to_vmem [thread:$0]  %s10581_s2, 64, %s49_s21, [#allocation6]  }
  0x67   :  { %s10240_s26 = smov [#allocation10]   ;;  %s10241_s16 = smov [#allocation13]  }
  0x68   :  { %s70_s15 = sshll.u32 %s10240_s26, 4  ;;  %s92_s17 = sshll.u32 %s10241_s16, 4  ;;  %s71_s15 = int_to_ptr.vmem [resolvable:$true] %s70_s15  ;;  %s93_s17 = int_to_ptr.vmem [resolvable:$true] %s92_s17 }
  0x69   :  { %s10129_s23 = scalar_lea.hbm %s10583_s4, 64 }
  0x6a   :  { %p10130_p6 = scmp.ne.s32.totalorder %s10583_s4, %s10129_s23  ;;  %p10133_p7 = scmp.lt.u32.totalorder %s10129_s23, %s10583_s4 }
  0x6c   :  { %p10135_p8 = pnand %p10133_p7, %p10130_p6 }
  0x6e   :  { %10138 = shalt.err (!%p10135_p8)
}
  0x6f   :  { %s10139_s2 = scalar_lea.vmem %s71_s15, 64  ;;  %p10144_p10 = scmp.lt.s32.totalorder %s71_s15, %s71_s15 }
  0x70   :  { %p10140_p9 = scmp.ne.s32.totalorder %s71_s15, %s10139_s2  ;;  %p10145_p11 = scmp.lt.s32.totalorder %s10139_s2, %s10139_s2 }
  0x72   :  { %p10146_p12 = por %p10145_p11, %p10144_p10 }
  0x74   :  { %p10147_p13 = pnand %p10146_p12, %p10140_p9 }
  0x76   :  { %10150 = shalt.err (!%p10147_p13)
}
  0x77   :  { %73 = dma.hbm_to_vmem [thread:$0]  %s10583_s4, 64, %s71_s15, [#allocation9]  }
  0x78   :  { %s10151_s28 = scalar_lea.hbm %s10585_s6, 256 }
  0x79   :  { %p10152_p0 = scmp.ne.s32.totalorder %s10585_s6, %s10151_s28  ;;  %p10155_p1 = scmp.lt.u32.totalorder %s10151_s28, %s10585_s6 }
  0x7b   :  { %p10157_p2 = pnand %p10155_p1, %p10152_p0 }
  0x7d   :  { %10160 = shalt.err (!%p10157_p2)
}
  0x7e   :  { %s10161_s13 = scalar_lea.vmem %s93_s17, 256  ;;  %p10166_p4 = scmp.lt.s32.totalorder %s93_s17, %s93_s17 }
  0x7f   :  { %p10162_p3 = scmp.ne.s32.totalorder %s93_s17, %s10161_s13  ;;  %p10167_p5 = scmp.lt.s32.totalorder %s10161_s13, %s10161_s13 }
  0x81   :  { %p10168_p6 = por %p10167_p5, %p10166_p4 }
  0x83   :  { %p10169_p7 = pnand %p10168_p6, %p10162_p3 }
  0x85   :  { %10172 = shalt.err (!%p10169_p7)
}
  0x86   :  { %95 = dma.hbm_to_vmem [thread:$0]  %s10585_s6, 256, %s93_s17, [#allocation12]  }
  0x87   :  { %s10242_s10 = smov [#allocation16]   ;;  %s10173_s26 = scalar_lea.hbm %s10587_s8, 16 }
  0x88   :  { %s114_s14 = sshll.u32 %s10242_s10, 4  ;;  %p10174_p8 = scmp.ne.s32.totalorder %s10587_s8, %s10173_s26  ;;  %s115_s14 = int_to_ptr.vmem [resolvable:$true] %s114_s14 }
  0x89   :  { %p10177_p9 = scmp.lt.u32.totalorder %s10173_s26, %s10587_s8 }
  0x8b   :  { %p10179_p10 = pnand %p10177_p9, %p10174_p8 }
  0x8d   :  { %10182 = shalt.err (!%p10179_p10)
}
  0x8e   :  { %s10183_s23 = scalar_lea.vmem %s115_s14, 16  ;;  %s10187_s6 = scalar_lea.vmem %s115_s14, 32 }
  0x8f   :  { %p10184_p11 = scmp.ne.s32.totalorder %s115_s14, %s10183_s23  ;;  %p10188_p12 = scmp.lt.s32.totalorder %s115_s14, %s115_s14 }
  0x90   :  { %p10189_p13 = scmp.lt.s32.totalorder %s10187_s6, %s10183_s23 }
  0x92   :  { %p10190_p0 = por %p10189_p13, %p10188_p12 }
  0x94   :  { %p10191_p1 = pnand %p10190_p0, %p10184_p11 }
  0x96   :  { %10194 = shalt.err (!%p10191_p1)
}
  0x97   :  { %117 = dma.hbm_to_vmem [thread:$0]  %s10587_s8, 16, %s115_s14, [#allocation15]  }
  0x98   :  { %10217 = dma.done.wait [#allocation3], 448  }
  0x99   :  { %10218 = vsyncadd [#allocation3], 4294966848 }
  0x9a   :  { %10219 = dma.done.wait [#allocation6], 28736  }
  0x9b   :  { %10220 = vsyncadd [#allocation6], 4294938560 }
  0x9c   :  { %10221 = dma.done.wait [#allocation9], 16448  }
  0x9d   :  { %10222 = vsyncadd [#allocation9], 4294950848 }
  0x9e   :  { %10223 = dma.done.wait [#allocation12], 65792  }
  0x9f   :  { %10224 = vsyncadd [#allocation12], 4294901504 }
  0xa0   :  { %10225 = dma.done.wait [#allocation15], 16400  }
  0xa1   :  { %10226 = vsyncadd [#allocation15], 4294950896  ;;  %v9334_v0 = vld [vmem:[#allocation5 + $0x4] ss:$16 sps:$4 sm:$0xff]   ;;  %v9336_v1 = vld [vmem:[#allocation5 + $0xc] ss:$16 sps:$4 sm:$0xff]  }
  0xa2   :  { %1541 = vmatprep.subr.bf16.mxu0 %v9334_v0  ;;  %v9338_v2 = vld [vmem:[#allocation5] ss:$16 sps:$4 sm:$0xff]   ;;  %v9339_v3 = vld [vmem:[#allocation5 + $0x8] ss:$16 sps:$4 sm:$0xff]   ;;  %1705 = vmatprep.subr.bf16.mxu1 %v9336_v1  ;;  %v9340_v4 = vld [vmem:[#allocation5 + $0x24] ss:$16 sps:$4 sm:$0xff]  }
  0xa3   :  { %1542 = vmatpush1.bf16.msra.mxu0 %v9338_v2  ;;  %1706 = vmatpush1.bf16.msra.mxu1 %v9339_v3  ;;  %v9342_v5 = vld [vmem:[#allocation5 + $0x2c] ss:$16 sps:$4 sm:$0xff]   ;;  %v9344_v6 = vld [vmem:[#allocation5 + $0x20] ss:$16 sps:$4 sm:$0xff]   ;;  %v9345_v7 = vld [vmem:[#allocation5 + $0x28] ss:$16 sps:$4 sm:$0xff]  }
  0xa4   :  { %1543 = vmatprep.subr.bf16.mxu0 %v9340_v4  ;;  %1707 = vmatprep.subr.bf16.mxu1 %v9342_v5  ;;  %v9346_v8 = vld [vmem:[#allocation5 + $0x44] ss:$16 sps:$4 sm:$0xff]   ;;  %v9348_v9 = vld [vmem:[#allocation5 + $0x4c] ss:$16 sps:$4 sm:$0xff]   ;;  %v9350_v10 = vld [vmem:[#allocation5 + $0x40] ss:$16 sps:$4 sm:$0xff]  }
  0xa5   :  { %v9351_v11 = vld [vmem:[#allocation5 + $0x48] ss:$16 sps:$4 sm:$0xff]   ;;  %v9352_v12 = vld [vmem:[#allocation5 + $0x64] ss:$16 sps:$4 sm:$0xff]   ;;  %v9354_v13 = vld [vmem:[#allocation5 + $0x6c] ss:$16 sps:$4 sm:$0xff]  }
  0xa6   :  { %v9356_v14 = vld [vmem:[#allocation5 + $0x60] ss:$16 sps:$4 sm:$0xff]   ;;  %v9357_v15 = vld [vmem:[#allocation5 + $0x68] ss:$16 sps:$4 sm:$0xff]   ;;  %v9358_v16 = vld [vmem:[#allocation5 + $0x84] ss:$16 sps:$4 sm:$0xff]  }
  0xa7   :  { %1544 = vmatpush1.bf16.msra.mxu0 %v9344_v6  ;;  %1708 = vmatpush1.bf16.msra.mxu1 %v9345_v7  ;;  %v9360_v17 = vld [vmem:[#allocation5 + $0x8c] ss:$16 sps:$4 sm:$0xff]   ;;  %v9362_v18 = vld [vmem:[#allocation5 + $0x80] ss:$16 sps:$4 sm:$0xff]   ;;  %v9363_v19 = vld [vmem:[#allocation5 + $0x88] ss:$16 sps:$4 sm:$0xff]  }
  0xa8   :  { %1545 = vmatprep.subr.bf16.mxu0 %v9346_v8  ;;  %1709 = vmatprep.subr.bf16.mxu1 %v9348_v9  ;;  %v9364_v20 = vld [vmem:[#allocation5 + $0xa4] ss:$16 sps:$4 sm:$0xff]   ;;  %v9366_v21 = vld [vmem:[#allocation5 + $0xac] ss:$16 sps:$4 sm:$0xff]   ;;  %v9368_v22 = vld [vmem:[#allocation5 + $0xa0] ss:$16 sps:$4 sm:$0xff]  }
  0xa9   :  { %v9369_v23 = vld [vmem:[#allocation5 + $0xa8] ss:$16 sps:$4 sm:$0xff]   ;;  %v9370_v24 = vld [vmem:[#allocation5 + $0xc4] ss:$16 sps:$4 sm:$0xff]   ;;  %v9372_v25 = vld [vmem:[#allocation5 + $0xcc] ss:$16 sps:$4 sm:$0xff]  }
  0xaa   :  { %v9374_v26 = vld [vmem:[#allocation5 + $0xc0] ss:$16 sps:$4 sm:$0xff]   ;;  %v9375_v27 = vld [vmem:[#allocation5 + $0xc8] ss:$16 sps:$4 sm:$0xff]   ;;  %v9376_v28 = vld [vmem:[#allocation5 + $0xe4] ss:$16 sps:$4 sm:$0xff]  }
  0xab   :  { %1546 = vmatpush1.bf16.msra.mxu0 %v9350_v10  ;;  %1710 = vmatpush1.bf16.msra.mxu1 %v9351_v11  ;;  %v9378_v29 = vld [vmem:[#allocation5 + $0xec] ss:$16 sps:$4 sm:$0xff]   ;;  %v9380_v30 = vld [vmem:[#allocation5 + $0xe0] ss:$16 sps:$4 sm:$0xff]   ;;  %v9381_v31 = vld [vmem:[#allocation5 + $0xe8] ss:$16 sps:$4 sm:$0xff]  }
  0xac   :  { %1547 = vmatprep.subr.bf16.mxu0 %v9352_v12  ;;  %1711 = vmatprep.subr.bf16.mxu1 %v9354_v13  ;;  %v9382_v32 = vld [vmem:[#allocation5 + $0x104] ss:$16 sps:$4 sm:$0xff]   ;;  %v9384_v33 = vld [vmem:[#allocation5 + $0x10c] ss:$16 sps:$4 sm:$0xff]   ;;  %v9386_v34 = vld [vmem:[#allocation5 + $0x100] ss:$16 sps:$4 sm:$0xff]  }
  0xad   :  { %v9387_v35 = vld [vmem:[#allocation5 + $0x108] ss:$16 sps:$4 sm:$0xff]   ;;  %v9388_v36 = vld [vmem:[#allocation5 + $0x124] ss:$16 sps:$4 sm:$0xff]   ;;  %v9390_v37 = vld [vmem:[#allocation5 + $0x12c] ss:$16 sps:$4 sm:$0xff]  }
  0xae   :  { %v9392_v38 = vld [vmem:[#allocation5 + $0x120] ss:$16 sps:$4 sm:$0xff]   ;;  %v9393_v39 = vld [vmem:[#allocation5 + $0x128] ss:$16 sps:$4 sm:$0xff]   ;;  %v9394_v40 = vld [vmem:[#allocation5 + $0x144] ss:$16 sps:$4 sm:$0xff]  }
  0xaf   :  { %1548 = vmatpush1.bf16.msra.mxu0 %v9356_v14  ;;  %1712 = vmatpush1.bf16.msra.mxu1 %v9357_v15  ;;  %v9396_v41 = vld [vmem:[#allocation5 + $0x14c] ss:$16 sps:$4 sm:$0xff]   ;;  %v9398_v42 = vld [vmem:[#allocation5 + $0x140] ss:$16 sps:$4 sm:$0xff]   ;;  %v9399_v43 = vld [vmem:[#allocation5 + $0x148] ss:$16 sps:$4 sm:$0xff]  }
  0xb0   :  { %1549 = vmatprep.subr.bf16.mxu0 %v9358_v16  ;;  %1713 = vmatprep.subr.bf16.mxu1 %v9360_v17  ;;  %v9400_v44 = vld [vmem:[#allocation5 + $0x164] ss:$16 sps:$4 sm:$0xff]   ;;  %v9402_v45 = vld [vmem:[#allocation5 + $0x16c] ss:$16 sps:$4 sm:$0xff]   ;;  %v9404_v47 = vld [vmem:[#allocation5 + $0x160] ss:$16 sps:$4 sm:$0xff]  }
  0xb1   :  { %v146_v46 = vld [vmem:[#allocation2] sm:$0xff]  ;;  %v9408_v51 = vld [vmem:[#allocation5 + $0x18c] ss:$16 sps:$4 sm:$0xff]   ;;  %v9410_v52 = vld [vmem:[#allocation5 + $0x180] ss:$16 sps:$4 sm:$0xff]   ;;  %s10244_s8 = smov [#allocation17]  }
  0xb2   :  { %v8055_v48 = vcombine.high %v146_v46, %v146_v46  ;;  %v9405_v49 = vld [vmem:[#allocation5 + $0x168] ss:$16 sps:$4 sm:$0xff]   ;;  %v9406_v50 = vld [vmem:[#allocation5 + $0x184] ss:$16 sps:$4 sm:$0xff]   ;;  %v9414_v55 = vld [vmem:[#allocation5 + $0x1ac] ss:$16 sps:$4 sm:$0xff]   ;;  %v8054_v4 = vcombine.low %v146_v46, %v146_v46 }
  0xb3   :  { %1550 = vmatpush1.bf16.msra.mxu0 %v9362_v18  ;;  %1714 = vmatpush1.bf16.msra.mxu1 %v9363_v19  ;;  %v9411_v53 = vld [vmem:[#allocation5 + $0x188] ss:$16 sps:$4 sm:$0xff]   ;;  %v9412_v54 = vld [vmem:[#allocation5 + $0x1a4] ss:$16 sps:$4 sm:$0xff]   ;;  %v9416_v56 = vld [vmem:[#allocation5 + $0x1a0] ss:$16 sps:$4 sm:$0xff]  }
  0xb4   :  { %1551 = vmatprep.subr.bf16.mxu0 %v9364_v20  ;;  %1715 = vmatprep.subr.bf16.mxu1 %v9366_v21  ;;  %v9417_v57 = vld [vmem:[#allocation5 + $0x1a8] ss:$16 sps:$4 sm:$0xff]   ;;  %v9418_v58 = vld [vmem:[#allocation5 + $0x1c4] ss:$16 sps:$4 sm:$0xff]   ;;  %v9420_v59 = vld [vmem:[#allocation5 + $0x1cc] ss:$16 sps:$4 sm:$0xff]  }
  0xb5   :  { %1573 = vmatprep.mubr.bf16.mxu0 %v8055_v48  ;;  %1737 = vmatprep.mubr.bf16.mxu1 %v8055_v48  ;;  %v9422_v60 = vld [vmem:[#allocation5 + $0x1c0] ss:$16 sps:$4 sm:$0xff]   ;;  %v9423_v61 = vld [vmem:[#allocation5 + $0x1c8] ss:$16 sps:$4 sm:$0xff]   ;;  %v9424_v62 = vld [vmem:[#allocation5 + $0x1e4] ss:$16 sps:$4 sm:$0xff]  }
  0xb6   :  { %v9426_v63 = vld [vmem:[#allocation5 + $0x1ec] ss:$16 sps:$4 sm:$0xff]   ;;  %v9428_v0 = vld [vmem:[#allocation5 + $0x1e0] ss:$16 sps:$4 sm:$0xff]   ;;  %v9429_v1 = vld [vmem:[#allocation5 + $0x1e8] ss:$16 sps:$4 sm:$0xff]  }
  0xb7   :  { %1552 = vmatpush1.bf16.msra.mxu0 %v9368_v22  ;;  %1716 = vmatpush1.bf16.msra.mxu1 %v9369_v23  ;;  %v9434_v2 = vld [vmem:[#allocation5 + $0x204] ss:$16 sps:$4 sm:$0xff]   ;;  %v9437_v3 = vld [vmem:[#allocation5 + $0x20c] ss:$16 sps:$4 sm:$0xff]   ;;  %v9432_v5 = vld [vmem:[#allocation5 + $0x200] ss:$16 sps:$4 sm:$0xff]  }
  0xb8   :  { %1553 = vmatprep.subr.bf16.mxu0 %v9370_v24  ;;  %1717 = vmatprep.subr.bf16.mxu1 %v9372_v25  ;;  %v9435_v6 = vld [vmem:[#allocation5 + $0x208] ss:$16 sps:$4 sm:$0xff]   ;;  %v9440_v7 = vld [vmem:[#allocation5 + $0x224] ss:$16 sps:$4 sm:$0xff]   ;;  %v9443_v8 = vld [vmem:[#allocation5 + $0x22c] ss:$16 sps:$4 sm:$0xff]  }
  0xb9   :  { %v9438_v9 = vld [vmem:[#allocation5 + $0x220] ss:$16 sps:$4 sm:$0xff]   ;;  %v9441_v10 = vld [vmem:[#allocation5 + $0x228] ss:$16 sps:$4 sm:$0xff]   ;;  %v9446_v11 = vld [vmem:[#allocation5 + $0x244] ss:$16 sps:$4 sm:$0xff]  }
  0xba   :  { %v9449_v12 = vld [vmem:[#allocation5 + $0x24c] ss:$16 sps:$4 sm:$0xff]   ;;  %v9444_v13 = vld [vmem:[#allocation5 + $0x240] ss:$16 sps:$4 sm:$0xff]   ;;  %v9447_v14 = vld [vmem:[#allocation5 + $0x248] ss:$16 sps:$4 sm:$0xff]  }
  0xbb   :  { %1554 = vmatpush1.bf16.msra.mxu0 %v9374_v26  ;;  %1718 = vmatpush1.bf16.msra.mxu1 %v9375_v27  ;;  %v9452_v15 = vld [vmem:[#allocation5 + $0x264] ss:$16 sps:$4 sm:$0xff]   ;;  %v9455_v16 = vld [vmem:[#allocation5 + $0x26c] ss:$16 sps:$4 sm:$0xff]   ;;  %v9450_v17 = vld [vmem:[#allocation5 + $0x260] ss:$16 sps:$4 sm:$0xff]  }
  0xbc   :  { %1555 = vmatprep.subr.bf16.mxu0 %v9376_v28  ;;  %1719 = vmatprep.subr.bf16.mxu1 %v9378_v29  ;;  %v9453_v18 = vld [vmem:[#allocation5 + $0x268] ss:$16 sps:$4 sm:$0xff]   ;;  %v9458_v19 = vld [vmem:[#allocation5 + $0x284] ss:$16 sps:$4 sm:$0xff]   ;;  %v9461_v20 = vld [vmem:[#allocation5 + $0x28c] ss:$16 sps:$4 sm:$0xff]  }
  0xbd   :  { %v9456_v21 = vld [vmem:[#allocation5 + $0x280] ss:$16 sps:$4 sm:$0xff]   ;;  %v9459_v22 = vld [vmem:[#allocation5 + $0x288] ss:$16 sps:$4 sm:$0xff]   ;;  %v9464_v23 = vld [vmem:[#allocation5 + $0x2a4] ss:$16 sps:$4 sm:$0xff]  }
  0xbe   :  { %v9467_v24 = vld [vmem:[#allocation5 + $0x2ac] ss:$16 sps:$4 sm:$0xff]   ;;  %v9462_v25 = vld [vmem:[#allocation5 + $0x2a0] ss:$16 sps:$4 sm:$0xff]   ;;  %v9465_v26 = vld [vmem:[#allocation5 + $0x2a8] ss:$16 sps:$4 sm:$0xff]  }
  0xbf   :  { %1556 = vmatpush1.bf16.msra.mxu0 %v9380_v30  ;;  %1720 = vmatpush1.bf16.msra.mxu1 %v9381_v31  ;;  %v9470_v27 = vld [vmem:[#allocation5 + $0x2c4] ss:$16 sps:$4 sm:$0xff]   ;;  %v9473_v28 = vld [vmem:[#allocation5 + $0x2cc] ss:$16 sps:$4 sm:$0xff]   ;;  %v9468_v31 = vld [vmem:[#allocation5 + $0x2c0] ss:$16 sps:$4 sm:$0xff]  }
  0xc0   :  { %1557 = vmatprep.subr.bf16.mxu0 %v9382_v32  ;;  %1721 = vmatprep.subr.bf16.mxu1 %v9384_v33  ;;  %v10403_v29 = vld [vmem:[#allocation2 + $0x8] sm:$0xff]  ;;  %v9471_v32 = vld [vmem:[#allocation5 + $0x2c8] ss:$16 sps:$4 sm:$0xff]   ;;  %v9476_v33 = vld [vmem:[#allocation5 + $0x2e4] ss:$16 sps:$4 sm:$0xff]   ;;  %s8041_s3 = sshll.u32 %s10244_s8, 4  ;;  %s8042_s3 = int_to_ptr.vmem [resolvable:$true] %s8041_s3 }
  0xc1   :  { %v8057_v30 = vcombine.high %v10403_v29, %v10403_v29  ;;  %v9497_v46 = vld [vmem:[#allocation5 + $0x34c] ss:$16 sps:$4 sm:$0xff]   ;;  %v9495_v48 = vld [vmem:[#allocation5 + $0x348] ss:$16 sps:$4 sm:$0xff]   ;;  %s10195_s20 = scalar_lea.vmem %s8042_s3, 128  ;;  %p10200_p3 = scmp.lt.s32.totalorder %s8042_s3, %s8042_s3 }
  0xc2   :  { %p10196_p2 = scmp.ne.s32.totalorder %s8042_s3, %s10195_s20  ;;  %p10201_p4 = scmp.lt.s32.totalorder %s10195_s20, %s10195_s20 }
  0xc3   :  { %1558 = vmatpush1.bf16.msra.mxu0 %v9386_v34  ;;  %1722 = vmatpush1.bf16.msra.mxu1 %v9387_v35  ;;  %v9479_v34 = vld [vmem:[#allocation5 + $0x2ec] ss:$16 sps:$4 sm:$0xff]   ;;  %v9474_v35 = vld [vmem:[#allocation5 + $0x2e0] ss:$16 sps:$4 sm:$0xff]  }
  0xc4   :  { %1559 = vmatprep.subr.bf16.mxu0 %v9388_v36  ;;  %1723 = vmatprep.subr.bf16.mxu1 %v9390_v37  ;;  %v9477_v36 = vld [vmem:[#allocation5 + $0x2e8] ss:$16 sps:$4 sm:$0xff]   ;;  %v9482_v37 = vld [vmem:[#allocation5 + $0x304] ss:$16 sps:$4 sm:$0xff]   ;;  %p10202_p5 = por %p10201_p4, %p10200_p3 }
  0xc6   :  { %p10203_p6 = pnand %p10202_p5, %p10196_p2 }
  0xc7   :  { %1560 = vmatpush1.bf16.msra.mxu0 %v9392_v38  ;;  %1724 = vmatpush1.bf16.msra.mxu1 %v9393_v39  ;;  %v9485_v38 = vld [vmem:[#allocation5 + $0x30c] ss:$16 sps:$4 sm:$0xff]   ;;  %v9480_v39 = vld [vmem:[#allocation5 + $0x300] ss:$16 sps:$4 sm:$0xff]  }
  0xc8   :  { %1561 = vmatprep.subr.bf16.mxu0 %v9394_v40  ;;  %1725 = vmatprep.subr.bf16.mxu1 %v9396_v41  ;;  %v9483_v40 = vld [vmem:[#allocation5 + $0x308] ss:$16 sps:$4 sm:$0xff]   ;;  %v9488_v41 = vld [vmem:[#allocation5 + $0x324] ss:$16 sps:$4 sm:$0xff]  }
  0xcb   :  { %1562 = vmatpush1.bf16.msra.mxu0 %v9398_v42  ;;  %1726 = vmatpush1.bf16.msra.mxu1 %v9399_v43  ;;  %v9491_v42 = vld [vmem:[#allocation5 + $0x32c] ss:$16 sps:$4 sm:$0xff]   ;;  %v9486_v43 = vld [vmem:[#allocation5 + $0x320] ss:$16 sps:$4 sm:$0xff]  }
  0xcc   :  { %1563 = vmatprep.subr.bf16.mxu0 %v9400_v44  ;;  %1727 = vmatprep.subr.bf16.mxu1 %v9402_v45  ;;  %v9489_v44 = vld [vmem:[#allocation5 + $0x328] ss:$16 sps:$4 sm:$0xff]   ;;  %v9494_v45 = vld [vmem:[#allocation5 + $0x344] ss:$16 sps:$4 sm:$0xff]  }
  0xcf   :  { %1564 = vmatpush1.bf16.msra.mxu0 %v9404_v47  ;;  %1728 = vmatpush1.bf16.msra.mxu1 %v9405_v49  ;;  %v9492_v47 = vld [vmem:[#allocation5 + $0x340] ss:$16 sps:$4 sm:$0xff]   ;;  %v9500_v49 = vld [vmem:[#allocation5 + $0x364] ss:$16 sps:$4 sm:$0xff]  }
  0xd0   :  { %1565 = vmatprep.subr.bf16.mxu0 %v9406_v50  ;;  %1729 = vmatprep.subr.bf16.mxu1 %v9408_v51  ;;  %v9503_v50 = vld [vmem:[#allocation5 + $0x36c] ss:$16 sps:$4 sm:$0xff]   ;;  %v9498_v51 = vld [vmem:[#allocation5 + $0x360] ss:$16 sps:$4 sm:$0xff]  }
  0xd3   :  { %1566 = vmatpush1.bf16.msra.mxu0 %v9410_v52  ;;  %1730 = vmatpush1.bf16.msra.mxu1 %v9411_v53  ;;  %v9501_v52 = vld [vmem:[#allocation5 + $0x368] ss:$16 sps:$4 sm:$0xff]   ;;  %v9506_v53 = vld [vmem:[#allocation5 + $0x384] ss:$16 sps:$4 sm:$0xff]  }
  0xd4   :  { %1567 = vmatprep.subr.bf16.mxu0 %v9412_v54  ;;  %1731 = vmatprep.subr.bf16.mxu1 %v9414_v55  ;;  %v9509_v54 = vld [vmem:[#allocation5 + $0x38c] ss:$16 sps:$4 sm:$0xff]   ;;  %v9504_v55 = vld [vmem:[#allocation5 + $0x380] ss:$16 sps:$4 sm:$0xff]  }
  0xd7   :  { %1568 = vmatpush1.bf16.msra.mxu0 %v9416_v56  ;;  %1732 = vmatpush1.bf16.msra.mxu1 %v9417_v57  ;;  %v9507_v56 = vld [vmem:[#allocation5 + $0x388] ss:$16 sps:$4 sm:$0xff]   ;;  %v9512_v57 = vld [vmem:[#allocation5 + $0x3a4] ss:$16 sps:$4 sm:$0xff]  }
  0xd8   :  { %1569 = vmatprep.subr.bf16.mxu0 %v9418_v58  ;;  %1733 = vmatprep.subr.bf16.mxu1 %v9420_v59  ;;  %v9515_v58 = vld [vmem:[#allocation5 + $0x3ac] ss:$16 sps:$4 sm:$0xff]   ;;  %v9510_v59 = vld [vmem:[#allocation5 + $0x3a0] ss:$16 sps:$4 sm:$0xff]  }
  0xdb   :  { %1570 = vmatpush1.bf16.msra.mxu0 %v9422_v60  ;;  %1734 = vmatpush1.bf16.msra.mxu1 %v9423_v61  ;;  %v9513_v60 = vld [vmem:[#allocation5 + $0x3a8] ss:$16 sps:$4 sm:$0xff]   ;;  %v9518_v61 = vld [vmem:[#allocation5 + $0x3c4] ss:$16 sps:$4 sm:$0xff]  }
  0xdc   :  { %1571 = vmatprep.subr.bf16.mxu0 %v9424_v62  ;;  %1735 = vmatprep.subr.bf16.mxu1 %v9426_v63  ;;  %v9521_v62 = vld [vmem:[#allocation5 + $0x3cc] ss:$16 sps:$4 sm:$0xff]   ;;  %v9516_v63 = vld [vmem:[#allocation5 + $0x3c0] ss:$16 sps:$4 sm:$0xff]  }
  0xdf   :  { %1572 = vmatpush1.bf16.msra.mxu0 %v9428_v0  ;;  %1736 = vmatpush1.bf16.msra.mxu1 %v9429_v1  ;;  %v9519_v0 = vld [vmem:[#allocation5 + $0x3c8] ss:$16 sps:$4 sm:$0xff]   ;;  %v9524_v1 = vld [vmem:[#allocation5 + $0x3e4] ss:$16 sps:$4 sm:$0xff]  }
  0xe0   :  { %1582 = vmatprep.subr.bf16.mxu0 %v9434_v2  ;;  %1746 = vmatprep.subr.bf16.mxu1 %v9437_v3  ;;  %v9527_v2 = vld [vmem:[#allocation5 + $0x3ec] ss:$16 sps:$4 sm:$0xff]   ;;  %v9522_v3 = vld [vmem:[#allocation5 + $0x3e0] ss:$16 sps:$4 sm:$0xff]  }
  0xe2   :  { %1574 = vmatmul.mubr.bf16.vlgmr.msra.gmra.mrb[0].mxu0 %v8054_v4  ;;  %1738 = vmatmul.mubr.bf16.vlgmr.msra.gmra.mrb[0].mxu1 %v8054_v4  ;;  %v9525_v4 = vld [vmem:[#allocation5 + $0x3e8] ss:$16 sps:$4 sm:$0xff]  }
  0xe3   :  { %1583 = vmatpush1.bf16.msra.mxu0 %v9432_v5  ;;  %1747 = vmatpush1.bf16.msra.mxu1 %v9435_v6  ;;  %v9532_v5 = vld [vmem:[#allocation5 + $0x404] ss:$16 sps:$4 sm:$0xff]   ;;  %v9535_v6 = vld [vmem:[#allocation5 + $0x40c] ss:$16 sps:$4 sm:$0xff]  }
  0xe4   :  { %1584 = vmatprep.subr.bf16.mxu0 %v9440_v7  ;;  %1748 = vmatprep.subr.bf16.mxu1 %v9443_v8  ;;  %v8056_v7 = vcombine.low %v10403_v29, %v10403_v29  ;;  %v9530_v8 = vld [vmem:[#allocation5 + $0x400] ss:$16 sps:$4 sm:$0xff]   ;;  %v9565_v29 = vld [vmem:[#allocation5 + $0x4ac] ss:$16 sps:$4 sm:$0xff]  }
  0xe5   :  { %1614 = vmatprep.mubr.bf16.mxu0 %v8057_v30  ;;  %1778 = vmatprep.mubr.bf16.mxu1 %v8057_v30  ;;  %v9560_v30 = vld [vmem:[#allocation5 + $0x4a0] ss:$16 sps:$4 sm:$0xff]  }
  0xe7   :  { %1585 = vmatpush1.bf16.msra.mxu0 %v9438_v9  ;;  %1749 = vmatpush1.bf16.msra.mxu1 %v9441_v10  ;;  %v9533_v9 = vld [vmem:[#allocation5 + $0x408] ss:$16 sps:$4 sm:$0xff]   ;;  %v9538_v10 = vld [vmem:[#allocation5 + $0x424] ss:$16 sps:$4 sm:$0xff]  }
  0xe8   :  { %1586 = vmatprep.subr.bf16.mxu0 %v9446_v11  ;;  %1750 = vmatprep.subr.bf16.mxu1 %v9449_v12  ;;  %v10409_v11 = vld [vmem:[#allocation2 + $0x10] sm:$0xff]  ;;  %v9541_v12 = vld [vmem:[#allocation5 + $0x42c] ss:$16 sps:$4 sm:$0xff]  }
  0xeb   :  { %1587 = vmatpush1.bf16.msra.mxu0 %v9444_v13  ;;  %1751 = vmatpush1.bf16.msra.mxu1 %v9447_v14  ;;  %v8059_v13 = vcombine.high %v10409_v11, %v10409_v11  ;;  %v9536_v14 = vld [vmem:[#allocation5 + $0x420] ss:$16 sps:$4 sm:$0xff]  }
  0xec   :  { %1588 = vmatprep.subr.bf16.mxu0 %v9452_v15  ;;  %1752 = vmatprep.subr.bf16.mxu1 %v9455_v16  ;;  %v9539_v15 = vld [vmem:[#allocation5 + $0x428] ss:$16 sps:$4 sm:$0xff]   ;;  %v9544_v16 = vld [vmem:[#allocation5 + $0x444] ss:$16 sps:$4 sm:$0xff]  }
  0xef   :  { %1589 = vmatpush1.bf16.msra.mxu0 %v9450_v17  ;;  %1753 = vmatpush1.bf16.msra.mxu1 %v9453_v18  ;;  %v9547_v17 = vld [vmem:[#allocation5 + $0x44c] ss:$16 sps:$4 sm:$0xff]   ;;  %v9542_v18 = vld [vmem:[#allocation5 + $0x440] ss:$16 sps:$4 sm:$0xff]  }
  0xf0   :  { %1590 = vmatprep.subr.bf16.mxu0 %v9458_v19  ;;  %1754 = vmatprep.subr.bf16.mxu1 %v9461_v20  ;;  %v9545_v19 = vld [vmem:[#allocation5 + $0x448] ss:$16 sps:$4 sm:$0xff]   ;;  %v9550_v20 = vld [vmem:[#allocation5 + $0x464] ss:$16 sps:$4 sm:$0xff]  }
  0xf3   :  { %1591 = vmatpush1.bf16.msra.mxu0 %v9456_v21  ;;  %1755 = vmatpush1.bf16.msra.mxu1 %v9459_v22  ;;  %v9553_v21 = vld [vmem:[#allocation5 + $0x46c] ss:$16 sps:$4 sm:$0xff]   ;;  %v9548_v22 = vld [vmem:[#allocation5 + $0x460] ss:$16 sps:$4 sm:$0xff]  }
  0xf4   :  { %1592 = vmatprep.subr.bf16.mxu0 %v9464_v23  ;;  %1756 = vmatprep.subr.bf16.mxu1 %v9467_v24  ;;  %v9551_v23 = vld [vmem:[#allocation5 + $0x468] ss:$16 sps:$4 sm:$0xff]   ;;  %v9556_v24 = vld [vmem:[#allocation5 + $0x484] ss:$16 sps:$4 sm:$0xff]  }
  0xf7   :  { %1593 = vmatpush1.bf16.msra.mxu0 %v9462_v25  ;;  %1757 = vmatpush1.bf16.msra.mxu1 %v9465_v26  ;;  %v9559_v25 = vld [vmem:[#allocation5 + $0x48c] ss:$16 sps:$4 sm:$0xff]   ;;  %v9554_v26 = vld [vmem:[#allocation5 + $0x480] ss:$16 sps:$4 sm:$0xff]  }
  0xf8   :  { %1594 = vmatprep.subr.bf16.mxu0 %v9470_v27  ;;  %1758 = vmatprep.subr.bf16.mxu1 %v9473_v28  ;;  %v9557_v27 = vld [vmem:[#allocation5 + $0x488] ss:$16 sps:$4 sm:$0xff]   ;;  %v9562_v28 = vld [vmem:[#allocation5 + $0x4a4] ss:$16 sps:$4 sm:$0xff]  }
  0xfb   :  { %1595 = vmatpush1.bf16.msra.mxu0 %v9468_v31  ;;  %1759 = vmatpush1.bf16.msra.mxu1 %v9471_v32  ;;  %v9563_v31 = vld [vmem:[#allocation5 + $0x4a8] ss:$16 sps:$4 sm:$0xff]   ;;  %v9568_v32 = vld [vmem:[#allocation5 + $0x4c4] ss:$16 sps:$4 sm:$0xff]  }
  0xfc   :  { %1596 = vmatprep.subr.bf16.mxu0 %v9476_v33  ;;  %1760 = vmatprep.subr.bf16.mxu1 %v9479_v34  ;;  %v9571_v33 = vld [vmem:[#allocation5 + $0x4cc] ss:$16 sps:$4 sm:$0xff]   ;;  %v9566_v34 = vld [vmem:[#allocation5 + $0x4c0] ss:$16 sps:$4 sm:$0xff]  }
  0xff   :  { %1597 = vmatpush1.bf16.msra.mxu0 %v9474_v35  ;;  %1761 = vmatpush1.bf16.msra.mxu1 %v9477_v36  ;;  %v9569_v35 = vld [vmem:[#allocation5 + $0x4c8] ss:$16 sps:$4 sm:$0xff]   ;;  %v9574_v36 = vld [vmem:[#allocation5 + $0x4e4] ss:$16 sps:$4 sm:$0xff]  }
 0x100   :  { %1598 = vmatprep.subr.bf16.mxu0 %v9482_v37  ;;  %1762 = vmatprep.subr.bf16.mxu1 %v9485_v38  ;;  %v9577_v37 = vld [vmem:[#allocation5 + $0x4ec] ss:$16 sps:$4 sm:$0xff]   ;;  %v9572_v38 = vld [vmem:[#allocation5 + $0x4e0] ss:$16 sps:$4 sm:$0xff]  }
 0x103   :  { %1599 = vmatpush1.bf16.msra.mxu0 %v9480_v39  ;;  %1763 = vmatpush1.bf16.msra.mxu1 %v9483_v40  ;;  %v9575_v39 = vld [vmem:[#allocation5 + $0x4e8] ss:$16 sps:$4 sm:$0xff]   ;;  %v9580_v40 = vld [vmem:[#allocation5 + $0x504] ss:$16 sps:$4 sm:$0xff]  }
 0x104   :  { %1600 = vmatprep.subr.bf16.mxu0 %v9488_v41  ;;  %1764 = vmatprep.subr.bf16.mxu1 %v9491_v42  ;;  %v9583_v41 = vld [vmem:[#allocation5 + $0x50c] ss:$16 sps:$4 sm:$0xff]   ;;  %v9578_v42 = vld [vmem:[#allocation5 + $0x500] ss:$16 sps:$4 sm:$0xff]  }
 0x107   :  { %1601 = vmatpush1.bf16.msra.mxu0 %v9486_v43  ;;  %1765 = vmatpush1.bf16.msra.mxu1 %v9489_v44  ;;  %v9581_v43 = vld [vmem:[#allocation5 + $0x508] ss:$16 sps:$4 sm:$0xff]   ;;  %v9586_v44 = vld [vmem:[#allocation5 + $0x524] ss:$16 sps:$4 sm:$0xff]  }
 0x108   :  { %1602 = vmatprep.subr.bf16.mxu0 %v9494_v45  ;;  %1766 = vmatprep.subr.bf16.mxu1 %v9497_v46  ;;  %v9589_v45 = vld [vmem:[#allocation5 + $0x52c] ss:$16 sps:$4 sm:$0xff]   ;;  %v9584_v46 = vld [vmem:[#allocation5 + $0x520] ss:$16 sps:$4 sm:$0xff]  }
 0x10b   :  { %1603 = vmatpush1.bf16.msra.mxu0 %v9492_v47  ;;  %1767 = vmatpush1.bf16.msra.mxu1 %v9495_v48  ;;  %v9587_v47 = vld [vmem:[#allocation5 + $0x528] ss:$16 sps:$4 sm:$0xff]   ;;  %v9592_v48 = vld [vmem:[#allocation5 + $0x544] ss:$16 sps:$4 sm:$0xff]  }
 0x10c   :  { %1604 = vmatprep.subr.bf16.mxu0 %v9500_v49  ;;  %1768 = vmatprep.subr.bf16.mxu1 %v9503_v50  ;;  %v9595_v49 = vld [vmem:[#allocation5 + $0x54c] ss:$16 sps:$4 sm:$0xff]   ;;  %v9590_v50 = vld [vmem:[#allocation5 + $0x540] ss:$16 sps:$4 sm:$0xff]  }
 0x10f   :  { %1605 = vmatpush1.bf16.msra.mxu0 %v9498_v51  ;;  %1769 = vmatpush1.bf16.msra.mxu1 %v9501_v52  ;;  %v9593_v51 = vld [vmem:[#allocation5 + $0x548] ss:$16 sps:$4 sm:$0xff]   ;;  %v9598_v52 = vld [vmem:[#allocation5 + $0x564] ss:$16 sps:$4 sm:$0xff]  }
 0x110   :  { %1606 = vmatprep.subr.bf16.mxu0 %v9506_v53  ;;  %1770 = vmatprep.subr.bf16.mxu1 %v9509_v54  ;;  %v9601_v53 = vld [vmem:[#allocation5 + $0x56c] ss:$16 sps:$4 sm:$0xff]   ;;  %v9596_v54 = vld [vmem:[#allocation5 + $0x560] ss:$16 sps:$4 sm:$0xff]  }
 0x113   :  { %1607 = vmatpush1.bf16.msra.mxu0 %v9504_v55  ;;  %1771 = vmatpush1.bf16.msra.mxu1 %v9507_v56  ;;  %v9599_v55 = vld [vmem:[#allocation5 + $0x568] ss:$16 sps:$4 sm:$0xff]   ;;  %v9604_v56 = vld [vmem:[#allocation5 + $0x584] ss:$16 sps:$4 sm:$0xff]  }
 0x114   :  { %1608 = vmatprep.subr.bf16.mxu0 %v9512_v57  ;;  %1772 = vmatprep.subr.bf16.mxu1 %v9515_v58  ;;  %v9607_v57 = vld [vmem:[#allocation5 + $0x58c] ss:$16 sps:$4 sm:$0xff]   ;;  %v9602_v58 = vld [vmem:[#allocation5 + $0x580] ss:$16 sps:$4 sm:$0xff]  }
 0x117   :  { %1609 = vmatpush1.bf16.msra.mxu0 %v9510_v59  ;;  %1773 = vmatpush1.bf16.msra.mxu1 %v9513_v60  ;;  %v9605_v59 = vld [vmem:[#allocation5 + $0x588] ss:$16 sps:$4 sm:$0xff]   ;;  %v9610_v60 = vld [vmem:[#allocation5 + $0x5a4] ss:$16 sps:$4 sm:$0xff]  }
 0x118   :  { %1610 = vmatprep.subr.bf16.mxu0 %v9518_v61  ;;  %1774 = vmatprep.subr.bf16.mxu1 %v9521_v62  ;;  %v9613_v61 = vld [vmem:[#allocation5 + $0x5ac] ss:$16 sps:$4 sm:$0xff]   ;;  %v9608_v62 = vld [vmem:[#allocation5 + $0x5a0] ss:$16 sps:$4 sm:$0xff]  }
 0x11b   :  { %1611 = vmatpush1.bf16.msra.mxu0 %v9516_v63  ;;  %1775 = vmatpush1.bf16.msra.mxu1 %v9519_v0  ;;  %v9611_v63 = vld [vmem:[#allocation5 + $0x5a8] ss:$16 sps:$4 sm:$0xff]   ;;  %v9616_v0 = vld [vmem:[#allocation5 + $0x5c4] ss:$16 sps:$4 sm:$0xff]  }
 0x11c   :  { %1612 = vmatprep.subr.bf16.mxu0 %v9524_v1  ;;  %1776 = vmatprep.subr.bf16.mxu1 %v9527_v2  ;;  %v9619_v1 = vld [vmem:[#allocation5 + $0x5cc] ss:$16 sps:$4 sm:$0xff]   ;;  %v9614_v2 = vld [vmem:[#allocation5 + $0x5c0] ss:$16 sps:$4 sm:$0xff]  }
 0x11f   :  { %1613 = vmatpush1.bf16.msra.mxu0 %v9522_v3  ;;  %1777 = vmatpush1.bf16.msra.mxu1 %v9525_v4  ;;  %v9617_v3 = vld [vmem:[#allocation5 + $0x5c8] ss:$16 sps:$4 sm:$0xff]   ;;  %v9622_v4 = vld [vmem:[#allocation5 + $0x5e4] ss:$16 sps:$4 sm:$0xff]  }
 0x120   :  { %1623 = vmatprep.subr.bf16.mxu0 %v9532_v5  ;;  %1787 = vmatprep.subr.bf16.mxu1 %v9535_v6  ;;  %v9625_v5 = vld [vmem:[#allocation5 + $0x5ec] ss:$16 sps:$4 sm:$0xff]   ;;  %v9620_v6 = vld [vmem:[#allocation5 + $0x5e0] ss:$16 sps:$4 sm:$0xff]  }
 0x122   :  { %1615 = vmatmul.mubr.bf16.vlgmr.msra.gmra.mrb[0].mxu0 %v8056_v7  ;;  %1779 = vmatmul.mubr.bf16.vlgmr.msra.gmra.mrb[0].mxu1 %v8056_v7  ;;  %v9623_v7 = vld [vmem:[#allocation5 + $0x5e8] ss:$16 sps:$4 sm:$0xff]  }
 0x123   :  { %1624 = vmatpush1.bf16.msra.mxu0 %v9530_v8  ;;  %1788 = vmatpush1.bf16.msra.mxu1 %v9533_v9  ;;  %v9630_v8 = vld [vmem:[#allocation5 + $0x604] ss:$16 sps:$4 sm:$0xff]   ;;  %v9633_v9 = vld [vmem:[#allocation5 + $0x60c] ss:$16 sps:$4 sm:$0xff]  }
 0x124   :  { %1625 = vmatprep.subr.bf16.mxu0 %v9538_v10  ;;  %1789 = vmatprep.subr.bf16.mxu1 %v9541_v12  ;;  %v9628_v10 = vld [vmem:[#allocation5 + $0x600] ss:$16 sps:$4 sm:$0xff]   ;;  %v9631_v12 = vld [vmem:[#allocation5 + $0x608] ss:$16 sps:$4 sm:$0xff]  }
 0x125   :  { %1655 = vmatprep.mubr.bf16.mxu0 %v8059_v13  ;;  %1819 = vmatprep.mubr.bf16.mxu1 %v8059_v13  ;;  %v8058_v13 = vcombine.low %v10409_v11, %v10409_v11  ;;  %v9648_v11 = vld [vmem:[#allocation5 + $0x664] ss:$16 sps:$4 sm:$0xff]  }
 0x127   :  { %1626 = vmatpush1.bf16.msra.mxu0 %v9536_v14  ;;  %1790 = vmatpush1.bf16.msra.mxu1 %v9539_v15  ;;  %v9636_v14 = vld [vmem:[#allocation5 + $0x624] ss:$16 sps:$4 sm:$0xff]   ;;  %v9639_v15 = vld [vmem:[#allocation5 + $0x62c] ss:$16 sps:$4 sm:$0xff]  }
 0x128   :  { %1627 = vmatprep.subr.bf16.mxu0 %v9544_v16  ;;  %1791 = vmatprep.subr.bf16.mxu1 %v9547_v17  ;;  %v9634_v16 = vld [vmem:[#allocation5 + $0x620] ss:$16 sps:$4 sm:$0xff]   ;;  %v9637_v17 = vld [vmem:[#allocation5 + $0x628] ss:$16 sps:$4 sm:$0xff]  }
 0x12b   :  { %1628 = vmatpush1.bf16.msra.mxu0 %v9542_v18  ;;  %1792 = vmatpush1.bf16.msra.mxu1 %v9545_v19  ;;  %v9642_v18 = vld [vmem:[#allocation5 + $0x644] ss:$16 sps:$4 sm:$0xff]   ;;  %v9645_v19 = vld [vmem:[#allocation5 + $0x64c] ss:$16 sps:$4 sm:$0xff]  }
 0x12c   :  { %1629 = vmatprep.subr.bf16.mxu0 %v9550_v20  ;;  %1793 = vmatprep.subr.bf16.mxu1 %v9553_v21  ;;  %v9640_v20 = vld [vmem:[#allocation5 + $0x640] ss:$16 sps:$4 sm:$0xff]   ;;  %v9643_v21 = vld [vmem:[#allocation5 + $0x648] ss:$16 sps:$4 sm:$0xff]  }
 0x12f   :  { %1630 = vmatpush1.bf16.msra.mxu0 %v9548_v22  ;;  %1794 = vmatpush1.bf16.msra.mxu1 %v9551_v23  ;;  %v10243_v22 = vmov 0   ;;  %v9651_v23 = vld [vmem:[#allocation5 + $0x66c] ss:$16 sps:$4 sm:$0xff]  }
 0x130   :  { %1631 = vmatprep.subr.bf16.mxu0 %v9556_v24  ;;  %1795 = vmatprep.subr.bf16.mxu1 %v9559_v25  ;;  %v9646_v24 = vld [vmem:[#allocation5 + $0x660] ss:$16 sps:$4 sm:$0xff]   ;;  %v9649_v25 = vld [vmem:[#allocation5 + $0x668] ss:$16 sps:$4 sm:$0xff]  }
 0x133   :  { %1632 = vmatpush1.bf16.msra.mxu0 %v9554_v26  ;;  %1796 = vmatpush1.bf16.msra.mxu1 %v9557_v27  ;;  %v9654_v26 = vld [vmem:[#allocation5 + $0x684] ss:$16 sps:$4 sm:$0xff]   ;;  %v9657_v27 = vld [vmem:[#allocation5 + $0x68c] ss:$16 sps:$4 sm:$0xff]  }
 0x134   :  { %1633 = vmatprep.subr.bf16.mxu0 %v9562_v28  ;;  %1797 = vmatprep.subr.bf16.mxu1 %v9565_v29  ;;  %v9652_v28 = vld [vmem:[#allocation5 + $0x680] ss:$16 sps:$4 sm:$0xff]   ;;  %v9655_v29 = vld [vmem:[#allocation5 + $0x688] ss:$16 sps:$4 sm:$0xff]  }
 0x137   :  { %1634 = vmatpush1.bf16.msra.mxu0 %v9560_v30  ;;  %1798 = vmatpush1.bf16.msra.mxu1 %v9563_v31  ;;  %v9660_v30 = vld [vmem:[#allocation5 + $0x6a4] ss:$16 sps:$4 sm:$0xff]   ;;  %v9663_v31 = vld [vmem:[#allocation5 + $0x6ac] ss:$16 sps:$4 sm:$0xff]  }
 0x138   :  { %1635 = vmatprep.subr.bf16.mxu0 %v9568_v32  ;;  %1799 = vmatprep.subr.bf16.mxu1 %v9571_v33  ;;  %v9658_v32 = vld [vmem:[#allocation5 + $0x6a0] ss:$16 sps:$4 sm:$0xff]   ;;  %v9661_v33 = vld [vmem:[#allocation5 + $0x6a8] ss:$16 sps:$4 sm:$0xff]  }
 0x13b   :  { %1636 = vmatpush1.bf16.msra.mxu0 %v9566_v34  ;;  %1800 = vmatpush1.bf16.msra.mxu1 %v9569_v35  ;;  %v9666_v34 = vld [vmem:[#allocation5 + $0x6c4] ss:$16 sps:$4 sm:$0xff]   ;;  %v9669_v35 = vld [vmem:[#allocation5 + $0x6cc] ss:$16 sps:$4 sm:$0xff]  }
 0x13c   :  { %1637 = vmatprep.subr.bf16.mxu0 %v9574_v36  ;;  %1801 = vmatprep.subr.bf16.mxu1 %v9577_v37  ;;  %v9664_v36 = vld [vmem:[#allocation5 + $0x6c0] ss:$16 sps:$4 sm:$0xff]   ;;  %v9667_v37 = vld [vmem:[#allocation5 + $0x6c8] ss:$16 sps:$4 sm:$0xff]  }
 0x13f   :  { %1638 = vmatpush1.bf16.msra.mxu0 %v9572_v38  ;;  %1802 = vmatpush1.bf16.msra.mxu1 %v9575_v39  ;;  %v9672_v38 = vld [vmem:[#allocation5 + $0x6e4] ss:$16 sps:$4 sm:$0xff]   ;;  %v9675_v39 = vld [vmem:[#allocation5 + $0x6ec] ss:$16 sps:$4 sm:$0xff]  }
 0x140   :  { %1639 = vmatprep.subr.bf16.mxu0 %v9580_v40  ;;  %1803 = vmatprep.subr.bf16.mxu1 %v9583_v41  ;;  %v9670_v40 = vld [vmem:[#allocation5 + $0x6e0] ss:$16 sps:$4 sm:$0xff]   ;;  %v9673_v41 = vld [vmem:[#allocation5 + $0x6e8] ss:$16 sps:$4 sm:$0xff]  }
 0x143   :  { %1640 = vmatpush1.bf16.msra.mxu0 %v9578_v42  ;;  %1804 = vmatpush1.bf16.msra.mxu1 %v9581_v43  ;;  %v9679_v42 = vld [vmem:[#allocation8 + $0x4] ss:$16 sps:$4 sm:$0xff]   ;;  %v9682_v43 = vld [vmem:[#allocation8 + $0xc] ss:$16 sps:$4 sm:$0xff]  }
 0x144   :  { %1641 = vmatprep.subr.bf16.mxu0 %v9586_v44  ;;  %1805 = vmatprep.subr.bf16.mxu1 %v9589_v45  ;;  %v9676_v44 = vld [vmem:[#allocation2 + $0x18] ss:$0 sps:$4 sm:$0xff]   ;;  %v9677_v45 = vld [vmem:[#allocation8] ss:$16 sps:$4 sm:$0xff]  }
 0x147   :  { %1642 = vmatpush1.bf16.msra.mxu0 %v9584_v46  ;;  %1806 = vmatpush1.bf16.msra.mxu1 %v9587_v47  ;;  %v9680_v46 = vld [vmem:[#allocation8 + $0x8] ss:$16 sps:$4 sm:$0xff]   ;;  %v9685_v47 = vld [vmem:[#allocation8 + $0x24] ss:$16 sps:$4 sm:$0xff]  }
 0x148   :  { %1643 = vmatprep.subr.bf16.mxu0 %v9592_v48  ;;  %1807 = vmatprep.subr.bf16.mxu1 %v9595_v49  ;;  %v9688_v48 = vld [vmem:[#allocation8 + $0x2c] ss:$16 sps:$4 sm:$0xff]   ;;  %v9683_v49 = vld [vmem:[#allocation8 + $0x20] ss:$16 sps:$4 sm:$0xff]  }
 0x14b   :  { %1644 = vmatpush1.bf16.msra.mxu0 %v9590_v50  ;;  %1808 = vmatpush1.bf16.msra.mxu1 %v9593_v51  ;;  %v9686_v50 = vld [vmem:[#allocation8 + $0x28] ss:$16 sps:$4 sm:$0xff]   ;;  %v9691_v51 = vld [vmem:[#allocation8 + $0x44] ss:$16 sps:$4 sm:$0xff]  }
 0x14c   :  { %1645 = vmatprep.subr.bf16.mxu0 %v9598_v52  ;;  %1809 = vmatprep.subr.bf16.mxu1 %v9601_v53  ;;  %v9694_v52 = vld [vmem:[#allocation8 + $0x4c] ss:$16 sps:$4 sm:$0xff]   ;;  %v9689_v53 = vld [vmem:[#allocation8 + $0x40] ss:$16 sps:$4 sm:$0xff]  }
 0x14f   :  { %1646 = vmatpush1.bf16.msra.mxu0 %v9596_v54  ;;  %1810 = vmatpush1.bf16.msra.mxu1 %v9599_v55  ;;  %v9692_v54 = vld [vmem:[#allocation8 + $0x48] ss:$16 sps:$4 sm:$0xff]   ;;  %v9697_v55 = vld [vmem:[#allocation8 + $0x64] ss:$16 sps:$4 sm:$0xff]  }
 0x150   :  { %1647 = vmatprep.subr.bf16.mxu0 %v9604_v56  ;;  %1811 = vmatprep.subr.bf16.mxu1 %v9607_v57  ;;  %v9700_v56 = vld [vmem:[#allocation8 + $0x6c] ss:$16 sps:$4 sm:$0xff]   ;;  %v9695_v57 = vld [vmem:[#allocation8 + $0x60] ss:$16 sps:$4 sm:$0xff]  }
 0x153   :  { %1648 = vmatpush1.bf16.msra.mxu0 %v9602_v58  ;;  %1812 = vmatpush1.bf16.msra.mxu1 %v9605_v59  ;;  %v9698_v58 = vld [vmem:[#allocation8 + $0x68] ss:$16 sps:$4 sm:$0xff]   ;;  %v9703_v59 = vld [vmem:[#allocation8 + $0x84] ss:$16 sps:$4 sm:$0xff]  }
 0x154   :  { %1649 = vmatprep.subr.bf16.mxu0 %v9610_v60  ;;  %1813 = vmatprep.subr.bf16.mxu1 %v9613_v61  ;;  %v9706_v60 = vld [vmem:[#allocation8 + $0x8c] ss:$16 sps:$4 sm:$0xff]   ;;  %v9701_v61 = vld [vmem:[#allocation8 + $0x80] ss:$16 sps:$4 sm:$0xff]  }
 0x157   :  { %1650 = vmatpush1.bf16.msra.mxu0 %v9608_v62  ;;  %1814 = vmatpush1.bf16.msra.mxu1 %v9611_v63  ;;  %v9704_v62 = vld [vmem:[#allocation8 + $0x88] ss:$16 sps:$4 sm:$0xff]   ;;  %v9709_v63 = vld [vmem:[#allocation8 + $0xa4] ss:$16 sps:$4 sm:$0xff]  }
 0x158   :  { %1651 = vmatprep.subr.bf16.mxu0 %v9616_v0  ;;  %1815 = vmatprep.subr.bf16.mxu1 %v9619_v1  ;;  %v9712_v0 = vld [vmem:[#allocation8 + $0xac] ss:$16 sps:$4 sm:$0xff]   ;;  %v9707_v1 = vld [vmem:[#allocation8 + $0xa0] ss:$16 sps:$4 sm:$0xff]  }
 0x15b   :  { %1652 = vmatpush1.bf16.msra.mxu0 %v9614_v2  ;;  %1816 = vmatpush1.bf16.msra.mxu1 %v9617_v3  ;;  %v9710_v2 = vld [vmem:[#allocation8 + $0xa8] ss:$16 sps:$4 sm:$0xff]   ;;  %v9715_v3 = vld [vmem:[#allocation8 + $0xc4] ss:$16 sps:$4 sm:$0xff]  }
 0x15c   :  { %1653 = vmatprep.subr.bf16.mxu0 %v9622_v4  ;;  %1817 = vmatprep.subr.bf16.mxu1 %v9625_v5  ;;  %v9718_v4 = vld [vmem:[#allocation8 + $0xcc] ss:$16 sps:$4 sm:$0xff]   ;;  %v9713_v5 = vld [vmem:[#allocation8 + $0xc0] ss:$16 sps:$4 sm:$0xff]  }
 0x15f   :  { %1654 = vmatpush1.bf16.msra.mxu0 %v9620_v6  ;;  %1818 = vmatpush1.bf16.msra.mxu1 %v9623_v7  ;;  %v9716_v6 = vld [vmem:[#allocation8 + $0xc8] ss:$16 sps:$4 sm:$0xff]   ;;  %v9721_v7 = vld [vmem:[#allocation8 + $0xe4] ss:$16 sps:$4 sm:$0xff]  }
 0x160   :  { %1664 = vmatprep.subr.bf16.mxu0 %v9630_v8  ;;  %1828 = vmatprep.subr.bf16.mxu1 %v9633_v9  ;;  %v9724_v8 = vld [vmem:[#allocation8 + $0xec] ss:$16 sps:$4 sm:$0xff]   ;;  %v9719_v9 = vld [vmem:[#allocation8 + $0xe0] ss:$16 sps:$4 sm:$0xff]  }
 0x162   :  { %1656 = vmatmul.mubr.bf16.vlgmr.msra.gmra.mrb[0].mxu0 %v8058_v13  ;;  %1820 = vmatmul.mubr.bf16.vlgmr.msra.gmra.mrb[0].mxu1 %v8058_v13  ;;  %v9730_v13 = vld [vmem:[#allocation8 + $0x10c] ss:$16 sps:$4 sm:$0xff]  }
 0x163   :  { %1665 = vmatpush1.bf16.msra.mxu0 %v9628_v10  ;;  %1829 = vmatpush1.bf16.msra.mxu1 %v9631_v12  ;;  %v9722_v10 = vld [vmem:[#allocation8 + $0xe8] ss:$16 sps:$4 sm:$0xff]   ;;  %v9727_v12 = vld [vmem:[#allocation8 + $0x104] ss:$16 sps:$4 sm:$0xff]  }
 0x164   :  { %1666 = vmatprep.subr.bf16.mxu0 %v9636_v14  ;;  %1830 = vmatprep.subr.bf16.mxu1 %v9639_v15  ;;  %v9725_v14 = vld [vmem:[#allocation8 + $0x100] ss:$16 sps:$4 sm:$0xff]   ;;  %v9728_v15 = vld [vmem:[#allocation8 + $0x108] ss:$16 sps:$4 sm:$0xff]  }
 0x165   :  { %1696 = vmatprep.mubr.bf16.mxu0 %v10243_v22  ;;  %1860 = vmatprep.mubr.bf16.mxu1 %v10243_v22  ;;  %v9737_v22 = vld [vmem:[#allocation8 + $0x140] ss:$16 sps:$4 sm:$0xff]  }
 0x167   :  { %1667 = vmatpush1.bf16.msra.mxu0 %v9634_v16  ;;  %1831 = vmatpush1.bf16.msra.mxu1 %v9637_v17  ;;  %v9733_v16 = vld [vmem:[#allocation8 + $0x124] ss:$16 sps:$4 sm:$0xff]   ;;  %v9736_v17 = vld [vmem:[#allocation8 + $0x12c] ss:$16 sps:$4 sm:$0xff]  }
 0x168   :  { %1668 = vmatprep.subr.bf16.mxu0 %v9642_v18  ;;  %1832 = vmatprep.subr.bf16.mxu1 %v9645_v19  ;;  %v9731_v18 = vld [vmem:[#allocation8 + $0x120] ss:$16 sps:$4 sm:$0xff]   ;;  %v9734_v19 = vld [vmem:[#allocation8 + $0x128] ss:$16 sps:$4 sm:$0xff]  }
 0x16b   :  { %1669 = vmatpush1.bf16.msra.mxu0 %v9640_v20  ;;  %1833 = vmatpush1.bf16.msra.mxu1 %v9643_v21  ;;  %v9739_v20 = vld [vmem:[#allocation8 + $0x144] ss:$16 sps:$4 sm:$0xff]   ;;  %v9742_v21 = vld [vmem:[#allocation8 + $0x14c] ss:$16 sps:$4 sm:$0xff]  }
 0x16c   :  { %1670 = vmatprep.subr.bf16.mxu0 %v9648_v11  ;;  %1834 = vmatprep.subr.bf16.mxu1 %v9651_v23  ;;  %v9740_v11 = vld [vmem:[#allocation8 + $0x148] ss:$16 sps:$4 sm:$0xff]   ;;  %v9745_v23 = vld [vmem:[#allocation8 + $0x164] ss:$16 sps:$4 sm:$0xff]  }
 0x16f   :  { %1671 = vmatpush1.bf16.msra.mxu0 %v9646_v24  ;;  %1835 = vmatpush1.bf16.msra.mxu1 %v9649_v25  ;;  %v9748_v24 = vld [vmem:[#allocation8 + $0x16c] ss:$16 sps:$4 sm:$0xff]   ;;  %v9743_v25 = vld [vmem:[#allocation8 + $0x160] ss:$16 sps:$4 sm:$0xff]  }
 0x170   :  { %1672 = vmatprep.subr.bf16.mxu0 %v9654_v26  ;;  %1836 = vmatprep.subr.bf16.mxu1 %v9657_v27  ;;  %v9746_v26 = vld [vmem:[#allocation8 + $0x168] ss:$16 sps:$4 sm:$0xff]   ;;  %v9751_v27 = vld [vmem:[#allocation8 + $0x184] ss:$16 sps:$4 sm:$0xff]  }
 0x173   :  { %1673 = vmatpush1.bf16.msra.mxu0 %v9652_v28  ;;  %1837 = vmatpush1.bf16.msra.mxu1 %v9655_v29  ;;  %v9754_v28 = vld [vmem:[#allocation8 + $0x18c] ss:$16 sps:$4 sm:$0xff]   ;;  %v9749_v29 = vld [vmem:[#allocation8 + $0x180] ss:$16 sps:$4 sm:$0xff]  }
 0x174   :  { %1674 = vmatprep.subr.bf16.mxu0 %v9660_v30  ;;  %1838 = vmatprep.subr.bf16.mxu1 %v9663_v31  ;;  %v9752_v30 = vld [vmem:[#allocation8 + $0x188] ss:$16 sps:$4 sm:$0xff]   ;;  %v9757_v31 = vld [vmem:[#allocation8 + $0x1a4] ss:$16 sps:$4 sm:$0xff]  }
 0x177   :  { %1675 = vmatpush1.bf16.msra.mxu0 %v9658_v32  ;;  %1839 = vmatpush1.bf16.msra.mxu1 %v9661_v33  ;;  %v9760_v32 = vld [vmem:[#allocation8 + $0x1ac] ss:$16 sps:$4 sm:$0xff]   ;;  %v9755_v33 = vld [vmem:[#allocation8 + $0x1a0] ss:$16 sps:$4 sm:$0xff]  }
 0x178   :  { %1676 = vmatprep.subr.bf16.mxu0 %v9666_v34  ;;  %1840 = vmatprep.subr.bf16.mxu1 %v9669_v35  ;;  %v9758_v34 = vld [vmem:[#allocation8 + $0x1a8] ss:$16 sps:$4 sm:$0xff]   ;;  %v9763_v35 = vld [vmem:[#allocation8 + $0x1c4] ss:$16 sps:$4 sm:$0xff]  }
 0x17b   :  { %1677 = vmatpush1.bf16.msra.mxu0 %v9664_v36  ;;  %1841 = vmatpush1.bf16.msra.mxu1 %v9667_v37  ;;  %v9766_v36 = vld [vmem:[#allocation8 + $0x1cc] ss:$16 sps:$4 sm:$0xff]   ;;  %v9761_v37 = vld [vmem:[#allocation8 + $0x1c0] ss:$16 sps:$4 sm:$0xff]  }
 0x17c   :  { %1678 = vmatprep.subr.bf16.mxu0 %v9672_v38  ;;  %1842 = vmatprep.subr.bf16.mxu1 %v9675_v39  ;;  %v9764_v38 = vld [vmem:[#allocation8 + $0x1c8] ss:$16 sps:$4 sm:$0xff]   ;;  %v9769_v39 = vld [vmem:[#allocation8 + $0x1e4] ss:$16 sps:$4 sm:$0xff]  }
 0x17f   :  { %1679 = vmatpush1.bf16.msra.mxu0 %v9670_v40  ;;  %1843 = vmatpush1.bf16.msra.mxu1 %v9673_v41  ;;  %v9772_v40 = vld [vmem:[#allocation8 + $0x1ec] ss:$16 sps:$4 sm:$0xff]   ;;  %v9767_v41 = vld [vmem:[#allocation8 + $0x1e0] ss:$16 sps:$4 sm:$0xff]  }
 0x180   :  { %2667 = vmatprep.subr.bf16.mxu0 %v9679_v42  ;;  %2749 = vmatprep.subr.bf16.mxu1 %v9682_v43  ;;  %v9770_v42 = vld [vmem:[#allocation8 + $0x1e8] ss:$16 sps:$4 sm:$0xff]   ;;  %v9775_v43 = vld [vmem:[#allocation8 + $0x204] ss:$16 sps:$4 sm:$0xff]  }
 0x182   :  { %1697 = vmatmul.mubr.bf16.vlgmr.msra.gmra.mrb[0].mxu0 %v9676_v44  ;;  %1861 = vmatmul.mubr.bf16.vlgmr.msra.gmra.mrb[0].mxu1 %v9676_v44  ;;  %v9778_v44 = vld [vmem:[#allocation8 + $0x20c] ss:$16 sps:$4 sm:$0xff]  }
 0x183   :  { %2668 = vmatpush1.bf16.msra.mxu0 %v9677_v45  ;;  %2750 = vmatpush1.bf16.msra.mxu1 %v9680_v46  ;;  %v376_v45 = vlaneseq }
 0x184   :  { %2669 = vmatprep.subr.bf16.mxu0 %v9685_v47  ;;  %2751 = vmatprep.subr.bf16.mxu1 %v9688_v48  ;;  %v10420_v48 = vld [vmem:[#allocation7] sm:$0xf] }
 0x185   :  { %v10415_v46 = vshrl.u32 %v376_v45, 7  ;;  %v9835_v45 = vld [vmem:[#allocation8 + $0x344] ss:$16 sps:$4 sm:$0xff]  }
 0x187   :  { %2670 = vmatpush1.bf16.msra.mxu0 %v9683_v49  ;;  %2752 = vmatpush1.bf16.msra.mxu1 %v9686_v50  ;;  %v10418_v47 = vsub.s32 0, %v10415_v46  ;;  %v10423_v49 = vsub.s32 1, %v10415_v46  ;;  %v10426_v50 = vsub.s32 3, %v10415_v46 }
 0x188   :  { %2671 = vmatprep.subr.bf16.mxu0 %v9691_v51  ;;  %2753 = vmatprep.subr.bf16.mxu1 %v9694_v52 }
 0x189   :  { %v379_v51 = vrot.slane %v10420_v48, %v10418_v47  ;;  %v383_v52 = vrot.slane %v10420_v48, %v10423_v49 }
 0x18b   :  { %2672 = vmatpush1.bf16.msra.mxu0 %v9689_v53  ;;  %2754 = vmatpush1.bf16.msra.mxu1 %v9692_v54  ;;  %v391_v53 = vrot.slane %v10420_v48, %v10426_v50 }
 0x18c   :  { %2673 = vmatprep.subr.bf16.mxu0 %v9697_v55  ;;  %2755 = vmatprep.subr.bf16.mxu1 %v9700_v56 }
 0x18f   :  { %2674 = vmatpush1.bf16.msra.mxu0 %v9695_v57  ;;  %2756 = vmatpush1.bf16.msra.mxu1 %v9698_v58 }
 0x190   :  { %2675 = vmatprep.subr.bf16.mxu0 %v9703_v59  ;;  %2757 = vmatprep.subr.bf16.mxu1 %v9706_v60 }
 0x193   :  { %2676 = vmatpush1.bf16.msra.mxu0 %v9701_v61  ;;  %2758 = vmatpush1.bf16.msra.mxu1 %v9704_v62 }
 0x194   :  { %2677 = vmatprep.subr.bf16.mxu0 %v9709_v63  ;;  %2759 = vmatprep.subr.bf16.mxu1 %v9712_v0 }
 0x197   :  { %2678 = vmatpush1.bf16.msra.mxu0 %v9707_v1  ;;  %2760 = vmatpush1.bf16.msra.mxu1 %v9710_v2 }
 0x198   :  { %2679 = vmatprep.subr.bf16.mxu0 %v9715_v3  ;;  %2761 = vmatprep.subr.bf16.mxu1 %v9718_v4 }
 0x19b   :  { %2680 = vmatpush1.bf16.msra.mxu0 %v9713_v5  ;;  %2762 = vmatpush1.bf16.msra.mxu1 %v9716_v6  ;;  %v9773_v5 = vld [vmem:[#allocation8 + $0x200] ss:$16 sps:$4 sm:$0xff]   ;;  %v9776_v6 = vld [vmem:[#allocation8 + $0x208] ss:$16 sps:$4 sm:$0xff]  }
 0x19c   :  { %2681 = vmatprep.subr.bf16.mxu0 %v9721_v7  ;;  %2763 = vmatprep.subr.bf16.mxu1 %v9724_v8  ;;  %v9781_v8 = vld [vmem:[#allocation8 + $0x224] ss:$16 sps:$4 sm:$0xff]  }
 0x19f   :  { %2682 = vmatpush1.bf16.msra.mxu0 %v9719_v9  ;;  %2764 = vmatpush1.bf16.msra.mxu1 %v9722_v10  ;;  %v9784_v9 = vld [vmem:[#allocation8 + $0x22c] ss:$16 sps:$4 sm:$0xff]  }
 0x1a0   :  { %2683 = vmatprep.subr.bf16.mxu0 %v9727_v12  ;;  %2765 = vmatprep.subr.bf16.mxu1 %v9730_v13  ;;  %v9779_v12 = vld [vmem:[#allocation8 + $0x220] ss:$16 sps:$4 sm:$0xff]   ;;  %v9782_v13 = vld [vmem:[#allocation8 + $0x228] ss:$16 sps:$4 sm:$0xff]  }
 0x1a3   :  { %2684 = vmatpush1.bf16.msra.mxu0 %v9725_v14  ;;  %2766 = vmatpush1.bf16.msra.mxu1 %v9728_v15  ;;  %v9787_v14 = vld [vmem:[#allocation8 + $0x244] ss:$16 sps:$4 sm:$0xff]   ;;  %v9790_v15 = vld [vmem:[#allocation8 + $0x24c] ss:$16 sps:$4 sm:$0xff]  }
 0x1a4   :  { %2685 = vmatprep.subr.bf16.mxu0 %v9733_v16  ;;  %2767 = vmatprep.subr.bf16.mxu1 %v9736_v17  ;;  %v9785_v16 = vld [vmem:[#allocation8 + $0x240] ss:$16 sps:$4 sm:$0xff]   ;;  %v9788_v17 = vld [vmem:[#allocation8 + $0x248] ss:$16 sps:$4 sm:$0xff]  }
 0x1a7   :  { %2686 = vmatpush1.bf16.msra.mxu0 %v9731_v18  ;;  %2768 = vmatpush1.bf16.msra.mxu1 %v9734_v19  ;;  %v9793_v18 = vld [vmem:[#allocation8 + $0x264] ss:$16 sps:$4 sm:$0xff]   ;;  %v9796_v19 = vld [vmem:[#allocation8 + $0x26c] ss:$16 sps:$4 sm:$0xff]  }
 0x1a8   :  { %2687 = vmatprep.subr.bf16.mxu0 %v9739_v20  ;;  %2769 = vmatprep.subr.bf16.mxu1 %v9742_v21  ;;  %v9791_v20 = vld [vmem:[#allocation8 + $0x260] ss:$16 sps:$4 sm:$0xff]   ;;  %v9794_v21 = vld [vmem:[#allocation8 + $0x268] ss:$16 sps:$4 sm:$0xff]  }
 0x1ab   :  { %2688 = vmatpush1.bf16.msra.mxu0 %v9737_v22  ;;  %2770 = vmatpush1.bf16.msra.mxu1 %v9740_v11  ;;  %v9799_v22 = vld [vmem:[#allocation8 + $0x284] ss:$16 sps:$4 sm:$0xff]   ;;  %v9802_v11 = vld [vmem:[#allocation8 + $0x28c] ss:$16 sps:$4 sm:$0xff]  }
 0x1ac   :  { %2689 = vmatprep.subr.bf16.mxu0 %v9745_v23  ;;  %2771 = vmatprep.subr.bf16.mxu1 %v9748_v24  ;;  %v9797_v23 = vld [vmem:[#allocation8 + $0x280] ss:$16 sps:$4 sm:$0xff]   ;;  %v9800_v24 = vld [vmem:[#allocation8 + $0x288] ss:$16 sps:$4 sm:$0xff]  }
 0x1af   :  { %2690 = vmatpush1.bf16.msra.mxu0 %v9743_v25  ;;  %2772 = vmatpush1.bf16.msra.mxu1 %v9746_v26  ;;  %v9805_v25 = vld [vmem:[#allocation8 + $0x2a4] ss:$16 sps:$4 sm:$0xff]   ;;  %v9808_v26 = vld [vmem:[#allocation8 + $0x2ac] ss:$16 sps:$4 sm:$0xff]  }
 0x1b0   :  { %2691 = vmatprep.subr.bf16.mxu0 %v9751_v27  ;;  %2773 = vmatprep.subr.bf16.mxu1 %v9754_v28  ;;  %v9803_v27 = vld [vmem:[#allocation8 + $0x2a0] ss:$16 sps:$4 sm:$0xff]   ;;  %v9806_v28 = vld [vmem:[#allocation8 + $0x2a8] ss:$16 sps:$4 sm:$0xff]  }
 0x1b3   :  { %2692 = vmatpush1.bf16.msra.mxu0 %v9749_v29  ;;  %2774 = vmatpush1.bf16.msra.mxu1 %v9752_v30  ;;  %v9811_v29 = vld [vmem:[#allocation8 + $0x2c4] ss:$16 sps:$4 sm:$0xff]   ;;  %v9814_v30 = vld [vmem:[#allocation8 + $0x2cc] ss:$16 sps:$4 sm:$0xff]  }
 0x1b4   :  { %2693 = vmatprep.subr.bf16.mxu0 %v9757_v31  ;;  %2775 = vmatprep.subr.bf16.mxu1 %v9760_v32  ;;  %v9809_v31 = vld [vmem:[#allocation8 + $0x2c0] ss:$16 sps:$4 sm:$0xff]   ;;  %v9812_v32 = vld [vmem:[#allocation8 + $0x2c8] ss:$16 sps:$4 sm:$0xff]  }
 0x1b7   :  { %2694 = vmatpush1.bf16.msra.mxu0 %v9755_v33  ;;  %2776 = vmatpush1.bf16.msra.mxu1 %v9758_v34  ;;  %v9817_v33 = vld [vmem:[#allocation8 + $0x2e4] ss:$16 sps:$4 sm:$0xff]   ;;  %v9820_v34 = vld [vmem:[#allocation8 + $0x2ec] ss:$16 sps:$4 sm:$0xff]  }
 0x1b8   :  { %2695 = vmatprep.subr.bf16.mxu0 %v9763_v35  ;;  %2777 = vmatprep.subr.bf16.mxu1 %v9766_v36  ;;  %v9815_v35 = vld [vmem:[#allocation8 + $0x2e0] ss:$16 sps:$4 sm:$0xff]   ;;  %v9818_v36 = vld [vmem:[#allocation8 + $0x2e8] ss:$16 sps:$4 sm:$0xff]  }
 0x1bb   :  { %2696 = vmatpush1.bf16.msra.mxu0 %v9761_v37  ;;  %2778 = vmatpush1.bf16.msra.mxu1 %v9764_v38  ;;  %v9823_v37 = vld [vmem:[#allocation8 + $0x304] ss:$16 sps:$4 sm:$0xff]   ;;  %v9826_v38 = vld [vmem:[#allocation8 + $0x30c] ss:$16 sps:$4 sm:$0xff]  }
 0x1bc   :  { %2697 = vmatprep.subr.bf16.mxu0 %v9769_v39  ;;  %2779 = vmatprep.subr.bf16.mxu1 %v9772_v40  ;;  %v9821_v39 = vld [vmem:[#allocation8 + $0x300] ss:$16 sps:$4 sm:$0xff]   ;;  %v9824_v40 = vld [vmem:[#allocation8 + $0x308] ss:$16 sps:$4 sm:$0xff]  }
 0x1bf   :  { %2698 = vmatpush1.bf16.msra.mxu0 %v9767_v41  ;;  %2780 = vmatpush1.bf16.msra.mxu1 %v9770_v42  ;;  %v9829_v41 = vld [vmem:[#allocation8 + $0x324] ss:$16 sps:$4 sm:$0xff]   ;;  %v9832_v42 = vld [vmem:[#allocation8 + $0x32c] ss:$16 sps:$4 sm:$0xff]  }
 0x1c0   :  { %2708 = vmatprep.subr.bf16.mxu0 %v9775_v43  ;;  %2790 = vmatprep.subr.bf16.mxu1 %v9778_v44  ;;  %v9827_v43 = vld [vmem:[#allocation8 + $0x320] ss:$16 sps:$4 sm:$0xff]   ;;  %v9830_v44 = vld [vmem:[#allocation8 + $0x328] ss:$16 sps:$4 sm:$0xff]  }
 0x255   :  { %v1698_v54 = vpop.f32.mrb[0].mxu0  ;;  %v10434_v55 = vpop.f32.mrb[0].mxu1 }
 0x256   :  { %v9230_v56 = vadd.f32 %v1698_v54, %v379_v51  ;;  %v1700_v57 = vpop.f32.mrb[1].mxu0  ;;  %v1864_v58 = vpop.f32.mrb[1].mxu1  ;;  %v9838_v51 = vld [vmem:[#allocation8 + $0x34c] ss:$16 sps:$4 sm:$0xff]   ;;  %v9841_v54 = vld [vmem:[#allocation8 + $0x364] ss:$16 sps:$4 sm:$0xff]  }
 0x257   :  { %v9231_v59 = vadd.f32 %v1700_v57, %v383_v52  ;;  %v9233_v60 = vadd.f32 %v1864_v58, %v391_v53  ;;  %v1702_v61 = vpop.f32.mrb[2].mxu0  ;;  %v1866_v62 = vpop.f32.mrb[2].mxu1  ;;  %v9833_v52 = vld [vmem:[#allocation8 + $0x340] ss:$16 sps:$4 sm:$0xff]   ;;  %v9836_v53 = vld [vmem:[#allocation8 + $0x348] ss:$16 sps:$4 sm:$0xff]  }
 0x258   :  { %v1869_v63 = vmax.f32 %v9230_v56, 0.0  ;;  %v1703_v0 = vpop.f32.mrb[3].mxu0  ;;  %v1867_v1 = vpop.f32.mrb[3].mxu1  ;;  %v9844_v56 = vld [vmem:[#allocation8 + $0x36c] ss:$16 sps:$4 sm:$0xff]  }
 0x259   :  { %v1870_v2 = vmax.f32 %v9231_v59, 0.0  ;;  %v1872_v3 = vmax.f32 %v9233_v60, 0.0  ;;  %v9839_v57 = vld [vmem:[#allocation8 + $0x360] ss:$16 sps:$4 sm:$0xff]   ;;  %v9842_v58 = vld [vmem:[#allocation8 + $0x368] ss:$16 sps:$4 sm:$0xff]  }
 0x25a   :  { %v1873_v7 = vpack.c.bf16 %v1869_v63, %v1869_v63  ;;  %v9847_v59 = vld [vmem:[#allocation8 + $0x384] ss:$16 sps:$4 sm:$0xff]   ;;  %v9850_v60 = vld [vmem:[#allocation8 + $0x38c] ss:$16 sps:$4 sm:$0xff]   ;;  %v9845_v61 = vld [vmem:[#allocation8 + $0x380] ss:$16 sps:$4 sm:$0xff]  }
 0x25b   :  { %v1874_v4 = vpack.c.bf16 %v1870_v2, %v1870_v2  ;;  %v1876_v10 = vpack.c.bf16 %v1872_v3, %v1872_v3  ;;  %v9848_v62 = vld [vmem:[#allocation8 + $0x388] ss:$16 sps:$4 sm:$0xff]   ;;  %v10437_v63 = vsub.s32 2, %v10415_v46  ;;  %v9853_v0 = vld [vmem:[#allocation8 + $0x3a4] ss:$16 sps:$4 sm:$0xff]  }
 0x25c   :  { %v9856_v1 = vld [vmem:[#allocation8 + $0x3ac] ss:$16 sps:$4 sm:$0xff]   ;;  %v9851_v2 = vld [vmem:[#allocation8 + $0x3a0] ss:$16 sps:$4 sm:$0xff]   ;;  %v9854_v3 = vld [vmem:[#allocation8 + $0x3a8] ss:$16 sps:$4 sm:$0xff]  }
 0x25d   :  { %2699 = vmatprep.mubr.bf16.mxu0 %v1874_v4  ;;  %2781 = vmatprep.mubr.bf16.mxu1 %v1874_v4  ;;  %v387_v4 = vrot.slane %v10420_v48, %v10437_v63  ;;  %v9863_v48 = vld [vmem:[#allocation8 + $0x3e0] ss:$16 sps:$4 sm:$0xff]  }
 0x25e   :  { %2700 = vmatmul.mubr.bf16.vlgmr.msra.gmra.mrb[4].mxu0 %v1873_v7  ;;  %2782 = vmatmul.mubr.bf16.vlgmr.msra.gmra.mrb[4].mxu1 %v1873_v7  ;;  %v9857_v7 = vld [vmem:[#allocation8 + $0x3c0] ss:$16 sps:$4 sm:$0xff]  }
 0x25f   :  { %2709 = vmatpush1.bf16.msra.mxu0 %v9773_v5  ;;  %2791 = vmatpush1.bf16.msra.mxu1 %v9776_v6  ;;  %v9859_v5 = vld [vmem:[#allocation8 + $0x3c4] ss:$16 sps:$4 sm:$0xff]   ;;  %v9862_v6 = vld [vmem:[#allocation8 + $0x3cc] ss:$16 sps:$4 sm:$0xff]  }
 0x260   :  { %2740 = vmatprep.mubr.bf16.mxu0 %v1876_v10  ;;  %2822 = vmatprep.mubr.bf16.mxu1 %v1876_v10  ;;  %v9865_v10 = vld [vmem:[#allocation8 + $0x3e4] ss:$16 sps:$4 sm:$0xff]  }
 0x261   :  { %2710 = vmatprep.subr.bf16.mxu0 %v9781_v8  ;;  %2792 = vmatprep.subr.bf16.mxu1 %v9784_v9  ;;  %v9860_v8 = vld [vmem:[#allocation8 + $0x3c8] ss:$16 sps:$4 sm:$0xff]   ;;  %v9232_v9 = vadd.f32 %v10434_v55, %v387_v4  ;;  %v2856_v55 = vld [vmem:[#allocation11 + $0x88] sm:$0xff] }
 0x262   :  { %v2943_v4 = vld [vmem:[#allocation11 + $0x340] sm:$0xff] }
 0x263   :  { %2711 = vmatpush1.bf16.msra.mxu0 %v9779_v12  ;;  %2793 = vmatpush1.bf16.msra.mxu1 %v9782_v13  ;;  %v9868_v12 = vld [vmem:[#allocation8 + $0x3ec] ss:$16 sps:$4 sm:$0xff]   ;;  %v2839_v13 = vld [vmem:[#allocation11] sm:$0xff] }
 0x264   :  { %2712 = vmatprep.subr.bf16.mxu0 %v9787_v14  ;;  %2794 = vmatprep.subr.bf16.mxu1 %v9790_v15  ;;  %v2847_v14 = vld [vmem:[#allocation11 + $0x40] sm:$0xff]  ;;  %v2840_v15 = vld [vmem:[#allocation11 + $0x8] sm:$0xff] }
 0x267   :  { %2713 = vmatpush1.bf16.msra.mxu0 %v9785_v16  ;;  %2795 = vmatpush1.bf16.msra.mxu1 %v9788_v17  ;;  %v2848_v16 = vld [vmem:[#allocation11 + $0x48] sm:$0xff]  ;;  %v9866_v17 = vld [vmem:[#allocation8 + $0x3e8] ss:$16 sps:$4 sm:$0xff]  }
 0x268   :  { %2714 = vmatprep.subr.bf16.mxu0 %v9793_v18  ;;  %2796 = vmatprep.subr.bf16.mxu1 %v9796_v19  ;;  %v1871_v18 = vmax.f32 %v9232_v9, 0.0  ;;  %v8414_v19 = vcombine.high %v2839_v13, %v2847_v14 }
 0x26b   :  { %2715 = vmatpush1.bf16.msra.mxu0 %v9791_v20  ;;  %2797 = vmatpush1.bf16.msra.mxu1 %v9794_v21  ;;  %v8416_v20 = vcombine.high %v2840_v15, %v2848_v16  ;;  %v2855_v21 = vld [vmem:[#allocation11 + $0x80] sm:$0xff] }
 0x26c   :  { %2716 = vmatprep.subr.bf16.mxu0 %v9799_v22  ;;  %2798 = vmatprep.subr.bf16.mxu1 %v9802_v11  ;;  %v2863_v22 = vld [vmem:[#allocation11 + $0xc0] sm:$0xff]  ;;  %v2864_v11 = vld [vmem:[#allocation11 + $0xc8] sm:$0xff] }
 0x26f   :  { %2717 = vmatpush1.bf16.msra.mxu0 %v9797_v23  ;;  %2799 = vmatpush1.bf16.msra.mxu1 %v9800_v24  ;;  %v8413_v23 = vcombine.low %v2839_v13, %v2847_v14  ;;  %v8415_v24 = vcombine.low %v2840_v15, %v2848_v16  ;;  %v2959_v13 = vld [vmem:[#allocation11 + $0x3c0] sm:$0xff]  ;;  %v2952_v14 = vld [vmem:[#allocation11 + $0x388] sm:$0xff] }
 0x270   :  { %2718 = vmatprep.subr.bf16.mxu0 %v9805_v25  ;;  %2800 = vmatprep.subr.bf16.mxu1 %v9808_v26  ;;  %v1875_v25 = vpack.c.bf16 %v1871_v18, %v1871_v18  ;;  %v8430_v26 = vcombine.high %v2855_v21, %v2863_v22  ;;  %v2960_v15 = vld [vmem:[#allocation11 + $0x3c8] sm:$0xff] }
 0x271   :  { %v8528_v18 = vcombine.high %v2952_v14, %v2960_v15 }
 0x273   :  { %2719 = vmatpush1.bf16.msra.mxu0 %v9803_v27  ;;  %2801 = vmatpush1.bf16.msra.mxu1 %v9806_v28  ;;  %v8432_v27 = vcombine.high %v2856_v55, %v2864_v11  ;;  %v2871_v28 = vld [vmem:[#allocation11 + $0x100] sm:$0xff] }
 0x274   :  { %2720 = vmatprep.subr.bf16.mxu0 %v9811_v29  ;;  %2802 = vmatprep.subr.bf16.mxu1 %v9814_v30  ;;  %v2879_v29 = vld [vmem:[#allocation11 + $0x140] sm:$0xff]  ;;  %v2872_v30 = vld [vmem:[#allocation11 + $0x108] sm:$0xff] }
 0x277   :  { %2721 = vmatpush1.bf16.msra.mxu0 %v9809_v31  ;;  %2803 = vmatpush1.bf16.msra.mxu1 %v9812_v32  ;;  %v2880_v31 = vld [vmem:[#allocation11 + $0x148] sm:$0xff]  ;;  %v8429_v32 = vcombine.low %v2855_v21, %v2863_v22 }
 0x278   :  { %2722 = vmatprep.subr.bf16.mxu0 %v9817_v33  ;;  %2804 = vmatprep.subr.bf16.mxu1 %v9820_v34  ;;  %v8431_v33 = vcombine.low %v2856_v55, %v2864_v11  ;;  %v8446_v34 = vcombine.high %v2871_v28, %v2879_v29  ;;  %v2968_v21 = vld [vmem:[#allocation11 + $0x408] sm:$0xff]  ;;  %v8527_v11 = vcombine.low %v2952_v14, %v2960_v15 }
 0x279   :  { %v2976_v22 = vld [vmem:[#allocation11 + $0x448] sm:$0xff] }
 0x27a   :  { %v3072_v15 = vld [vmem:[#allocation11 + $0x748] sm:$0xff] }
 0x27b   :  { %2723 = vmatpush1.bf16.msra.mxu0 %v9815_v35  ;;  %2805 = vmatpush1.bf16.msra.mxu1 %v9818_v36  ;;  %v8448_v35 = vcombine.high %v2872_v30, %v2880_v31  ;;  %v2887_v36 = vld [vmem:[#allocation11 + $0x180] sm:$0xff] }
 0x27c   :  { %2724 = vmatprep.subr.bf16.mxu0 %v9823_v37  ;;  %2806 = vmatprep.subr.bf16.mxu1 %v9826_v38  ;;  %v2895_v37 = vld [vmem:[#allocation11 + $0x1c0] sm:$0xff]  ;;  %v2888_v38 = vld [vmem:[#allocation11 + $0x188] sm:$0xff] }
 0x27f   :  { %2725 = vmatpush1.bf16.msra.mxu0 %v9821_v39  ;;  %2807 = vmatpush1.bf16.msra.mxu1 %v9824_v40  ;;  %v2896_v39 = vld [vmem:[#allocation11 + $0x1c8] sm:$0xff]  ;;  %v8445_v40 = vcombine.low %v2871_v28, %v2879_v29 }
 0x280   :  { %2726 = vmatprep.subr.bf16.mxu0 %v9829_v41  ;;  %2808 = vmatprep.subr.bf16.mxu1 %v9832_v42  ;;  %v8447_v41 = vcombine.low %v2872_v30, %v2880_v31  ;;  %v8462_v42 = vcombine.high %v2887_v36, %v2895_v37  ;;  %v2992_v28 = vld [vmem:[#allocation11 + $0x4c8] sm:$0xff]  ;;  %v8543_v30 = vcombine.low %v2968_v21, %v2976_v22 }
 0x283   :  { %2727 = vmatpush1.bf16.msra.mxu0 %v9827_v43  ;;  %2809 = vmatpush1.bf16.msra.mxu1 %v9830_v44  ;;  %v8464_v43 = vcombine.high %v2888_v38, %v2896_v39  ;;  %v2903_v44 = vld [vmem:[#allocation11 + $0x200] sm:$0xff] }
 0x284   :  { %2728 = vmatprep.subr.bf16.mxu0 %v9835_v45  ;;  %2810 = vmatprep.subr.bf16.mxu1 %v9838_v51  ;;  %v2911_v45 = vld [vmem:[#allocation11 + $0x240] sm:$0xff]  ;;  %v2904_v51 = vld [vmem:[#allocation11 + $0x208] sm:$0xff] }
 0x287   :  { %2729 = vmatpush1.bf16.msra.mxu0 %v9833_v52  ;;  %2811 = vmatpush1.bf16.msra.mxu1 %v9836_v53  ;;  %v2912_v52 = vld [vmem:[#allocation11 + $0x248] sm:$0xff]  ;;  %v8461_v53 = vcombine.low %v2887_v36, %v2895_v37 }
 0x288   :  { %2730 = vmatprep.subr.bf16.mxu0 %v9841_v54  ;;  %2812 = vmatprep.subr.bf16.mxu1 %v9844_v56  ;;  %v8463_v54 = vcombine.low %v2888_v38, %v2896_v39  ;;  %v8478_v56 = vcombine.high %v2903_v44, %v2911_v45  ;;  %v3008_v36 = vld [vmem:[#allocation11 + $0x548] sm:$0xff] }
 0x28b   :  { %2731 = vmatpush1.bf16.msra.mxu0 %v9839_v57  ;;  %2813 = vmatpush1.bf16.msra.mxu1 %v9842_v58  ;;  %v8480_v57 = vcombine.high %v2904_v51, %v2912_v52  ;;  %v2919_v58 = vld [vmem:[#allocation11 + $0x280] sm:$0xff] }
 0x28c   :  { %2732 = vmatprep.subr.bf16.mxu0 %v9847_v59  ;;  %2814 = vmatprep.subr.bf16.mxu1 %v9850_v60  ;;  %v2927_v59 = vld [vmem:[#allocation11 + $0x2c0] sm:$0xff]  ;;  %v2920_v60 = vld [vmem:[#allocation11 + $0x288] sm:$0xff] }
 0x28f   :  { %2733 = vmatpush1.bf16.msra.mxu0 %v9845_v61  ;;  %2815 = vmatpush1.bf16.msra.mxu1 %v9848_v62  ;;  %v2928_v61 = vld [vmem:[#allocation11 + $0x2c8] sm:$0xff]  ;;  %v8477_v62 = vcombine.low %v2903_v44, %v2911_v45 }
 0x290   :  { %2734 = vmatprep.subr.bf16.mxu0 %v9853_v0  ;;  %2816 = vmatprep.subr.bf16.mxu1 %v9856_v1  ;;  %v8479_v0 = vcombine.low %v2904_v51, %v2912_v52  ;;  %v8494_v1 = vcombine.high %v2919_v58, %v2927_v59  ;;  %v3024_v44 = vld [vmem:[#allocation11 + $0x5c8] sm:$0xff] }
 0x293   :  { %2735 = vmatpush1.bf16.msra.mxu0 %v9851_v2  ;;  %2817 = vmatpush1.bf16.msra.mxu1 %v9854_v3  ;;  %v8496_v2 = vcombine.high %v2920_v60, %v2928_v61  ;;  %v2935_v3 = vld [vmem:[#allocation11 + $0x300] sm:$0xff] }
 0x294   :  { %2736 = vmatprep.subr.bf16.mxu0 %v9859_v5  ;;  %2818 = vmatprep.subr.bf16.mxu1 %v9862_v6  ;;  %v2936_v5 = vld [vmem:[#allocation11 + $0x308] sm:$0xff]  ;;  %v8510_v9 = vcombine.high %v2935_v3, %v2943_v4  ;;  %v8509_v16 = vcombine.low %v2935_v3, %v2943_v4 }
 0x295   :  { %v2944_v6 = vld [vmem:[#allocation11 + $0x348] sm:$0xff] }
 0x296   :  { %v3056_v3 = vld [vmem:[#allocation11 + $0x6c8] sm:$0xff] }
 0x297   :  { %2737 = vmatpush1.bf16.msra.mxu0 %v9857_v7  ;;  %2819 = vmatpush1.bf16.msra.mxu1 %v9860_v8  ;;  %v8493_v7 = vcombine.low %v2919_v58, %v2927_v59  ;;  %v8495_v8 = vcombine.low %v2920_v60, %v2928_v61  ;;  %v3040_v58 = vld [vmem:[#allocation11 + $0x648] sm:$0xff] }
 0x298   :  { %2738 = vmatprep.subr.bf16.mxu0 %v9865_v10  ;;  %2820 = vmatprep.subr.bf16.mxu1 %v9868_v12  ;;  %v8512_v10 = vcombine.high %v2936_v5, %v2944_v6  ;;  %v2951_v12 = vld [vmem:[#allocation11 + $0x380] sm:$0xff] }
 0x299   :  { %v8525_v55 = vcombine.low %v2951_v12, %v2959_v13 }
 0x29b   :  { %2739 = vmatpush1.bf16.msra.mxu0 %v9863_v48  ;;  %2821 = vmatpush1.bf16.msra.mxu1 %v9866_v17  ;;  %v8511_v48 = vcombine.low %v2936_v5, %v2944_v6  ;;  %v8526_v17 = vcombine.high %v2951_v12, %v2959_v13  ;;  %v3071_v12 = vld [vmem:[#allocation11 + $0x740] sm:$0xff]  ;;  %v3064_v13 = vld [vmem:[#allocation11 + $0x708] sm:$0xff] }
 0x29c   :  { %5995 = vmatprep.subr.bf16.mxu0 %v8414_v19  ;;  %6077 = vmatprep.subr.bf16.mxu1 %v8416_v20  ;;  %v2967_v19 = vld [vmem:[#allocation11 + $0x400] sm:$0xff] }
 0x29d   :  { %v2975_v20 = vld [vmem:[#allocation11 + $0x440] sm:$0xff] }
 0x29e   :  { %2741 = vmatmul.mubr.bf16.vlgmr.msra.gmra.mrb[4].mxu0 %v1875_v25  ;;  %2823 = vmatmul.mubr.bf16.vlgmr.msra.gmra.mrb[4].mxu1 %v1875_v25  ;;  %v2983_v25 = vld [vmem:[#allocation11 + $0x480] sm:$0xff]  ;;  %v8541_v29 = vcombine.low %v2967_v19, %v2975_v20 }
 0x29f   :  { %5996 = vmatpush1.bf16.msra.mxu0 %v8413_v23  ;;  %6078 = vmatpush1.bf16.msra.mxu1 %v8415_v24  ;;  %v8542_v23 = vcombine.high %v2967_v19, %v2975_v20  ;;  %v8544_v24 = vcombine.high %v2968_v21, %v2976_v22  ;;  %v3087_v19 = vld [vmem:[#allocation11 + $0x7c0] sm:$0xff]  ;;  %v3080_v20 = vld [vmem:[#allocation11 + $0x788] sm:$0xff] }
 0x2a0   :  { %5997 = vmatprep.subr.bf16.mxu0 %v8430_v26  ;;  %6079 = vmatprep.subr.bf16.mxu1 %v8432_v27  ;;  %v2991_v26 = vld [vmem:[#allocation11 + $0x4c0] sm:$0xff]  ;;  %v2984_v27 = vld [vmem:[#allocation11 + $0x488] sm:$0xff] }
 0x2a1   :  { %v8558_v31 = vcombine.high %v2983_v25, %v2991_v26  ;;  %v8557_v37 = vcombine.low %v2983_v25, %v2991_v26  ;;  %v8559_v38 = vcombine.low %v2984_v27, %v2992_v28  ;;  %v3088_v22 = vld [vmem:[#allocation11 + $0x7c8] sm:$0xff]  ;;  %v3103_v25 = vld [vmem:[#allocation11 + $0x840] sm:$0xff] }
 0x2a2   :  { %v3096_v26 = vld [vmem:[#allocation11 + $0x808] sm:$0xff] }
 0x2a3   :  { %5998 = vmatpush1.bf16.msra.mxu0 %v8429_v32  ;;  %6080 = vmatpush1.bf16.msra.mxu1 %v8431_v33  ;;  %v8560_v32 = vcombine.high %v2984_v27, %v2992_v28  ;;  %v2999_v33 = vld [vmem:[#allocation11 + $0x500] sm:$0xff]  ;;  %v3104_v28 = vld [vmem:[#allocation11 + $0x848] sm:$0xff] }
 0x2a4   :  { %5999 = vmatprep.subr.bf16.mxu0 %v8446_v34  ;;  %6081 = vmatprep.subr.bf16.mxu1 %v8448_v35  ;;  %v3007_v34 = vld [vmem:[#allocation11 + $0x540] sm:$0xff]  ;;  %v3000_v35 = vld [vmem:[#allocation11 + $0x508] sm:$0xff] }
 0x2a5   :  { %v8574_v39 = vcombine.high %v2999_v33, %v3007_v34  ;;  %v8573_v45 = vcombine.low %v2999_v33, %v3007_v34  ;;  %v8575_v51 = vcombine.low %v3000_v35, %v3008_v36 }
 0x2a7   :  { %6000 = vmatpush1.bf16.msra.mxu0 %v8445_v40  ;;  %6082 = vmatpush1.bf16.msra.mxu1 %v8447_v41  ;;  %v8576_v40 = vcombine.high %v3000_v35, %v3008_v36  ;;  %v3015_v41 = vld [vmem:[#allocation11 + $0x580] sm:$0xff] }
 0x2a8   :  { %6001 = vmatprep.subr.bf16.mxu0 %v8462_v42  ;;  %6083 = vmatprep.subr.bf16.mxu1 %v8464_v43  ;;  %v3023_v42 = vld [vmem:[#allocation11 + $0x5c0] sm:$0xff]  ;;  %v3016_v43 = vld [vmem:[#allocation11 + $0x588] sm:$0xff] }
 0x2a9   :  { %v8590_v52 = vcombine.high %v3015_v41, %v3023_v42  ;;  %v8589_v59 = vcombine.low %v3015_v41, %v3023_v42  ;;  %v8591_v60 = vcombine.low %v3016_v43, %v3024_v44 }
 0x2ab   :  { %6002 = vmatpush1.bf16.msra.mxu0 %v8461_v53  ;;  %6084 = vmatpush1.bf16.msra.mxu1 %v8463_v54  ;;  %v8592_v53 = vcombine.high %v3016_v43, %v3024_v44  ;;  %v3031_v54 = vld [vmem:[#allocation11 + $0x600] sm:$0xff] }
 0x2ac   :  { %6003 = vmatprep.subr.bf16.mxu0 %v8478_v56  ;;  %6085 = vmatprep.subr.bf16.mxu1 %v8480_v57  ;;  %v3039_v56 = vld [vmem:[#allocation11 + $0x640] sm:$0xff]  ;;  %v3032_v57 = vld [vmem:[#allocation11 + $0x608] sm:$0xff] }
 0x2ad   :  { %v8606_v61 = vcombine.high %v3031_v54, %v3039_v56  ;;  %v8605_v4 = vcombine.low %v3031_v54, %v3039_v56  ;;  %v8607_v5 = vcombine.low %v3032_v57, %v3040_v58  ;;  %v3111_v54 = vld [vmem:[#allocation11 + $0x880] sm:$0xff] }
 0x2af   :  { %6004 = vmatpush1.bf16.msra.mxu0 %v8477_v62  ;;  %6086 = vmatpush1.bf16.msra.mxu1 %v8479_v0  ;;  %v8608_v62 = vcombine.high %v3032_v57, %v3040_v58  ;;  %v3047_v0 = vld [vmem:[#allocation11 + $0x680] sm:$0xff]  ;;  %v3112_v58 = vld [vmem:[#allocation11 + $0x888] sm:$0xff] }
 0x2b0   :  { %6005 = vmatprep.subr.bf16.mxu0 %v8494_v1  ;;  %6087 = vmatprep.subr.bf16.mxu1 %v8496_v2  ;;  %v3055_v1 = vld [vmem:[#allocation11 + $0x6c0] sm:$0xff]  ;;  %v3048_v2 = vld [vmem:[#allocation11 + $0x688] sm:$0xff] }
 0x2b1   :  { %v8622_v6 = vcombine.high %v3047_v0, %v3055_v1  ;;  %v3119_v57 = vld [vmem:[#allocation11 + $0x8c0] sm:$0xff] }
 0x2b3   :  { %6006 = vmatpush1.bf16.msra.mxu0 %v8493_v7  ;;  %6088 = vmatpush1.bf16.msra.mxu1 %v8495_v8  ;;  %v8624_v7 = vcombine.high %v3048_v2, %v3056_v3  ;;  %v8621_v8 = vcombine.low %v3047_v0, %v3055_v1  ;;  %v8686_v0 = vcombine.high %v3111_v54, %v3119_v57 }
 0x2b4   :  { %6007 = vmatprep.subr.bf16.mxu0 %v8510_v9  ;;  %6089 = vmatprep.subr.bf16.mxu1 %v8512_v10  ;;  %v8623_v9 = vcombine.low %v3048_v2, %v3056_v3  ;;  %v3063_v10 = vld [vmem:[#allocation11 + $0x700] sm:$0xff]  ;;  %v3128_v3 = vld [vmem:[#allocation11 + $0x908] sm:$0xff] }
 0x2b5   :  { %v8638_v14 = vcombine.high %v3063_v10, %v3071_v12  ;;  %v3135_v2 = vld [vmem:[#allocation11 + $0x940] sm:$0xff] }
 0x2b7   :  { %6008 = vmatpush1.bf16.msra.mxu0 %v8509_v16  ;;  %6090 = vmatpush1.bf16.msra.mxu1 %v8511_v48  ;;  %v8637_v16 = vcombine.low %v3063_v10, %v3071_v12  ;;  %v8639_v48 = vcombine.low %v3064_v13, %v3072_v15  ;;  %v3143_v10 = vld [vmem:[#allocation11 + $0x980] sm:$0xff] }
 0x2b8   :  { %6009 = vmatprep.subr.bf16.mxu0 %v8526_v17  ;;  %6091 = vmatprep.subr.bf16.mxu1 %v8528_v18  ;;  %v8640_v17 = vcombine.high %v3064_v13, %v3072_v15  ;;  %v3079_v18 = vld [vmem:[#allocation11 + $0x780] sm:$0xff]  ;;  %v3144_v13 = vld [vmem:[#allocation11 + $0x988] sm:$0xff] }
 0x2b9   :  { %v8654_v21 = vcombine.high %v3079_v18, %v3087_v19  ;;  %v3151_v12 = vld [vmem:[#allocation11 + $0x9c0] sm:$0xff] }
 0x2bb   :  { %6010 = vmatpush1.bf16.msra.mxu0 %v8525_v55  ;;  %6092 = vmatpush1.bf16.msra.mxu1 %v8527_v11  ;;  %v8653_v55 = vcombine.low %v3079_v18, %v3087_v19  ;;  %v8655_v11 = vcombine.low %v3080_v20, %v3088_v22  ;;  %v3159_v18 = vld [vmem:[#allocation11 + $0xa00] sm:$0xff] }
 0x2bc   :  { %6011 = vmatprep.subr.bf16.mxu0 %v8542_v23  ;;  %6093 = vmatprep.subr.bf16.mxu1 %v8544_v24  ;;  %v8656_v23 = vcombine.high %v3080_v20, %v3088_v22  ;;  %v3095_v24 = vld [vmem:[#allocation11 + $0x800] sm:$0xff]  ;;  %v3160_v20 = vld [vmem:[#allocation11 + $0xa08] sm:$0xff]  ;;  %v8717_v22 = vcombine.low %v3143_v10, %v3151_v12 }
 0x2bd   :  { %v8670_v27 = vcombine.high %v3095_v24, %v3103_v25  ;;  %v3167_v19 = vld [vmem:[#allocation11 + $0xa40] sm:$0xff] }
 0x2bf   :  { %6012 = vmatpush1.bf16.msra.mxu0 %v8541_v29  ;;  %6094 = vmatpush1.bf16.msra.mxu1 %v8543_v30  ;;  %v8669_v29 = vcombine.low %v3095_v24, %v3103_v25  ;;  %v8671_v30 = vcombine.low %v3096_v26, %v3104_v28  ;;  %v3175_v24 = vld [vmem:[#allocation11 + $0xa80] sm:$0xff] }
 0x2c0   :  { %6013 = vmatprep.subr.bf16.mxu0 %v8558_v31  ;;  %6095 = vmatprep.subr.bf16.mxu1 %v8560_v32  ;;  %v8672_v31 = vcombine.high %v3096_v26, %v3104_v28  ;;  %v10442_v32 = vld [vmem:[#allocation10] sm:$0xf]  ;;  %v3183_v25 = vld [vmem:[#allocation11 + $0xac0] sm:$0xff]  ;;  %v3176_v26 = vld [vmem:[#allocation11 + $0xa88] sm:$0xff]  ;;  %v8733_v28 = vcombine.low %v3159_v18, %v3167_v19 }
 0x2c1   :  { %v2010_v33 = vrot.slane %v10442_v32, %v10418_v47  ;;  %v2014_v34 = vrot.slane %v10442_v32, %v10423_v49  ;;  %v2022_v35 = vrot.slane %v10442_v32, %v10426_v50 }
 0x2c3   :  { %6014 = vmatpush1.bf16.msra.mxu0 %v8557_v37  ;;  %6096 = vmatpush1.bf16.msra.mxu1 %v8559_v38 }
 0x2c4   :  { %6015 = vmatprep.subr.bf16.mxu0 %v8574_v39  ;;  %6097 = vmatprep.subr.bf16.mxu1 %v8576_v40 }
 0x2c7   :  { %6016 = vmatpush1.bf16.msra.mxu0 %v8573_v45  ;;  %6098 = vmatpush1.bf16.msra.mxu1 %v8575_v51 }
 0x2c8   :  { %6017 = vmatprep.subr.bf16.mxu0 %v8590_v52  ;;  %6099 = vmatprep.subr.bf16.mxu1 %v8592_v53 }
 0x2cb   :  { %6018 = vmatpush1.bf16.msra.mxu0 %v8589_v59  ;;  %6100 = vmatpush1.bf16.msra.mxu1 %v8591_v60  ;;  %v3120_v59 = vld [vmem:[#allocation11 + $0x8c8] sm:$0xff] }
 0x2cc   :  { %6019 = vmatprep.subr.bf16.mxu0 %v8606_v61  ;;  %6101 = vmatprep.subr.bf16.mxu1 %v8608_v62  ;;  %v3127_v62 = vld [vmem:[#allocation11 + $0x900] sm:$0xff]  ;;  %v8688_v1 = vcombine.high %v3112_v58, %v3120_v59 }
 0x2cd   :  { %v8701_v15 = vcombine.low %v3127_v62, %v3135_v2 }
 0x2cf   :  { %6020 = vmatpush1.bf16.msra.mxu0 %v8605_v4  ;;  %6102 = vmatpush1.bf16.msra.mxu1 %v8607_v5  ;;  %v3136_v4 = vld [vmem:[#allocation11 + $0x948] sm:$0xff] }
 0x2d0   :  { %6021 = vmatprep.subr.bf16.mxu0 %v8622_v6  ;;  %6103 = vmatprep.subr.bf16.mxu1 %v8624_v7  ;;  %v8685_v6 = vcombine.low %v3111_v54, %v3119_v57  ;;  %v8687_v7 = vcombine.low %v3112_v58, %v3120_v59  ;;  %v3231_v57 = vld [vmem:[#allocation11 + $0xc40] sm:$0xff]  ;;  %v3224_v58 = vld [vmem:[#allocation11 + $0xc08] sm:$0xff] }
 0x2d1   :  { %v3232_v59 = vld [vmem:[#allocation11 + $0xc48] sm:$0xff] }
 0x2d3   :  { %6022 = vmatpush1.bf16.msra.mxu0 %v8621_v8  ;;  %6104 = vmatpush1.bf16.msra.mxu1 %v8623_v9  ;;  %v8702_v8 = vcombine.high %v3127_v62, %v3135_v2  ;;  %v8704_v9 = vcombine.high %v3128_v3, %v3136_v4  ;;  %v8800_v2 = vcombine.high %v3224_v58, %v3232_v59 }
 0x2d4   :  { %6023 = vmatprep.subr.bf16.mxu0 %v8638_v14  ;;  %6105 = vmatprep.subr.bf16.mxu1 %v8640_v17  ;;  %v3152_v14 = vld [vmem:[#allocation11 + $0x9c8] sm:$0xff] }
 0x2d5   :  { %v8720_v17 = vcombine.high %v3144_v13, %v3152_v14 }
 0x2d7   :  { %6024 = vmatpush1.bf16.msra.mxu0 %v8637_v16  ;;  %6106 = vmatpush1.bf16.msra.mxu1 %v8639_v48  ;;  %v8703_v16 = vcombine.low %v3128_v3, %v3136_v4  ;;  %v8718_v48 = vcombine.high %v3143_v10, %v3151_v12  ;;  %v3239_v3 = vld [vmem:[#allocation11 + $0xc80] sm:$0xff] }
 0x2d8   :  { %6025 = vmatprep.subr.bf16.mxu0 %v8654_v21  ;;  %6107 = vmatprep.subr.bf16.mxu1 %v8656_v23  ;;  %v3168_v21 = vld [vmem:[#allocation11 + $0xa48] sm:$0xff]  ;;  %v3247_v4 = vld [vmem:[#allocation11 + $0xcc0] sm:$0xff] }
 0x2d9   :  { %v8736_v23 = vcombine.high %v3160_v20, %v3168_v21  ;;  %v8814_v10 = vcombine.high %v3239_v3, %v3247_v4 }
 0x2db   :  { %6026 = vmatpush1.bf16.msra.mxu0 %v8653_v55  ;;  %6108 = vmatpush1.bf16.msra.mxu1 %v8655_v11  ;;  %v8719_v55 = vcombine.low %v3144_v13, %v3152_v14  ;;  %v8734_v11 = vcombine.high %v3159_v18, %v3167_v19  ;;  %v3255_v13 = vld [vmem:[#allocation11 + $0xd00] sm:$0xff] }
 0x2dc   :  { %6036 = vmatprep.subr.bf16.mxu0 %v8670_v27  ;;  %6118 = vmatprep.subr.bf16.mxu1 %v8672_v31  ;;  %v3184_v27 = vld [vmem:[#allocation11 + $0xac8] sm:$0xff]  ;;  %v3263_v14 = vld [vmem:[#allocation11 + $0xd40] sm:$0xff] }
 0x2dd   :  { %v8752_v31 = vcombine.high %v3176_v26, %v3184_v27  ;;  %v8830_v18 = vcombine.high %v3255_v13, %v3263_v14 }
 0x371   :  { %v2742_v36 = vpop.f32.mrb[4].mxu0  ;;  %v10450_v37 = vpop.f32.mrb[4].mxu1 }
 0x372   :  { %v9234_v38 = vadd.f32 %v2742_v36, %v2010_v33  ;;  %v2744_v39 = vpop.f32.mrb[5].mxu0  ;;  %v2826_v40 = vpop.f32.mrb[5].mxu1  ;;  %v3191_v33 = vld [vmem:[#allocation11 + $0xb00] sm:$0xff]  ;;  %v3200_v36 = vld [vmem:[#allocation11 + $0xb48] sm:$0xff] }
 0x373   :  { %v9235_v41 = vadd.f32 %v2744_v39, %v2014_v34  ;;  %v9237_v42 = vadd.f32 %v2826_v40, %v2022_v35  ;;  %v2746_v43 = vpop.f32.mrb[6].mxu0  ;;  %v2828_v44 = vpop.f32.mrb[6].mxu1  ;;  %v3199_v34 = vld [vmem:[#allocation11 + $0xb40] sm:$0xff]  ;;  %v3192_v35 = vld [vmem:[#allocation11 + $0xb08] sm:$0xff]  ;;  %v8751_v39 = vcombine.low %v3176_v26, %v3184_v27 }
 0x374   :  { %v2831_v45 = vmax.f32 %v9234_v38, 0.0  ;;  %v2747_v51 = vpop.f32.mrb[7].mxu0  ;;  %v2829_v52 = vpop.f32.mrb[7].mxu1  ;;  %v8749_v38 = vcombine.low %v3175_v24, %v3183_v25  ;;  %v8766_v40 = vcombine.high %v3191_v33, %v3199_v34  ;;  %v3215_v43 = vld [vmem:[#allocation11 + $0xbc0] sm:$0xff]  ;;  %v3208_v44 = vld [vmem:[#allocation11 + $0xb88] sm:$0xff] }
 0x375   :  { %v2832_v53 = vmax.f32 %v9235_v41, 0.0  ;;  %v2834_v56 = vmax.f32 %v9237_v42, 0.0  ;;  %v8768_v41 = vcombine.high %v3192_v35, %v3200_v36  ;;  %v3207_v42 = vld [vmem:[#allocation11 + $0xb80] sm:$0xff]  ;;  %v8765_v51 = vcombine.low %v3191_v33, %v3199_v34 }
 0x376   :  { %v10454_v61 = vpack.c.bf16 %v2831_v45, %v2831_v45  ;;  %v3216_v45 = vld [vmem:[#allocation11 + $0xbc8] sm:$0xff]  ;;  %v8767_v52 = vcombine.low %v3192_v35, %v3200_v36  ;;  %v8781_v62 = vcombine.low %v3207_v42, %v3215_v43  ;;  %v3287_v26 = vld [vmem:[#allocation11 + $0xe00] sm:$0xff] }
 0x377   :  { %v10452_v60 = vpack.c.bf16 %v2832_v53, %v2832_v53  ;;  %v10458_v5 = vpack.c.bf16 %v2834_v56, %v2834_v56  ;;  %v8782_v53 = vcombine.high %v3207_v42, %v3215_v43  ;;  %v8784_v54 = vcombine.high %v3208_v44, %v3216_v45  ;;  %v3223_v56 = vld [vmem:[#allocation11 + $0xc00] sm:$0xff] }
 0x378   :  { %v3295_v27 = vld [vmem:[#allocation11 + $0xe40] sm:$0xff] }
 0x379   :  { %6027 = vmatprep.mubr.bf16.mxu0 %v10452_v60  ;;  %6109 = vmatprep.mubr.bf16.mxu1 %v10452_v60  ;;  %v8862_v33 = vcombine.high %v3287_v26, %v3295_v27  ;;  %v3303_v35 = vld [vmem:[#allocation11 + $0xe80] sm:$0xff] }
 0x37a   :  { %6028 = vmatmul.mubr.bf16.vlgmr.msra.gmra.mrb[8].mxu0 %v10454_v61  ;;  %6110 = vmatmul.mubr.bf16.vlgmr.msra.gmra.mrb[8].mxu1 %v10454_v61  ;;  %v3311_v36 = vld [vmem:[#allocation11 + $0xec0] sm:$0xff] }
 0x37b   :  { %6037 = vmatpush1.bf16.msra.mxu0 %v8669_v29  ;;  %6119 = vmatpush1.bf16.msra.mxu1 %v8671_v30  ;;  %v8735_v29 = vcombine.low %v3160_v20, %v3168_v21  ;;  %v8750_v30 = vcombine.high %v3175_v24, %v3183_v25  ;;  %v3271_v20 = vld [vmem:[#allocation11 + $0xd80] sm:$0xff]  ;;  %v8878_v42 = vcombine.high %v3303_v35, %v3311_v36 }
 0x37c   :  { %6068 = vmatprep.mubr.bf16.mxu0 %v10458_v5  ;;  %6150 = vmatprep.mubr.bf16.mxu1 %v10458_v5  ;;  %v3279_v21 = vld [vmem:[#allocation11 + $0xdc0] sm:$0xff] }
 0x37d   :  { %6038 = vmatprep.subr.bf16.mxu0 %v8686_v0  ;;  %6120 = vmatprep.subr.bf16.mxu1 %v8688_v1  ;;  %v8783_v0 = vcombine.low %v3208_v44, %v3216_v45  ;;  %v8798_v1 = vcombine.high %v3223_v56, %v3231_v57  ;;  %v8846_v24 = vcombine.high %v3271_v20, %v3279_v21  ;;  %v3319_v44 = vld [vmem:[#allocation11 + $0xf00] sm:$0xff] }
 0x37e   :  { %v3327_v45 = vld [vmem:[#allocation11 + $0xf40] sm:$0xff] }
 0x37f   :  { %6039 = vmatpush1.bf16.msra.mxu0 %v8685_v6  ;;  %6121 = vmatpush1.bf16.msra.mxu1 %v8687_v7  ;;  %v3240_v6 = vld [vmem:[#allocation11 + $0xc88] sm:$0xff] }
 0x380   :  { %6040 = vmatprep.subr.bf16.mxu0 %v8702_v8  ;;  %6122 = vmatprep.subr.bf16.mxu1 %v8704_v9  ;;  %v3248_v7 = vld [vmem:[#allocation11 + $0xcc8] sm:$0xff]  ;;  %v8797_v8 = vcombine.low %v3223_v56, %v3231_v57  ;;  %v8799_v9 = vcombine.low %v3224_v58, %v3232_v59  ;;  %v2018_v56 = vrot.slane %v10442_v32, %v10437_v63  ;;  %v3335_v59 = vld [vmem:[#allocation11 + $0xf80] sm:$0xff]  ;;  %v2849_v32 = vld [vmem:[#allocation11 + $0x50] sm:$0xff] }
 0x381   :  { %v8816_v12 = vcombine.high %v3240_v6, %v3248_v7  ;;  %v8894_v57 = vcombine.high %v3319_v44, %v3327_v45 }
 0x383   :  { %6041 = vmatpush1.bf16.msra.mxu0 %v8701_v15  ;;  %6123 = vmatpush1.bf16.msra.mxu1 %v8703_v16  ;;  %v3256_v15 = vld [vmem:[#allocation11 + $0xd08] sm:$0xff] }
 0x384   :  { %6042 = vmatprep.subr.bf16.mxu0 %v8718_v48  ;;  %6124 = vmatprep.subr.bf16.mxu1 %v8720_v17  ;;  %v3264_v16 = vld [vmem:[#allocation11 + $0xd48] sm:$0xff]  ;;  %v8813_v48 = vcombine.low %v3239_v3, %v3247_v4  ;;  %v8815_v17 = vcombine.low %v3240_v6, %v3248_v7  ;;  %v9236_v4 = vadd.f32 %v10450_v37, %v2018_v56  ;;  %v2858_v37 = vld [vmem:[#allocation11 + $0x98] sm:$0xff] }
 0x385   :  { %v8832_v19 = vcombine.high %v3256_v15, %v3264_v16  ;;  %v2922_v56 = vld [vmem:[#allocation11 + $0x298] sm:$0xff] }
 0x387   :  { %6043 = vmatpush1.bf16.msra.mxu0 %v8717_v22  ;;  %6125 = vmatpush1.bf16.msra.mxu1 %v8719_v55  ;;  %v3272_v22 = vld [vmem:[#allocation11 + $0xd88] sm:$0xff] }
 0x388   :  { %6044 = vmatprep.subr.bf16.mxu0 %v8734_v11  ;;  %6126 = vmatprep.subr.bf16.mxu1 %v8736_v23  ;;  %v3280_v55 = vld [vmem:[#allocation11 + $0xdc8] sm:$0xff]  ;;  %v8829_v11 = vcombine.low %v3255_v13, %v3263_v14  ;;  %v8831_v23 = vcombine.low %v3256_v15, %v3264_v16  ;;  %v2833_v14 = vmax.f32 %v9236_v4, 0.0  ;;  %v2946_v4 = vld [vmem:[#allocation11 + $0x358] sm:$0xff] }
 0x389   :  { %v8848_v25 = vcombine.high %v3272_v22, %v3280_v55 }
 0x38b   :  { %6045 = vmatpush1.bf16.msra.mxu0 %v8733_v28  ;;  %6127 = vmatpush1.bf16.msra.mxu1 %v8735_v29  ;;  %v3288_v28 = vld [vmem:[#allocation11 + $0xe08] sm:$0xff] }
 0x38c   :  { %6046 = vmatprep.subr.bf16.mxu0 %v8750_v30  ;;  %6128 = vmatprep.subr.bf16.mxu1 %v8752_v31  ;;  %v3296_v29 = vld [vmem:[#allocation11 + $0xe48] sm:$0xff]  ;;  %v8845_v30 = vcombine.low %v3271_v20, %v3279_v21  ;;  %v8847_v31 = vcombine.low %v3272_v22, %v3280_v55  ;;  %v10467_v20 = vpack.c.bf16 %v2833_v14, %v2833_v14 }
 0x38d   :  { %v8864_v34 = vcombine.high %v3288_v28, %v3296_v29 }
 0x38f   :  { %6047 = vmatpush1.bf16.msra.mxu0 %v8749_v38  ;;  %6129 = vmatpush1.bf16.msra.mxu1 %v8751_v39  ;;  %v3304_v38 = vld [vmem:[#allocation11 + $0xe88] sm:$0xff] }
 0x390   :  { %6048 = vmatprep.subr.bf16.mxu0 %v8766_v40  ;;  %6130 = vmatprep.subr.bf16.mxu1 %v8768_v41  ;;  %v3312_v39 = vld [vmem:[#allocation11 + $0xec8] sm:$0xff]  ;;  %v8861_v40 = vcombine.low %v3287_v26, %v3295_v27  ;;  %v8863_v41 = vcombine.low %v3288_v28, %v3296_v29 }
 0x391   :  { %v8880_v43 = vcombine.high %v3304_v38, %v3312_v39 }
 0x393   :  { %6049 = vmatpush1.bf16.msra.mxu0 %v8765_v51  ;;  %6131 = vmatpush1.bf16.msra.mxu1 %v8767_v52  ;;  %v3320_v51 = vld [vmem:[#allocation11 + $0xf08] sm:$0xff] }
 0x394   :  { %6050 = vmatprep.subr.bf16.mxu0 %v8782_v53  ;;  %6132 = vmatprep.subr.bf16.mxu1 %v8784_v54  ;;  %v3328_v52 = vld [vmem:[#allocation11 + $0xf48] sm:$0xff]  ;;  %v8877_v53 = vcombine.low %v3303_v35, %v3311_v36  ;;  %v8879_v54 = vcombine.low %v3304_v38, %v3312_v39 }
 0x395   :  { %v8896_v58 = vcombine.high %v3320_v51, %v3328_v52  ;;  %v8895_v3 = vcombine.low %v3320_v51, %v3328_v52 }
 0x397   :  { %6051 = vmatpush1.bf16.msra.mxu0 %v8781_v62  ;;  %6133 = vmatpush1.bf16.msra.mxu1 %v8783_v0  ;;  %v3343_v62 = vld [vmem:[#allocation11 + $0xfc0] sm:$0xff]  ;;  %v3336_v0 = vld [vmem:[#allocation11 + $0xf88] sm:$0xff] }
 0x398   :  { %6052 = vmatprep.subr.bf16.mxu0 %v8798_v1  ;;  %6134 = vmatprep.subr.bf16.mxu1 %v8800_v2  ;;  %v3344_v1 = vld [vmem:[#allocation11 + $0xfc8] sm:$0xff]  ;;  %v8893_v2 = vcombine.low %v3319_v44, %v3327_v45  ;;  %v8910_v6 = vcombine.high %v3335_v59, %v3343_v62 }
 0x399   :  { %v8912_v7 = vcombine.high %v3336_v0, %v3344_v1  ;;  %v8911_v13 = vcombine.low %v3336_v0, %v3344_v1  ;;  %v2937_v1 = vld [vmem:[#allocation11 + $0x310] sm:$0xff] }
 0x39b   :  { %6053 = vmatpush1.bf16.msra.mxu0 %v8797_v8  ;;  %6135 = vmatpush1.bf16.msra.mxu1 %v8799_v9  ;;  %v2841_v8 = vld [vmem:[#allocation11 + $0x10] sm:$0xff]  ;;  %v2842_v9 = vld [vmem:[#allocation11 + $0x18] sm:$0xff] }
 0x39c   :  { %6054 = vmatprep.subr.bf16.mxu0 %v8814_v10  ;;  %6136 = vmatprep.subr.bf16.mxu1 %v8816_v12  ;;  %v2850_v10 = vld [vmem:[#allocation11 + $0x58] sm:$0xff]  ;;  %v8909_v12 = vcombine.low %v3335_v59, %v3343_v62  ;;  %v8418_v15 = vcombine.high %v2841_v8, %v2849_v32 }
 0x39d   :  { %v8420_v16 = vcombine.high %v2842_v9, %v2850_v10  ;;  %v8419_v21 = vcombine.low %v2842_v9, %v2850_v10  ;;  %v2953_v9 = vld [vmem:[#allocation11 + $0x390] sm:$0xff] }
 0x39e   :  { %v2961_v10 = vld [vmem:[#allocation11 + $0x3d0] sm:$0xff] }
 0x39f   :  { %6055 = vmatpush1.bf16.msra.mxu0 %v8813_v48  ;;  %6137 = vmatpush1.bf16.msra.mxu1 %v8815_v17  ;;  %v2857_v48 = vld [vmem:[#allocation11 + $0x90] sm:$0xff] }
 0x3a0   :  { %6056 = vmatprep.subr.bf16.mxu0 %v8830_v18  ;;  %6138 = vmatprep.subr.bf16.mxu1 %v8832_v19  ;;  %v2865_v17 = vld [vmem:[#allocation11 + $0xd0] sm:$0xff]  ;;  %v2866_v18 = vld [vmem:[#allocation11 + $0xd8] sm:$0xff]  ;;  %v8417_v19 = vcombine.low %v2841_v8, %v2849_v32 }
 0x3a1   :  { %v8434_v22 = vcombine.high %v2857_v48, %v2865_v17  ;;  %v8436_v55 = vcombine.high %v2858_v37, %v2866_v18  ;;  %v8433_v26 = vcombine.low %v2857_v48, %v2865_v17  ;;  %v8435_v27 = vcombine.low %v2858_v37, %v2866_v18  ;;  %v2969_v17 = vld [vmem:[#allocation11 + $0x410] sm:$0xff]  ;;  %v2970_v18 = vld [vmem:[#allocation11 + $0x418] sm:$0xff] }
 0x3a2   :  { %v2977_v37 = vld [vmem:[#allocation11 + $0x450] sm:$0xff] }
 0x3a3   :  { %6057 = vmatpush1.bf16.msra.mxu0 %v8829_v11  ;;  %6139 = vmatpush1.bf16.msra.mxu1 %v8831_v23  ;;  %v2873_v11 = vld [vmem:[#allocation11 + $0x110] sm:$0xff] }
 0x3a4   :  { %6058 = vmatprep.subr.bf16.mxu0 %v8846_v24  ;;  %6140 = vmatprep.subr.bf16.mxu1 %v8848_v25  ;;  %v2881_v23 = vld [vmem:[#allocation11 + $0x150] sm:$0xff]  ;;  %v2874_v24 = vld [vmem:[#allocation11 + $0x118] sm:$0xff] }
 0x3a5   :  { %v2882_v25 = vld [vmem:[#allocation11 + $0x158] sm:$0xff]  ;;  %v8450_v28 = vcombine.high %v2873_v11, %v2881_v23  ;;  %v8449_v35 = vcombine.low %v2873_v11, %v2881_v23  ;;  %v2985_v23 = vld [vmem:[#allocation11 + $0x490] sm:$0xff] }
 0x3a6   :  { %v8452_v29 = vcombine.high %v2874_v24, %v2882_v25  ;;  %v8451_v36 = vcombine.low %v2874_v24, %v2882_v25  ;;  %v2993_v24 = vld [vmem:[#allocation11 + $0x4d0] sm:$0xff]  ;;  %v2986_v25 = vld [vmem:[#allocation11 + $0x498] sm:$0xff] }
 0x3a7   :  { %6059 = vmatpush1.bf16.msra.mxu0 %v8845_v30  ;;  %6141 = vmatpush1.bf16.msra.mxu1 %v8847_v31  ;;  %v2889_v30 = vld [vmem:[#allocation11 + $0x190] sm:$0xff] }
 0x3a8   :  { %6060 = vmatprep.subr.bf16.mxu0 %v8862_v33  ;;  %6142 = vmatprep.subr.bf16.mxu1 %v8864_v34  ;;  %v2897_v31 = vld [vmem:[#allocation11 + $0x1d0] sm:$0xff]  ;;  %v2890_v33 = vld [vmem:[#allocation11 + $0x198] sm:$0xff] }
 0x3a9   :  { %v2898_v34 = vld [vmem:[#allocation11 + $0x1d8] sm:$0xff]  ;;  %v8466_v38 = vcombine.high %v2889_v30, %v2897_v31  ;;  %v8465_v44 = vcombine.low %v2889_v30, %v2897_v31  ;;  %v3001_v31 = vld [vmem:[#allocation11 + $0x510] sm:$0xff] }
 0x3aa   :  { %v8468_v39 = vcombine.high %v2890_v33, %v2898_v34  ;;  %v8467_v45 = vcombine.low %v2890_v33, %v2898_v34  ;;  %v3009_v33 = vld [vmem:[#allocation11 + $0x550] sm:$0xff]  ;;  %v3002_v34 = vld [vmem:[#allocation11 + $0x518] sm:$0xff] }
 0x3ab   :  { %6061 = vmatpush1.bf16.msra.mxu0 %v8861_v40  ;;  %6143 = vmatpush1.bf16.msra.mxu1 %v8863_v41  ;;  %v2905_v40 = vld [vmem:[#allocation11 + $0x210] sm:$0xff] }
 0x3ac   :  { %6062 = vmatprep.subr.bf16.mxu0 %v8878_v42  ;;  %6144 = vmatprep.subr.bf16.mxu1 %v8880_v43  ;;  %v2913_v41 = vld [vmem:[#allocation11 + $0x250] sm:$0xff]  ;;  %v2906_v42 = vld [vmem:[#allocation11 + $0x218] sm:$0xff] }
 0x3ad   :  { %v2914_v43 = vld [vmem:[#allocation11 + $0x258] sm:$0xff]  ;;  %v8482_v51 = vcombine.high %v2905_v40, %v2913_v41 }
 0x3ae   :  { %v8484_v52 = vcombine.high %v2906_v42, %v2914_v43  ;;  %v8483_v59 = vcombine.low %v2906_v42, %v2914_v43  ;;  %v3025_v42 = vld [vmem:[#allocation11 + $0x5d0] sm:$0xff]  ;;  %v3018_v43 = vld [vmem:[#allocation11 + $0x598] sm:$0xff] }
 0x3af   :  { %6063 = vmatpush1.bf16.msra.mxu0 %v8877_v53  ;;  %6145 = vmatpush1.bf16.msra.mxu1 %v8879_v54  ;;  %v2921_v53 = vld [vmem:[#allocation11 + $0x290] sm:$0xff] }
 0x3b0   :  { %6064 = vmatprep.subr.bf16.mxu0 %v8894_v57  ;;  %6146 = vmatprep.subr.bf16.mxu1 %v8896_v58  ;;  %v2929_v54 = vld [vmem:[#allocation11 + $0x2d0] sm:$0xff]  ;;  %v2930_v57 = vld [vmem:[#allocation11 + $0x2d8] sm:$0xff]  ;;  %v8481_v58 = vcombine.low %v2905_v40, %v2913_v41 }
 0x3b1   :  { %v8498_v62 = vcombine.high %v2921_v53, %v2929_v54  ;;  %v8500_v0 = vcombine.high %v2922_v56, %v2930_v57  ;;  %v3017_v41 = vld [vmem:[#allocation11 + $0x590] sm:$0xff] }
 0x3b3   :  { %6065 = vmatpush1.bf16.msra.mxu0 %v8893_v2  ;;  %6147 = vmatpush1.bf16.msra.mxu1 %v8895_v3  ;;  %v2945_v2 = vld [vmem:[#allocation11 + $0x350] sm:$0xff]  ;;  %v2938_v3 = vld [vmem:[#allocation11 + $0x318] sm:$0xff] }
 0x3b4   :  { %6066 = vmatprep.subr.bf16.mxu0 %v8910_v6  ;;  %6148 = vmatprep.subr.bf16.mxu1 %v8912_v7  ;;  %v8497_v6 = vcombine.low %v2921_v53, %v2929_v54  ;;  %v8499_v7 = vcombine.low %v2922_v56, %v2930_v57  ;;  %v8514_v8 = vcombine.high %v2937_v1, %v2945_v2  ;;  %v3033_v54 = vld [vmem:[#allocation11 + $0x610] sm:$0xff]  ;;  %v3034_v57 = vld [vmem:[#allocation11 + $0x618] sm:$0xff] }
 0x3b5   :  { %v8516_v32 = vcombine.high %v2938_v3, %v2946_v4  ;;  %v8513_v14 = vcombine.low %v2937_v1, %v2945_v2  ;;  %v3041_v56 = vld [vmem:[#allocation11 + $0x650] sm:$0xff] }
 0x3b6   :  { %v3049_v2 = vld [vmem:[#allocation11 + $0x690] sm:$0xff] }
 0x3b7   :  { %6067 = vmatpush1.bf16.msra.mxu0 %v8909_v12  ;;  %6149 = vmatpush1.bf16.msra.mxu1 %v8911_v13  ;;  %v2954_v12 = vld [vmem:[#allocation11 + $0x398] sm:$0xff] }
 0x3b8   :  { %6159 = vmatprep.subr.bf16.mxu0 %v8418_v15  ;;  %6241 = vmatprep.subr.bf16.mxu1 %v8420_v16  ;;  %v2962_v13 = vld [vmem:[#allocation11 + $0x3d8] sm:$0xff]  ;;  %v8515_v15 = vcombine.low %v2938_v3, %v2946_v4  ;;  %v8530_v16 = vcombine.high %v2953_v9, %v2961_v10  ;;  %v3057_v3 = vld [vmem:[#allocation11 + $0x6d0] sm:$0xff] }
 0x3b9   :  { %v8532_v48 = vcombine.high %v2954_v12, %v2962_v13  ;;  %v3050_v4 = vld [vmem:[#allocation11 + $0x698] sm:$0xff] }
 0x3ba   :  { %6069 = vmatmul.mubr.bf16.vlgmr.msra.gmra.mrb[8].mxu0 %v10467_v20  ;;  %6151 = vmatmul.mubr.bf16.vlgmr.msra.gmra.mrb[8].mxu1 %v10467_v20 }
 0x3bb   :  { %6160 = vmatpush1.bf16.msra.mxu0 %v8417_v19  ;;  %6191 = vmatprep.mubr.bf16.mxu0 %v10452_v60  ;;  %v2978_v19 = vld [vmem:[#allocation11 + $0x458] sm:$0xff] }
 0x3bc   :  { %6242 = vmatpush1.bf16.msra.mxu1 %v8419_v21  ;;  %6273 = vmatprep.mubr.bf16.mxu1 %v10452_v60  ;;  %v8529_v21 = vcombine.low %v2953_v9, %v2961_v10  ;;  %v8548_v11 = vcombine.high %v2970_v18, %v2978_v19  ;;  %v3065_v10 = vld [vmem:[#allocation11 + $0x710] sm:$0xff] }
 0x3bd   :  { %6161 = vmatprep.subr.bf16.mxu0 %v8434_v22  ;;  %6243 = vmatprep.subr.bf16.mxu1 %v8436_v55  ;;  %v8531_v22 = vcombine.low %v2954_v12, %v2962_v13  ;;  %v8546_v55 = vcombine.high %v2969_v17, %v2977_v37  ;;  %v3073_v12 = vld [vmem:[#allocation11 + $0x750] sm:$0xff]  ;;  %v3066_v13 = vld [vmem:[#allocation11 + $0x718] sm:$0xff] }
 0x3bf   :  { %6162 = vmatpush1.bf16.msra.mxu0 %v8433_v26  ;;  %v2994_v26 = vld [vmem:[#allocation11 + $0x4d8] sm:$0xff] }
 0x3c0   :  { %6244 = vmatpush1.bf16.msra.mxu1 %v8435_v27  ;;  %6163 = vmatprep.subr.bf16.mxu0 %v8450_v28  ;;  %v8545_v27 = vcombine.low %v2969_v17, %v2977_v37  ;;  %v8547_v28 = vcombine.low %v2970_v18, %v2978_v19  ;;  %v8564_v30 = vcombine.high %v2986_v25, %v2994_v26  ;;  %v3081_v37 = vld [vmem:[#allocation11 + $0x790] sm:$0xff]  ;;  %v3082_v19 = vld [vmem:[#allocation11 + $0x798] sm:$0xff] }
 0x3c1   :  { %6245 = vmatprep.subr.bf16.mxu1 %v8452_v29  ;;  %v8562_v29 = vcombine.high %v2985_v23, %v2993_v24  ;;  %v3089_v18 = vld [vmem:[#allocation11 + $0x7d0] sm:$0xff] }
 0x3c3   :  { %6164 = vmatpush1.bf16.msra.mxu0 %v8449_v35  ;;  %v3010_v35 = vld [vmem:[#allocation11 + $0x558] sm:$0xff] }
 0x3c4   :  { %6246 = vmatpush1.bf16.msra.mxu1 %v8451_v36  ;;  %6165 = vmatprep.subr.bf16.mxu0 %v8466_v38  ;;  %v8561_v36 = vcombine.low %v2985_v23, %v2993_v24  ;;  %v8563_v38 = vcombine.low %v2986_v25, %v2994_v26  ;;  %v8580_v40 = vcombine.high %v3002_v34, %v3010_v35  ;;  %v3097_v24 = vld [vmem:[#allocation11 + $0x810] sm:$0xff]  ;;  %v3098_v26 = vld [vmem:[#allocation11 + $0x818] sm:$0xff] }
 0x3c5   :  { %6247 = vmatprep.subr.bf16.mxu1 %v8468_v39  ;;  %v8578_v39 = vcombine.high %v3001_v31, %v3009_v33  ;;  %v3105_v25 = vld [vmem:[#allocation11 + $0x850] sm:$0xff] }
 0x3c7   :  { %6166 = vmatpush1.bf16.msra.mxu0 %v8465_v44  ;;  %v3026_v44 = vld [vmem:[#allocation11 + $0x5d8] sm:$0xff] }
 0x3c8   :  { %6248 = vmatpush1.bf16.msra.mxu1 %v8467_v45  ;;  %6167 = vmatprep.subr.bf16.mxu0 %v8482_v51  ;;  %v8577_v45 = vcombine.low %v3001_v31, %v3009_v33  ;;  %v8579_v51 = vcombine.low %v3002_v34, %v3010_v35  ;;  %v8596_v53 = vcombine.high %v3018_v43, %v3026_v44  ;;  %v3113_v33 = vld [vmem:[#allocation11 + $0x890] sm:$0xff] }
 0x3c9   :  { %6249 = vmatprep.subr.bf16.mxu1 %v8484_v52  ;;  %v8594_v52 = vcombine.high %v3017_v41, %v3025_v42  ;;  %v3121_v34 = vld [vmem:[#allocation11 + $0x8d0] sm:$0xff]  ;;  %v8673_v35 = vcombine.low %v3097_v24, %v3105_v25 }
 0x3cb   :  { %6168 = vmatpush1.bf16.msra.mxu0 %v8481_v58  ;;  %v3042_v58 = vld [vmem:[#allocation11 + $0x658] sm:$0xff] }
 0x3cc   :  { %6250 = vmatpush1.bf16.msra.mxu1 %v8483_v59  ;;  %6169 = vmatprep.subr.bf16.mxu0 %v8498_v62  ;;  %v8593_v59 = vcombine.low %v3017_v41, %v3025_v42  ;;  %v8595_v62 = vcombine.low %v3018_v43, %v3026_v44  ;;  %v8612_v1 = vcombine.high %v3034_v57, %v3042_v58  ;;  %v3129_v41 = vld [vmem:[#allocation11 + $0x910] sm:$0xff]  ;;  %v3130_v44 = vld [vmem:[#allocation11 + $0x918] sm:$0xff] }
 0x3cd   :  { %6251 = vmatprep.subr.bf16.mxu1 %v8500_v0  ;;  %v8610_v0 = vcombine.high %v3033_v54, %v3041_v56  ;;  %v3137_v42 = vld [vmem:[#allocation11 + $0x950] sm:$0xff] }
 0x3cf   :  { %6170 = vmatpush1.bf16.msra.mxu0 %v8497_v6  ;;  %v3058_v6 = vld [vmem:[#allocation11 + $0x6d8] sm:$0xff] }
 0x3d0   :  { %6252 = vmatpush1.bf16.msra.mxu1 %v8499_v7  ;;  %6171 = vmatprep.subr.bf16.mxu0 %v8514_v8  ;;  %v8609_v7 = vcombine.low %v3033_v54, %v3041_v56  ;;  %v8611_v8 = vcombine.low %v3034_v57, %v3042_v58  ;;  %v8628_v9 = vcombine.high %v3050_v4, %v3058_v6  ;;  %v3145_v56 = vld [vmem:[#allocation11 + $0x990] sm:$0xff]  ;;  %v3146_v58 = vld [vmem:[#allocation11 + $0x998] sm:$0xff] }
 0x3d1   :  { %6253 = vmatprep.subr.bf16.mxu1 %v8516_v32  ;;  %v8626_v32 = vcombine.high %v3049_v2, %v3057_v3  ;;  %v3153_v57 = vld [vmem:[#allocation11 + $0x9d0] sm:$0xff] }
 0x3d3   :  { %6172 = vmatpush1.bf16.msra.mxu0 %v8513_v14  ;;  %v3074_v14 = vld [vmem:[#allocation11 + $0x758] sm:$0xff] }
 0x3d4   :  { %6254 = vmatpush1.bf16.msra.mxu1 %v8515_v15  ;;  %6173 = vmatprep.subr.bf16.mxu0 %v8530_v16  ;;  %v8625_v15 = vcombine.low %v3049_v2, %v3057_v3  ;;  %v8627_v16 = vcombine.low %v3050_v4, %v3058_v6  ;;  %v8644_v17 = vcombine.high %v3066_v13, %v3074_v14  ;;  %v3161_v3 = vld [vmem:[#allocation11 + $0xa10] sm:$0xff]  ;;  %v3162_v6 = vld [vmem:[#allocation11 + $0xa18] sm:$0xff] }
 0x3d5   :  { %6255 = vmatprep.subr.bf16.mxu1 %v8532_v48  ;;  %v8642_v48 = vcombine.high %v3065_v10, %v3073_v12  ;;  %v3169_v4 = vld [vmem:[#allocation11 + $0xa50] sm:$0xff] }
 0x3d7   :  { %6174 = vmatpush1.bf16.msra.mxu0 %v8529_v21  ;;  %v3090_v21 = vld [vmem:[#allocation11 + $0x7d8] sm:$0xff] }
 0x3d8   :  { %6256 = vmatpush1.bf16.msra.mxu1 %v8531_v22  ;;  %6175 = vmatprep.subr.bf16.mxu0 %v8546_v55  ;;  %v8641_v22 = vcombine.low %v3065_v10, %v3073_v12  ;;  %v8643_v55 = vcombine.low %v3066_v13, %v3074_v14  ;;  %v8660_v23 = vcombine.high %v3082_v19, %v3090_v21  ;;  %v3177_v12 = vld [vmem:[#allocation11 + $0xa90] sm:$0xff]  ;;  %v3178_v14 = vld [vmem:[#allocation11 + $0xa98] sm:$0xff] }
 0x3d9   :  { %6257 = vmatprep.subr.bf16.mxu1 %v8548_v11  ;;  %v8658_v11 = vcombine.high %v3081_v37, %v3089_v18  ;;  %v3185_v13 = vld [vmem:[#allocation11 + $0xad0] sm:$0xff] }
 0x3db   :  { %6176 = vmatpush1.bf16.msra.mxu0 %v8545_v27  ;;  %v3106_v27 = vld [vmem:[#allocation11 + $0x858] sm:$0xff] }
 0x3dc   :  { %6258 = vmatpush1.bf16.msra.mxu1 %v8547_v28  ;;  %6177 = vmatprep.subr.bf16.mxu0 %v8562_v29  ;;  %v8657_v28 = vcombine.low %v3081_v37, %v3089_v18  ;;  %v8659_v29 = vcombine.low %v3082_v19, %v3090_v21  ;;  %v8676_v31 = vcombine.high %v3098_v26, %v3106_v27  ;;  %v3193_v18 = vld [vmem:[#allocation11 + $0xb10] sm:$0xff]  ;;  %v3194_v21 = vld [vmem:[#allocation11 + $0xb18] sm:$0xff] }
 0x3dd   :  { %6259 = vmatprep.subr.bf16.mxu1 %v8564_v30  ;;  %v8674_v30 = vcombine.high %v3097_v24, %v3105_v25  ;;  %v3201_v19 = vld [vmem:[#allocation11 + $0xb50] sm:$0xff] }
 0x3de   :  { %v3209_v25 = vld [vmem:[#allocation11 + $0xb90] sm:$0xff] }
 0x3df   :  { %6178 = vmatpush1.bf16.msra.mxu0 %v8561_v36  ;;  %v3114_v36 = vld [vmem:[#allocation11 + $0x898] sm:$0xff] }
 0x3e0   :  { %6260 = vmatpush1.bf16.msra.mxu1 %v8563_v38  ;;  %6179 = vmatprep.subr.bf16.mxu0 %v8578_v39  ;;  %v3122_v38 = vld [vmem:[#allocation11 + $0x8d8] sm:$0xff]  ;;  %v8675_v39 = vcombine.low %v3098_v26, %v3106_v27  ;;  %v3217_v26 = vld [vmem:[#allocation11 + $0xbd0] sm:$0xff] }
 0x3e1   :  { %6261 = vmatprep.subr.bf16.mxu1 %v8580_v40  ;;  %v8690_v40 = vcombine.high %v3113_v33, %v3121_v34  ;;  %v8692_v43 = vcombine.high %v3114_v36, %v3122_v38  ;;  %v3210_v27 = vld [vmem:[#allocation11 + $0xb98] sm:$0xff] }
 0x3e3   :  { %6180 = vmatpush1.bf16.msra.mxu0 %v8577_v45  ;;  %v3138_v45 = vld [vmem:[#allocation11 + $0x958] sm:$0xff] }
 0x3e4   :  { %6262 = vmatpush1.bf16.msra.mxu1 %v8579_v51  ;;  %6181 = vmatprep.subr.bf16.mxu0 %v8594_v52  ;;  %v8689_v51 = vcombine.low %v3113_v33, %v3121_v34  ;;  %v8691_v52 = vcombine.low %v3114_v36, %v3122_v38  ;;  %v8708_v54 = vcombine.high %v3130_v44, %v3138_v45  ;;  %v3225_v34 = vld [vmem:[#allocation11 + $0xc10] sm:$0xff]  ;;  %v3226_v36 = vld [vmem:[#allocation11 + $0xc18] sm:$0xff] }
 0x3e5   :  { %6263 = vmatprep.subr.bf16.mxu1 %v8596_v53  ;;  %v8706_v53 = vcombine.high %v3129_v41, %v3137_v42  ;;  %v3234_v38 = vld [vmem:[#allocation11 + $0xc58] sm:$0xff] }
 0x3e7   :  { %6182 = vmatpush1.bf16.msra.mxu0 %v8593_v59  ;;  %v3154_v59 = vld [vmem:[#allocation11 + $0x9d8] sm:$0xff] }
 0x3e8   :  { %6264 = vmatpush1.bf16.msra.mxu1 %v8595_v62  ;;  %6183 = vmatprep.subr.bf16.mxu0 %v8610_v0  ;;  %v8705_v62 = vcombine.low %v3129_v41, %v3137_v42  ;;  %v8707_v0 = vcombine.low %v3130_v44, %v3138_v45  ;;  %v8724_v2 = vcombine.high %v3146_v58, %v3154_v59  ;;  %v3249_v44 = vld [vmem:[#allocation11 + $0xcd0] sm:$0xff]  ;;  %v3242_v45 = vld [vmem:[#allocation11 + $0xc98] sm:$0xff] }
 0x3e9   :  { %6265 = vmatprep.subr.bf16.mxu1 %v8612_v1  ;;  %v8722_v1 = vcombine.high %v3145_v56, %v3153_v57  ;;  %v8804_v42 = vcombine.high %v3226_v36, %v3234_v38 }
 0x3eb   :  { %6184 = vmatpush1.bf16.msra.mxu0 %v8609_v7  ;;  %v3170_v7 = vld [vmem:[#allocation11 + $0xa58] sm:$0xff] }
 0x3ec   :  { %6266 = vmatpush1.bf16.msra.mxu1 %v8611_v8  ;;  %6185 = vmatprep.subr.bf16.mxu0 %v8626_v32  ;;  %v8721_v8 = vcombine.low %v3145_v56, %v3153_v57  ;;  %v8723_v32 = vcombine.low %v3146_v58, %v3154_v59  ;;  %v8740_v10 = vcombine.high %v3162_v6, %v3170_v7  ;;  %v3257_v57 = vld [vmem:[#allocation11 + $0xd10] sm:$0xff]  ;;  %v3258_v59 = vld [vmem:[#allocation11 + $0xd18] sm:$0xff] }
 0x3ed   :  { %6267 = vmatprep.subr.bf16.mxu1 %v8628_v9  ;;  %v8738_v9 = vcombine.high %v3161_v3, %v3169_v4  ;;  %v3265_v58 = vld [vmem:[#allocation11 + $0xd50] sm:$0xff] }
 0x3ef   :  { %6186 = vmatpush1.bf16.msra.mxu0 %v8625_v15  ;;  %v3186_v15 = vld [vmem:[#allocation11 + $0xad8] sm:$0xff] }
 0x3f0   :  { %6268 = vmatpush1.bf16.msra.mxu1 %v8627_v16  ;;  %6187 = vmatprep.subr.bf16.mxu0 %v8642_v48  ;;  %v8737_v16 = vcombine.low %v3161_v3, %v3169_v4  ;;  %v8739_v48 = vcombine.low %v3162_v6, %v3170_v7  ;;  %v8756_v37 = vcombine.high %v3178_v14, %v3186_v15  ;;  %v3273_v4 = vld [vmem:[#allocation11 + $0xd90] sm:$0xff]  ;;  %v3274_v7 = vld [vmem:[#allocation11 + $0xd98] sm:$0xff] }
 0x3f1   :  { %6269 = vmatprep.subr.bf16.mxu1 %v8644_v17  ;;  %v8754_v17 = vcombine.high %v3177_v12, %v3185_v13  ;;  %v3281_v6 = vld [vmem:[#allocation11 + $0xdd0] sm:$0xff] }
 0x3f3   :  { %6188 = vmatpush1.bf16.msra.mxu0 %v8641_v22  ;;  %v3202_v22 = vld [vmem:[#allocation11 + $0xb58] sm:$0xff] }
 0x3f4   :  { %6270 = vmatpush1.bf16.msra.mxu1 %v8643_v55  ;;  %6189 = vmatprep.subr.bf16.mxu0 %v8658_v11  ;;  %v8753_v55 = vcombine.low %v3177_v12, %v3185_v13  ;;  %v8755_v11 = vcombine.low %v3178_v14, %v3186_v15  ;;  %v8772_v24 = vcombine.high %v3194_v21, %v3202_v22  ;;  %v3289_v13 = vld [vmem:[#allocation11 + $0xe10] sm:$0xff]  ;;  %v3290_v15 = vld [vmem:[#allocation11 + $0xe18] sm:$0xff] }
 0x3f5   :  { %6271 = vmatprep.subr.bf16.mxu1 %v8660_v23  ;;  %v8770_v23 = vcombine.high %v3193_v18, %v3201_v19  ;;  %v3297_v14 = vld [vmem:[#allocation11 + $0xe50] sm:$0xff] }
 0x3f7   :  { %6190 = vmatpush1.bf16.msra.mxu0 %v8657_v28  ;;  %v3218_v28 = vld [vmem:[#allocation11 + $0xbd8] sm:$0xff] }
 0x3f8   :  { %6272 = vmatpush1.bf16.msra.mxu1 %v8659_v29  ;;  %6200 = vmatprep.subr.bf16.mxu0 %v8674_v30  ;;  %v8769_v29 = vcombine.low %v3193_v18, %v3201_v19  ;;  %v8771_v30 = vcombine.low %v3194_v21, %v3202_v22  ;;  %v8788_v33 = vcombine.high %v3210_v27, %v3218_v28  ;;  %v3305_v19 = vld [vmem:[#allocation11 + $0xe90] sm:$0xff]  ;;  %v3306_v22 = vld [vmem:[#allocation11 + $0xe98] sm:$0xff] }
 0x3f9   :  { %6282 = vmatprep.subr.bf16.mxu1 %v8676_v31  ;;  %v8786_v31 = vcombine.high %v3209_v25, %v3217_v26  ;;  %v3313_v21 = vld [vmem:[#allocation11 + $0xed0] sm:$0xff] }
 0x3fa   :  { %6192 = vmatmul.mubr.bf16.vlgmr.msra.gmra.mrb[12].mxu0 %v10454_v61 }
 0x3fb   :  { %6274 = vmatmul.mubr.bf16.vlgmr.msra.gmra.mrb[12].mxu1 %v10454_v61  ;;  %6201 = vmatpush1.bf16.msra.mxu0 %v8673_v35  ;;  %v3233_v35 = vld [vmem:[#allocation11 + $0xc50] sm:$0xff] }
 0x3fc   :  { %6232 = vmatprep.mubr.bf16.mxu0 %v10458_v5  ;;  %6283 = vmatpush1.bf16.msra.mxu1 %v8675_v39  ;;  %v8785_v39 = vcombine.low %v3209_v25, %v3217_v26  ;;  %v8802_v41 = vcombine.high %v3225_v34, %v3233_v35  ;;  %v3321_v26 = vld [vmem:[#allocation11 + $0xf10] sm:$0xff] }
 0x3fd   :  { %6314 = vmatprep.mubr.bf16.mxu1 %v10458_v5  ;;  %6202 = vmatprep.subr.bf16.mxu0 %v8690_v40  ;;  %v8787_v40 = vcombine.low %v3210_v27, %v3218_v28  ;;  %v3329_v27 = vld [vmem:[#allocation11 + $0xf50] sm:$0xff]  ;;  %v3322_v28 = vld [vmem:[#allocation11 + $0xf18] sm:$0xff] }
 0x3fe   :  { %6284 = vmatprep.subr.bf16.mxu1 %v8692_v43  ;;  %v3241_v43 = vld [vmem:[#allocation11 + $0xc90] sm:$0xff] }
 0x3ff   :  { %6203 = vmatpush1.bf16.msra.mxu0 %v8689_v51  ;;  %v3250_v51 = vld [vmem:[#allocation11 + $0xcd8] sm:$0xff] }
 0x400   :  { %6285 = vmatpush1.bf16.msra.mxu1 %v8691_v52  ;;  %6204 = vmatprep.subr.bf16.mxu0 %v8706_v53  ;;  %v8801_v52 = vcombine.low %v3225_v34, %v3233_v35  ;;  %v8803_v53 = vcombine.low %v3226_v36, %v3234_v38  ;;  %v8820_v56 = vcombine.high %v3242_v45, %v3250_v51  ;;  %v3337_v35 = vld [vmem:[#allocation11 + $0xf90] sm:$0xff]  ;;  %v3338_v38 = vld [vmem:[#allocation11 + $0xf98] sm:$0xff] }
 0x401   :  { %6286 = vmatprep.subr.bf16.mxu1 %v8708_v54  ;;  %v8818_v54 = vcombine.high %v3241_v43, %v3249_v44  ;;  %v3345_v36 = vld [vmem:[#allocation11 + $0xfd0] sm:$0xff] }
 0x403   :  { %6205 = vmatpush1.bf16.msra.mxu0 %v8705_v62  ;;  %v3266_v62 = vld [vmem:[#allocation11 + $0xd58] sm:$0xff] }
 0x404   :  { %6287 = vmatpush1.bf16.msra.mxu1 %v8707_v0  ;;  %6206 = vmatprep.subr.bf16.mxu0 %v8722_v1  ;;  %v8817_v0 = vcombine.low %v3241_v43, %v3249_v44  ;;  %v8819_v1 = vcombine.low %v3242_v45, %v3250_v51  ;;  %v8836_v3 = vcombine.high %v3258_v59, %v3266_v62  ;;  %v2843_v44 = vld [vmem:[#allocation11 + $0x20] sm:$0xff]  ;;  %v2844_v51 = vld [vmem:[#allocation11 + $0x28] sm:$0xff] }
 0x405   :  { %6288 = vmatprep.subr.bf16.mxu1 %v8724_v2  ;;  %v8834_v2 = vcombine.high %v3257_v57, %v3265_v58  ;;  %v2851_v45 = vld [vmem:[#allocation11 + $0x60] sm:$0xff] }
 0x407   :  { %6207 = vmatpush1.bf16.msra.mxu0 %v8721_v8  ;;  %v3282_v8 = vld [vmem:[#allocation11 + $0xdd8] sm:$0xff] }
 0x408   :  { %6289 = vmatpush1.bf16.msra.mxu1 %v8723_v32  ;;  %6208 = vmatprep.subr.bf16.mxu0 %v8738_v9  ;;  %v8833_v32 = vcombine.low %v3257_v57, %v3265_v58  ;;  %v8835_v9 = vcombine.low %v3258_v59, %v3266_v62  ;;  %v8852_v12 = vcombine.high %v3274_v7, %v3282_v8  ;;  %v2859_v58 = vld [vmem:[#allocation11 + $0xa0] sm:$0xff] }
 0x409   :  { %6290 = vmatprep.subr.bf16.mxu1 %v8740_v10  ;;  %v8850_v10 = vcombine.high %v3273_v4, %v3281_v6  ;;  %v2867_v59 = vld [vmem:[#allocation11 + $0xe0] sm:$0xff]  ;;  %v8421_v62 = vcombine.low %v2843_v44, %v2851_v45 }
 0x40b   :  { %6209 = vmatpush1.bf16.msra.mxu0 %v8737_v16  ;;  %v3298_v16 = vld [vmem:[#allocation11 + $0xe58] sm:$0xff] }
 0x40c   :  { %6291 = vmatpush1.bf16.msra.mxu1 %v8739_v48  ;;  %6210 = vmatprep.subr.bf16.mxu0 %v8754_v17  ;;  %v8849_v48 = vcombine.low %v3273_v4, %v3281_v6  ;;  %v8851_v17 = vcombine.low %v3274_v7, %v3282_v8  ;;  %v8868_v18 = vcombine.high %v3290_v15, %v3298_v16  ;;  %v2875_v4 = vld [vmem:[#allocation11 + $0x120] sm:$0xff]  ;;  %v2876_v8 = vld [vmem:[#allocation11 + $0x128] sm:$0xff] }
 0x40d   :  { %6292 = vmatprep.subr.bf16.mxu1 %v8756_v37  ;;  %v8866_v37 = vcombine.high %v3289_v13, %v3297_v14  ;;  %v2883_v6 = vld [vmem:[#allocation11 + $0x160] sm:$0xff] }
 0x40f   :  { %6211 = vmatpush1.bf16.msra.mxu0 %v8753_v55  ;;  %v3314_v55 = vld [vmem:[#allocation11 + $0xed8] sm:$0xff] }
 0x410   :  { %6293 = vmatpush1.bf16.msra.mxu1 %v8755_v11  ;;  %6212 = vmatprep.subr.bf16.mxu0 %v8770_v23  ;;  %v8865_v11 = vcombine.low %v3289_v13, %v3297_v14  ;;  %v8867_v23 = vcombine.low %v3290_v15, %v3298_v16  ;;  %v8884_v25 = vcombine.high %v3306_v22, %v3314_v55  ;;  %v2891_v14 = vld [vmem:[#allocation11 + $0x1a0] sm:$0xff]  ;;  %v2892_v16 = vld [vmem:[#allocation11 + $0x1a8] sm:$0xff] }
 0x411   :  { %6294 = vmatprep.subr.bf16.mxu1 %v8772_v24  ;;  %v8882_v24 = vcombine.high %v3305_v19, %v3313_v21  ;;  %v2899_v15 = vld [vmem:[#allocation11 + $0x1e0] sm:$0xff] }
 0x413   :  { %6213 = vmatpush1.bf16.msra.mxu0 %v8769_v29  ;;  %v3330_v29 = vld [vmem:[#allocation11 + $0xf58] sm:$0xff] }
 0x414   :  { %6295 = vmatpush1.bf16.msra.mxu1 %v8771_v30  ;;  %6214 = vmatprep.subr.bf16.mxu0 %v8786_v31  ;;  %v8881_v30 = vcombine.low %v3305_v19, %v3313_v21  ;;  %v8883_v31 = vcombine.low %v3306_v22, %v3314_v55  ;;  %v8900_v34 = vcombine.high %v3322_v28, %v3330_v29  ;;  %v2907_v21 = vld [vmem:[#allocation11 + $0x220] sm:$0xff]  ;;  %v2908_v55 = vld [vmem:[#allocation11 + $0x228] sm:$0xff] }
 0x415   :  { %6296 = vmatprep.subr.bf16.mxu1 %v8788_v33  ;;  %v8898_v33 = vcombine.high %v3321_v26, %v3329_v27  ;;  %v2915_v22 = vld [vmem:[#allocation11 + $0x260] sm:$0xff] }
 0x417   :  { %6215 = vmatpush1.bf16.msra.mxu0 %v8785_v39  ;;  %v3346_v39 = vld [vmem:[#allocation11 + $0xfd8] sm:$0xff] }
 0x418   :  { %6297 = vmatpush1.bf16.msra.mxu1 %v8787_v40  ;;  %6216 = vmatprep.subr.bf16.mxu0 %v8802_v41  ;;  %v8897_v40 = vcombine.low %v3321_v26, %v3329_v27  ;;  %v8899_v41 = vcombine.low %v3322_v28, %v3330_v29  ;;  %v8916_v43 = vcombine.high %v3338_v38, %v3346_v39  ;;  %v2923_v27 = vld [vmem:[#allocation11 + $0x2a0] sm:$0xff]  ;;  %v2924_v29 = vld [vmem:[#allocation11 + $0x2a8] sm:$0xff] }
 0x419   :  { %6298 = vmatprep.subr.bf16.mxu1 %v8804_v42  ;;  %v8914_v42 = vcombine.high %v3337_v35, %v3345_v36  ;;  %v2931_v28 = vld [vmem:[#allocation11 + $0x2e0] sm:$0xff] }
 0x41b   :  { %6217 = vmatpush1.bf16.msra.mxu0 %v8801_v52  ;;  %v2852_v52 = vld [vmem:[#allocation11 + $0x68] sm:$0xff] }
 0x41c   :  { %6299 = vmatpush1.bf16.msra.mxu1 %v8803_v53  ;;  %6218 = vmatprep.subr.bf16.mxu0 %v8818_v54  ;;  %v8913_v53 = vcombine.low %v3337_v35, %v3345_v36  ;;  %v8915_v54 = vcombine.low %v3338_v38, %v3346_v39  ;;  %v8424_v57 = vcombine.high %v2844_v51, %v2852_v52  ;;  %v2939_v36 = vld [vmem:[#allocation11 + $0x320] sm:$0xff]  ;;  %v2940_v39 = vld [vmem:[#allocation11 + $0x328] sm:$0xff] }
 0x41d   :  { %6300 = vmatprep.subr.bf16.mxu1 %v8820_v56  ;;  %v8422_v56 = vcombine.high %v2843_v44, %v2851_v45  ;;  %v2947_v38 = vld [vmem:[#allocation11 + $0x360] sm:$0xff] }
 0x41e   :  { %v2955_v45 = vld [vmem:[#allocation11 + $0x3a0] sm:$0xff] }
 0x41f   :  { %6219 = vmatpush1.bf16.msra.mxu0 %v8817_v0  ;;  %v2860_v0 = vld [vmem:[#allocation11 + $0xa8] sm:$0xff] }
 0x420   :  { %6301 = vmatpush1.bf16.msra.mxu1 %v8819_v1  ;;  %6220 = vmatprep.subr.bf16.mxu0 %v8834_v2  ;;  %v2868_v1 = vld [vmem:[#allocation11 + $0xe8] sm:$0xff]  ;;  %v8423_v2 = vcombine.low %v2844_v51, %v2852_v52  ;;  %v2963_v51 = vld [vmem:[#allocation11 + $0x3e0] sm:$0xff] }
 0x421   :  { %6302 = vmatprep.subr.bf16.mxu1 %v8836_v3  ;;  %v8438_v3 = vcombine.high %v2859_v58, %v2867_v59  ;;  %v8440_v7 = vcombine.high %v2860_v0, %v2868_v1  ;;  %v2956_v52 = vld [vmem:[#allocation11 + $0x3a8] sm:$0xff] }
 0x423   :  { %6221 = vmatpush1.bf16.msra.mxu0 %v8833_v32  ;;  %v2884_v32 = vld [vmem:[#allocation11 + $0x168] sm:$0xff] }
 0x424   :  { %6303 = vmatpush1.bf16.msra.mxu1 %v8835_v9  ;;  %6222 = vmatprep.subr.bf16.mxu0 %v8850_v10  ;;  %v8437_v9 = vcombine.low %v2859_v58, %v2867_v59  ;;  %v8439_v10 = vcombine.low %v2860_v0, %v2868_v1  ;;  %v8456_v13 = vcombine.high %v2876_v8, %v2884_v32  ;;  %v2971_v59 = vld [vmem:[#allocation11 + $0x420] sm:$0xff]  ;;  %v2972_v0 = vld [vmem:[#allocation11 + $0x428] sm:$0xff] }
 0x425   :  { %6304 = vmatprep.subr.bf16.mxu1 %v8852_v12  ;;  %v8454_v12 = vcombine.high %v2875_v4, %v2883_v6  ;;  %v2980_v1 = vld [vmem:[#allocation11 + $0x468] sm:$0xff] }
 0x427   :  { %6223 = vmatpush1.bf16.msra.mxu0 %v8849_v48  ;;  %v2900_v48 = vld [vmem:[#allocation11 + $0x1e8] sm:$0xff] }
 0x428   :  { %6305 = vmatpush1.bf16.msra.mxu1 %v8851_v17  ;;  %6224 = vmatprep.subr.bf16.mxu0 %v8866_v37  ;;  %v8453_v17 = vcombine.low %v2875_v4, %v2883_v6  ;;  %v8455_v37 = vcombine.low %v2876_v8, %v2884_v32  ;;  %v8472_v19 = vcombine.high %v2892_v16, %v2900_v48  ;;  %v2995_v8 = vld [vmem:[#allocation11 + $0x4e0] sm:$0xff]  ;;  %v2988_v32 = vld [vmem:[#allocation11 + $0x4a8] sm:$0xff] }
 0x429   :  { %6306 = vmatprep.subr.bf16.mxu1 %v8868_v18  ;;  %v8470_v18 = vcombine.high %v2891_v14, %v2899_v15  ;;  %v8552_v6 = vcombine.high %v2972_v0, %v2980_v1 }
 0x42b   :  { %6225 = vmatpush1.bf16.msra.mxu0 %v8865_v11  ;;  %v2916_v11 = vld [vmem:[#allocation11 + $0x268] sm:$0xff] }
 0x42c   :  { %6307 = vmatpush1.bf16.msra.mxu1 %v8867_v23  ;;  %6226 = vmatprep.subr.bf16.mxu0 %v8882_v24  ;;  %v8469_v23 = vcombine.low %v2891_v14, %v2899_v15  ;;  %v8471_v24 = vcombine.low %v2892_v16, %v2900_v48  ;;  %v8488_v26 = vcombine.high %v2908_v55, %v2916_v11  ;;  %v3003_v15 = vld [vmem:[#allocation11 + $0x520] sm:$0xff]  ;;  %v3004_v48 = vld [vmem:[#allocation11 + $0x528] sm:$0xff] }
 0x42d   :  { %6308 = vmatprep.subr.bf16.mxu1 %v8884_v25  ;;  %v8486_v25 = vcombine.high %v2907_v21, %v2915_v22  ;;  %v3011_v16 = vld [vmem:[#allocation11 + $0x560] sm:$0xff] }
 0x42f   :  { %6227 = vmatpush1.bf16.msra.mxu0 %v8881_v30  ;;  %v2932_v30 = vld [vmem:[#allocation11 + $0x2e8] sm:$0xff] }
 0x430   :  { %6309 = vmatpush1.bf16.msra.mxu1 %v8883_v31  ;;  %6228 = vmatprep.subr.bf16.mxu0 %v8898_v33  ;;  %v8485_v31 = vcombine.low %v2907_v21, %v2915_v22  ;;  %v8487_v33 = vcombine.low %v2908_v55, %v2916_v11  ;;  %v8504_v35 = vcombine.high %v2924_v29, %v2932_v30  ;;  %v3019_v22 = vld [vmem:[#allocation11 + $0x5a0] sm:$0xff]  ;;  %v3020_v11 = vld [vmem:[#allocation11 + $0x5a8] sm:$0xff] }
 0x431   :  { %6310 = vmatprep.subr.bf16.mxu1 %v8900_v34  ;;  %v8502_v34 = vcombine.high %v2923_v27, %v2931_v28  ;;  %v3027_v55 = vld [vmem:[#allocation11 + $0x5e0] sm:$0xff] }
 0x433   :  { %6229 = vmatpush1.bf16.msra.mxu0 %v8897_v40  ;;  %v2948_v40 = vld [vmem:[#allocation11 + $0x368] sm:$0xff] }
 0x434   :  { %6311 = vmatpush1.bf16.msra.mxu1 %v8899_v41  ;;  %6230 = vmatprep.subr.bf16.mxu0 %v8914_v42  ;;  %v8501_v41 = vcombine.low %v2923_v27, %v2931_v28  ;;  %v8503_v42 = vcombine.low %v2924_v29, %v2932_v30  ;;  %v8520_v44 = vcombine.high %v2940_v39, %v2948_v40  ;;  %v3035_v28 = vld [vmem:[#allocation11 + $0x620] sm:$0xff]  ;;  %v3036_v30 = vld [vmem:[#allocation11 + $0x628] sm:$0xff] }
 0x435   :  { %6312 = vmatprep.subr.bf16.mxu1 %v8916_v43  ;;  %v8518_v43 = vcombine.high %v2939_v36, %v2947_v38  ;;  %v3043_v29 = vld [vmem:[#allocation11 + $0x660] sm:$0xff] }
 0x437   :  { %6231 = vmatpush1.bf16.msra.mxu0 %v8913_v53  ;;  %v2964_v53 = vld [vmem:[#allocation11 + $0x3e8] sm:$0xff] }
 0x438   :  { %6313 = vmatpush1.bf16.msra.mxu1 %v8915_v54  ;;  %6323 = vmatprep.subr.bf16.mxu0 %v8422_v56  ;;  %v8517_v54 = vcombine.low %v2939_v36, %v2947_v38  ;;  %v8519_v56 = vcombine.low %v2940_v39, %v2948_v40  ;;  %v8536_v58 = vcombine.high %v2956_v52, %v2964_v53  ;;  %v3051_v38 = vld [vmem:[#allocation11 + $0x6a0] sm:$0xff]  ;;  %v3052_v40 = vld [vmem:[#allocation11 + $0x6a8] sm:$0xff] }
 0x439   :  { %6405 = vmatprep.subr.bf16.mxu1 %v8424_v57  ;;  %v8534_v57 = vcombine.high %v2955_v45, %v2963_v51  ;;  %v3059_v39 = vld [vmem:[#allocation11 + $0x6e0] sm:$0xff] }
 0x43a   :  { %6233 = vmatmul.mubr.bf16.vlgmr.msra.gmra.mrb[12].mxu0 %v10467_v20 }
 0x43b   :  { %6315 = vmatmul.mubr.bf16.vlgmr.msra.gmra.mrb[12].mxu1 %v10467_v20  ;;  %6324 = vmatpush1.bf16.msra.mxu0 %v8421_v62  ;;  %v2979_v62 = vld [vmem:[#allocation11 + $0x460] sm:$0xff] }
 0x43c   :  { %6355 = vmatprep.mubr.bf16.mxu0 %v10452_v60  ;;  %6406 = vmatpush1.bf16.msra.mxu1 %v8423_v2  ;;  %v8533_v2 = vcombine.low %v2955_v45, %v2963_v51  ;;  %v8550_v4 = vcombine.high %v2971_v59, %v2979_v62  ;;  %v3067_v51 = vld [vmem:[#allocation11 + $0x720] sm:$0xff] }
 0x43d   :  { %6437 = vmatprep.mubr.bf16.mxu1 %v10452_v60  ;;  %6325 = vmatprep.subr.bf16.mxu0 %v8438_v3  ;;  %v8535_v3 = vcombine.low %v2956_v52, %v2964_v53  ;;  %v3075_v52 = vld [vmem:[#allocation11 + $0x760] sm:$0xff]  ;;  %v3068_v53 = vld [vmem:[#allocation11 + $0x728] sm:$0xff] }
 0x43e   :  { %6407 = vmatprep.subr.bf16.mxu1 %v8440_v7  ;;  %v2987_v7 = vld [vmem:[#allocation11 + $0x4a0] sm:$0xff] }
 0x43f   :  { %6326 = vmatpush1.bf16.msra.mxu0 %v8437_v9  ;;  %v2996_v9 = vld [vmem:[#allocation11 + $0x4e8] sm:$0xff] }
 0x440   :  { %6408 = vmatpush1.bf16.msra.mxu1 %v8439_v10  ;;  %6327 = vmatprep.subr.bf16.mxu0 %v8454_v12  ;;  %v8549_v10 = vcombine.low %v2971_v59, %v2979_v62  ;;  %v8551_v12 = vcombine.low %v2972_v0, %v2980_v1  ;;  %v8568_v14 = vcombine.high %v2988_v32, %v2996_v9  ;;  %v3083_v62 = vld [vmem:[#allocation11 + $0x7a0] sm:$0xff]  ;;  %v3084_v1 = vld [vmem:[#allocation11 + $0x7a8] sm:$0xff] }
 0x441   :  { %6409 = vmatprep.subr.bf16.mxu1 %v8456_v13  ;;  %v8566_v13 = vcombine.high %v2987_v7, %v2995_v8  ;;  %v3091_v0 = vld [vmem:[#allocation11 + $0x7e0] sm:$0xff] }
 0x443   :  { %6328 = vmatpush1.bf16.msra.mxu0 %v8453_v17  ;;  %v3012_v17 = vld [vmem:[#allocation11 + $0x568] sm:$0xff] }
 0x444   :  { %6410 = vmatpush1.bf16.msra.mxu1 %v8455_v37  ;;  %6329 = vmatprep.subr.bf16.mxu0 %v8470_v18  ;;  %v8565_v37 = vcombine.low %v2987_v7, %v2995_v8  ;;  %v8567_v18 = vcombine.low %v2988_v32, %v2996_v9  ;;  %v8584_v21 = vcombine.high %v3004_v48, %v3012_v17  ;;  %v3099_v8 = vld [vmem:[#allocation11 + $0x820] sm:$0xff]  ;;  %v3100_v9 = vld [vmem:[#allocation11 + $0x828] sm:$0xff] }
 0x445   :  { %6411 = vmatprep.subr.bf16.mxu1 %v8472_v19  ;;  %v8582_v19 = vcombine.high %v3003_v15, %v3011_v16  ;;  %v3107_v32 = vld [vmem:[#allocation11 + $0x860] sm:$0xff] }
 0x447   :  { %6330 = vmatpush1.bf16.msra.mxu0 %v8469_v23  ;;  %v3028_v23 = vld [vmem:[#allocation11 + $0x5e8] sm:$0xff] }
 0x448   :  { %6412 = vmatpush1.bf16.msra.mxu1 %v8471_v24  ;;  %6331 = vmatprep.subr.bf16.mxu0 %v8486_v25  ;;  %v8581_v24 = vcombine.low %v3003_v15, %v3011_v16  ;;  %v8583_v25 = vcombine.low %v3004_v48, %v3012_v17  ;;  %v8600_v27 = vcombine.high %v3020_v11, %v3028_v23  ;;  %v3115_v16 = vld [vmem:[#allocation11 + $0x8a0] sm:$0xff] }
 0x449   :  { %6413 = vmatprep.subr.bf16.mxu1 %v8488_v26  ;;  %v8598_v26 = vcombine.high %v3019_v22, %v3027_v55  ;;  %v3123_v48 = vld [vmem:[#allocation11 + $0x8e0] sm:$0xff]  ;;  %v8677_v17 = vcombine.low %v3099_v8, %v3107_v32 }
 0x44b   :  { %6332 = vmatpush1.bf16.msra.mxu0 %v8485_v31  ;;  %v3044_v31 = vld [vmem:[#allocation11 + $0x668] sm:$0xff] }
 0x44c   :  { %6414 = vmatpush1.bf16.msra.mxu1 %v8487_v33  ;;  %6333 = vmatprep.subr.bf16.mxu0 %v8502_v34  ;;  %v8597_v33 = vcombine.low %v3019_v22, %v3027_v55  ;;  %v8599_v34 = vcombine.low %v3020_v11, %v3028_v23  ;;  %v8616_v36 = vcombine.high %v3036_v30, %v3044_v31  ;;  %v3131_v22 = vld [vmem:[#allocation11 + $0x920] sm:$0xff]  ;;  %v3132_v23 = vld [vmem:[#allocation11 + $0x928] sm:$0xff] }
 0x44d   :  { %6415 = vmatprep.subr.bf16.mxu1 %v8504_v35  ;;  %v8614_v35 = vcombine.high %v3035_v28, %v3043_v29  ;;  %v3139_v55 = vld [vmem:[#allocation11 + $0x960] sm:$0xff] }
 0x44f   :  { %6334 = vmatpush1.bf16.msra.mxu0 %v8501_v41  ;;  %v3060_v41 = vld [vmem:[#allocation11 + $0x6e8] sm:$0xff] }
 0x450   :  { %6416 = vmatpush1.bf16.msra.mxu1 %v8503_v42  ;;  %6335 = vmatprep.subr.bf16.mxu0 %v8518_v43  ;;  %v8613_v42 = vcombine.low %v3035_v28, %v3043_v29  ;;  %v8615_v43 = vcombine.low %v3036_v30, %v3044_v31  ;;  %v8632_v45 = vcombine.high %v3052_v40, %v3060_v41  ;;  %v3147_v29 = vld [vmem:[#allocation11 + $0x9a0] sm:$0xff]  ;;  %v3148_v31 = vld [vmem:[#allocation11 + $0x9a8] sm:$0xff] }
 0x451   :  { %6417 = vmatprep.subr.bf16.mxu1 %v8520_v44  ;;  %v8630_v44 = vcombine.high %v3051_v38, %v3059_v39  ;;  %v3155_v30 = vld [vmem:[#allocation11 + $0x9e0] sm:$0xff] }
 0x453   :  { %6336 = vmatpush1.bf16.msra.mxu0 %v8517_v54  ;;  %v3076_v54 = vld [vmem:[#allocation11 + $0x768] sm:$0xff] }
 0x454   :  { %6418 = vmatpush1.bf16.msra.mxu1 %v8519_v56  ;;  %6337 = vmatprep.subr.bf16.mxu0 %v8534_v57  ;;  %v8629_v56 = vcombine.low %v3051_v38, %v3059_v39  ;;  %v8631_v57 = vcombine.low %v3052_v40, %v3060_v41  ;;  %v8648_v59 = vcombine.high %v3068_v53, %v3076_v54  ;;  %v3163_v39 = vld [vmem:[#allocation11 + $0xa20] sm:$0xff]  ;;  %v3164_v41 = vld [vmem:[#allocation11 + $0xa28] sm:$0xff] }
 0x455   :  { %6419 = vmatprep.subr.bf16.mxu1 %v8536_v58  ;;  %v8646_v58 = vcombine.high %v3067_v51, %v3075_v52  ;;  %v3171_v40 = vld [vmem:[#allocation11 + $0xa60] sm:$0xff] }
 0x457   :  { %6338 = vmatpush1.bf16.msra.mxu0 %v8533_v2  ;;  %v3092_v2 = vld [vmem:[#allocation11 + $0x7e8] sm:$0xff] }
 0x458   :  { %6420 = vmatpush1.bf16.msra.mxu1 %v8535_v3  ;;  %6339 = vmatprep.subr.bf16.mxu0 %v8550_v4  ;;  %v8645_v3 = vcombine.low %v3067_v51, %v3075_v52  ;;  %v8647_v4 = vcombine.low %v3068_v53, %v3076_v54  ;;  %v8664_v7 = vcombine.high %v3084_v1, %v3092_v2  ;;  %v3179_v52 = vld [vmem:[#allocation11 + $0xaa0] sm:$0xff]  ;;  %v3180_v54 = vld [vmem:[#allocation11 + $0xaa8] sm:$0xff] }
 0x459   :  { %6421 = vmatprep.subr.bf16.mxu1 %v8552_v6  ;;  %v8662_v6 = vcombine.high %v3083_v62, %v3091_v0  ;;  %v3187_v53 = vld [vmem:[#allocation11 + $0xae0] sm:$0xff] }
 0x45b   :  { %6340 = vmatpush1.bf16.msra.mxu0 %v8549_v10  ;;  %v3108_v10 = vld [vmem:[#allocation11 + $0x868] sm:$0xff] }
 0x45c   :  { %6422 = vmatpush1.bf16.msra.mxu1 %v8551_v12  ;;  %6341 = vmatprep.subr.bf16.mxu0 %v8566_v13  ;;  %v8661_v12 = vcombine.low %v3083_v62, %v3091_v0  ;;  %v8663_v13 = vcombine.low %v3084_v1, %v3092_v2  ;;  %v8680_v15 = vcombine.high %v3100_v9, %v3108_v10  ;;  %v3195_v0 = vld [vmem:[#allocation11 + $0xb20] sm:$0xff]  ;;  %v3196_v2 = vld [vmem:[#allocation11 + $0xb28] sm:$0xff] }
 0x45d   :  { %6423 = vmatprep.subr.bf16.mxu1 %v8568_v14  ;;  %v8678_v14 = vcombine.high %v3099_v8, %v3107_v32  ;;  %v3203_v1 = vld [vmem:[#allocation11 + $0xb60] sm:$0xff] }
 0x45f   :  { %6342 = vmatpush1.bf16.msra.mxu0 %v8565_v37  ;;  %v3116_v37 = vld [vmem:[#allocation11 + $0x8a8] sm:$0xff] }
 0x460   :  { %6424 = vmatpush1.bf16.msra.mxu1 %v8567_v18  ;;  %6343 = vmatprep.subr.bf16.mxu0 %v8582_v19  ;;  %v3124_v18 = vld [vmem:[#allocation11 + $0x8e8] sm:$0xff]  ;;  %v8679_v19 = vcombine.low %v3100_v9, %v3108_v10  ;;  %v3211_v10 = vld [vmem:[#allocation11 + $0xba0] sm:$0xff] }
 0x461   :  { %6425 = vmatprep.subr.bf16.mxu1 %v8584_v21  ;;  %v8694_v21 = vcombine.high %v3115_v16, %v3123_v48  ;;  %v8696_v11 = vcombine.high %v3116_v37, %v3124_v18 }
 0x463   :  { %6344 = vmatpush1.bf16.msra.mxu0 %v8581_v24  ;;  %v3140_v24 = vld [vmem:[#allocation11 + $0x968] sm:$0xff] }
 0x464   :  { %6426 = vmatpush1.bf16.msra.mxu1 %v8583_v25  ;;  %6345 = vmatprep.subr.bf16.mxu0 %v8598_v26  ;;  %v8693_v25 = vcombine.low %v3115_v16, %v3123_v48  ;;  %v8695_v26 = vcombine.low %v3116_v37, %v3124_v18  ;;  %v8712_v28 = vcombine.high %v3132_v23, %v3140_v24  ;;  %v3220_v16 = vld [vmem:[#allocation11 + $0xbe8] sm:$0xff] }
 0x465   :  { %6427 = vmatprep.subr.bf16.mxu1 %v8600_v27  ;;  %v8710_v27 = vcombine.high %v3131_v22, %v3139_v55  ;;  %v8773_v37 = vcombine.low %v3195_v0, %v3203_v1 }
 0x467   :  { %6346 = vmatpush1.bf16.msra.mxu0 %v8597_v33  ;;  %v3156_v33 = vld [vmem:[#allocation11 + $0x9e8] sm:$0xff] }
 0x468   :  { %6428 = vmatpush1.bf16.msra.mxu1 %v8599_v34  ;;  %6347 = vmatprep.subr.bf16.mxu0 %v8614_v35  ;;  %v8709_v34 = vcombine.low %v3131_v22, %v3139_v55  ;;  %v8711_v35 = vcombine.low %v3132_v23, %v3140_v24  ;;  %v8728_v38 = vcombine.high %v3148_v31, %v3156_v33  ;;  %v3235_v23 = vld [vmem:[#allocation11 + $0xc60] sm:$0xff]  ;;  %v3228_v24 = vld [vmem:[#allocation11 + $0xc28] sm:$0xff] }
 0x469   :  { %6429 = vmatprep.subr.bf16.mxu1 %v8616_v36  ;;  %v8726_v36 = vcombine.high %v3147_v29, %v3155_v30 }
 0x46b   :  { %6348 = vmatpush1.bf16.msra.mxu0 %v8613_v42  ;;  %v3172_v42 = vld [vmem:[#allocation11 + $0xa68] sm:$0xff] }
 0x46c   :  { %6430 = vmatpush1.bf16.msra.mxu1 %v8615_v43  ;;  %6349 = vmatprep.subr.bf16.mxu0 %v8630_v44  ;;  %v8725_v43 = vcombine.low %v3147_v29, %v3155_v30  ;;  %v8727_v44 = vcombine.low %v3148_v31, %v3156_v33  ;;  %v8744_v51 = vcombine.high %v3164_v41, %v3172_v42  ;;  %v3243_v30 = vld [vmem:[#allocation11 + $0xca0] sm:$0xff]  ;;  %v3244_v33 = vld [vmem:[#allocation11 + $0xca8] sm:$0xff] }
 0x46d   :  { %6431 = vmatprep.subr.bf16.mxu1 %v8632_v45  ;;  %v8742_v45 = vcombine.high %v3163_v39, %v3171_v40  ;;  %v3251_v31 = vld [vmem:[#allocation11 + $0xce0] sm:$0xff] }
 0x46f   :  { %6350 = vmatpush1.bf16.msra.mxu0 %v8629_v56  ;;  %v3188_v56 = vld [vmem:[#allocation11 + $0xae8] sm:$0xff] }
 0x470   :  { %6432 = vmatpush1.bf16.msra.mxu1 %v8631_v57  ;;  %6351 = vmatprep.subr.bf16.mxu0 %v8646_v58  ;;  %v8741_v57 = vcombine.low %v3163_v39, %v3171_v40  ;;  %v8743_v58 = vcombine.low %v3164_v41, %v3172_v42  ;;  %v8760_v62 = vcombine.high %v3180_v54, %v3188_v56  ;;  %v3259_v40 = vld [vmem:[#allocation11 + $0xd20] sm:$0xff]  ;;  %v3260_v42 = vld [vmem:[#allocation11 + $0xd28] sm:$0xff] }
 0x471   :  { %6433 = vmatprep.subr.bf16.mxu1 %v8648_v59  ;;  %v8758_v59 = vcombine.high %v3179_v52, %v3187_v53  ;;  %v3267_v41 = vld [vmem:[#allocation11 + $0xd60] sm:$0xff] }
 0x473   :  { %6352 = vmatpush1.bf16.msra.mxu0 %v8645_v3  ;;  %v3204_v3 = vld [vmem:[#allocation11 + $0xb68] sm:$0xff] }
 0x474   :  { %6434 = vmatpush1.bf16.msra.mxu1 %v8647_v4  ;;  %6353 = vmatprep.subr.bf16.mxu0 %v8662_v6  ;;  %v8757_v4 = vcombine.low %v3179_v52, %v3187_v53  ;;  %v8759_v6 = vcombine.low %v3180_v54, %v3188_v56  ;;  %v8776_v9 = vcombine.high %v3196_v2, %v3204_v3  ;;  %v3275_v53 = vld [vmem:[#allocation11 + $0xda0] sm:$0xff]  ;;  %v3276_v56 = vld [vmem:[#allocation11 + $0xda8] sm:$0xff] }
 0x475   :  { %6435 = vmatprep.subr.bf16.mxu1 %v8664_v7  ;;  %v8774_v7 = vcombine.high %v3195_v0, %v3203_v1  ;;  %v3283_v54 = vld [vmem:[#allocation11 + $0xde0] sm:$0xff] }
 0x476   :  { %v3291_v1 = vld [vmem:[#allocation11 + $0xe20] sm:$0xff] }
 0x477   :  { %6354 = vmatpush1.bf16.msra.mxu0 %v8661_v12  ;;  %v3219_v12 = vld [vmem:[#allocation11 + $0xbe0] sm:$0xff] }
 0x478   :  { %6436 = vmatpush1.bf16.msra.mxu1 %v8663_v13  ;;  %6364 = vmatprep.subr.bf16.mxu0 %v8678_v14  ;;  %v8790_v22 = vcombine.high %v3211_v10, %v3219_v12 }
 0x479   :  { %6446 = vmatprep.subr.bf16.mxu1 %v8680_v15  ;;  %v3212_v15 = vld [vmem:[#allocation11 + $0xba8] sm:$0xff] }
 0x47a   :  { %6356 = vmatmul.mubr.bf16.vlgmr.msra.gmra.mrb[16].mxu0 %v10454_v61  ;;  %v8792_v55 = vcombine.high %v3212_v15, %v3220_v16 }
 0x47b   :  { %6438 = vmatmul.mubr.bf16.vlgmr.msra.gmra.mrb[16].mxu1 %v10454_v61  ;;  %6365 = vmatpush1.bf16.msra.mxu0 %v8677_v17 }
 0x47c   :  { %6396 = vmatprep.mubr.bf16.mxu0 %v10458_v5  ;;  %6447 = vmatpush1.bf16.msra.mxu1 %v8679_v19 }
 0x47d   :  { %6478 = vmatprep.mubr.bf16.mxu1 %v10458_v5  ;;  %6366 = vmatprep.subr.bf16.mxu0 %v8694_v21  ;;  %v8775_v21 = vcombine.low %v3196_v2, %v3204_v3  ;;  %v3299_v2 = vld [vmem:[#allocation11 + $0xe60] sm:$0xff]  ;;  %v3292_v3 = vld [vmem:[#allocation11 + $0xe28] sm:$0xff] }
 0x47e   :  { %6448 = vmatprep.subr.bf16.mxu1 %v8696_v11  ;;  %v3227_v11 = vld [vmem:[#allocation11 + $0xc20] sm:$0xff] }
 0x47f   :  { %6367 = vmatpush1.bf16.msra.mxu0 %v8693_v25  ;;  %v3236_v25 = vld [vmem:[#allocation11 + $0xc68] sm:$0xff] }
 0x480   :  { %6449 = vmatpush1.bf16.msra.mxu1 %v8695_v26  ;;  %6368 = vmatprep.subr.bf16.mxu0 %v8710_v27  ;;  %v8789_v26 = vcombine.low %v3211_v10, %v3219_v12  ;;  %v8791_v27 = vcombine.low %v3212_v15, %v3220_v16  ;;  %v8808_v29 = vcombine.high %v3228_v24, %v3236_v25  ;;  %v3307_v12 = vld [vmem:[#allocation11 + $0xea0] sm:$0xff]  ;;  %v3308_v16 = vld [vmem:[#allocation11 + $0xea8] sm:$0xff] }
 0x481   :  { %6450 = vmatprep.subr.bf16.mxu1 %v8712_v28  ;;  %v8806_v28 = vcombine.high %v3227_v11, %v3235_v23  ;;  %v3315_v15 = vld [vmem:[#allocation11 + $0xee0] sm:$0xff] }
 0x483   :  { %6369 = vmatpush1.bf16.msra.mxu0 %v8709_v34  ;;  %v3252_v34 = vld [vmem:[#allocation11 + $0xce8] sm:$0xff] }
 0x484   :  { %6451 = vmatpush1.bf16.msra.mxu1 %v8711_v35  ;;  %6370 = vmatprep.subr.bf16.mxu0 %v8726_v36  ;;  %v8805_v35 = vcombine.low %v3227_v11, %v3235_v23  ;;  %v8807_v36 = vcombine.low %v3228_v24, %v3236_v25  ;;  %v8824_v39 = vcombine.high %v3244_v33, %v3252_v34  ;;  %v3332_v11 = vld [vmem:[#allocation11 + $0xf68] sm:$0xff] }
 0x485   :  { %6452 = vmatprep.subr.bf16.mxu1 %v8728_v38  ;;  %v8822_v38 = vcombine.high %v3243_v30, %v3251_v31  ;;  %v8885_v23 = vcombine.low %v3307_v12, %v3315_v15 }
 0x487   :  { %6371 = vmatpush1.bf16.msra.mxu0 %v8725_v43  ;;  %v3268_v43 = vld [vmem:[#allocation11 + $0xd68] sm:$0xff] }
 0x488   :  { %6453 = vmatpush1.bf16.msra.mxu1 %v8727_v44  ;;  %6372 = vmatprep.subr.bf16.mxu0 %v8742_v45  ;;  %v8821_v44 = vcombine.low %v3243_v30, %v3251_v31  ;;  %v8823_v45 = vcombine.low %v3244_v33, %v3252_v34  ;;  %v8840_v52 = vcombine.high %v3260_v42, %v3268_v43  ;;  %v3348_v30 = vld [vmem:[#allocation11 + $0xfe8] sm:$0xff] }
 0x489   :  { %6454 = vmatprep.subr.bf16.mxu1 %v8744_v51  ;;  %v8838_v51 = vcombine.high %v3259_v40, %v3267_v41 }
 0x48b   :  { %6373 = vmatpush1.bf16.msra.mxu0 %v8741_v57  ;;  %v3284_v57 = vld [vmem:[#allocation11 + $0xde8] sm:$0xff] }
 0x48c   :  { %6455 = vmatpush1.bf16.msra.mxu1 %v8743_v58  ;;  %6374 = vmatprep.subr.bf16.mxu0 %v8758_v59  ;;  %v8837_v58 = vcombine.low %v3259_v40, %v3267_v41  ;;  %v8839_v59 = vcombine.low %v3260_v42, %v3268_v43  ;;  %v8856_v0 = vcombine.high %v3276_v56, %v3284_v57  ;;  %v2854_v40 = vld [vmem:[#allocation11 + $0x78] sm:$0xff] }
 0x48d   :  { %v10485_v8 = vpop.f32.mrb[8].mxu0  ;;  %v10487_v32 = vpop.f32.mrb[8].mxu1  ;;  %6456 = vmatprep.subr.bf16.mxu1 %v8760_v62  ;;  %v8854_v62 = vcombine.high %v3275_v53, %v3283_v54 }
 0x48e   :  { %v10489_v13 = vpop.f32.mrb[9].mxu0  ;;  %v10491_v14 = vpop.f32.mrb[9].mxu1 }
 0x48f   :  { %v6074_v48 = vpop.f32.mrb[10].mxu0  ;;  %v6156_v17 = vpop.f32.mrb[10].mxu1  ;;  %6375 = vmatpush1.bf16.msra.mxu0 %v8757_v4  ;;  %v3300_v4 = vld [vmem:[#allocation11 + $0xe68] sm:$0xff] }
 0x490   :  { %6457 = vmatpush1.bf16.msra.mxu1 %v8759_v6  ;;  %v6075_v18 = vpop.f32.mrb[11].mxu0  ;;  %v6157_v19 = vpop.f32.mrb[11].mxu1  ;;  %6376 = vmatprep.subr.bf16.mxu0 %v8774_v7  ;;  %v8853_v6 = vcombine.low %v3275_v53, %v3283_v54  ;;  %v8855_v7 = vcombine.low %v3276_v56, %v3284_v57  ;;  %v8872_v10 = vcombine.high %v3292_v3, %v3300_v4  ;;  %v3316_v48 = vld [vmem:[#allocation11 + $0xee8] sm:$0xff]  ;;  %v2862_v53 = vld [vmem:[#allocation11 + $0xb8] sm:$0xff] }
 0x491   :  { %6458 = vmatprep.subr.bf16.mxu1 %v8776_v9  ;;  %v8870_v9 = vcombine.high %v3291_v1, %v3299_v2  ;;  %v8869_v17 = vcombine.low %v3291_v1, %v3299_v2  ;;  %v8886_v18 = vcombine.high %v3307_v12, %v3315_v15  ;;  %v8888_v19 = vcombine.high %v3308_v16, %v3316_v48  ;;  %v2870_v54 = vld [vmem:[#allocation11 + $0xf8] sm:$0xff] }
 0x492   :  { %v8887_v24 = vcombine.low %v3308_v16, %v3316_v48  ;;  %v2886_v1 = vld [vmem:[#allocation11 + $0x178] sm:$0xff] }
 0x493   :  { %6377 = vmatpush1.bf16.msra.mxu0 %v8773_v37  ;;  %v8871_v37 = vcombine.low %v3292_v3, %v3300_v4  ;;  %v8443_v3 = vcombine.low %v2862_v53, %v2870_v54  ;;  %v2902_v12 = vld [vmem:[#allocation11 + $0x1f8] sm:$0xff] }
 0x494   :  { %6459 = vmatpush1.bf16.msra.mxu1 %v8775_v21  ;;  %6378 = vmatprep.subr.bf16.mxu0 %v8790_v22  ;;  %v3323_v21 = vld [vmem:[#allocation11 + $0xf20] sm:$0xff] }
 0x495   :  { %6460 = vmatprep.subr.bf16.mxu1 %v8792_v55  ;;  %v3331_v22 = vld [vmem:[#allocation11 + $0xf60] sm:$0xff]  ;;  %v3324_v55 = vld [vmem:[#allocation11 + $0xf28] sm:$0xff] }
 0x496   :  { %v8902_v25 = vcombine.high %v3323_v21, %v3331_v22  ;;  %v8901_v31 = vcombine.low %v3323_v21, %v3331_v22  ;;  %v8903_v33 = vcombine.low %v3324_v55, %v3332_v11  ;;  %v2918_v21 = vld [vmem:[#allocation11 + $0x278] sm:$0xff] }
 0x497   :  { %6379 = vmatpush1.bf16.msra.mxu0 %v8789_v26  ;;  %v8904_v26 = vcombine.high %v3324_v55, %v3332_v11 }
 0x498   :  { %6461 = vmatpush1.bf16.msra.mxu1 %v8791_v27  ;;  %6380 = vmatprep.subr.bf16.mxu0 %v8806_v28  ;;  %v3339_v27 = vld [vmem:[#allocation11 + $0xfa0] sm:$0xff] }
 0x499   :  { %6462 = vmatprep.subr.bf16.mxu1 %v8808_v29  ;;  %v3347_v28 = vld [vmem:[#allocation11 + $0xfe0] sm:$0xff]  ;;  %v3340_v29 = vld [vmem:[#allocation11 + $0xfa8] sm:$0xff] }
 0x49a   :  { %v8918_v34 = vcombine.high %v3339_v27, %v3347_v28  ;;  %v8917_v41 = vcombine.low %v3339_v27, %v3347_v28  ;;  %v8919_v42 = vcombine.low %v3340_v29, %v3348_v30 }
 0x49b   :  { %6381 = vmatpush1.bf16.msra.mxu0 %v8805_v35  ;;  %v8920_v35 = vcombine.high %v3340_v29, %v3348_v30 }
 0x49c   :  { %6463 = vmatpush1.bf16.msra.mxu1 %v8807_v36  ;;  %6382 = vmatprep.subr.bf16.mxu0 %v8822_v38  ;;  %v2845_v36 = vld [vmem:[#allocation11 + $0x30] sm:$0xff] }
 0x49d   :  { %6464 = vmatprep.subr.bf16.mxu1 %v8824_v39  ;;  %v2853_v38 = vld [vmem:[#allocation11 + $0x70] sm:$0xff]  ;;  %v2846_v39 = vld [vmem:[#allocation11 + $0x38] sm:$0xff] }
 0x49e   :  { %v8426_v43 = vcombine.high %v2845_v36, %v2853_v38  ;;  %v8427_v56 = vcombine.low %v2846_v39, %v2854_v40 }
 0x49f   :  { %6383 = vmatpush1.bf16.msra.mxu0 %v8821_v44  ;;  %v8428_v44 = vcombine.high %v2846_v39, %v2854_v40 }
 0x4a0   :  { %6465 = vmatpush1.bf16.msra.mxu1 %v8823_v45  ;;  %6384 = vmatprep.subr.bf16.mxu0 %v8838_v51  ;;  %v2861_v45 = vld [vmem:[#allocation11 + $0xb0] sm:$0xff] }
 0x4a1   :  { %6466 = vmatprep.subr.bf16.mxu1 %v8840_v52  ;;  %v2869_v51 = vld [vmem:[#allocation11 + $0xf0] sm:$0xff]  ;;  %v8425_v52 = vcombine.low %v2845_v36, %v2853_v38 }
 0x4a2   :  { %v8442_v57 = vcombine.high %v2861_v45, %v2869_v51  ;;  %v8441_v2 = vcombine.low %v2861_v45, %v2869_v51 }
 0x4a3   :  { %6385 = vmatpush1.bf16.msra.mxu0 %v8837_v58  ;;  %v2877_v58 = vld [vmem:[#allocation11 + $0x130] sm:$0xff] }
 0x4a4   :  { %6467 = vmatpush1.bf16.msra.mxu1 %v8839_v59  ;;  %6386 = vmatprep.subr.bf16.mxu0 %v8854_v62  ;;  %v2885_v59 = vld [vmem:[#allocation11 + $0x170] sm:$0xff]  ;;  %v8444_v62 = vcombine.high %v2862_v53, %v2870_v54 }
 0x4a5   :  { %6468 = vmatprep.subr.bf16.mxu1 %v8856_v0  ;;  %v2878_v0 = vld [vmem:[#allocation11 + $0x138] sm:$0xff]  ;;  %v8458_v4 = vcombine.high %v2877_v58, %v2885_v59  ;;  %v8457_v15 = vcombine.low %v2877_v58, %v2885_v59  ;;  %v2973_v54 = vld [vmem:[#allocation11 + $0x430] sm:$0xff] }
 0x4a6   :  { %v8459_v16 = vcombine.low %v2878_v0, %v2886_v1  ;;  %v2982_v58 = vld [vmem:[#allocation11 + $0x478] sm:$0xff] }
 0x4a7   :  { %6387 = vmatpush1.bf16.msra.mxu0 %v8853_v6  ;;  %v8460_v6 = vcombine.high %v2878_v0, %v2886_v1 }
 0x4a8   :  { %6469 = vmatpush1.bf16.msra.mxu1 %v8855_v7  ;;  %6388 = vmatprep.subr.bf16.mxu0 %v8870_v9  ;;  %v2893_v7 = vld [vmem:[#allocation11 + $0x1b0] sm:$0xff] }
 0x4a9   :  { %6470 = vmatprep.subr.bf16.mxu1 %v8872_v10  ;;  %v2901_v9 = vld [vmem:[#allocation11 + $0x1f0] sm:$0xff]  ;;  %v2894_v10 = vld [vmem:[#allocation11 + $0x1b8] sm:$0xff] }
 0x4aa   :  { %v8474_v48 = vcombine.high %v2893_v7, %v2901_v9  ;;  %v8475_v22 = vcombine.low %v2894_v10, %v2902_v12 }
 0x4ab   :  { %6389 = vmatpush1.bf16.msra.mxu0 %v8869_v17  ;;  %v8476_v17 = vcombine.high %v2894_v10, %v2902_v12 }
 0x4ac   :  { %6471 = vmatpush1.bf16.msra.mxu1 %v8871_v37  ;;  %6390 = vmatprep.subr.bf16.mxu0 %v8886_v18  ;;  %v2909_v37 = vld [vmem:[#allocation11 + $0x230] sm:$0xff] }
 0x4ad   :  { %6472 = vmatprep.subr.bf16.mxu1 %v8888_v19  ;;  %v2917_v18 = vld [vmem:[#allocation11 + $0x270] sm:$0xff]  ;;  %v2910_v19 = vld [vmem:[#allocation11 + $0x238] sm:$0xff] }
 0x4ae   :  { %v8490_v55 = vcombine.high %v2909_v37, %v2917_v18  ;;  %v8492_v11 = vcombine.high %v2910_v19, %v2918_v21  ;;  %v8489_v27 = vcombine.low %v2909_v37, %v2917_v18  ;;  %v8491_v28 = vcombine.low %v2910_v19, %v2918_v21 }
 0x4af   :  { %6391 = vmatpush1.bf16.msra.mxu0 %v8885_v23  ;;  %v2925_v23 = vld [vmem:[#allocation11 + $0x2b0] sm:$0xff] }
 0x4b0   :  { %6473 = vmatpush1.bf16.msra.mxu1 %v8887_v24  ;;  %6392 = vmatprep.subr.bf16.mxu0 %v8902_v25  ;;  %v2933_v24 = vld [vmem:[#allocation11 + $0x2f0] sm:$0xff]  ;;  %v2926_v25 = vld [vmem:[#allocation11 + $0x2b8] sm:$0xff] }
 0x4b1   :  { %6474 = vmatprep.subr.bf16.mxu1 %v8904_v26  ;;  %v2934_v26 = vld [vmem:[#allocation11 + $0x2f8] sm:$0xff]  ;;  %v8506_v29 = vcombine.high %v2925_v23, %v2933_v24  ;;  %v8505_v36 = vcombine.low %v2925_v23, %v2933_v24 }
 0x4b2   :  { %v8508_v30 = vcombine.high %v2926_v25, %v2934_v26  ;;  %v8507_v38 = vcombine.low %v2926_v25, %v2934_v26 }
 0x4b3   :  { %6393 = vmatpush1.bf16.msra.mxu0 %v8901_v31  ;;  %v2941_v31 = vld [vmem:[#allocation11 + $0x330] sm:$0xff] }
 0x4b4   :  { %6475 = vmatpush1.bf16.msra.mxu1 %v8903_v33  ;;  %6394 = vmatprep.subr.bf16.mxu0 %v8918_v34  ;;  %v2949_v33 = vld [vmem:[#allocation11 + $0x370] sm:$0xff]  ;;  %v2942_v34 = vld [vmem:[#allocation11 + $0x338] sm:$0xff] }
 0x4b5   :  { %6476 = vmatprep.subr.bf16.mxu1 %v8920_v35  ;;  %v2950_v35 = vld [vmem:[#allocation11 + $0x378] sm:$0xff]  ;;  %v8522_v39 = vcombine.high %v2941_v31, %v2949_v33  ;;  %v8521_v45 = vcombine.low %v2941_v31, %v2949_v33 }
 0x4b6   :  { %v8524_v40 = vcombine.high %v2942_v34, %v2950_v35  ;;  %v8523_v51 = vcombine.low %v2942_v34, %v2950_v35 }
 0x4b7   :  { %6395 = vmatpush1.bf16.msra.mxu0 %v8917_v41  ;;  %v2957_v41 = vld [vmem:[#allocation11 + $0x3b0] sm:$0xff] }
 0x4b8   :  { %6477 = vmatpush1.bf16.msra.mxu1 %v8919_v42  ;;  %6487 = vmatprep.subr.bf16.mxu0 %v8426_v43  ;;  %v2965_v42 = vld [vmem:[#allocation11 + $0x3f0] sm:$0xff]  ;;  %v2958_v43 = vld [vmem:[#allocation11 + $0x3b8] sm:$0xff] }
 0x4b9   :  { %6569 = vmatprep.subr.bf16.mxu1 %v8428_v44  ;;  %v2966_v44 = vld [vmem:[#allocation11 + $0x3f8] sm:$0xff]  ;;  %v8537_v59 = vcombine.low %v2957_v41, %v2965_v42 }
 0x4ba   :  { %6397 = vmatmul.mubr.bf16.vlgmr.msra.gmra.mrb[16].mxu0 %v10467_v20  ;;  %v8540_v53 = vcombine.high %v2958_v43, %v2966_v44 }
 0x4bb   :  { %6479 = vmatmul.mubr.bf16.vlgmr.msra.gmra.mrb[16].mxu1 %v10467_v20  ;;  %6488 = vmatpush1.bf16.msra.mxu0 %v8425_v52  ;;  %v8538_v52 = vcombine.high %v2957_v41, %v2965_v42 }
 0x4bc   :  { %6519 = vmatprep.mubr.bf16.mxu0 %v10452_v60  ;;  %6570 = vmatpush1.bf16.msra.mxu1 %v8427_v56  ;;  %v2981_v56 = vld [vmem:[#allocation11 + $0x470] sm:$0xff] }
 0x4bd   :  { %6601 = vmatprep.mubr.bf16.mxu1 %v10452_v60  ;;  %6489 = vmatprep.subr.bf16.mxu0 %v8442_v57  ;;  %v8473_v60 = vcombine.low %v2893_v7, %v2901_v9  ;;  %v2974_v57 = vld [vmem:[#allocation11 + $0x438] sm:$0xff]  ;;  %v8554_v0 = vcombine.high %v2973_v54, %v2981_v56  ;;  %v8553_v7 = vcombine.low %v2973_v54, %v2981_v56 }
 0x4be   :  { %6571 = vmatprep.subr.bf16.mxu1 %v8444_v62  ;;  %v8539_v62 = vcombine.low %v2958_v43, %v2966_v44  ;;  %v8556_v1 = vcombine.high %v2974_v57, %v2982_v58  ;;  %v8555_v9 = vcombine.low %v2974_v57, %v2982_v58 }
 0x4bf   :  { %6490 = vmatpush1.bf16.msra.mxu0 %v8441_v2  ;;  %v2989_v2 = vld [vmem:[#allocation11 + $0x4b0] sm:$0xff] }
 0x4c0   :  { %6572 = vmatpush1.bf16.msra.mxu1 %v8443_v3  ;;  %6491 = vmatprep.subr.bf16.mxu0 %v8458_v4  ;;  %v2997_v3 = vld [vmem:[#allocation11 + $0x4f0] sm:$0xff]  ;;  %v2990_v4 = vld [vmem:[#allocation11 + $0x4b8] sm:$0xff] }
 0x4c1   :  { %6573 = vmatprep.subr.bf16.mxu1 %v8460_v6  ;;  %v2998_v6 = vld [vmem:[#allocation11 + $0x4f8] sm:$0xff]  ;;  %v8570_v10 = vcombine.high %v2989_v2, %v2997_v3  ;;  %v8569_v37 = vcombine.low %v2989_v2, %v2997_v3 }
 0x4c2   :  { %v8572_v12 = vcombine.high %v2990_v4, %v2998_v6  ;;  %v8571_v18 = vcombine.low %v2990_v4, %v2998_v6 }
 0x4c3   :  { %6492 = vmatpush1.bf16.msra.mxu0 %v8457_v15  ;;  %v3005_v15 = vld [vmem:[#allocation11 + $0x530] sm:$0xff] }
 0x4c4   :  { %6574 = vmatpush1.bf16.msra.mxu1 %v8459_v16  ;;  %6493 = vmatprep.subr.bf16.mxu0 %v8474_v48  ;;  %v3013_v16 = vld [vmem:[#allocation11 + $0x570] sm:$0xff]  ;;  %v3006_v48 = vld [vmem:[#allocation11 + $0x538] sm:$0xff] }
 0x4c5   :  { %6575 = vmatprep.subr.bf16.mxu1 %v8476_v17  ;;  %v3014_v17 = vld [vmem:[#allocation11 + $0x578] sm:$0xff]  ;;  %v8586_v19 = vcombine.high %v3005_v15, %v3013_v16  ;;  %v8585_v23 = vcombine.low %v3005_v15, %v3013_v16 }
 0x4c6   :  { %v8588_v21 = vcombine.high %v3006_v48, %v3014_v17  ;;  %v8587_v24 = vcombine.low %v3006_v48, %v3014_v17 }
 0x4c7   :  { %6494 = vmatpush1.bf16.msra.mxu0 %v8473_v60  ;;  %v3021_v60 = vld [vmem:[#allocation11 + $0x5b0] sm:$0xff] }
 0x4c8   :  { %6576 = vmatpush1.bf16.msra.mxu1 %v8475_v22  ;;  %6495 = vmatprep.subr.bf16.mxu0 %v8490_v55  ;;  %v3029_v22 = vld [vmem:[#allocation11 + $0x5f0] sm:$0xff]  ;;  %v3022_v55 = vld [vmem:[#allocation11 + $0x5b8] sm:$0xff] }
 0x4c9   :  { %6577 = vmatprep.subr.bf16.mxu1 %v8492_v11  ;;  %v3030_v11 = vld [vmem:[#allocation11 + $0x5f8] sm:$0xff]  ;;  %v8602_v25 = vcombine.high %v3021_v60, %v3029_v22  ;;  %v8601_v31 = vcombine.low %v3021_v60, %v3029_v22 }
 0x4ca   :  { %v8604_v26 = vcombine.high %v3022_v55, %v3030_v11  ;;  %v8603_v33 = vcombine.low %v3022_v55, %v3030_v11  ;;  %v3126_v60 = vld [vmem:[#allocation11 + $0x8f8] sm:$0xff]  ;;  %v3133_v11 = vld [vmem:[#allocation11 + $0x930] sm:$0xff] }
 0x4cb   :  { %6496 = vmatpush1.bf16.msra.mxu0 %v8489_v27  ;;  %v3037_v27 = vld [vmem:[#allocation11 + $0x630] sm:$0xff] }
 0x4cc   :  { %6578 = vmatpush1.bf16.msra.mxu1 %v8491_v28  ;;  %6497 = vmatprep.subr.bf16.mxu0 %v8506_v29  ;;  %v3045_v28 = vld [vmem:[#allocation11 + $0x670] sm:$0xff]  ;;  %v3038_v29 = vld [vmem:[#allocation11 + $0x638] sm:$0xff] }
 0x4cd   :  { %6579 = vmatprep.subr.bf16.mxu1 %v8508_v30  ;;  %v3046_v30 = vld [vmem:[#allocation11 + $0x678] sm:$0xff]  ;;  %v8618_v34 = vcombine.high %v3037_v27, %v3045_v28  ;;  %v8617_v41 = vcombine.low %v3037_v27, %v3045_v28 }
 0x4ce   :  { %v8620_v35 = vcombine.high %v3038_v29, %v3046_v30  ;;  %v8619_v42 = vcombine.low %v3038_v29, %v3046_v30 }
 0x4cf   :  { %6498 = vmatpush1.bf16.msra.mxu0 %v8505_v36  ;;  %v3053_v36 = vld [vmem:[#allocation11 + $0x6b0] sm:$0xff] }
 0x4d0   :  { %6580 = vmatpush1.bf16.msra.mxu1 %v8507_v38  ;;  %6499 = vmatprep.subr.bf16.mxu0 %v8522_v39  ;;  %v3061_v38 = vld [vmem:[#allocation11 + $0x6f0] sm:$0xff]  ;;  %v3054_v39 = vld [vmem:[#allocation11 + $0x6b8] sm:$0xff] }
 0x4d1   :  { %6581 = vmatprep.subr.bf16.mxu1 %v8524_v40  ;;  %v3062_v40 = vld [vmem:[#allocation11 + $0x6f8] sm:$0xff]  ;;  %v8634_v43 = vcombine.high %v3053_v36, %v3061_v38  ;;  %v8633_v54 = vcombine.low %v3053_v36, %v3061_v38 }
 0x4d2   :  { %v8636_v44 = vcombine.high %v3054_v39, %v3062_v40  ;;  %v8635_v56 = vcombine.low %v3054_v39, %v3062_v40  ;;  %v3165_v40 = vld [vmem:[#allocation11 + $0xa30] sm:$0xff] }
 0x4d3   :  { %6500 = vmatpush1.bf16.msra.mxu0 %v8521_v45  ;;  %v3069_v45 = vld [vmem:[#allocation11 + $0x730] sm:$0xff] }
 0x4d4   :  { %6582 = vmatpush1.bf16.msra.mxu1 %v8523_v51  ;;  %6501 = vmatprep.subr.bf16.mxu0 %v8538_v52  ;;  %v3077_v51 = vld [vmem:[#allocation11 + $0x770] sm:$0xff]  ;;  %v3070_v52 = vld [vmem:[#allocation11 + $0x738] sm:$0xff] }
 0x4d5   :  { %6583 = vmatprep.subr.bf16.mxu1 %v8540_v53  ;;  %v3078_v53 = vld [vmem:[#allocation11 + $0x778] sm:$0xff]  ;;  %v8650_v57 = vcombine.high %v3069_v45, %v3077_v51  ;;  %v8649_v2 = vcombine.low %v3069_v45, %v3077_v51 }
 0x4d6   :  { %v8652_v58 = vcombine.high %v3070_v52, %v3078_v53  ;;  %v8651_v3 = vcombine.low %v3070_v52, %v3078_v53  ;;  %v3181_v52 = vld [vmem:[#allocation11 + $0xab0] sm:$0xff] }
 0x4d7   :  { %6502 = vmatpush1.bf16.msra.mxu0 %v8537_v59  ;;  %v3085_v59 = vld [vmem:[#allocation11 + $0x7b0] sm:$0xff] }
 0x4d8   :  { %6584 = vmatpush1.bf16.msra.mxu1 %v8539_v62  ;;  %6503 = vmatprep.subr.bf16.mxu0 %v8554_v0  ;;  %v3093_v62 = vld [vmem:[#allocation11 + $0x7f0] sm:$0xff]  ;;  %v3086_v0 = vld [vmem:[#allocation11 + $0x7b8] sm:$0xff] }
 0x4d9   :  { %6585 = vmatprep.subr.bf16.mxu1 %v8556_v1  ;;  %v3094_v1 = vld [vmem:[#allocation11 + $0x7f8] sm:$0xff]  ;;  %v8666_v4 = vcombine.high %v3085_v59, %v3093_v62  ;;  %v8665_v15 = vcombine.low %v3085_v59, %v3093_v62  ;;  %v3189_v53 = vld [vmem:[#allocation11 + $0xaf0] sm:$0xff] }
 0x4da   :  { %v8668_v6 = vcombine.high %v3086_v0, %v3094_v1  ;;  %v8667_v16 = vcombine.low %v3086_v0, %v3094_v1  ;;  %v8762_v59 = vcombine.high %v3181_v52, %v3189_v53  ;;  %v3197_v0 = vld [vmem:[#allocation11 + $0xb30] sm:$0xff] }
 0x4db   :  { %6504 = vmatpush1.bf16.msra.mxu0 %v8553_v7  ;;  %v3101_v7 = vld [vmem:[#allocation11 + $0x830] sm:$0xff] }
 0x4dc   :  { %6586 = vmatpush1.bf16.msra.mxu1 %v8555_v9  ;;  %6505 = vmatprep.subr.bf16.mxu0 %v8570_v10  ;;  %v3109_v9 = vld [vmem:[#allocation11 + $0x870] sm:$0xff]  ;;  %v3102_v10 = vld [vmem:[#allocation11 + $0x838] sm:$0xff] }
 0x4dd   :  { %6587 = vmatprep.subr.bf16.mxu1 %v8572_v12  ;;  %v3110_v12 = vld [vmem:[#allocation11 + $0x878] sm:$0xff]  ;;  %v8682_v48 = vcombine.high %v3101_v7, %v3109_v9  ;;  %v3205_v1 = vld [vmem:[#allocation11 + $0xb70] sm:$0xff] }
 0x4de   :  { %v8684_v17 = vcombine.high %v3102_v10, %v3110_v12  ;;  %v8683_v22 = vcombine.low %v3102_v10, %v3110_v12  ;;  %v3213_v12 = vld [vmem:[#allocation11 + $0xbb0] sm:$0xff] }
 0x4df   :  { %6506 = vmatpush1.bf16.msra.mxu0 %v8569_v37  ;;  %v3117_v37 = vld [vmem:[#allocation11 + $0x8b0] sm:$0xff] }
 0x4e0   :  { %6588 = vmatpush1.bf16.msra.mxu1 %v8571_v18  ;;  %6507 = vmatprep.subr.bf16.mxu0 %v8586_v19  ;;  %v3125_v18 = vld [vmem:[#allocation11 + $0x8f0] sm:$0xff]  ;;  %v8681_v19 = vcombine.low %v3101_v7, %v3109_v9  ;;  %v8778_v7 = vcombine.high %v3197_v0, %v3205_v1 }
 0x4e1   :  { %6589 = vmatprep.subr.bf16.mxu1 %v8588_v21  ;;  %v3118_v21 = vld [vmem:[#allocation11 + $0x8b8] sm:$0xff]  ;;  %v8698_v55 = vcombine.high %v3117_v37, %v3125_v18  ;;  %v8697_v27 = vcombine.low %v3117_v37, %v3125_v18 }
 0x4e2   :  { %v8699_v28 = vcombine.low %v3118_v21, %v3126_v60  ;;  %v3222_v37 = vld [vmem:[#allocation11 + $0xbf8] sm:$0xff] }
 0x4e3   :  { %6508 = vmatpush1.bf16.msra.mxu0 %v8585_v23  ;;  %v3141_v23 = vld [vmem:[#allocation11 + $0x970] sm:$0xff] }
 0x4e4   :  { %6590 = vmatpush1.bf16.msra.mxu1 %v8587_v24  ;;  %6509 = vmatprep.subr.bf16.mxu0 %v8602_v25  ;;  %v8700_v24 = vcombine.high %v3118_v21, %v3126_v60  ;;  %v3134_v25 = vld [vmem:[#allocation11 + $0x938] sm:$0xff]  ;;  %v8714_v29 = vcombine.high %v3133_v11, %v3141_v23  ;;  %v8713_v36 = vcombine.low %v3133_v11, %v3141_v23 }
 0x4e5   :  { %6591 = vmatprep.subr.bf16.mxu1 %v8604_v26  ;;  %v3142_v26 = vld [vmem:[#allocation11 + $0x978] sm:$0xff]  ;;  %v8777_v21 = vcombine.low %v3197_v0, %v3205_v1 }
 0x4e6   :  { %v8716_v30 = vcombine.high %v3134_v25, %v3142_v26 }
 0x4e7   :  { %6510 = vmatpush1.bf16.msra.mxu0 %v8601_v31  ;;  %v3149_v31 = vld [vmem:[#allocation11 + $0x9b0] sm:$0xff] }
 0x4e8   :  { %6592 = vmatpush1.bf16.msra.mxu1 %v8603_v33  ;;  %6511 = vmatprep.subr.bf16.mxu0 %v8618_v34  ;;  %v3157_v33 = vld [vmem:[#allocation11 + $0x9f0] sm:$0xff]  ;;  %v3150_v34 = vld [vmem:[#allocation11 + $0x9b8] sm:$0xff] }
 0x4e9   :  { %6593 = vmatprep.subr.bf16.mxu1 %v8620_v35  ;;  %v3158_v35 = vld [vmem:[#allocation11 + $0x9f8] sm:$0xff]  ;;  %v8730_v38 = vcombine.high %v3149_v31, %v3157_v33 }
 0x4ea   :  { %v8732_v39 = vcombine.high %v3150_v34, %v3158_v35 }
 0x4eb   :  { %6512 = vmatpush1.bf16.msra.mxu0 %v8617_v41  ;;  %v3173_v41 = vld [vmem:[#allocation11 + $0xa70] sm:$0xff] }
 0x4ec   :  { %6594 = vmatpush1.bf16.msra.mxu1 %v8619_v42  ;;  %6513 = vmatprep.subr.bf16.mxu0 %v8634_v43  ;;  %v3166_v42 = vld [vmem:[#allocation11 + $0xa38] sm:$0xff]  ;;  %v8746_v45 = vcombine.high %v3165_v40, %v3173_v41 }
 0x4ed   :  { %6595 = vmatprep.subr.bf16.mxu1 %v8636_v44  ;;  %v3174_v43 = vld [vmem:[#allocation11 + $0xa78] sm:$0xff]  ;;  %v8731_v44 = vcombine.low %v3150_v34, %v3158_v35  ;;  %v3245_v34 = vld [vmem:[#allocation11 + $0xcb0] sm:$0xff] }
 0x4ee   :  { %v8748_v51 = vcombine.high %v3166_v42, %v3174_v43  ;;  %v3253_v35 = vld [vmem:[#allocation11 + $0xcf0] sm:$0xff] }
 0x4ef   :  { %6514 = vmatpush1.bf16.msra.mxu0 %v8633_v54  ;;  %v3182_v54 = vld [vmem:[#allocation11 + $0xab8] sm:$0xff] }
 0x4f0   :  { %6596 = vmatpush1.bf16.msra.mxu1 %v8635_v56  ;;  %6515 = vmatprep.subr.bf16.mxu0 %v8650_v57  ;;  %v3190_v56 = vld [vmem:[#allocation11 + $0xaf8] sm:$0xff]  ;;  %v8745_v57 = vcombine.low %v3165_v40, %v3173_v41  ;;  %v8826_v40 = vcombine.high %v3245_v34, %v3253_v35 }
 0x4f1   :  { %6597 = vmatprep.subr.bf16.mxu1 %v8652_v58  ;;  %v8747_v58 = vcombine.low %v3166_v42, %v3174_v43  ;;  %v8764_v62 = vcombine.high %v3182_v54, %v3190_v56  ;;  %v3261_v42 = vld [vmem:[#allocation11 + $0xd30] sm:$0xff] }
 0x4f2   :  { %v3269_v43 = vld [vmem:[#allocation11 + $0xd70] sm:$0xff] }
 0x4f3   :  { %6516 = vmatpush1.bf16.msra.mxu0 %v8649_v2  ;;  %v3198_v2 = vld [vmem:[#allocation11 + $0xb38] sm:$0xff] }
 0x4f4   :  { %6598 = vmatpush1.bf16.msra.mxu1 %v8651_v3  ;;  %6517 = vmatprep.subr.bf16.mxu0 %v8666_v4  ;;  %v3206_v3 = vld [vmem:[#allocation11 + $0xb78] sm:$0xff]  ;;  %v8761_v4 = vcombine.low %v3181_v52, %v3189_v53  ;;  %v8842_v52 = vcombine.high %v3261_v42, %v3269_v43 }
 0x4f5   :  { %6599 = vmatprep.subr.bf16.mxu1 %v8668_v6  ;;  %v8763_v6 = vcombine.low %v3182_v54, %v3190_v56  ;;  %v8780_v10 = vcombine.high %v3198_v2, %v3206_v3  ;;  %v3277_v54 = vld [vmem:[#allocation11 + $0xdb0] sm:$0xff] }
 0x4f6   :  { %v3285_v56 = vld [vmem:[#allocation11 + $0xdf0] sm:$0xff] }
 0x4f7   :  { %6518 = vmatpush1.bf16.msra.mxu0 %v8665_v15  ;;  %v3221_v15 = vld [vmem:[#allocation11 + $0xbf0] sm:$0xff]  ;;  %v8858_v0 = vcombine.high %v3277_v54, %v3285_v56 }
 0x4f8   :  { %6600 = vmatpush1.bf16.msra.mxu1 %v8667_v16  ;;  %6528 = vmatprep.subr.bf16.mxu0 %v8682_v48  ;;  %v8794_v11 = vcombine.high %v3213_v12, %v3221_v15 }
 0x4f9   :  { %6610 = vmatprep.subr.bf16.mxu1 %v8684_v17  ;;  %v3214_v17 = vld [vmem:[#allocation11 + $0xbb8] sm:$0xff] }
 0x4fa   :  { %6520 = vmatmul.mubr.bf16.vlgmr.msra.gmra.mrb[20].mxu0 %v10454_v61 }
 0x4fb   :  { %6602 = vmatmul.mubr.bf16.vlgmr.msra.gmra.mrb[20].mxu1 %v10454_v61  ;;  %6529 = vmatpush1.bf16.msra.mxu0 %v8681_v19  ;;  %v8715_v61 = vcombine.low %v3134_v25, %v3142_v26  ;;  %v3229_v25 = vld [vmem:[#allocation11 + $0xc30] sm:$0xff] }
 0x4fc   :  { %6560 = vmatprep.mubr.bf16.mxu0 %v10458_v5  ;;  %6611 = vmatpush1.bf16.msra.mxu1 %v8683_v22  ;;  %v3237_v26 = vld [vmem:[#allocation11 + $0xc70] sm:$0xff] }
 0x4fd   :  { %6642 = vmatprep.mubr.bf16.mxu1 %v10458_v5  ;;  %6530 = vmatprep.subr.bf16.mxu0 %v8698_v55  ;;  %v8729_v5 = vcombine.low %v3149_v31, %v3157_v33  ;;  %v8779_v55 = vcombine.low %v3198_v2, %v3206_v3  ;;  %v8810_v31 = vcombine.high %v3229_v25, %v3237_v26  ;;  %v3293_v2 = vld [vmem:[#allocation11 + $0xe30] sm:$0xff] }
 0x4fe   :  { %6612 = vmatprep.subr.bf16.mxu1 %v8700_v24  ;;  %v8796_v24 = vcombine.high %v3214_v17, %v3222_v37  ;;  %v3301_v3 = vld [vmem:[#allocation11 + $0xe70] sm:$0xff] }
 0x4ff   :  { %6531 = vmatpush1.bf16.msra.mxu0 %v8697_v27  ;;  %v3230_v27 = vld [vmem:[#allocation11 + $0xc38] sm:$0xff] }
 0x500   :  { %6613 = vmatpush1.bf16.msra.mxu1 %v8699_v28  ;;  %6532 = vmatprep.subr.bf16.mxu0 %v8714_v29  ;;  %v3238_v28 = vld [vmem:[#allocation11 + $0xc78] sm:$0xff]  ;;  %v8793_v29 = vcombine.low %v3213_v12, %v3221_v15  ;;  %v8874_v12 = vcombine.high %v3293_v2, %v3301_v3 }
 0x501   :  { %6614 = vmatprep.subr.bf16.mxu1 %v8716_v30  ;;  %v8795_v30 = vcombine.low %v3214_v17, %v3222_v37  ;;  %v8812_v33 = vcombine.high %v3230_v27, %v3238_v28  ;;  %v3309_v17 = vld [vmem:[#allocation11 + $0xeb0] sm:$0xff] }
 0x502   :  { %v3317_v37 = vld [vmem:[#allocation11 + $0xef0] sm:$0xff] }
 0x503   :  { %6533 = vmatpush1.bf16.msra.mxu0 %v8713_v36  ;;  %v3246_v36 = vld [vmem:[#allocation11 + $0xcb8] sm:$0xff] }
 0x504   :  { %6615 = vmatpush1.bf16.msra.mxu1 %v8715_v61  ;;  %6534 = vmatprep.subr.bf16.mxu0 %v8730_v38  ;;  %v3254_v61 = vld [vmem:[#allocation11 + $0xcf8] sm:$0xff]  ;;  %v8809_v38 = vcombine.low %v3229_v25, %v3237_v26 }
 0x505   :  { %6616 = vmatprep.subr.bf16.mxu1 %v8732_v39  ;;  %v8811_v39 = vcombine.low %v3230_v27, %v3238_v28  ;;  %v8828_v41 = vcombine.high %v3246_v36, %v3254_v61  ;;  %v3326_v25 = vld [vmem:[#allocation11 + $0xf38] sm:$0xff]  ;;  %v10509_v27 = vld [vmem:[#allocation13] sm:$0xff]  ;;  %v8889_v28 = vcombine.low %v3309_v17, %v3317_v37 }
 0x506   :  { %v3334_v26 = vld [vmem:[#allocation11 + $0xf78] sm:$0xff] }
 0x507   :  { %6535 = vmatpush1.bf16.msra.mxu0 %v8729_v5  ;;  %v3262_v5 = vld [vmem:[#allocation11 + $0xd38] sm:$0xff] }
 0x508   :  { %6617 = vmatpush1.bf16.msra.mxu1 %v8731_v44  ;;  %6536 = vmatprep.subr.bf16.mxu0 %v8746_v45  ;;  %v3270_v44 = vld [vmem:[#allocation11 + $0xd78] sm:$0xff]  ;;  %v8825_v45 = vcombine.low %v3245_v34, %v3253_v35  ;;  %v3349_v34 = vld [vmem:[#allocation11 + $0xff0] sm:$0xff]  ;;  %v3362_v35 = vrot.slane %v10509_v27, %v10423_v49 }
 0x509   :  { %6618 = vmatprep.subr.bf16.mxu1 %v8748_v51  ;;  %v8827_v51 = vcombine.low %v3246_v36, %v3254_v61  ;;  %v8844_v53 = vcombine.high %v3262_v5, %v3270_v44  ;;  %v3342_v36 = vld [vmem:[#allocation11 + $0xfb8] sm:$0xff] }
 0x50a   :  { %v3350_v61 = vld [vmem:[#allocation11 + $0xff8] sm:$0xff] }
 0x50b   :  { %6537 = vmatpush1.bf16.msra.mxu0 %v8745_v57  ;;  %v3278_v57 = vld [vmem:[#allocation11 + $0xdb8] sm:$0xff] }
 0x50c   :  { %6619 = vmatpush1.bf16.msra.mxu1 %v8747_v58  ;;  %6538 = vmatprep.subr.bf16.mxu0 %v8762_v59  ;;  %v3286_v58 = vld [vmem:[#allocation11 + $0xdf8] sm:$0xff]  ;;  %v8841_v59 = vcombine.low %v3261_v42, %v3269_v43  ;;  %v8924_v42 = vcombine.high %v3342_v36, %v3350_v61  ;;  %v9239_v43 = vadd.f32 %v10489_v13, %v3362_v35 }
 0x50d   :  { %v10501_v9 = vpop.f32.mrb[12].mxu0  ;;  %6620 = vmatprep.subr.bf16.mxu1 %v8764_v62  ;;  %v8843_v62 = vcombine.low %v3262_v5, %v3270_v44  ;;  %v8860_v1 = vcombine.high %v3278_v57, %v3286_v58 }
 0x50e   :  { %v10503_v16 = vpop.f32.mrb[12].mxu1  ;;  %v10505_v48 = vpop.f32.mrb[13].mxu0 }
 0x50f   :  { %v10507_v18 = vpop.f32.mrb[13].mxu1  ;;  %v6238_v19 = vpop.f32.mrb[14].mxu0  ;;  %6539 = vmatpush1.bf16.msra.mxu0 %v8761_v4  ;;  %v3294_v4 = vld [vmem:[#allocation11 + $0xe38] sm:$0xff] }
 0x510   :  { %v6320_v60 = vpop.f32.mrb[14].mxu1  ;;  %6621 = vmatpush1.bf16.msra.mxu1 %v8763_v6  ;;  %v6239_v22 = vpop.f32.mrb[15].mxu0  ;;  %6540 = vmatprep.subr.bf16.mxu0 %v8778_v7  ;;  %v3302_v6 = vld [vmem:[#allocation11 + $0xe78] sm:$0xff]  ;;  %v8857_v7 = vcombine.low %v3277_v54, %v3285_v56  ;;  %v9871_v56 = vld [vmem:[#allocation14] sm:$0xff]  }
 0x511   :  { %v6321_v23 = vpop.f32.mrb[15].mxu1  ;;  %6622 = vmatprep.subr.bf16.mxu1 %v8780_v10  ;;  %v8859_v10 = vcombine.low %v3278_v57, %v3286_v58  ;;  %v8876_v15 = vcombine.high %v3294_v4, %v3302_v6  ;;  %v3310_v19 = vld [vmem:[#allocation11 + $0xeb8] sm:$0xff]  ;;  %v8873_v60 = vcombine.low %v3293_v2, %v3301_v3  ;;  %v8875_v22 = vcombine.low %v3294_v4, %v3302_v6  ;;  %v9872_v57 = vld [vmem:[#allocation14 + $0x80] sm:$0xff]   ;;  %v9878_v2 = vld [vmem:[#allocation14 + $0xd0] sm:$0xff]  }
 0x512   :  { %v3325_v23 = vld [vmem:[#allocation11 + $0xf30] sm:$0xff]  ;;  %v9873_v58 = vld [vmem:[#allocation14 + $0x48] sm:$0xff]   ;;  %v9879_v3 = vld [vmem:[#allocation14 + $0x10] sm:$0xff]  }
 0x513   :  { %6541 = vmatpush1.bf16.msra.mxu0 %v8777_v21  ;;  %v3318_v21 = vld [vmem:[#allocation11 + $0xef8] sm:$0xff]  ;;  %v9880_v4 = vld [vmem:[#allocation14 + $0x90] sm:$0xff]   ;;  %v9881_v6 = vld [vmem:[#allocation14 + $0x58] sm:$0xff]  }
 0x514   :  { %6623 = vmatpush1.bf16.msra.mxu1 %v8779_v55  ;;  %6542 = vmatprep.subr.bf16.mxu0 %v8794_v11  ;;  %v8890_v55 = vcombine.high %v3309_v17, %v3317_v37  ;;  %v8892_v11 = vcombine.high %v3310_v19, %v3318_v21  ;;  %v9887_v17 = vld [vmem:[#allocation14 + $0x20] sm:$0xff]  }
 0x515   :  { %6624 = vmatprep.subr.bf16.mxu1 %v8796_v24  ;;  %v3333_v24 = vld [vmem:[#allocation11 + $0xf70] sm:$0xff] }
 0x516   :  { %v9888_v37 = vld [vmem:[#allocation14 + $0xa0] sm:$0xff]  }
 0x517   :  { %6543 = vmatpush1.bf16.msra.mxu0 %v8793_v29  ;;  %v8891_v29 = vcombine.low %v3310_v19, %v3318_v21  ;;  %v9889_v19 = vld [vmem:[#allocation14 + $0x68] sm:$0xff]  }
 0x518   :  { %6625 = vmatpush1.bf16.msra.mxu1 %v8795_v30  ;;  %6544 = vmatprep.subr.bf16.mxu0 %v8810_v31  ;;  %v8906_v30 = vcombine.high %v3325_v23, %v3333_v24  ;;  %v8908_v31 = vcombine.high %v3326_v25, %v3334_v26  ;;  %v9890_v21 = vld [vmem:[#allocation14 + $0xe8] sm:$0xff]  }
 0x519   :  { %6626 = vmatprep.subr.bf16.mxu1 %v8812_v33  ;;  %v3341_v33 = vld [vmem:[#allocation11 + $0xfb0] sm:$0xff] }
 0x51a   :  { %v8921_v44 = vcombine.low %v3341_v33, %v3349_v34 }
 0x51b   :  { %6545 = vmatpush1.bf16.msra.mxu0 %v8809_v38  ;;  %v3370_v38 = vrot.slane %v10509_v27, %v10426_v50 }
 0x51c   :  { %6627 = vmatpush1.bf16.msra.mxu1 %v8811_v39  ;;  %6546 = vmatprep.subr.bf16.mxu0 %v8826_v40  ;;  %v8905_v39 = vcombine.low %v3325_v23, %v3333_v24  ;;  %v8907_v40 = vcombine.low %v3326_v25, %v3334_v26  ;;  %v9892_v23 = vld [vmem:[#allocation14 + $0xa8] sm:$0xff]   ;;  %v9893_v24 = vld [vmem:[#allocation14 + $0x70] sm:$0xff]   ;;  %v3366_v25 = vrot.slane %v10509_v27, %v10437_v63 }
 0x51d   :  { %6628 = vmatprep.subr.bf16.mxu1 %v8828_v41  ;;  %v8922_v41 = vcombine.high %v3341_v33, %v3349_v34  ;;  %v9241_v5 = vadd.f32 %v10491_v14, %v3370_v38  ;;  %v9874_v14 = vld [vmem:[#allocation14 + $0xc8] sm:$0xff]   ;;  %v9894_v26 = vld [vmem:[#allocation14 + $0xf0] sm:$0xff]   ;;  %v9897_v34 = vld [vmem:[#allocation14 + $0x78] sm:$0xff]  }
 0x51e   :  { %v9896_v33 = vld [vmem:[#allocation14 + $0xb0] sm:$0xff]   ;;  %v9240_v35 = vadd.f32 %v10487_v32, %v3366_v25  ;;  %v9903_v32 = vld [vmem:[#allocation14 + $0x100] sm:$0xff]  }
 0x51f   :  { %6547 = vmatpush1.bf16.msra.mxu0 %v8825_v45  ;;  %v8923_v45 = vcombine.low %v3342_v36, %v3350_v61  ;;  %v6654_v54 = vmax.f32 %v9241_v5, 0.0  ;;  %v9898_v36 = vld [vmem:[#allocation14 + $0xf8] sm:$0xff]   ;;  %v9928_v25 = vld [vmem:[#allocation14 + $0x1b0] sm:$0xff]  }
 0x520   :  { %6629 = vmatpush1.bf16.msra.mxu1 %v8827_v51  ;;  %6548 = vmatprep.subr.bf16.mxu0 %v8842_v52  ;;  %v9869_v51 = vld [vmem:[#allocation14 + $0x40] sm:$0xff]  }
 0x521   :  { %6630 = vmatprep.subr.bf16.mxu1 %v8844_v53  ;;  %v9870_v52 = vld [vmem:[#allocation14 + $0xc0] sm:$0xff]   ;;  %v6652_v53 = vmax.f32 %v9239_v43, 0.0 }
 0x522   :  { %v9902_v43 = vld [vmem:[#allocation14 + $0x1c0] sm:$0xff]  }
 0x523   :  { %6549 = vmatpush1.bf16.msra.mxu0 %v8841_v59  ;;  %v6668_v13 = vpack.c.bf16 %v6652_v53, %v6652_v53  ;;  %v6670_v59 = vpack.c.bf16 %v6654_v54, %v6654_v54  ;;  %v9906_v53 = vld [vmem:[#allocation14 + $0x1c8] sm:$0xff]  }
 0x524   :  { %6631 = vmatpush1.bf16.msra.mxu1 %v8843_v62  ;;  %6550 = vmatprep.subr.bf16.mxu0 %v8858_v0  ;;  %v9875_v62 = vld [vmem:[#allocation14 + $0x8] sm:$0xff]  }
 0x525   :  { %6632 = vmatprep.subr.bf16.mxu1 %v8860_v1  ;;  %v9876_v0 = vld [vmem:[#allocation14 + $0x88] sm:$0xff]   ;;  %v9877_v1 = vld [vmem:[#allocation14 + $0x50] sm:$0xff]  }
 0x527   :  { %6551 = vmatpush1.bf16.msra.mxu0 %v8857_v7  ;;  %v9882_v7 = vld [vmem:[#allocation14 + $0xd8] sm:$0xff]  }
 0x528   :  { %6633 = vmatpush1.bf16.msra.mxu1 %v8859_v10  ;;  %6552 = vmatprep.subr.bf16.mxu0 %v8874_v12  ;;  %v9884_v10 = vld [vmem:[#allocation14 + $0x98] sm:$0xff]   ;;  %v9885_v12 = vld [vmem:[#allocation14 + $0x60] sm:$0xff]  }
 0x529   :  { %6634 = vmatprep.subr.bf16.mxu1 %v8876_v15  ;;  %v9886_v15 = vld [vmem:[#allocation14 + $0xe0] sm:$0xff]  }
 0x52b   :  { %6553 = vmatpush1.bf16.msra.mxu0 %v8873_v60  ;;  %v3377_v60 = vsub.s32 5, %v10415_v46 }
 0x52c   :  { %6635 = vmatpush1.bf16.msra.mxu1 %v8875_v22  ;;  %6554 = vmatprep.subr.bf16.mxu0 %v8890_v55  ;;  %v3385_v22 = vsub.s32 7, %v10415_v46  ;;  %v9891_v55 = vld [vmem:[#allocation14 + $0x28] sm:$0xff]  }
 0x52d   :  { %6636 = vmatprep.subr.bf16.mxu1 %v8892_v11  ;;  %v3358_v11 = vrot.slane %v10509_v27, %v10418_v47 }
 0x52f   :  { %6555 = vmatpush1.bf16.msra.mxu0 %v8889_v28  ;;  %v3378_v28 = vrot.slane %v10509_v27, %v3377_v60 }
 0x530   :  { %6637 = vmatpush1.bf16.msra.mxu1 %v8891_v29  ;;  %6556 = vmatprep.subr.bf16.mxu0 %v8906_v30  ;;  %v3386_v29 = vrot.slane %v10509_v27, %v3385_v22  ;;  %v9895_v30 = vld [vmem:[#allocation14 + $0x30] sm:$0xff]  }
 0x531   :  { %6638 = vmatprep.subr.bf16.mxu1 %v8908_v31  ;;  %v9238_v31 = vadd.f32 %v10485_v8, %v3358_v11  ;;  %v9243_v61 = vadd.f32 %v10505_v48, %v3378_v28  ;;  %v6653_v8 = vmax.f32 %v9240_v35, 0.0  ;;  %v9904_v48 = vld [vmem:[#allocation14 + $0x180] sm:$0xff]   ;;  %v9926_v11 = vld [vmem:[#allocation14 + $0x1f0] sm:$0xff]  }
 0x532   :  { %v9245_v38 = vadd.f32 %v10507_v18, %v3386_v29  ;;  %v9905_v18 = vld [vmem:[#allocation14 + $0x148] sm:$0xff]   ;;  %v9930_v29 = vld [vmem:[#allocation14 + $0x1f8] sm:$0xff]   ;;  %v9934_v35 = vld [vmem:[#allocation14 + $0x2c0] sm:$0xff]  }
 0x533   :  { %6557 = vmatpush1.bf16.msra.mxu0 %v8905_v39  ;;  %v9899_v39 = vld [vmem:[#allocation14 + $0x38] sm:$0xff]   ;;  %v6656_v5 = vmax.f32 %v9243_v61, 0.0  ;;  %v9936_v61 = vld [vmem:[#allocation14 + $0x280] sm:$0xff]  }
 0x534   :  { %6639 = vmatpush1.bf16.msra.mxu1 %v8907_v40  ;;  %6558 = vmatprep.subr.bf16.mxu0 %v8922_v41  ;;  %v6651_v40 = vmax.f32 %v9238_v31, 0.0  ;;  %v9900_v41 = vld [vmem:[#allocation14 + $0xb8] sm:$0xff]  }
 0x535   :  { %6640 = vmatprep.subr.bf16.mxu1 %v8924_v42  ;;  %v9901_v42 = vld [vmem:[#allocation14 + $0x140] sm:$0xff]  }
 0x537   :  { %6559 = vmatpush1.bf16.msra.mxu0 %v8921_v44  ;;  %v6658_v44 = vmax.f32 %v9245_v38, 0.0  ;;  %v9937_v38 = vld [vmem:[#allocation14 + $0x248] sm:$0xff]  }
 0x538   :  { %6641 = vmatpush1.bf16.msra.mxu1 %v8923_v45  ;;  %9054 = vmatprep.subr.bf16.mxu0 %v9869_v51  ;;  %v6667_v45 = vpack.c.bf16 %v6651_v40, %v6651_v40  ;;  %v6669_v51 = vpack.c.bf16 %v6653_v8, %v6653_v8  ;;  %v9939_v40 = vld [vmem:[#allocation14 + $0x208] sm:$0xff]   ;;  %v9942_v8 = vld [vmem:[#allocation14 + $0x2d0] sm:$0xff]  }
 0x539   :  { %9076 = vmatprep.subr.bf16.mxu1 %v9870_v52  ;;  %v6672_v52 = vpack.c.bf16 %v6656_v5, %v6656_v5  ;;  %v6674_v54 = vpack.c.bf16 %v6658_v44, %v6658_v44  ;;  %v9944_v5 = vld [vmem:[#allocation14 + $0x290] sm:$0xff]   ;;  %v9945_v44 = vld [vmem:[#allocation14 + $0x258] sm:$0xff]  }
 0x53a   :  { %6561 = vmatmul.mubr.bf16.vlgmr.msra.gmra.mrb[20].mxu0 %v10467_v20 }
 0x53b   :  { %6643 = vmatmul.mubr.bf16.vlgmr.msra.gmra.mrb[20].mxu1 %v10467_v20  ;;  %9055 = vmatpush3.bf16.msra.mxu0 %v9871_v56  ;;  %v9883_v20 = vld [vmem:[#allocation14 + $0x18] sm:$0xff]   ;;  %v9907_v56 = vld [vmem:[#allocation14 + $0x108] sm:$0xff]  }
 0x53c   :  { %7746 = vmatprep.mubr.bf16.mxu0 %v6668_v13  ;;  %9077 = vmatpush3.bf16.msra.mxu1 %v9872_v57  ;;  %v9908_v57 = vld [vmem:[#allocation14 + $0x188] sm:$0xff]   ;;  %v9910_v13 = vld [vmem:[#allocation14 + $0x1d0] sm:$0xff]  }
 0x53d   :  { %7786 = vmatprep.mubr.bf16.mxu1 %v6670_v59  ;;  %9056 = vmatprep.subr.bf16.mxu0 %v9873_v58  ;;  %v9909_v58 = vld [vmem:[#allocation14 + $0x150] sm:$0xff]  }
 0x53e   :  { %9078 = vmatprep.subr.bf16.mxu1 %v9874_v14  ;;  %v9911_v14 = vld [vmem:[#allocation14 + $0x110] sm:$0xff]  }
 0x53f   :  { %9057 = vmatpush3.bf16.msra.mxu0 %v9875_v62  ;;  %v9912_v59 = vld [vmem:[#allocation14 + $0x190] sm:$0xff]   ;;  %v9913_v62 = vld [vmem:[#allocation14 + $0x158] sm:$0xff]  }
 0x540   :  { %9079 = vmatpush3.bf16.msra.mxu1 %v9876_v0  ;;  %9058 = vmatprep.subr.bf16.mxu0 %v9877_v1  ;;  %v9914_v0 = vld [vmem:[#allocation14 + $0x1d8] sm:$0xff]  }
 0x541   :  { %9080 = vmatprep.subr.bf16.mxu1 %v9878_v2  ;;  %v9915_v1 = vld [vmem:[#allocation14 + $0x118] sm:$0xff]  }
 0x542   :  { %v9916_v2 = vld [vmem:[#allocation14 + $0x198] sm:$0xff]  }
 0x543   :  { %9059 = vmatpush3.bf16.msra.mxu0 %v9879_v3  ;;  %v9917_v3 = vld [vmem:[#allocation14 + $0x160] sm:$0xff]  }
 0x544   :  { %9081 = vmatpush3.bf16.msra.mxu1 %v9880_v4  ;;  %9060 = vmatprep.subr.bf16.mxu0 %v9881_v6  ;;  %v9918_v4 = vld [vmem:[#allocation14 + $0x1e0] sm:$0xff]  }
 0x545   :  { %9082 = vmatprep.subr.bf16.mxu1 %v9882_v7  ;;  %v9919_v6 = vld [vmem:[#allocation14 + $0x120] sm:$0xff]   ;;  %v3373_v7 = vsub.s32 4, %v10415_v46 }
 0x547   :  { %9061 = vmatpush3.bf16.msra.mxu0 %v9883_v20  ;;  %v9920_v20 = vld [vmem:[#allocation14 + $0x1a0] sm:$0xff]  }
 0x548   :  { %9083 = vmatpush3.bf16.msra.mxu1 %v9884_v10  ;;  %9062 = vmatprep.subr.bf16.mxu0 %v9885_v12  ;;  %v9921_v10 = vld [vmem:[#allocation14 + $0x168] sm:$0xff]   ;;  %v3381_v12 = vsub.s32 6, %v10415_v46 }
 0x549   :  { %9084 = vmatprep.subr.bf16.mxu1 %v9886_v15  ;;  %v9922_v15 = vld [vmem:[#allocation14 + $0x1e8] sm:$0xff]  }
 0x54b   :  { %9063 = vmatpush3.bf16.msra.mxu0 %v9887_v17  ;;  %v9923_v17 = vld [vmem:[#allocation14 + $0x128] sm:$0xff]  }
 0x54c   :  { %9085 = vmatpush3.bf16.msra.mxu1 %v9888_v37  ;;  %9064 = vmatprep.subr.bf16.mxu0 %v9889_v19  ;;  %v3374_v37 = vrot.slane %v10509_v27, %v3373_v7  ;;  %v9924_v19 = vld [vmem:[#allocation14 + $0x1a8] sm:$0xff]  }
 0x54d   :  { %9086 = vmatprep.subr.bf16.mxu1 %v9890_v21  ;;  %v9925_v21 = vld [vmem:[#allocation14 + $0x170] sm:$0xff]  }
 0x54f   :  { %9065 = vmatpush3.bf16.msra.mxu0 %v9891_v55  ;;  %v3382_v55 = vrot.slane %v10509_v27, %v3381_v12  ;;  %v9932_v27 = vld [vmem:[#allocation14 + $0x1b8] sm:$0xff]  }
 0x550   :  { %9087 = vmatpush3.bf16.msra.mxu1 %v9892_v23  ;;  %9066 = vmatprep.subr.bf16.mxu0 %v9893_v24  ;;  %v9927_v23 = vld [vmem:[#allocation14 + $0x130] sm:$0xff]   ;;  %v9242_v24 = vadd.f32 %v10501_v9, %v3374_v37  ;;  %v9935_v9 = vld [vmem:[#allocation14 + $0x200] sm:$0xff]  }
 0x551   :  { %9088 = vmatprep.subr.bf16.mxu1 %v9894_v26  ;;  %v9929_v26 = vld [vmem:[#allocation14 + $0x178] sm:$0xff]   ;;  %v9244_v28 = vadd.f32 %v10503_v16, %v3382_v55 }
 0x552   :  { %v6655_v31 = vmax.f32 %v9242_v24, 0.0 }
 0x553   :  { %9067 = vmatpush3.bf16.msra.mxu0 %v9895_v30  ;;  %v9931_v30 = vld [vmem:[#allocation14 + $0x138] sm:$0xff]  }
 0x554   :  { %9089 = vmatpush3.bf16.msra.mxu1 %v9896_v33  ;;  %9068 = vmatprep.subr.bf16.mxu0 %v9897_v34  ;;  %v9933_v33 = vld [vmem:[#allocation14 + $0x240] sm:$0xff]   ;;  %v6657_v34 = vmax.f32 %v9244_v28, 0.0 }
 0x555   :  { %9090 = vmatprep.subr.bf16.mxu1 %v9898_v36  ;;  %v6671_v36 = vpack.c.bf16 %v6655_v31, %v6655_v31  ;;  %v9965_v31 = vld [vmem:[#allocation14 + $0x340] sm:$0xff]  }
 0x556   :  { %v6673_v16 = vpack.c.bf16 %v6657_v34, %v6657_v34  ;;  %v9967_v34 = vld [vmem:[#allocation14 + $0x300] sm:$0xff]  }
 0x557   :  { %9069 = vmatpush3.bf16.msra.mxu0 %v9899_v39  ;;  %v9938_v39 = vld [vmem:[#allocation14 + $0x2c8] sm:$0xff]  }
 0x558   :  { %9091 = vmatpush3.bf16.msra.mxu1 %v9900_v41  ;;  %9098 = vmatprep.subr.bf16.mxu0 %v9901_v42  ;;  %v9940_v41 = vld [vmem:[#allocation14 + $0x288] sm:$0xff]   ;;  %v9941_v42 = vld [vmem:[#allocation14 + $0x250] sm:$0xff]  }
 0x559   :  { %9120 = vmatprep.subr.bf16.mxu1 %v9902_v43  ;;  %v9943_v43 = vld [vmem:[#allocation14 + $0x210] sm:$0xff]  }
 0x55a   :  { %7747 = vmatmul.mubr.bf16.vlgmr.msra.gmra.mrb[24].mxu0 %v6667_v45  ;;  %v9947_v45 = vld [vmem:[#allocation14 + $0x218] sm:$0xff]  }
 0x55b   :  { %7787 = vmatmul.mubr.bf16.vlgmr.msra.gmra.mrb[24].mxu1 %v6669_v51  ;;  %9099 = vmatpush3.bf16.msra.mxu0 %v9903_v32  ;;  %v9946_v32 = vld [vmem:[#allocation14 + $0x2d8] sm:$0xff]   ;;  %v9949_v51 = vld [vmem:[#allocation14 + $0x260] sm:$0xff]  }
 0x55c   :  { %7826 = vmatprep.mubr.bf16.mxu0 %v6672_v52  ;;  %9121 = vmatpush3.bf16.msra.mxu1 %v9904_v48  ;;  %v9948_v48 = vld [vmem:[#allocation14 + $0x298] sm:$0xff]   ;;  %v9951_v52 = vld [vmem:[#allocation14 + $0x220] sm:$0xff]  }
 0x55d   :  { %7866 = vmatprep.mubr.bf16.mxu1 %v6674_v54  ;;  %9100 = vmatprep.subr.bf16.mxu0 %v9905_v18  ;;  %v9950_v18 = vld [vmem:[#allocation14 + $0x2e0] sm:$0xff]   ;;  %v10545_v54 = vld [vmem:[#allocation13 + $0x8] sm:$0xff] }
 0x55e   :  { %9122 = vmatprep.subr.bf16.mxu1 %v9906_v53  ;;  %v9952_v53 = vld [vmem:[#allocation14 + $0x2a0] sm:$0xff]  }
 0x55f   :  { %9101 = vmatpush3.bf16.msra.mxu0 %v9907_v56  ;;  %v9953_v56 = vld [vmem:[#allocation14 + $0x268] sm:$0xff]  }
 0x560   :  { %9123 = vmatpush3.bf16.msra.mxu1 %v9908_v57  ;;  %9102 = vmatprep.subr.bf16.mxu0 %v9909_v58  ;;  %v9954_v57 = vld [vmem:[#allocation14 + $0x2e8] sm:$0xff]   ;;  %v3394_v58 = vrot.slane %v10545_v54, %v10423_v49 }
 0x561   :  { %9124 = vmatprep.subr.bf16.mxu1 %v9910_v13  ;;  %v9955_v13 = vld [vmem:[#allocation14 + $0x228] sm:$0xff]  }
 0x563   :  { %9103 = vmatpush3.bf16.msra.mxu0 %v9911_v14  ;;  %v3390_v14 = vrot.slane %v10545_v54, %v10418_v47 }
 0x564   :  { %9125 = vmatpush3.bf16.msra.mxu1 %v9912_v59  ;;  %9104 = vmatprep.subr.bf16.mxu0 %v9913_v62  ;;  %v3402_v59 = vrot.slane %v10545_v54, %v10426_v50  ;;  %v9956_v62 = vld [vmem:[#allocation14 + $0x2a8] sm:$0xff]  }
 0x565   :  { %9126 = vmatprep.subr.bf16.mxu1 %v9914_v0  ;;  %v9957_v0 = vld [vmem:[#allocation14 + $0x270] sm:$0xff]  }
 0x567   :  { %9105 = vmatpush3.bf16.msra.mxu0 %v9915_v1 }
 0x568   :  { %9127 = vmatpush3.bf16.msra.mxu1 %v9916_v2  ;;  %9106 = vmatprep.subr.bf16.mxu0 %v9917_v3  ;;  %v3398_v2 = vrot.slane %v10545_v54, %v10437_v63  ;;  %v9958_v3 = vld [vmem:[#allocation14 + $0x2f0] sm:$0xff]  }
 0x569   :  { %9128 = vmatprep.subr.bf16.mxu1 %v9918_v4 }
 0x56b   :  { %9107 = vmatpush3.bf16.msra.mxu0 %v9919_v6 }
 0x56c   :  { %9129 = vmatpush3.bf16.msra.mxu1 %v9920_v20  ;;  %9108 = vmatprep.subr.bf16.mxu0 %v9921_v10 }
 0x56d   :  { %9130 = vmatprep.subr.bf16.mxu1 %v9922_v15  ;;  %v9959_v15 = vld [vmem:[#allocation14 + $0x230] sm:$0xff]  }
 0x56f   :  { %9109 = vmatpush3.bf16.msra.mxu0 %v9923_v17 }
 0x570   :  { %9131 = vmatpush3.bf16.msra.mxu1 %v9924_v19  ;;  %9110 = vmatprep.subr.bf16.mxu0 %v9925_v21  ;;  %v9960_v19 = vld [vmem:[#allocation14 + $0x2b0] sm:$0xff]   ;;  %v9961_v21 = vld [vmem:[#allocation14 + $0x278] sm:$0xff]  }
 0x571   :  { %9132 = vmatprep.subr.bf16.mxu1 %v9926_v11 }
 0x573   :  { %9111 = vmatpush3.bf16.msra.mxu0 %v9927_v23  ;;  %v9962_v23 = vld [vmem:[#allocation14 + $0x2f8] sm:$0xff]  }
 0x574   :  { %9133 = vmatpush3.bf16.msra.mxu1 %v9928_v25  ;;  %9112 = vmatprep.subr.bf16.mxu0 %v9929_v26  ;;  %v9963_v26 = vld [vmem:[#allocation14 + $0x238] sm:$0xff]  }
 0x575   :  { %9134 = vmatprep.subr.bf16.mxu1 %v9930_v29 }
 0x577   :  { %9113 = vmatpush3.bf16.msra.mxu0 %v9931_v30  ;;  %v9964_v30 = vld [vmem:[#allocation14 + $0x2b8] sm:$0xff]  }
 0x578   :  { %9135 = vmatpush3.bf16.msra.mxu1 %v9932_v27  ;;  %9142 = vmatprep.subr.bf16.mxu0 %v9933_v33  ;;  %v9966_v33 = vld [vmem:[#allocation14 + $0x3c0] sm:$0xff]  }
 0x579   :  { %9164 = vmatprep.subr.bf16.mxu1 %v9934_v35 }
 0x57a   :  { %7827 = vmatmul.mubr.bf16.vlgmr.msra.gmra.mrb[28].mxu0 %v6671_v36  ;;  %v9969_v36 = vld [vmem:[#allocation14 + $0x348] sm:$0xff]  }
 0x57b   :  { %7867 = vmatmul.mubr.bf16.vlgmr.msra.gmra.mrb[28].mxu1 %v6673_v16  ;;  %9143 = vmatpush3.bf16.msra.mxu0 %v9935_v9  ;;  %v9968_v9 = vld [vmem:[#allocation14 + $0x380] sm:$0xff]   ;;  %v9971_v16 = vld [vmem:[#allocation14 + $0x308] sm:$0xff]  }
 0x57c   :  { %9165 = vmatpush3.bf16.msra.mxu1 %v9936_v61  ;;  %9144 = vmatprep.subr.bf16.mxu0 %v9937_v38  ;;  %v9970_v38 = vld [vmem:[#allocation14 + $0x3c8] sm:$0xff]  }
 0x57d   :  { %9166 = vmatprep.subr.bf16.mxu1 %v9938_v39  ;;  %v9972_v39 = vld [vmem:[#allocation14 + $0x388] sm:$0xff]  }
 0x57f   :  { %9145 = vmatpush3.bf16.msra.mxu0 %v9939_v40  ;;  %v9973_v40 = vld [vmem:[#allocation14 + $0x350] sm:$0xff]  }
 0x580   :  { %9167 = vmatpush3.bf16.msra.mxu1 %v9940_v41  ;;  %9146 = vmatprep.subr.bf16.mxu0 %v9941_v42  ;;  %v9974_v41 = vld [vmem:[#allocation14 + $0x3d0] sm:$0xff]  }
 0x581   :  { %9168 = vmatprep.subr.bf16.mxu1 %v9942_v8  ;;  %v9975_v42 = vld [vmem:[#allocation14 + $0x310] sm:$0xff]  }
 0x582   :  { %v9976_v8 = vld [vmem:[#allocation14 + $0x390] sm:$0xff]  }
 0x583   :  { %9147 = vmatpush3.bf16.msra.mxu0 %v9943_v43  ;;  %v9977_v43 = vld [vmem:[#allocation14 + $0x358] sm:$0xff]  }
 0x584   :  { %9169 = vmatpush3.bf16.msra.mxu1 %v9944_v5  ;;  %9148 = vmatprep.subr.bf16.mxu0 %v9945_v44  ;;  %v9978_v5 = vld [vmem:[#allocation14 + $0x3d8] sm:$0xff]  }
 0x585   :  { %9170 = vmatprep.subr.bf16.mxu1 %v9946_v32  ;;  %v9979_v44 = vld [vmem:[#allocation14 + $0x318] sm:$0xff]  }
 0x586   :  { %v9980_v32 = vld [vmem:[#allocation14 + $0x398] sm:$0xff]  }
 0x587   :  { %9149 = vmatpush3.bf16.msra.mxu0 %v9947_v45  ;;  %v9981_v45 = vld [vmem:[#allocation14 + $0x360] sm:$0xff]  }
 0x588   :  { %9171 = vmatpush3.bf16.msra.mxu1 %v9948_v48  ;;  %9150 = vmatprep.subr.bf16.mxu0 %v9949_v51  ;;  %v9982_v48 = vld [vmem:[#allocation14 + $0x3e0] sm:$0xff]  }
 0x589   :  { %9172 = vmatprep.subr.bf16.mxu1 %v9950_v18  ;;  %v9983_v51 = vld [vmem:[#allocation14 + $0x320] sm:$0xff]  }
 0x58a   :  { %v9984_v18 = vld [vmem:[#allocation14 + $0x3a0] sm:$0xff]  }
 0x58b   :  { %9151 = vmatpush3.bf16.msra.mxu0 %v9951_v52  ;;  %v9985_v52 = vld [vmem:[#allocation14 + $0x368] sm:$0xff]  }
 0x58c   :  { %9173 = vmatpush3.bf16.msra.mxu1 %v9952_v53  ;;  %9152 = vmatprep.subr.bf16.mxu0 %v9953_v56  ;;  %v9986_v53 = vld [vmem:[#allocation14 + $0x3e8] sm:$0xff]  }
 0x58d   :  { %v6398_v1 = vpop.f32.mrb[16].mxu0  ;;  %9174 = vmatprep.subr.bf16.mxu1 %v9954_v57  ;;  %v9987_v56 = vld [vmem:[#allocation14 + $0x328] sm:$0xff]  }
 0x58e   :  { %v6480_v4 = vpop.f32.mrb[16].mxu1  ;;  %v6400_v6 = vpop.f32.mrb[17].mxu0  ;;  %v9246_v47 = vadd.f32 %v6398_v1, %v3390_v14  ;;  %v9988_v57 = vld [vmem:[#allocation14 + $0x3a8] sm:$0xff]   ;;  %v9991_v14 = vld [vmem:[#allocation14 + $0x330] sm:$0xff]   ;;  %v9995_v1 = vld [vmem:[#allocation14 + $0x338] sm:$0xff]  }
 0x58f   :  { %v9247_v49 = vadd.f32 %v6400_v6, %v3394_v58  ;;  %v6482_v20 = vpop.f32.mrb[17].mxu1  ;;  %v6402_v10 = vpop.f32.mrb[18].mxu0  ;;  %9153 = vmatpush3.bf16.msra.mxu0 %v9955_v13  ;;  %v9248_v55 = vadd.f32 %v6480_v4, %v3398_v2  ;;  %v9989_v58 = vld [vmem:[#allocation14 + $0x370] sm:$0xff]   ;;  %v9996_v2 = vld [vmem:[#allocation14 + $0x3b8] sm:$0xff]   ;;  %v3414_v4 = vrot.slane %v10545_v54, %v3381_v12  ;;  %v3410_v6 = vrot.slane %v10545_v54, %v3377_v60 }
 0x590   :  { %v9249_v17 = vadd.f32 %v6482_v20, %v3402_v59  ;;  %v6484_v37 = vpop.f32.mrb[18].mxu1  ;;  %9175 = vmatpush3.bf16.msra.mxu1 %v9956_v62  ;;  %v6403_v50 = vpop.f32.mrb[19].mxu0  ;;  %9154 = vmatprep.subr.bf16.mxu0 %v9957_v0  ;;  %v6659_v28 = vmax.f32 %v9246_v47, 0.0  ;;  %v9990_v13 = vld [vmem:[#allocation14 + $0x3f0] sm:$0xff]   ;;  %v9993_v62 = vld [vmem:[#allocation14 + $0x378] sm:$0xff]  }
 0x591   :  { %v6660_v11 = vmax.f32 %v9247_v49, 0.0  ;;  %v6485_v63 = vpop.f32.mrb[19].mxu1  ;;  %9176 = vmatprep.subr.bf16.mxu1 %v9958_v3  ;;  %v6661_v27 = vmax.f32 %v9248_v55, 0.0  ;;  %v9992_v59 = vld [vmem:[#allocation14 + $0x3b0] sm:$0xff]   ;;  %v9994_v0 = vld [vmem:[#allocation14 + $0x3f8] sm:$0xff]   ;;  %v3406_v3 = vrot.slane %v10545_v54, %v3373_v7  ;;  %v3418_v49 = vrot.slane %v10545_v54, %v3385_v22 }
 0x592   :  { %v6662_v24 = vmax.f32 %v9249_v17, 0.0  ;;  %v6675_v35 = vpack.c.bf16 %v6659_v28, %v6659_v28  ;;  %v8925_v28 = vld [vmem:[#allocation16] ss:$0 sm:$0xff] }
 0x593   :  { %v6676_v25 = vpack.c.bf16 %v6660_v11, %v6660_v11  ;;  %9155 = vmatpush3.bf16.msra.mxu0 %v9959_v15  ;;  %v6677_v61 = vpack.c.bf16 %v6661_v27, %v6661_v27 }
 0x594   :  { %v6678_v29 = vpack.c.bf16 %v6662_v24, %v6662_v24  ;;  %9177 = vmatpush3.bf16.msra.mxu1 %v9960_v19  ;;  %9156 = vmatprep.subr.bf16.mxu0 %v9961_v21 }
 0x595   :  { %7906 = vmatprep.mubr.bf16.mxu0 %v6676_v25  ;;  %9178 = vmatprep.subr.bf16.mxu1 %v9962_v23 }
 0x596   :  { %7946 = vmatprep.mubr.bf16.mxu1 %v6678_v29 }
 0x597   :  { %9157 = vmatpush3.bf16.msra.mxu0 %v9963_v26 }
 0x598   :  { %9179 = vmatpush3.bf16.msra.mxu1 %v9964_v30  ;;  %9186 = vmatprep.subr.bf16.mxu0 %v9965_v31 }
 0x599   :  { %9208 = vmatprep.subr.bf16.mxu1 %v9966_v33 }
 0x59a   :  { %7907 = vmatmul.mubr.bf16.vlgmr.msra.gmra.mrb[32].mxu0 %v6675_v35 }
 0x59b   :  { %7947 = vmatmul.mubr.bf16.vlgmr.msra.gmra.mrb[32].mxu1 %v6677_v61  ;;  %9187 = vmatpush3.bf16.msra.mxu0 %v9967_v34 }
 0x59c   :  { %9209 = vmatpush3.bf16.msra.mxu1 %v9968_v9  ;;  %9188 = vmatprep.subr.bf16.mxu0 %v9969_v36 }
 0x59d   :  { %9210 = vmatprep.subr.bf16.mxu1 %v9970_v38 }
 0x59f   :  { %9189 = vmatpush3.bf16.msra.mxu0 %v9971_v16 }
 0x5a0   :  { %9211 = vmatpush3.bf16.msra.mxu1 %v9972_v39  ;;  %9190 = vmatprep.subr.bf16.mxu0 %v9973_v40 }
 0x5a1   :  { %9212 = vmatprep.subr.bf16.mxu1 %v9974_v41 }
 0x5a3   :  { %9191 = vmatpush3.bf16.msra.mxu0 %v9975_v42 }
 0x5a4   :  { %9213 = vmatpush3.bf16.msra.mxu1 %v9976_v8  ;;  %9192 = vmatprep.subr.bf16.mxu0 %v9977_v43 }
 0x5a5   :  { %9214 = vmatprep.subr.bf16.mxu1 %v9978_v5 }
 0x5a7   :  { %9193 = vmatpush3.bf16.msra.mxu0 %v9979_v44 }
 0x5a8   :  { %9215 = vmatpush3.bf16.msra.mxu1 %v9980_v32  ;;  %9194 = vmatprep.subr.bf16.mxu0 %v9981_v45 }
 0x5a9   :  { %9216 = vmatprep.subr.bf16.mxu1 %v9982_v48 }
 0x5ab   :  { %9195 = vmatpush3.bf16.msra.mxu0 %v9983_v51 }
 0x5ac   :  { %9217 = vmatpush3.bf16.msra.mxu1 %v9984_v18  ;;  %9196 = vmatprep.subr.bf16.mxu0 %v9985_v52 }
 0x5ad   :  { %9218 = vmatprep.subr.bf16.mxu1 %v9986_v53 }
 0x5af   :  { %9197 = vmatpush3.bf16.msra.mxu0 %v9987_v56 }
 0x5b0   :  { %9219 = vmatpush3.bf16.msra.mxu1 %v9988_v57  ;;  %9198 = vmatprep.subr.bf16.mxu0 %v9989_v58 }
 0x5b1   :  { %9220 = vmatprep.subr.bf16.mxu1 %v9990_v13 }
 0x5b3   :  { %9199 = vmatpush3.bf16.msra.mxu0 %v9991_v14 }
 0x5b4   :  { %9221 = vmatpush3.bf16.msra.mxu1 %v9992_v59  ;;  %9200 = vmatprep.subr.bf16.mxu0 %v9993_v62 }
 0x5b5   :  { %9222 = vmatprep.subr.bf16.mxu1 %v9994_v0 }
 0x5b7   :  { %9201 = vmatpush3.bf16.msra.mxu0 %v9995_v1 }
 0x5b8   :  { %9223 = vmatpush3.bf16.msra.mxu1 %v9996_v2 }
 0x60d   :  { %v6562_v20 = vpop.f32.mrb[20].mxu0 }
 0x60e   :  { %v9250_v10 = vadd.f32 %v6562_v20, %v3406_v3  ;;  %v6644_v15 = vpop.f32.mrb[20].mxu1  ;;  %v6564_v47 = vpop.f32.mrb[21].mxu0 }
 0x60f   :  { %v9252_v17 = vadd.f32 %v6644_v15, %v3414_v4  ;;  %v9251_v37 = vadd.f32 %v6564_v47, %v3410_v6  ;;  %v6646_v50 = vpop.f32.mrb[21].mxu1  ;;  %v6566_v7 = vpop.f32.mrb[22].mxu0 }
 0x610   :  { %v6663_v19 = vmax.f32 %v9250_v10, 0.0  ;;  %v9253_v21 = vadd.f32 %v6646_v50, %v3418_v49  ;;  %v6648_v55 = vpop.f32.mrb[22].mxu1  ;;  %v6567_v12 = vpop.f32.mrb[23].mxu0 }
 0x611   :  { %v6665_v11 = vmax.f32 %v9252_v17, 0.0  ;;  %v6664_v63 = vmax.f32 %v9251_v37, 0.0  ;;  %v6649_v23 = vpop.f32.mrb[23].mxu1 }
 0x612   :  { %v6666_v60 = vmax.f32 %v9253_v21, 0.0  ;;  %v6679_v46 = vpack.c.bf16 %v6663_v19, %v6663_v19 }
 0x613   :  { %v6680_v24 = vpack.c.bf16 %v6664_v63, %v6664_v63  ;;  %v6681_v22 = vpack.c.bf16 %v6665_v11, %v6665_v11 }
 0x614   :  { %v6682_v25 = vpack.c.bf16 %v6666_v60, %v6666_v60 }
 0x615   :  { %7986 = vmatprep.mubr.bf16.mxu0 %v6680_v24 }
 0x616   :  { %8026 = vmatprep.mubr.bf16.mxu1 %v6682_v25  ;;  %7987 = vmatmul.mubr.bf16.vlgmr.msra.gmra.mrb[36].mxu0 %v6679_v46 }
 0x617   :  { %8027 = vmatmul.mubr.bf16.vlgmr.msra.gmra.mrb[36].mxu1 %v6681_v22 }
 0x62d   :  { %v9070_v54 = vpop.f32.mrb[24].mxu0 }
 0x62e   :  { %v9092_v26 = vpop.f32.mrb[24].mxu1  ;;  %v9071_v29 = vpop.f32.mrb[25].mxu0 }
 0x62f   :  { %v9072_v30 = vadd.f32 %v9071_v29, %v9070_v54  ;;  %v9093_v31 = vpop.f32.mrb[25].mxu1  ;;  %v9073_v27 = vpop.f32.mrb[26].mxu0 }
 0x630   :  { %v9094_v33 = vadd.f32 %v9093_v31, %v9092_v26  ;;  %v9095_v34 = vpop.f32.mrb[26].mxu1  ;;  %v9074_v35 = vpop.f32.mrb[27].mxu0 }
 0x631   :  { %v7749_v9 = vadd.f32 %v9072_v30, %v8925_v28  ;;  %v9096_v36 = vpop.f32.mrb[27].mxu1 }
 0x633   :  { %v7789_v61 = vadd.f32 %v9094_v33, %v7749_v9 }
 0x64d   :  { %v9114_v38 = vpop.f32.mrb[28].mxu0 }
 0x64e   :  { %v9136_v16 = vpop.f32.mrb[28].mxu1  ;;  %v9115_v39 = vpop.f32.mrb[29].mxu0 }
 0x64f   :  { %v9116_v40 = vadd.f32 %v9115_v39, %v9114_v38  ;;  %v9137_v41 = vpop.f32.mrb[29].mxu1  ;;  %v9117_v42 = vpop.f32.mrb[30].mxu0 }
 0x650   :  { %v9138_v8 = vadd.f32 %v9137_v41, %v9136_v16  ;;  %v9139_v43 = vpop.f32.mrb[30].mxu1  ;;  %v9118_v5 = vpop.f32.mrb[31].mxu0 }
 0x651   :  { %v7829_v44 = vadd.f32 %v9116_v40, %v7789_v61  ;;  %v9140_v32 = vpop.f32.mrb[31].mxu1 }
 0x653   :  { %v7869_v45 = vadd.f32 %v9138_v8, %v7829_v44 }
 0x66d   :  { %v9158_v48 = vpop.f32.mrb[32].mxu0 }
 0x66e   :  { %v9180_v51 = vpop.f32.mrb[32].mxu1  ;;  %v9159_v18 = vpop.f32.mrb[33].mxu0 }
 0x66f   :  { %v9160_v52 = vadd.f32 %v9159_v18, %v9158_v48  ;;  %v9181_v53 = vpop.f32.mrb[33].mxu1  ;;  %v9161_v56 = vpop.f32.mrb[34].mxu0 }
 0x670   :  { %v9182_v57 = vadd.f32 %v9181_v53, %v9180_v51  ;;  %v9183_v58 = vpop.f32.mrb[34].mxu1  ;;  %v9162_v13 = vpop.f32.mrb[35].mxu0 }
 0x671   :  { %v7909_v14 = vadd.f32 %v9160_v52, %v7869_v45  ;;  %v9184_v59 = vpop.f32.mrb[35].mxu1 }
 0x673   :  { %v7949_v62 = vadd.f32 %v9182_v57, %v7909_v14 }
 0x6e9   :  { %v9202_v0 = vpop.f32.mrb[36].mxu0 }
 0x6ea   :  { %v9224_v1 = vpop.f32.mrb[36].mxu1  ;;  %v9203_v2 = vpop.f32.mrb[37].mxu0 }
 0x6eb   :  { %v9204_v3 = vadd.f32 %v9203_v2, %v9202_v0  ;;  %v9225_v4 = vpop.f32.mrb[37].mxu1  ;;  %v9205_v6 = vpop.f32.mrb[38].mxu0 }
 0x6ec   :  { %v9226_v49 = vadd.f32 %v9225_v4, %v9224_v1  ;;  %v9227_v20 = vpop.f32.mrb[38].mxu1  ;;  %v9206_v10 = vpop.f32.mrb[39].mxu0 }
 0x6ed   :  { %v7989_v15 = vadd.f32 %v9204_v3, %v7949_v62  ;;  %v9228_v47 = vpop.f32.mrb[39].mxu1 }
 0x6ef   :  { %v8029_v17 = vadd.f32 %v9226_v49, %v7989_v15 }
 0x6f1   :  { %8034 = vst [vmem:[#allocation17] sm:$0xff] %v8029_v17 }
 0x6f2   :  { %10206 = shalt.err (!%p10203_p6)
}
 0x6f3   :  { %s10207_s21 = scalar_lea.hbm %s10588_s9, 128 }
 0x6f4   :  { %p10208_p7 = scmp.ne.s32.totalorder %s10588_s9, %s10207_s21  ;;  %p10211_p8 = scmp.lt.u32.totalorder %s10207_s21, %s10588_s9 }
 0x6f6   :  { %p10213_p9 = pnand %p10211_p8, %p10208_p7 }
 0x6f8   :  { %10216 = shalt.err (!%p10213_p9)
}
 0x6f9   :  { %8044 = dma.vmem_to_hbm [thread:$0]  %s8042_s3, 128, %s10588_s9, [#allocation4]  }
 0x6fa   :  { %10227 = dma.done.wait [#allocation4], 128  }
 0x6fb   :  { %10228 = vsyncadd [#allocation4], 4294967168 }
 0x6fc   :  { %8048 = vsyncpa [#allocation3], 1 }
 0x6fd   :  { %8049 = vsyncpa [#allocation6], 1 }
 0x6fe   :  { %8050 = vsyncpa [#allocation9], 1 }
 0x6ff   :  { %8051 = vsyncpa [#allocation12], 1 }
 0x700   :  { %8052 = vsyncpa [#allocation15], 1 }
 0x701   :  { %8053 = vsyncpa [#allocation4], 1 }

// kernel: tpu_custom_call.1
= control target key start
LH: loop header
LB: loop body
LE: loop exit
PB: predicated region body
PF: predicated region fallthrough
CT: control target
= control target key end

     0   :  { %14 = vsyncpa [#allocation3], 0  ;;  %s10579_s0 = inlined_call_operand.hbm [shape: bf16[8,896], index: 0, kind: input, shape index: {}]   ;;  %s10580_s1 = inlined_call_operand.hbm [shape: bf16[896,512], index: 1, kind: input, shape index: {}]   ;;  %s10581_s2 = inlined_call_operand.hbm [shape: f32[1,512], index: 2, kind: input, shape index: {}]   ;;  %s10582_s3 = inlined_call_operand.hbm [shape: bf16[512,512], index: 3, kind: input, shape index: {}]   ;;  %s10583_s4 = inlined_call_operand.hbm [shape: f32[1,512], index: 4, kind: input, shape index: {}]   ;;  %s10584_s5 = inlined_call_operand.hbm [shape: bf16[512,2048], index: 5, kind: input, shape index: {}]   ;;  %s10585_s6 = inlined_call_operand.hbm [shape: f32[1,2048], index: 6, kind: input, shape index: {}]   ;;  %s10586_s7 = inlined_call_operand.hbm [shape: bf16[2048,128], index: 7, kind: input, shape index: {}]   ;;  %s10587_s8 = inlined_call_operand.hbm [shape: f32[1,128], index: 8, kind: input, shape index: {}]   ;;  %s10588_s9 = inlined_call_operand.hbm [shape: f32[8,128], index: 9, kind: output, shape index: {}]  }
   0x1   :  { %15 = vsyncpa [#allocation6], 0 }
   0x2   :  { %16 = vsyncpa [#allocation9], 0 }
   0x3   :  { %17 = vsyncpa [#allocation12], 0 }
   0x4   :  { %18 = vsyncpa [#allocation15], 0 }
   0x5   :  { %19 = vsyncpa [#allocation4], 0  ;;  %s10229_s30 = smov [#allocation5]   ;;  %s9997_s13 = scalar_lea.hbm %s10580_s1, 28672 }
   0x6   :  { %s35_s10 = sshll.u32 %s10229_s30, 4  ;;  %p9998_p0 = scmp.ne.s32.totalorder %s10580_s1, %s9997_s13  ;;  %s36_s10 = int_to_ptr.vmem [resolvable:$true] %s35_s10 }
   0x7   :  { %p10001_p1 = scmp.lt.u32.totalorder %s9997_s13, %s10580_s1 }
   0x9   :  { %p10003_p2 = pnand %p10001_p1, %p9998_p0 }
   0xb   :  { %10006 = shalt.err (!%p10003_p2)
}
   0xc   :  { %s10007_s18 = scalar_lea.vmem %s36_s10, 28672  ;;  %p10012_p4 = scmp.lt.s32.totalorder %s36_s10, %s36_s10 }
   0xd   :  { %p10008_p3 = scmp.ne.s32.totalorder %s36_s10, %s10007_s18  ;;  %p10013_p5 = scmp.lt.s32.totalorder %s10007_s18, %s10007_s18 }
   0xf   :  { %p10014_p6 = por %p10013_p5, %p10012_p4 }
  0x11   :  { %p10015_p7 = pnand %p10014_p6, %p10008_p3 }
  0x13   :  { %10018 = shalt.err (!%p10015_p7)
}
  0x14   :  { %s10230_s19 = smov 256   ;;  %s10231_s20 = smov 16  }
  0x15   :  { %41 = dma.hbm_to_vmem [thread:$0]  %s10580_s1, 28672, %s36_s10, [#allocation6], %s10230_s19, %s10230_s19, %s10231_s20  }
  0x16   :  { %s10232_s23 = smov [#allocation8]   ;;  %s10233_s25 = smov [#allocation11]  }
  0x17   :  { %s57_s24 = sshll.u32 %s10232_s23, 4  ;;  %s79_s26 = sshll.u32 %s10233_s25, 4  ;;  %s58_s24 = int_to_ptr.vmem [resolvable:$true] %s57_s24  ;;  %s80_s26 = int_to_ptr.vmem [resolvable:$true] %s79_s26 }
  0x18   :  { %s10019_s29 = scalar_lea.hbm %s10582_s3, 16384 }
  0x19   :  { %p10020_p8 = scmp.ne.s32.totalorder %s10582_s3, %s10019_s29  ;;  %p10023_p9 = scmp.lt.u32.totalorder %s10019_s29, %s10582_s3 }
  0x1b   :  { %p10025_p10 = pnand %p10023_p9, %p10020_p8 }
  0x1d   :  { %10028 = shalt.err (!%p10025_p10)
}
  0x1e   :  { %s10029_s1 = scalar_lea.vmem %s58_s24, 16384  ;;  %p10034_p12 = scmp.lt.s32.totalorder %s58_s24, %s58_s24 }
  0x1f   :  { %p10030_p11 = scmp.ne.s32.totalorder %s58_s24, %s10029_s1  ;;  %p10035_p13 = scmp.lt.s32.totalorder %s10029_s1, %s10029_s1 }
  0x21   :  { %p10036_p0 = por %p10035_p13, %p10034_p12 }
  0x23   :  { %p10037_p1 = pnand %p10036_p0, %p10030_p11 }
  0x25   :  { %10040 = shalt.err (!%p10037_p1)
}
  0x26   :  { %63 = dma.hbm_to_vmem [thread:$0]  %s10582_s3, 16384, %s58_s24, [#allocation9], %s10230_s19, %s10230_s19, %s10231_s20  }
  0x27   :  { %s10041_s17 = scalar_lea.hbm %s10584_s5, 65536 }
  0x28   :  { %p10042_p2 = scmp.ne.s32.totalorder %s10584_s5, %s10041_s17  ;;  %p10045_p3 = scmp.lt.u32.totalorder %s10041_s17, %s10584_s5 }
  0x2a   :  { %p10047_p4 = pnand %p10045_p3, %p10042_p2 }
  0x2c   :  { %10050 = shalt.err (!%p10047_p4)
}
  0x2d   :  { %s10051_s25 = scalar_lea.vmem %s80_s26, 65536  ;;  %p10056_p6 = scmp.lt.s32.totalorder %s80_s26, %s80_s26 }
  0x2e   :  { %p10052_p5 = scmp.ne.s32.totalorder %s80_s26, %s10051_s25  ;;  %p10057_p7 = scmp.lt.s32.totalorder %s10051_s25, %s10051_s25 }
  0x30   :  { %p10058_p8 = por %p10057_p7, %p10056_p6 }
  0x32   :  { %p10059_p9 = pnand %p10058_p8, %p10052_p5 }
  0x34   :  { %10062 = shalt.err (!%p10059_p9)
}
  0x35   :  { %s10234_s3 = smov 1024   ;;  %s10235_s19 = smov 64  }
  0x36   :  { %85 = dma.hbm_to_vmem [thread:$0]  %s10584_s5, 65536, %s80_s26, [#allocation12], %s10234_s3, %s10234_s3, %s10235_s19  }
  0x37   :  { %s10236_s27 = smov [#allocation14]   ;;  %s10063_s11 = scalar_lea.hbm %s10586_s7, 16384 }
  0x38   :  { %s101_s28 = sshll.u32 %s10236_s27, 4  ;;  %p10064_p10 = scmp.ne.s32.totalorder %s10586_s7, %s10063_s11  ;;  %s102_s28 = int_to_ptr.vmem [resolvable:$true] %s101_s28 }
  0x39   :  { %p10067_p11 = scmp.lt.u32.totalorder %s10063_s11, %s10586_s7 }
  0x3b   :  { %p10069_p12 = pnand %p10067_p11, %p10064_p10 }
  0x3d   :  { %10072 = shalt.err (!%p10069_p12)
}
  0x3e   :  { %s10073_s14 = scalar_lea.vmem %s102_s28, 16384  ;;  %p10078_p0 = scmp.lt.s32.totalorder %s102_s28, %s102_s28 }
  0x3f   :  { %p10074_p13 = scmp.ne.s32.totalorder %s102_s28, %s10073_s14  ;;  %p10079_p1 = scmp.lt.s32.totalorder %s10073_s14, %s10073_s14 }
  0x41   :  { %p10080_p2 = por %p10079_p1, %p10078_p0 }
  0x43   :  { %p10081_p3 = pnand %p10080_p2, %p10074_p13 }
  0x45   :  { %10084 = shalt.err (!%p10081_p3)
}
  0x46   :  { %s10237_s5 = smov 4   ;;  %s10238_s16 = smov [#allocation2]  }
  0x47   :  { %107 = dma.hbm_to_vmem [thread:$0]  %s10586_s7, 16384, %s102_s28, [#allocation15], %s10235_s19, %s10235_s19, %s10237_s5  }
  0x48   :  { %s26_s17 = sshll.u32 %s10238_s16, 4  ;;  %s10239_s18 = smov [#allocation7]   ;;  %s27_s17 = int_to_ptr.vmem [resolvable:$true] %s26_s17 }
  0x49   :  { %s48_s21 = sshll.u32 %s10239_s18, 4  ;;  %s10085_s25 = scalar_lea.hbm %s10579_s0, 448  ;;  %s49_s21 = int_to_ptr.vmem [resolvable:$true] %s48_s21 }
  0x4a   :  { %p10086_p4 = scmp.ne.s32.totalorder %s10579_s0, %s10085_s25  ;;  %p10089_p5 = scmp.lt.u32.totalorder %s10085_s25, %s10579_s0 }
  0x4c   :  { %p10091_p6 = pnand %p10089_p5, %p10086_p4 }
  0x4e   :  { %10094 = shalt.err (!%p10091_p6)
}
  0x4f   :  { %s10095_s7 = scalar_lea.vmem %s27_s17, 448  ;;  %p10100_p8 = scmp.lt.s32.totalorder %s27_s17, %s27_s17 }
  0x50   :  { %p10096_p7 = scmp.ne.s32.totalorder %s27_s17, %s10095_s7  ;;  %p10101_p9 = scmp.lt.s32.totalorder %s10095_s7, %s10095_s7 }
  0x52   :  { %p10102_p10 = por %p10101_p9, %p10100_p8 }
  0x54   :  { %p10103_p11 = pnand %p10102_p10, %p10096_p7 }
  0x56   :  { %10106 = shalt.err (!%p10103_p11)
}
  0x57   :  { %29 = dma.hbm_to_vmem [thread:$0]  %s10579_s0, 448, %s27_s17, [#allocation3]  }
  0x58   :  { %s10107_s11 = scalar_lea.hbm %s10581_s2, 64 }
  0x59   :  { %p10108_p12 = scmp.ne.s32.totalorder %s10581_s2, %s10107_s11  ;;  %p10111_p13 = scmp.lt.u32.totalorder %s10107_s11, %s10581_s2 }
  0x5b   :  { %p10113_p0 = pnand %p10111_p13, %p10108_p12 }
  0x5d   :  { %10116 = shalt.err (!%p10113_p0)
}
  0x5e   :  { %s10117_s14 = scalar_lea.vmem %s49_s21, 64  ;;  %p10122_p2 = scmp.lt.s32.totalorder %s49_s21, %s49_s21 }
  0x5f   :  { %p10118_p1 = scmp.ne.s32.totalorder %s49_s21, %s10117_s14  ;;  %p10123_p3 = scmp.lt.s32.totalorder %s10117_s14, %s10117_s14 }
  0x61   :  { %p10124_p4 = por %p10123_p3, %p10122_p2 }
  0x63   :  { %p10125_p5 = pnand %p10124_p4, %p10118_p1 }
  0x65   :  { %10128 = shalt.err (!%p10125_p5)
}
  0x66   :  { %51 = dma.hbm_to_vmem [thread:$0]  %s10581_s2, 64, %s49_s21, [#allocation6]  }
  0x67   :  { %s10240_s26 = smov [#allocation10]   ;;  %s10241_s16 = smov [#allocation13]  }
  0x68   :  { %s70_s15 = sshll.u32 %s10240_s26, 4  ;;  %s92_s17 = sshll.u32 %s10241_s16, 4  ;;  %s71_s15 = int_to_ptr.vmem [resolvable:$true] %s70_s15  ;;  %s93_s17 = int_to_ptr.vmem [resolvable:$true] %s92_s17 }
  0x69   :  { %s10129_s23 = scalar_lea.hbm %s10583_s4, 64 }
  0x6a   :  { %p10130_p6 = scmp.ne.s32.totalorder %s10583_s4, %s10129_s23  ;;  %p10133_p7 = scmp.lt.u32.totalorder %s10129_s23, %s10583_s4 }
  0x6c   :  { %p10135_p8 = pnand %p10133_p7, %p10130_p6 }
  0x6e   :  { %10138 = shalt.err (!%p10135_p8)
}
  0x6f   :  { %s10139_s2 = scalar_lea.vmem %s71_s15, 64  ;;  %p10144_p10 = scmp.lt.s32.totalorder %s71_s15, %s71_s15 }
  0x70   :  { %p10140_p9 = scmp.ne.s32.totalorder %s71_s15, %s10139_s2  ;;  %p10145_p11 = scmp.lt.s32.totalorder %s10139_s2, %s10139_s2 }
  0x72   :  { %p10146_p12 = por %p10145_p11, %p10144_p10 }
  0x74   :  { %p10147_p13 = pnand %p10146_p12, %p10140_p9 }
  0x76   :  { %10150 = shalt.err (!%p10147_p13)
}
  0x77   :  { %73 = dma.hbm_to_vmem [thread:$0]  %s10583_s4, 64, %s71_s15, [#allocation9]  }
  0x78   :  { %s10151_s28 = scalar_lea.hbm %s10585_s6, 256 }
  0x79   :  { %p10152_p0 = scmp.ne.s32.totalorder %s10585_s6, %s10151_s28  ;;  %p10155_p1 = scmp.lt.u32.totalorder %s10151_s28, %s10585_s6 }
  0x7b   :  { %p10157_p2 = pnand %p10155_p1, %p10152_p0 }
  0x7d   :  { %10160 = shalt.err (!%p10157_p2)
}
  0x7e   :  { %s10161_s13 = scalar_lea.vmem %s93_s17, 256  ;;  %p10166_p4 = scmp.lt.s32.totalorder %s93_s17, %s93_s17 }
  0x7f   :  { %p10162_p3 = scmp.ne.s32.totalorder %s93_s17, %s10161_s13  ;;  %p10167_p5 = scmp.lt.s32.totalorder %s10161_s13, %s10161_s13 }
  0x81   :  { %p10168_p6 = por %p10167_p5, %p10166_p4 }
  0x83   :  { %p10169_p7 = pnand %p10168_p6, %p10162_p3 }
  0x85   :  { %10172 = shalt.err (!%p10169_p7)
}
  0x86   :  { %95 = dma.hbm_to_vmem [thread:$0]  %s10585_s6, 256, %s93_s17, [#allocation12]  }
  0x87   :  { %s10242_s10 = smov [#allocation16]   ;;  %s10173_s26 = scalar_lea.hbm %s10587_s8, 16 }
  0x88   :  { %s114_s14 = sshll.u32 %s10242_s10, 4  ;;  %p10174_p8 = scmp.ne.s32.totalorder %s10587_s8, %s10173_s26  ;;  %s115_s14 = int_to_ptr.vmem [resolvable:$true] %s114_s14 }
  0x89   :  { %p10177_p9 = scmp.lt.u32.totalorder %s10173_s26, %s10587_s8 }
  0x8b   :  { %p10179_p10 = pnand %p10177_p9, %p10174_p8 }
  0x8d   :  { %10182 = shalt.err (!%p10179_p10)
}
  0x8e   :  { %s10183_s23 = scalar_lea.vmem %s115_s14, 16  ;;  %s10187_s6 = scalar_lea.vmem %s115_s14, 32 }
  0x8f   :  { %p10184_p11 = scmp.ne.s32.totalorder %s115_s14, %s10183_s23  ;;  %p10188_p12 = scmp.lt.s32.totalorder %s115_s14, %s115_s14 }
  0x90   :  { %p10189_p13 = scmp.lt.s32.totalorder %s10187_s6, %s10183_s23 }
  0x92   :  { %p10190_p0 = por %p10189_p13, %p10188_p12 }
  0x94   :  { %p10191_p1 = pnand %p10190_p0, %p10184_p11 }
  0x96   :  { %10194 = shalt.err (!%p10191_p1)
}
  0x97   :  { %117 = dma.hbm_to_vmem [thread:$0]  %s10587_s8, 16, %s115_s14, [#allocation15]  }
  0x98   :  { %10217 = dma.done.wait [#allocation3], 448  }
  0x99   :  { %10218 = vsyncadd [#allocation3], 4294966848 }
  0x9a   :  { %10219 = dma.done.wait [#allocation6], 28736  }
  0x9b   :  { %10220 = vsyncadd [#allocation6], 4294938560 }
  0x9c   :  { %10221 = dma.done.wait [#allocation9], 16448  }
  0x9d   :  { %10222 = vsyncadd [#allocation9], 4294950848 }
  0x9e   :  { %10223 = dma.done.wait [#allocation12], 65792  }
  0x9f   :  { %10224 = vsyncadd [#allocation12], 4294901504 }
  0xa0   :  { %10225 = dma.done.wait [#allocation15], 16400  }
  0xa1   :  { %10226 = vsyncadd [#allocation15], 4294950896  ;;  %v9334_v0 = vld [vmem:[#allocation5 + $0x4] ss:$16 sps:$4 sm:$0xff]   ;;  %v9336_v1 = vld [vmem:[#allocation5 + $0xc] ss:$16 sps:$4 sm:$0xff]  }
  0xa2   :  { %1541 = vmatprep.subr.bf16.mxu0 %v9334_v0  ;;  %v9338_v2 = vld [vmem:[#allocation5] ss:$16 sps:$4 sm:$0xff]   ;;  %v9339_v3 = vld [vmem:[#allocation5 + $0x8] ss:$16 sps:$4 sm:$0xff]   ;;  %1705 = vmatprep.subr.bf16.mxu1 %v9336_v1  ;;  %v9340_v4 = vld [vmem:[#allocation5 + $0x24] ss:$16 sps:$4 sm:$0xff]  }
  0xa3   :  { %1542 = vmatpush1.bf16.msra.mxu0 %v9338_v2  ;;  %1706 = vmatpush1.bf16.msra.mxu1 %v9339_v3  ;;  %v9342_v5 = vld [vmem:[#allocation5 + $0x2c] ss:$16 sps:$4 sm:$0xff]   ;;  %v9344_v6 = vld [vmem:[#allocation5 + $0x20] ss:$16 sps:$4 sm:$0xff]   ;;  %v9345_v7 = vld [vmem:[#allocation5 + $0x28] ss:$16 sps:$4 sm:$0xff]  }
  0xa4   :  { %1543 = vmatprep.subr.bf16.mxu0 %v9340_v4  ;;  %1707 = vmatprep.subr.bf16.mxu1 %v9342_v5  ;;  %v9346_v8 = vld [vmem:[#allocation5 + $0x44] ss:$16 sps:$4 sm:$0xff]   ;;  %v9348_v9 = vld [vmem:[#allocation5 + $0x4c] ss:$16 sps:$4 sm:$0xff]   ;;  %v9350_v10 = vld [vmem:[#allocation5 + $0x40] ss:$16 sps:$4 sm:$0xff]  }
  0xa5   :  { %v9351_v11 = vld [vmem:[#allocation5 + $0x48] ss:$16 sps:$4 sm:$0xff]   ;;  %v9352_v12 = vld [vmem:[#allocation5 + $0x64] ss:$16 sps:$4 sm:$0xff]   ;;  %v9354_v13 = vld [vmem:[#allocation5 + $0x6c] ss:$16 sps:$4 sm:$0xff]  }
  0xa6   :  { %v9356_v14 = vld [vmem:[#allocation5 + $0x60] ss:$16 sps:$4 sm:$0xff]   ;;  %v9357_v15 = vld [vmem:[#allocation5 + $0x68] ss:$16 sps:$4 sm:$0xff]   ;;  %v9358_v16 = vld [vmem:[#allocation5 + $0x84] ss:$16 sps:$4 sm:$0xff]  }
  0xa7   :  { %1544 = vmatpush1.bf16.msra.mxu0 %v9344_v6  ;;  %1708 = vmatpush1.bf16.msra.mxu1 %v9345_v7  ;;  %v9360_v17 = vld [vmem:[#allocation5 + $0x8c] ss:$16 sps:$4 sm:$0xff]   ;;  %v9362_v18 = vld [vmem:[#allocation5 + $0x80] ss:$16 sps:$4 sm:$0xff]   ;;  %v9363_v19 = vld [vmem:[#allocation5 + $0x88] ss:$16 sps:$4 sm:$0xff]  }
  0xa8   :  { %1545 = vmatprep.subr.bf16.mxu0 %v9346_v8  ;;  %1709 = vmatprep.subr.bf16.mxu1 %v9348_v9  ;;  %v9364_v20 = vld [vmem:[#allocation5 + $0xa4] ss:$16 sps:$4 sm:$0xff]   ;;  %v9366_v21 = vld [vmem:[#allocation5 + $0xac] ss:$16 sps:$4 sm:$0xff]   ;;  %v9368_v22 = vld [vmem:[#allocation5 + $0xa0] ss:$16 sps:$4 sm:$0xff]  }
  0xa9   :  { %v9369_v23 = vld [vmem:[#allocation5 + $0xa8] ss:$16 sps:$4 sm:$0xff]   ;;  %v9370_v24 = vld [vmem:[#allocation5 + $0xc4] ss:$16 sps:$4 sm:$0xff]   ;;  %v9372_v25 = vld [vmem:[#allocation5 + $0xcc] ss:$16 sps:$4 sm:$0xff]  }
  0xaa   :  { %v9374_v26 = vld [vmem:[#allocation5 + $0xc0] ss:$16 sps:$4 sm:$0xff]   ;;  %v9375_v27 = vld [vmem:[#allocation5 + $0xc8] ss:$16 sps:$4 sm:$0xff]   ;;  %v9376_v28 = vld [vmem:[#allocation5 + $0xe4] ss:$16 sps:$4 sm:$0xff]  }
  0xab   :  { %1546 = vmatpush1.bf16.msra.mxu0 %v9350_v10  ;;  %1710 = vmatpush1.bf16.msra.mxu1 %v9351_v11  ;;  %v9378_v29 = vld [vmem:[#allocation5 + $0xec] ss:$16 sps:$4 sm:$0xff]   ;;  %v9380_v30 = vld [vmem:[#allocation5 + $0xe0] ss:$16 sps:$4 sm:$0xff]   ;;  %v9381_v31 = vld [vmem:[#allocation5 + $0xe8] ss:$16 sps:$4 sm:$0xff]  }
  0xac   :  { %1547 = vmatprep.subr.bf16.mxu0 %v9352_v12  ;;  %1711 = vmatprep.subr.bf16.mxu1 %v9354_v13  ;;  %v9382_v32 = vld [vmem:[#allocation5 + $0x104] ss:$16 sps:$4 sm:$0xff]   ;;  %v9384_v33 = vld [vmem:[#allocation5 + $0x10c] ss:$16 sps:$4 sm:$0xff]   ;;  %v9386_v34 = vld [vmem:[#allocation5 + $0x100] ss:$16 sps:$4 sm:$0xff]  }
  0xad   :  { %v9387_v35 = vld [vmem:[#allocation5 + $0x108] ss:$16 sps:$4 sm:$0xff]   ;;  %v9388_v36 = vld [vmem:[#allocation5 + $0x124] ss:$16 sps:$4 sm:$0xff]   ;;  %v9390_v37 = vld [vmem:[#allocation5 + $0x12c] ss:$16 sps:$4 sm:$0xff]  }
  0xae   :  { %v9392_v38 = vld [vmem:[#allocation5 + $0x120] ss:$16 sps:$4 sm:$0xff]   ;;  %v9393_v39 = vld [vmem:[#allocation5 + $0x128] ss:$16 sps:$4 sm:$0xff]   ;;  %v9394_v40 = vld [vmem:[#allocation5 + $0x144] ss:$16 sps:$4 sm:$0xff]  }
  0xaf   :  { %1548 = vmatpush1.bf16.msra.mxu0 %v9356_v14  ;;  %1712 = vmatpush1.bf16.msra.mxu1 %v9357_v15  ;;  %v9396_v41 = vld [vmem:[#allocation5 + $0x14c] ss:$16 sps:$4 sm:$0xff]   ;;  %v9398_v42 = vld [vmem:[#allocation5 + $0x140] ss:$16 sps:$4 sm:$0xff]   ;;  %v9399_v43 = vld [vmem:[#allocation5 + $0x148] ss:$16 sps:$4 sm:$0xff]  }
  0xb0   :  { %1549 = vmatprep.subr.bf16.mxu0 %v9358_v16  ;;  %1713 = vmatprep.subr.bf16.mxu1 %v9360_v17  ;;  %v9400_v44 = vld [vmem:[#allocation5 + $0x164] ss:$16 sps:$4 sm:$0xff]   ;;  %v9402_v45 = vld [vmem:[#allocation5 + $0x16c] ss:$16 sps:$4 sm:$0xff]   ;;  %v9404_v47 = vld [vmem:[#allocation5 + $0x160] ss:$16 sps:$4 sm:$0xff]  }
  0xb1   :  { %v146_v46 = vld [vmem:[#allocation2] sm:$0xff]  ;;  %v9408_v51 = vld [vmem:[#allocation5 + $0x18c] ss:$16 sps:$4 sm:$0xff]   ;;  %v9410_v52 = vld [vmem:[#allocation5 + $0x180] ss:$16 sps:$4 sm:$0xff]   ;;  %s10244_s8 = smov [#allocation17]  }
  0xb2   :  { %v8055_v48 = vcombine.high %v146_v46, %v146_v46  ;;  %v9405_v49 = vld [vmem:[#allocation5 + $0x168] ss:$16 sps:$4 sm:$0xff]   ;;  %v9406_v50 = vld [vmem:[#allocation5 + $0x184] ss:$16 sps:$4 sm:$0xff]   ;;  %v9414_v55 = vld [vmem:[#allocation5 + $0x1ac] ss:$16 sps:$4 sm:$0xff]   ;;  %v8054_v4 = vcombine.low %v146_v46, %v146_v46 }
  0xb3   :  { %1550 = vmatpush1.bf16.msra.mxu0 %v9362_v18  ;;  %1714 = vmatpush1.bf16.msra.mxu1 %v9363_v19  ;;  %v9411_v53 = vld [vmem:[#allocation5 + $0x188] ss:$16 sps:$4 sm:$0xff]   ;;  %v9412_v54 = vld [vmem:[#allocation5 + $0x1a4] ss:$16 sps:$4 sm:$0xff]   ;;  %v9416_v56 = vld [vmem:[#allocation5 + $0x1a0] ss:$16 sps:$4 sm:$0xff]  }
  0xb4   :  { %1551 = vmatprep.subr.bf16.mxu0 %v9364_v20  ;;  %1715 = vmatprep.subr.bf16.mxu1 %v9366_v21  ;;  %v9417_v57 = vld [vmem:[#allocation5 + $0x1a8] ss:$16 sps:$4 sm:$0xff]   ;;  %v9418_v58 = vld [vmem:[#allocation5 + $0x1c4] ss:$16 sps:$4 sm:$0xff]   ;;  %v9420_v59 = vld [vmem:[#allocation5 + $0x1cc] ss:$16 sps:$4 sm:$0xff]  }
  0xb5   :  { %1573 = vmatprep.mubr.bf16.mxu0 %v8055_v48  ;;  %1737 = vmatprep.mubr.bf16.mxu1 %v8055_v48  ;;  %v9422_v60 = vld [vmem:[#allocation5 + $0x1c0] ss:$16 sps:$4 sm:$0xff]   ;;  %v9423_v61 = vld [vmem:[#allocation5 + $0x1c8] ss:$16 sps:$4 sm:$0xff]   ;;  %v9424_v62 = vld [vmem:[#allocation5 + $0x1e4] ss:$16 sps:$4 sm:$0xff]  }
  0xb6   :  { %v9426_v63 = vld [vmem:[#allocation5 + $0x1ec] ss:$16 sps:$4 sm:$0xff]   ;;  %v9428_v0 = vld [vmem:[#allocation5 + $0x1e0] ss:$16 sps:$4 sm:$0xff]   ;;  %v9429_v1 = vld [vmem:[#allocation5 + $0x1e8] ss:$16 sps:$4 sm:$0xff]  }
  0xb7   :  { %1552 = vmatpush1.bf16.msra.mxu0 %v9368_v22  ;;  %1716 = vmatpush1.bf16.msra.mxu1 %v9369_v23  ;;  %v9434_v2 = vld [vmem:[#allocation5 + $0x204] ss:$16 sps:$4 sm:$0xff]   ;;  %v9437_v3 = vld [vmem:[#allocation5 + $0x20c] ss:$16 sps:$4 sm:$0xff]   ;;  %v9432_v5 = vld [vmem:[#allocation5 + $0x200] ss:$16 sps:$4 sm:$0xff]  }
  0xb8   :  { %1553 = vmatprep.subr.bf16.mxu0 %v9370_v24  ;;  %1717 = vmatprep.subr.bf16.mxu1 %v9372_v25  ;;  %v9435_v6 = vld [vmem:[#allocation5 + $0x208] ss:$16 sps:$4 sm:$0xff]   ;;  %v9440_v7 = vld [vmem:[#allocation5 + $0x224] ss:$16 sps:$4 sm:$0xff]   ;;  %v9443_v8 = vld [vmem:[#allocation5 + $0x22c] ss:$16 sps:$4 sm:$0xff]  }
  0xb9   :  { %v9438_v9 = vld [vmem:[#allocation5 + $0x220] ss:$16 sps:$4 sm:$0xff]   ;;  %v9441_v10 = vld [vmem:[#allocation5 + $0x228] ss:$16 sps:$4 sm:$0xff]   ;;  %v9446_v11 = vld [vmem:[#allocation5 + $0x244] ss:$16 sps:$4 sm:$0xff]  }
  0xba   :  { %v9449_v12 = vld [vmem:[#allocation5 + $0x24c] ss:$16 sps:$4 sm:$0xff]   ;;  %v9444_v13 = vld [vmem:[#allocation5 + $0x240] ss:$16 sps:$4 sm:$0xff]   ;;  %v9447_v14 = vld [vmem:[#allocation5 + $0x248] ss:$16 sps:$4 sm:$0xff]  }
  0xbb   :  { %1554 = vmatpush1.bf16.msra.mxu0 %v9374_v26  ;;  %1718 = vmatpush1.bf16.msra.mxu1 %v9375_v27  ;;  %v9452_v15 = vld [vmem:[#allocation5 + $0x264] ss:$16 sps:$4 sm:$0xff]   ;;  %v9455_v16 = vld [vmem:[#allocation5 + $0x26c] ss:$16 sps:$4 sm:$0xff]   ;;  %v9450_v17 = vld [vmem:[#allocation5 + $0x260] ss:$16 sps:$4 sm:$0xff]  }
  0xbc   :  { %1555 = vmatprep.subr.bf16.mxu0 %v9376_v28  ;;  %1719 = vmatprep.subr.bf16.mxu1 %v9378_v29  ;;  %v9453_v18 = vld [vmem:[#allocation5 + $0x268] ss:$16 sps:$4 sm:$0xff]   ;;  %v9458_v19 = vld [vmem:[#allocation5 + $0x284] ss:$16 sps:$4 sm:$0xff]   ;;  %v9461_v20 = vld [vmem:[#allocation5 + $0x28c] ss:$16 sps:$4 sm:$0xff]  }
  0xbd   :  { %v9456_v21 = vld [vmem:[#allocation5 + $0x280] ss:$16 sps:$4 sm:$0xff]   ;;  %v9459_v22 = vld [vmem:[#allocation5 + $0x288] ss:$16 sps:$4 sm:$0xff]   ;;  %v9464_v23 = vld [vmem:[#allocation5 + $0x2a4] ss:$16 sps:$4 sm:$0xff]  }
  0xbe   :  { %v9467_v24 = vld [vmem:[#allocation5 + $0x2ac] ss:$16 sps:$4 sm:$0xff]   ;;  %v9462_v25 = vld [vmem:[#allocation5 + $0x2a0] ss:$16 sps:$4 sm:$0xff]   ;;  %v9465_v26 = vld [vmem:[#allocation5 + $0x2a8] ss:$16 sps:$4 sm:$0xff]  }
  0xbf   :  { %1556 = vmatpush1.bf16.msra.mxu0 %v9380_v30  ;;  %1720 = vmatpush1.bf16.msra.mxu1 %v9381_v31  ;;  %v9470_v27 = vld [vmem:[#allocation5 + $0x2c4] ss:$16 sps:$4 sm:$0xff]   ;;  %v9473_v28 = vld [vmem:[#allocation5 + $0x2cc] ss:$16 sps:$4 sm:$0xff]   ;;  %v9468_v31 = vld [vmem:[#allocation5 + $0x2c0] ss:$16 sps:$4 sm:$0xff]  }
  0xc0   :  { %1557 = vmatprep.subr.bf16.mxu0 %v9382_v32  ;;  %1721 = vmatprep.subr.bf16.mxu1 %v9384_v33  ;;  %v10403_v29 = vld [vmem:[#allocation2 + $0x8] sm:$0xff]  ;;  %v9471_v32 = vld [vmem:[#allocation5 + $0x2c8] ss:$16 sps:$4 sm:$0xff]   ;;  %v9476_v33 = vld [vmem:[#allocation5 + $0x2e4] ss:$16 sps:$4 sm:$0xff]   ;;  %s8041_s3 = sshll.u32 %s10244_s8, 4  ;;  %s8042_s3 = int_to_ptr.vmem [resolvable:$true] %s8041_s3 }
  0xc1   :  { %v8057_v30 = vcombine.high %v10403_v29, %v10403_v29  ;;  %v9497_v46 = vld [vmem:[#allocation5 + $0x34c] ss:$16 sps:$4 sm:$0xff]   ;;  %v9495_v48 = vld [vmem:[#allocation5 + $0x348] ss:$16 sps:$4 sm:$0xff]   ;;  %s10195_s20 = scalar_lea.vmem %s8042_s3, 128  ;;  %p10200_p3 = scmp.lt.s32.totalorder %s8042_s3, %s8042_s3 }
  0xc2   :  { %p10196_p2 = scmp.ne.s32.totalorder %s8042_s3, %s10195_s20  ;;  %p10201_p4 = scmp.lt.s32.totalorder %s10195_s20, %s10195_s20 }
  0xc3   :  { %1558 = vmatpush1.bf16.msra.mxu0 %v9386_v34  ;;  %1722 = vmatpush1.bf16.msra.mxu1 %v9387_v35  ;;  %v9479_v34 = vld [vmem:[#allocation5 + $0x2ec] ss:$16 sps:$4 sm:$0xff]   ;;  %v9474_v35 = vld [vmem:[#allocation5 + $0x2e0] ss:$16 sps:$4 sm:$0xff]  }
  0xc4   :  { %1559 = vmatprep.subr.bf16.mxu0 %v9388_v36  ;;  %1723 = vmatprep.subr.bf16.mxu1 %v9390_v37  ;;  %v9477_v36 = vld [vmem:[#allocation5 + $0x2e8] ss:$16 sps:$4 sm:$0xff]   ;;  %v9482_v37 = vld [vmem:[#allocation5 + $0x304] ss:$16 sps:$4 sm:$0xff]   ;;  %p10202_p5 = por %p10201_p4, %p10200_p3 }
  0xc6   :  { %p10203_p6 = pnand %p10202_p5, %p10196_p2 }
  0xc7   :  { %1560 = vmatpush1.bf16.msra.mxu0 %v9392_v38  ;;  %1724 = vmatpush1.bf16.msra.mxu1 %v9393_v39  ;;  %v9485_v38 = vld [vmem:[#allocation5 + $0x30c] ss:$16 sps:$4 sm:$0xff]   ;;  %v9480_v39 = vld [vmem:[#allocation5 + $0x300] ss:$16 sps:$4 sm:$0xff]  }
  0xc8   :  { %1561 = vmatprep.subr.bf16.mxu0 %v9394_v40  ;;  %1725 = vmatprep.subr.bf16.mxu1 %v9396_v41  ;;  %v9483_v40 = vld [vmem:[#allocation5 + $0x308] ss:$16 sps:$4 sm:$0xff]   ;;  %v9488_v41 = vld [vmem:[#allocation5 + $0x324] ss:$16 sps:$4 sm:$0xff]  }
  0xcb   :  { %1562 = vmatpush1.bf16.msra.mxu0 %v9398_v42  ;;  %1726 = vmatpush1.bf16.msra.mxu1 %v9399_v43  ;;  %v9491_v42 = vld [vmem:[#allocation5 + $0x32c] ss:$16 sps:$4 sm:$0xff]   ;;  %v9486_v43 = vld [vmem:[#allocation5 + $0x320] ss:$16 sps:$4 sm:$0xff]  }
  0xcc   :  { %1563 = vmatprep.subr.bf16.mxu0 %v9400_v44  ;;  %1727 = vmatprep.subr.bf16.mxu1 %v9402_v45  ;;  %v9489_v44 = vld [vmem:[#allocation5 + $0x328] ss:$16 sps:$4 sm:$0xff]   ;;  %v9494_v45 = vld [vmem:[#allocation5 + $0x344] ss:$16 sps:$4 sm:$0xff]  }
  0xcf   :  { %1564 = vmatpush1.bf16.msra.mxu0 %v9404_v47  ;;  %1728 = vmatpush1.bf16.msra.mxu1 %v9405_v49  ;;  %v9492_v47 = vld [vmem:[#allocation5 + $0x340] ss:$16 sps:$4 sm:$0xff]   ;;  %v9500_v49 = vld [vmem:[#allocation5 + $0x364] ss:$16 sps:$4 sm:$0xff]  }
  0xd0   :  { %1565 = vmatprep.subr.bf16.mxu0 %v9406_v50  ;;  %1729 = vmatprep.subr.bf16.mxu1 %v9408_v51  ;;  %v9503_v50 = vld [vmem:[#allocation5 + $0x36c] ss:$16 sps:$4 sm:$0xff]   ;;  %v9498_v51 = vld [vmem:[#allocation5 + $0x360] ss:$16 sps:$4 sm:$0xff]  }
  0xd3   :  { %1566 = vmatpush1.bf16.msra.mxu0 %v9410_v52  ;;  %1730 = vmatpush1.bf16.msra.mxu1 %v9411_v53  ;;  %v9501_v52 = vld [vmem:[#allocation5 + $0x368] ss:$16 sps:$4 sm:$0xff]   ;;  %v9506_v53 = vld [vmem:[#allocation5 + $0x384] ss:$16 sps:$4 sm:$0xff]  }
  0xd4   :  { %1567 = vmatprep.subr.bf16.mxu0 %v9412_v54  ;;  %1731 = vmatprep.subr.bf16.mxu1 %v9414_v55  ;;  %v9509_v54 = vld [vmem:[#allocation5 + $0x38c] ss:$16 sps:$4 sm:$0xff]   ;;  %v9504_v55 = vld [vmem:[#allocation5 + $0x380] ss:$16 sps:$4 sm:$0xff]  }
  0xd7   :  { %1568 = vmatpush1.bf16.msra.mxu0 %v9416_v56  ;;  %1732 = vmatpush1.bf16.msra.mxu1 %v9417_v57  ;;  %v9507_v56 = vld [vmem:[#allocation5 + $0x388] ss:$16 sps:$4 sm:$0xff]   ;;  %v9512_v57 = vld [vmem:[#allocation5 + $0x3a4] ss:$16 sps:$4 sm:$0xff]  }
  0xd8   :  { %1569 = vmatprep.subr.bf16.mxu0 %v9418_v58  ;;  %1733 = vmatprep.subr.bf16.mxu1 %v9420_v59  ;;  %v9515_v58 = vld [vmem:[#allocation5 + $0x3ac] ss:$16 sps:$4 sm:$0xff]   ;;  %v9510_v59 = vld [vmem:[#allocation5 + $0x3a0] ss:$16 sps:$4 sm:$0xff]  }
  0xdb   :  { %1570 = vmatpush1.bf16.msra.mxu0 %v9422_v60  ;;  %1734 = vmatpush1.bf16.msra.mxu1 %v9423_v61  ;;  %v9513_v60 = vld [vmem:[#allocation5 + $0x3a8] ss:$16 sps:$4 sm:$0xff]   ;;  %v9518_v61 = vld [vmem:[#allocation5 + $0x3c4] ss:$16 sps:$4 sm:$0xff]  }
  0xdc   :  { %1571 = vmatprep.subr.bf16.mxu0 %v9424_v62  ;;  %1735 = vmatprep.subr.bf16.mxu1 %v9426_v63  ;;  %v9521_v62 = vld [vmem:[#allocation5 + $0x3cc] ss:$16 sps:$4 sm:$0xff]   ;;  %v9516_v63 = vld [vmem:[#allocation5 + $0x3c0] ss:$16 sps:$4 sm:$0xff]  }
  0xdf   :  { %1572 = vmatpush1.bf16.msra.mxu0 %v9428_v0  ;;  %1736 = vmatpush1.bf16.msra.mxu1 %v9429_v1  ;;  %v9519_v0 = vld [vmem:[#allocation5 + $0x3c8] ss:$16 sps:$4 sm:$0xff]   ;;  %v9524_v1 = vld [vmem:[#allocation5 + $0x3e4] ss:$16 sps:$4 sm:$0xff]  }
  0xe0   :  { %1582 = vmatprep.subr.bf16.mxu0 %v9434_v2  ;;  %1746 = vmatprep.subr.bf16.mxu1 %v9437_v3  ;;  %v9527_v2 = vld [vmem:[#allocation5 + $0x3ec] ss:$16 sps:$4 sm:$0xff]   ;;  %v9522_v3 = vld [vmem:[#allocation5 + $0x3e0] ss:$16 sps:$4 sm:$0xff]  }
  0xe2   :  { %1574 = vmatmul.mubr.bf16.vlgmr.msra.gmra.mrb[0].mxu0 %v8054_v4  ;;  %1738 = vmatmul.mubr.bf16.vlgmr.msra.gmra.mrb[0].mxu1 %v8054_v4  ;;  %v9525_v4 = vld [vmem:[#allocation5 + $0x3e8] ss:$16 sps:$4 sm:$0xff]  }
  0xe3   :  { %1583 = vmatpush1.bf16.msra.mxu0 %v9432_v5  ;;  %1747 = vmatpush1.bf16.msra.mxu1 %v9435_v6  ;;  %v9532_v5 = vld [vmem:[#allocation5 + $0x404] ss:$16 sps:$4 sm:$0xff]   ;;  %v9535_v6 = vld [vmem:[#allocation5 + $0x40c] ss:$16 sps:$4 sm:$0xff]  }
  0xe4   :  { %1584 = vmatprep.subr.bf16.mxu0 %v9440_v7  ;;  %1748 = vmatprep.subr.bf16.mxu1 %v9443_v8  ;;  %v8056_v7 = vcombine.low %v10403_v29, %v10403_v29  ;;  %v9530_v8 = vld [vmem:[#allocation5 + $0x400] ss:$16 sps:$4 sm:$0xff]   ;;  %v9565_v29 = vld [vmem:[#allocation5 + $0x4ac] ss:$16 sps:$4 sm:$0xff]  }
  0xe5   :  { %1614 = vmatprep.mubr.bf16.mxu0 %v8057_v30  ;;  %1778 = vmatprep.mubr.bf16.mxu1 %v8057_v30  ;;  %v9560_v30 = vld [vmem:[#allocation5 + $0x4a0] ss:$16 sps:$4 sm:$0xff]  }
  0xe7   :  { %1585 = vmatpush1.bf16.msra.mxu0 %v9438_v9  ;;  %1749 = vmatpush1.bf16.msra.mxu1 %v9441_v10  ;;  %v9533_v9 = vld [vmem:[#allocation5 + $0x408] ss:$16 sps:$4 sm:$0xff]   ;;  %v9538_v10 = vld [vmem:[#allocation5 + $0x424] ss:$16 sps:$4 sm:$0xff]  }
  0xe8   :  { %1586 = vmatprep.subr.bf16.mxu0 %v9446_v11  ;;  %1750 = vmatprep.subr.bf16.mxu1 %v9449_v12  ;;  %v10409_v11 = vld [vmem:[#allocation2 + $0x10] sm:$0xff]  ;;  %v9541_v12 = vld [vmem:[#allocation5 + $0x42c] ss:$16 sps:$4 sm:$0xff]  }
  0xeb   :  { %1587 = vmatpush1.bf16.msra.mxu0 %v9444_v13  ;;  %1751 = vmatpush1.bf16.msra.mxu1 %v9447_v14  ;;  %v8059_v13 = vcombine.high %v10409_v11, %v10409_v11  ;;  %v9536_v14 = vld [vmem:[#allocation5 + $0x420] ss:$16 sps:$4 sm:$0xff]  }
  0xec   :  { %1588 = vmatprep.subr.bf16.mxu0 %v9452_v15  ;;  %1752 = vmatprep.subr.bf16.mxu1 %v9455_v16  ;;  %v9539_v15 = vld [vmem:[#allocation5 + $0x428] ss:$16 sps:$4 sm:$0xff]   ;;  %v9544_v16 = vld [vmem:[#allocation5 + $0x444] ss:$16 sps:$4 sm:$0xff]  }
  0xef   :  { %1589 = vmatpush1.bf16.msra.mxu0 %v9450_v17  ;;  %1753 = vmatpush1.bf16.msra.mxu1 %v9453_v18  ;;  %v9547_v17 = vld [vmem:[#allocation5 + $0x44c] ss:$16 sps:$4 sm:$0xff]   ;;  %v9542_v18 = vld [vmem:[#allocation5 + $0x440] ss:$16 sps:$4 sm:$0xff]  }
  0xf0   :  { %1590 = vmatprep.subr.bf16.mxu0 %v9458_v19  ;;  %1754 = vmatprep.subr.bf16.mxu1 %v9461_v20  ;;  %v9545_v19 = vld [vmem:[#allocation5 + $0x448] ss:$16 sps:$4 sm:$0xff]   ;;  %v9550_v20 = vld [vmem:[#allocation5 + $0x464] ss:$16 sps:$4 sm:$0xff]  }
  0xf3   :  { %1591 = vmatpush1.bf16.msra.mxu0 %v9456_v21  ;;  %1755 = vmatpush1.bf16.msra.mxu1 %v9459_v22  ;;  %v9553_v21 = vld [vmem:[#allocation5 + $0x46c] ss:$16 sps:$4 sm:$0xff]   ;;  %v9548_v22 = vld [vmem:[#allocation5 + $0x460] ss:$16 sps:$4 sm:$0xff]  }
  0xf4   :  { %1592 = vmatprep.subr.bf16.mxu0 %v9464_v23  ;;  %1756 = vmatprep.subr.bf16.mxu1 %v9467_v24  ;;  %v9551_v23 = vld [vmem:[#allocation5 + $0x468] ss:$16 sps:$4 sm:$0xff]   ;;  %v9556_v24 = vld [vmem:[#allocation5 + $0x484] ss:$16 sps:$4 sm:$0xff]  }
  0xf7   :  { %1593 = vmatpush1.bf16.msra.mxu0 %v9462_v25  ;;  %1757 = vmatpush1.bf16.msra.mxu1 %v9465_v26  ;;  %v9559_v25 = vld [vmem:[#allocation5 + $0x48c] ss:$16 sps:$4 sm:$0xff]   ;;  %v9554_v26 = vld [vmem:[#allocation5 + $0x480] ss:$16 sps:$4 sm:$0xff]  }
  0xf8   :  { %1594 = vmatprep.subr.bf16.mxu0 %v9470_v27  ;;  %1758 = vmatprep.subr.bf16.mxu1 %v9473_v28  ;;  %v9557_v27 = vld [vmem:[#allocation5 + $0x488] ss:$16 sps:$4 sm:$0xff]   ;;  %v9562_v28 = vld [vmem:[#allocation5 + $0x4a4] ss:$16 sps:$4 sm:$0xff]  }
  0xfb   :  { %1595 = vmatpush1.bf16.msra.mxu0 %v9468_v31  ;;  %1759 = vmatpush1.bf16.msra.mxu1 %v9471_v32  ;;  %v9563_v31 = vld [vmem:[#allocation5 + $0x4a8] ss:$16 sps:$4 sm:$0xff]   ;;  %v9568_v32 = vld [vmem:[#allocation5 + $0x4c4] ss:$16 sps:$4 sm:$0xff]  }
  0xfc   :  { %1596 = vmatprep.subr.bf16.mxu0 %v9476_v33  ;;  %1760 = vmatprep.subr.bf16.mxu1 %v9479_v34  ;;  %v9571_v33 = vld [vmem:[#allocation5 + $0x4cc] ss:$16 sps:$4 sm:$0xff]   ;;  %v9566_v34 = vld [vmem:[#allocation5 + $0x4c0] ss:$16 sps:$4 sm:$0xff]  }
  0xff   :  { %1597 = vmatpush1.bf16.msra.mxu0 %v9474_v35  ;;  %1761 = vmatpush1.bf16.msra.mxu1 %v9477_v36  ;;  %v9569_v35 = vld [vmem:[#allocation5 + $0x4c8] ss:$16 sps:$4 sm:$0xff]   ;;  %v9574_v36 = vld [vmem:[#allocation5 + $0x4e4] ss:$16 sps:$4 sm:$0xff]  }
 0x100   :  { %1598 = vmatprep.subr.bf16.mxu0 %v9482_v37  ;;  %1762 = vmatprep.subr.bf16.mxu1 %v9485_v38  ;;  %v9577_v37 = vld [vmem:[#allocation5 + $0x4ec] ss:$16 sps:$4 sm:$0xff]   ;;  %v9572_v38 = vld [vmem:[#allocation5 + $0x4e0] ss:$16 sps:$4 sm:$0xff]  }
 0x103   :  { %1599 = vmatpush1.bf16.msra.mxu0 %v9480_v39  ;;  %1763 = vmatpush1.bf16.msra.mxu1 %v9483_v40  ;;  %v9575_v39 = vld [vmem:[#allocation5 + $0x4e8] ss:$16 sps:$4 sm:$0xff]   ;;  %v9580_v40 = vld [vmem:[#allocation5 + $0x504] ss:$16 sps:$4 sm:$0xff]  }
 0x104   :  { %1600 = vmatprep.subr.bf16.mxu0 %v9488_v41  ;;  %1764 = vmatprep.subr.bf16.mxu1 %v9491_v42  ;;  %v9583_v41 = vld [vmem:[#allocation5 + $0x50c] ss:$16 sps:$4 sm:$0xff]   ;;  %v9578_v42 = vld [vmem:[#allocation5 + $0x500] ss:$16 sps:$4 sm:$0xff]  }
 0x107   :  { %1601 = vmatpush1.bf16.msra.mxu0 %v9486_v43  ;;  %1765 = vmatpush1.bf16.msra.mxu1 %v9489_v44  ;;  %v9581_v43 = vld [vmem:[#allocation5 + $0x508] ss:$16 sps:$4 sm:$0xff]   ;;  %v9586_v44 = vld [vmem:[#allocation5 + $0x524] ss:$16 sps:$4 sm:$0xff]  }
 0x108   :  { %1602 = vmatprep.subr.bf16.mxu0 %v9494_v45  ;;  %1766 = vmatprep.subr.bf16.mxu1 %v9497_v46  ;;  %v9589_v45 = vld [vmem:[#allocation5 + $0x52c] ss:$16 sps:$4 sm:$0xff]   ;;  %v9584_v46 = vld [vmem:[#allocation5 + $0x520] ss:$16 sps:$4 sm:$0xff]  }
 0x10b   :  { %1603 = vmatpush1.bf16.msra.mxu0 %v9492_v47  ;;  %1767 = vmatpush1.bf16.msra.mxu1 %v9495_v48  ;;  %v9587_v47 = vld [vmem:[#allocation5 + $0x528] ss:$16 sps:$4 sm:$0xff]   ;;  %v9592_v48 = vld [vmem:[#allocation5 + $0x544] ss:$16 sps:$4 sm:$0xff]  }
 0x10c   :  { %1604 = vmatprep.subr.bf16.mxu0 %v9500_v49  ;;  %1768 = vmatprep.subr.bf16.mxu1 %v9503_v50  ;;  %v9595_v49 = vld [vmem:[#allocation5 + $0x54c] ss:$16 sps:$4 sm:$0xff]   ;;  %v9590_v50 = vld [vmem:[#allocation5 + $0x540] ss:$16 sps:$4 sm:$0xff]  }
 0x10f   :  { %1605 = vmatpush1.bf16.msra.mxu0 %v9498_v51  ;;  %1769 = vmatpush1.bf16.msra.mxu1 %v9501_v52  ;;  %v9593_v51 = vld [vmem:[#allocation5 + $0x548] ss:$16 sps:$4 sm:$0xff]   ;;  %v9598_v52 = vld [vmem:[#allocation5 + $0x564] ss:$16 sps:$4 sm:$0xff]  }
 0x110   :  { %1606 = vmatprep.subr.bf16.mxu0 %v9506_v53  ;;  %1770 = vmatprep.subr.bf16.mxu1 %v9509_v54  ;;  %v9601_v53 = vld [vmem:[#allocation5 + $0x56c] ss:$16 sps:$4 sm:$0xff]   ;;  %v9596_v54 = vld [vmem:[#allocation5 + $0x560] ss:$16 sps:$4 sm:$0xff]  }
 0x113   :  { %1607 = vmatpush1.bf16.msra.mxu0 %v9504_v55  ;;  %1771 = vmatpush1.bf16.msra.mxu1 %v9507_v56  ;;  %v9599_v55 = vld [vmem:[#allocation5 + $0x568] ss:$16 sps:$4 sm:$0xff]   ;;  %v9604_v56 = vld [vmem:[#allocation5 + $0x584] ss:$16 sps:$4 sm:$0xff]  }
 0x114   :  { %1608 = vmatprep.subr.bf16.mxu0 %v9512_v57  ;;  %1772 = vmatprep.subr.bf16.mxu1 %v9515_v58  ;;  %v9607_v57 = vld [vmem:[#allocation5 + $0x58c] ss:$16 sps:$4 sm:$0xff]   ;;  %v9602_v58 = vld [vmem:[#allocation5 + $0x580] ss:$16 sps:$4 sm:$0xff]  }
 0x117   :  { %1609 = vmatpush1.bf16.msra.mxu0 %v9510_v59  ;;  %1773 = vmatpush1.bf16.msra.mxu1 %v9513_v60  ;;  %v9605_v59 = vld [vmem:[#allocation5 + $0x588] ss:$16 sps:$4 sm:$0xff]   ;;  %v9610_v60 = vld [vmem:[#allocation5 + $0x5a4] ss:$16 sps:$4 sm:$0xff]  }
 0x118   :  { %1610 = vmatprep.subr.bf16.mxu0 %v9518_v61  ;;  %1774 = vmatprep.subr.bf16.mxu1 %v9521_v62  ;;  %v9613_v61 = vld [vmem:[#allocation5 + $0x5ac] ss:$16 sps:$4 sm:$0xff]   ;;  %v9608_v62 = vld [vmem:[#allocation5 + $0x5a0] ss:$16 sps:$4 sm:$0xff]  }
 0x11b   :  { %1611 = vmatpush1.bf16.msra.mxu0 %v9516_v63  ;;  %1775 = vmatpush1.bf16.msra.mxu1 %v9519_v0  ;;  %v9611_v63 = vld [vmem:[#allocation5 + $0x5a8] ss:$16 sps:$4 sm:$0xff]   ;;  %v9616_v0 = vld [vmem:[#allocation5 + $0x5c4] ss:$16 sps:$4 sm:$0xff]  }
 0x11c   :  { %1612 = vmatprep.subr.bf16.mxu0 %v9524_v1  ;;  %1776 = vmatprep.subr.bf16.mxu1 %v9527_v2  ;;  %v9619_v1 = vld [vmem:[#allocation5 + $0x5cc] ss:$16 sps:$4 sm:$0xff]   ;;  %v9614_v2 = vld [vmem:[#allocation5 + $0x5c0] ss:$16 sps:$4 sm:$0xff]  }
 0x11f   :  { %1613 = vmatpush1.bf16.msra.mxu0 %v9522_v3  ;;  %1777 = vmatpush1.bf16.msra.mxu1 %v9525_v4  ;;  %v9617_v3 = vld [vmem:[#allocation5 + $0x5c8] ss:$16 sps:$4 sm:$0xff]   ;;  %v9622_v4 = vld [vmem:[#allocation5 + $0x5e4] ss:$16 sps:$4 sm:$0xff]  }
 0x120   :  { %1623 = vmatprep.subr.bf16.mxu0 %v9532_v5  ;;  %1787 = vmatprep.subr.bf16.mxu1 %v9535_v6  ;;  %v9625_v5 = vld [vmem:[#allocation5 + $0x5ec] ss:$16 sps:$4 sm:$0xff]   ;;  %v9620_v6 = vld [vmem:[#allocation5 + $0x5e0] ss:$16 sps:$4 sm:$0xff]  }
 0x122   :  { %1615 = vmatmul.mubr.bf16.vlgmr.msra.gmra.mrb[0].mxu0 %v8056_v7  ;;  %1779 = vmatmul.mubr.bf16.vlgmr.msra.gmra.mrb[0].mxu1 %v8056_v7  ;;  %v9623_v7 = vld [vmem:[#allocation5 + $0x5e8] ss:$16 sps:$4 sm:$0xff]  }
 0x123   :  { %1624 = vmatpush1.bf16.msra.mxu0 %v9530_v8  ;;  %1788 = vmatpush1.bf16.msra.mxu1 %v9533_v9  ;;  %v9630_v8 = vld [vmem:[#allocation5 + $0x604] ss:$16 sps:$4 sm:$0xff]   ;;  %v9633_v9 = vld [vmem:[#allocation5 + $0x60c] ss:$16 sps:$4 sm:$0xff]  }
 0x124   :  { %1625 = vmatprep.subr.bf16.mxu0 %v9538_v10  ;;  %1789 = vmatprep.subr.bf16.mxu1 %v9541_v12  ;;  %v9628_v10 = vld [vmem:[#allocation5 + $0x600] ss:$16 sps:$4 sm:$0xff]   ;;  %v9631_v12 = vld [vmem:[#allocation5 + $0x608] ss:$16 sps:$4 sm:$0xff]  }
 0x125   :  { %1655 = vmatprep.mubr.bf16.mxu0 %v8059_v13  ;;  %1819 = vmatprep.mubr.bf16.mxu1 %v8059_v13  ;;  %v8058_v13 = vcombine.low %v10409_v11, %v10409_v11  ;;  %v9648_v11 = vld [vmem:[#allocation5 + $0x664] ss:$16 sps:$4 sm:$0xff]  }
 0x127   :  { %1626 = vmatpush1.bf16.msra.mxu0 %v9536_v14  ;;  %1790 = vmatpush1.bf16.msra.mxu1 %v9539_v15  ;;  %v9636_v14 = vld [vmem:[#allocation5 + $0x624] ss:$16 sps:$4 sm:$0xff]   ;;  %v9639_v15 = vld [vmem:[#allocation5 + $0x62c] ss:$16 sps:$4 sm:$0xff]  }
 0x128   :  { %1627 = vmatprep.subr.bf16.mxu0 %v9544_v16  ;;  %1791 = vmatprep.subr.bf16.mxu1 %v9547_v17  ;;  %v9634_v16 = vld [vmem:[#allocation5 + $0x620] ss:$16 sps:$4 sm:$0xff]   ;;  %v9637_v17 = vld [vmem:[#allocation5 + $0x628] ss:$16 sps:$4 sm:$0xff]  }
 0x12b   :  { %1628 = vmatpush1.bf16.msra.mxu0 %v9542_v18  ;;  %1792 = vmatpush1.bf16.msra.mxu1 %v9545_v19  ;;  %v9642_v18 = vld [vmem:[#allocation5 + $0x644] ss:$16 sps:$4 sm:$0xff]   ;;  %v9645_v19 = vld [vmem:[#allocation5 + $0x64c] ss:$16 sps:$4 sm:$0xff]  }
 0x12c   :  { %1629 = vmatprep.subr.bf16.mxu0 %v9550_v20  ;;  %1793 = vmatprep.subr.bf16.mxu1 %v9553_v21  ;;  %v9640_v20 = vld [vmem:[#allocation5 + $0x640] ss:$16 sps:$4 sm:$0xff]   ;;  %v9643_v21 = vld [vmem:[#allocation5 + $0x648] ss:$16 sps:$4 sm:$0xff]  }
 0x12f   :  { %1630 = vmatpush1.bf16.msra.mxu0 %v9548_v22  ;;  %1794 = vmatpush1.bf16.msra.mxu1 %v9551_v23  ;;  %v10243_v22 = vmov 0   ;;  %v9651_v23 = vld [vmem:[#allocation5 + $0x66c] ss:$16 sps:$4 sm:$0xff]  }
 0x130   :  { %1631 = vmatprep.subr.bf16.mxu0 %v9556_v24  ;;  %1795 = vmatprep.subr.bf16.mxu1 %v9559_v25  ;;  %v9646_v24 = vld [vmem:[#allocation5 + $0x660] ss:$16 sps:$4 sm:$0xff]   ;;  %v9649_v25 = vld [vmem:[#allocation5 + $0x668] ss:$16 sps:$4 sm:$0xff]  }
 0x133   :  { %1632 = vmatpush1.bf16.msra.mxu0 %v9554_v26  ;;  %1796 = vmatpush1.bf16.msra.mxu1 %v9557_v27  ;;  %v9654_v26 = vld [vmem:[#allocation5 + $0x684] ss:$16 sps:$4 sm:$0xff]   ;;  %v9657_v27 = vld [vmem:[#allocation5 + $0x68c] ss:$16 sps:$4 sm:$0xff]  }
 0x134   :  { %1633 = vmatprep.subr.bf16.mxu0 %v9562_v28  ;;  %1797 = vmatprep.subr.bf16.mxu1 %v9565_v29  ;;  %v9652_v28 = vld [vmem:[#allocation5 + $0x680] ss:$16 sps:$4 sm:$0xff]   ;;  %v9655_v29 = vld [vmem:[#allocation5 + $0x688] ss:$16 sps:$4 sm:$0xff]  }
 0x137   :  { %1634 = vmatpush1.bf16.msra.mxu0 %v9560_v30  ;;  %1798 = vmatpush1.bf16.msra.mxu1 %v9563_v31  ;;  %v9660_v30 = vld [vmem:[#allocation5 + $0x6a4] ss:$16 sps:$4 sm:$0xff]   ;;  %v9663_v31 = vld [vmem:[#allocation5 + $0x6ac] ss:$16 sps:$4 sm:$0xff]  }
 0x138   :  { %1635 = vmatprep.subr.bf16.mxu0 %v9568_v32  ;;  %1799 = vmatprep.subr.bf16.mxu1 %v9571_v33  ;;  %v9658_v32 = vld [vmem:[#allocation5 + $0x6a0] ss:$16 sps:$4 sm:$0xff]   ;;  %v9661_v33 = vld [vmem:[#allocation5 + $0x6a8] ss:$16 sps:$4 sm:$0xff]  }
 0x13b   :  { %1636 = vmatpush1.bf16.msra.mxu0 %v9566_v34  ;;  %1800 = vmatpush1.bf16.msra.mxu1 %v9569_v35  ;;  %v9666_v34 = vld [vmem:[#allocation5 + $0x6c4] ss:$16 sps:$4 sm:$0xff]   ;;  %v9669_v35 = vld [vmem:[#allocation5 + $0x6cc] ss:$16 sps:$4 sm:$0xff]  }
 0x13c   :  { %1637 = vmatprep.subr.bf16.mxu0 %v9574_v36  ;;  %1801 = vmatprep.subr.bf16.mxu1 %v9577_v37  ;;  %v9664_v36 = vld [vmem:[#allocation5 + $0x6c0] ss:$16 sps:$4 sm:$0xff]   ;;  %v9667_v37 = vld [vmem:[#allocation5 + $0x6c8] ss:$16 sps:$4 sm:$0xff]  }
 0x13f   :  { %1638 = vmatpush1.bf16.msra.mxu0 %v9572_v38  ;;  %1802 = vmatpush1.bf16.msra.mxu1 %v9575_v39  ;;  %v9672_v38 = vld [vmem:[#allocation5 + $0x6e4] ss:$16 sps:$4 sm:$0xff]   ;;  %v9675_v39 = vld [vmem:[#allocation5 + $0x6ec] ss:$16 sps:$4 sm:$0xff]  }
 0x140   :  { %1639 = vmatprep.subr.bf16.mxu0 %v9580_v40  ;;  %1803 = vmatprep.subr.bf16.mxu1 %v9583_v41  ;;  %v9670_v40 = vld [vmem:[#allocation5 + $0x6e0] ss:$16 sps:$4 sm:$0xff]   ;;  %v9673_v41 = vld [vmem:[#allocation5 + $0x6e8] ss:$16 sps:$4 sm:$0xff]  }
 0x143   :  { %1640 = vmatpush1.bf16.msra.mxu0 %v9578_v42  ;;  %1804 = vmatpush1.bf16.msra.mxu1 %v9581_v43  ;;  %v9679_v42 = vld [vmem:[#allocation8 + $0x4] ss:$16 sps:$4 sm:$0xff]   ;;  %v9682_v43 = vld [vmem:[#allocation8 + $0xc] ss:$16 sps:$4 sm:$0xff]  }
 0x144   :  { %1641 = vmatprep.subr.bf16.mxu0 %v9586_v44  ;;  %1805 = vmatprep.subr.bf16.mxu1 %v9589_v45  ;;  %v9676_v44 = vld [vmem:[#allocation2 + $0x18] ss:$0 sps:$4 sm:$0xff]   ;;  %v9677_v45 = vld [vmem:[#allocation8] ss:$16 sps:$4 sm:$0xff]  }
 0x147   :  { %1642 = vmatpush1.bf16.msra.mxu0 %v9584_v46  ;;  %1806 = vmatpush1.bf16.msra.mxu1 %v9587_v47  ;;  %v9680_v46 = vld [vmem:[#allocation8 + $0x8] ss:$16 sps:$4 sm:$0xff]   ;;  %v9685_v47 = vld [vmem:[#allocation8 + $0x24] ss:$16 sps:$4 sm:$0xff]  }
 0x148   :  { %1643 = vmatprep.subr.bf16.mxu0 %v9592_v48  ;;  %1807 = vmatprep.subr.bf16.mxu1 %v9595_v49  ;;  %v9688_v48 = vld [vmem:[#allocation8 + $0x2c] ss:$16 sps:$4 sm:$0xff]   ;;  %v9683_v49 = vld [vmem:[#allocation8 + $0x20] ss:$16 sps:$4 sm:$0xff]  }
 0x14b   :  { %1644 = vmatpush1.bf16.msra.mxu0 %v9590_v50  ;;  %1808 = vmatpush1.bf16.msra.mxu1 %v9593_v51  ;;  %v9686_v50 = vld [vmem:[#allocation8 + $0x28] ss:$16 sps:$4 sm:$0xff]   ;;  %v9691_v51 = vld [vmem:[#allocation8 + $0x44] ss:$16 sps:$4 sm:$0xff]  }
 0x14c   :  { %1645 = vmatprep.subr.bf16.mxu0 %v9598_v52  ;;  %1809 = vmatprep.subr.bf16.mxu1 %v9601_v53  ;;  %v9694_v52 = vld [vmem:[#allocation8 + $0x4c] ss:$16 sps:$4 sm:$0xff]   ;;  %v9689_v53 = vld [vmem:[#allocation8 + $0x40] ss:$16 sps:$4 sm:$0xff]  }
 0x14f   :  { %1646 = vmatpush1.bf16.msra.mxu0 %v9596_v54  ;;  %1810 = vmatpush1.bf16.msra.mxu1 %v9599_v55  ;;  %v9692_v54 = vld [vmem:[#allocation8 + $0x48] ss:$16 sps:$4 sm:$0xff]   ;;  %v9697_v55 = vld [vmem:[#allocation8 + $0x64] ss:$16 sps:$4 sm:$0xff]  }
 0x150   :  { %1647 = vmatprep.subr.bf16.mxu0 %v9604_v56  ;;  %1811 = vmatprep.subr.bf16.mxu1 %v9607_v57  ;;  %v9700_v56 = vld [vmem:[#allocation8 + $0x6c] ss:$16 sps:$4 sm:$0xff]   ;;  %v9695_v57 = vld [vmem:[#allocation8 + $0x60] ss:$16 sps:$4 sm:$0xff]  }
 0x153   :  { %1648 = vmatpush1.bf16.msra.mxu0 %v9602_v58  ;;  %1812 = vmatpush1.bf16.msra.mxu1 %v9605_v59  ;;  %v9698_v58 = vld [vmem:[#allocation8 + $0x68] ss:$16 sps:$4 sm:$0xff]   ;;  %v9703_v59 = vld [vmem:[#allocation8 + $0x84] ss:$16 sps:$4 sm:$0xff]  }
 0x154   :  { %1649 = vmatprep.subr.bf16.mxu0 %v9610_v60  ;;  %1813 = vmatprep.subr.bf16.mxu1 %v9613_v61  ;;  %v9706_v60 = vld [vmem:[#allocation8 + $0x8c] ss:$16 sps:$4 sm:$0xff]   ;;  %v9701_v61 = vld [vmem:[#allocation8 + $0x80] ss:$16 sps:$4 sm:$0xff]  }
 0x157   :  { %1650 = vmatpush1.bf16.msra.mxu0 %v9608_v62  ;;  %1814 = vmatpush1.bf16.msra.mxu1 %v9611_v63  ;;  %v9704_v62 = vld [vmem:[#allocation8 + $0x88] ss:$16 sps:$4 sm:$0xff]   ;;  %v9709_v63 = vld [vmem:[#allocation8 + $0xa4] ss:$16 sps:$4 sm:$0xff]  }
 0x158   :  { %1651 = vmatprep.subr.bf16.mxu0 %v9616_v0  ;;  %1815 = vmatprep.subr.bf16.mxu1 %v9619_v1  ;;  %v9712_v0 = vld [vmem:[#allocation8 + $0xac] ss:$16 sps:$4 sm:$0xff]   ;;  %v9707_v1 = vld [vmem:[#allocation8 + $0xa0] ss:$16 sps:$4 sm:$0xff]  }
 0x15b   :  { %1652 = vmatpush1.bf16.msra.mxu0 %v9614_v2  ;;  %1816 = vmatpush1.bf16.msra.mxu1 %v9617_v3  ;;  %v9710_v2 = vld [vmem:[#allocation8 + $0xa8] ss:$16 sps:$4 sm:$0xff]   ;;  %v9715_v3 = vld [vmem:[#allocation8 + $0xc4] ss:$16 sps:$4 sm:$0xff]  }
 0x15c   :  { %1653 = vmatprep.subr.bf16.mxu0 %v9622_v4  ;;  %1817 = vmatprep.subr.bf16.mxu1 %v9625_v5  ;;  %v9718_v4 = vld [vmem:[#allocation8 + $0xcc] ss:$16 sps:$4 sm:$0xff]   ;;  %v9713_v5 = vld [vmem:[#allocation8 + $0xc0] ss:$16 sps:$4 sm:$0xff]  }
 0x15f   :  { %1654 = vmatpush1.bf16.msra.mxu0 %v9620_v6  ;;  %1818 = vmatpush1.bf16.msra.mxu1 %v9623_v7  ;;  %v9716_v6 = vld [vmem:[#allocation8 + $0xc8] ss:$16 sps:$4 sm:$0xff]   ;;  %v9721_v7 = vld [vmem:[#allocation8 + $0xe4] ss:$16 sps:$4 sm:$0xff]  }
 0x160   :  { %1664 = vmatprep.subr.bf16.mxu0 %v9630_v8  ;;  %1828 = vmatprep.subr.bf16.mxu1 %v9633_v9  ;;  %v9724_v8 = vld [vmem:[#allocation8 + $0xec] ss:$16 sps:$4 sm:$0xff]   ;;  %v9719_v9 = vld [vmem:[#allocation8 + $0xe0] ss:$16 sps:$4 sm:$0xff]  }
 0x162   :  { %1656 = vmatmul.mubr.bf16.vlgmr.msra.gmra.mrb[0].mxu0 %v8058_v13  ;;  %1820 = vmatmul.mubr.bf16.vlgmr.msra.gmra.mrb[0].mxu1 %v8058_v13  ;;  %v9730_v13 = vld [vmem:[#allocation8 + $0x10c] ss:$16 sps:$4 sm:$0xff]  }
 0x163   :  { %1665 = vmatpush1.bf16.msra.mxu0 %v9628_v10  ;;  %1829 = vmatpush1.bf16.msra.mxu1 %v9631_v12  ;;  %v9722_v10 = vld [vmem:[#allocation8 + $0xe8] ss:$16 sps:$4 sm:$0xff]   ;;  %v9727_v12 = vld [vmem:[#allocation8 + $0x104] ss:$16 sps:$4 sm:$0xff]  }
 0x164   :  { %1666 = vmatprep.subr.bf16.mxu0 %v9636_v14  ;;  %1830 = vmatprep.subr.bf16.mxu1 %v9639_v15  ;;  %v9725_v14 = vld [vmem:[#allocation8 + $0x100] ss:$16 sps:$4 sm:$0xff]   ;;  %v9728_v15 = vld [vmem:[#allocation8 + $0x108] ss:$16 sps:$4 sm:$0xff]  }
 0x165   :  { %1696 = vmatprep.mubr.bf16.mxu0 %v10243_v22  ;;  %1860 = vmatprep.mubr.bf16.mxu1 %v10243_v22  ;;  %v9737_v22 = vld [vmem:[#allocation8 + $0x140] ss:$16 sps:$4 sm:$0xff]  }
 0x167   :  { %1667 = vmatpush1.bf16.msra.mxu0 %v9634_v16  ;;  %1831 = vmatpush1.bf16.msra.mxu1 %v9637_v17  ;;  %v9733_v16 = vld [vmem:[#allocation8 + $0x124] ss:$16 sps:$4 sm:$0xff]   ;;  %v9736_v17 = vld [vmem:[#allocation8 + $0x12c] ss:$16 sps:$4 sm:$0xff]  }
 0x168   :  { %1668 = vmatprep.subr.bf16.mxu0 %v9642_v18  ;;  %1832 = vmatprep.subr.bf16.mxu1 %v9645_v19  ;;  %v9731_v18 = vld [vmem:[#allocation8 + $0x120] ss:$16 sps:$4 sm:$0xff]   ;;  %v9734_v19 = vld [vmem:[#allocation8 + $0x128] ss:$16 sps:$4 sm:$0xff]  }
 0x16b   :  { %1669 = vmatpush1.bf16.msra.mxu0 %v9640_v20  ;;  %1833 = vmatpush1.bf16.msra.mxu1 %v9643_v21  ;;  %v9739_v20 = vld [vmem:[#allocation8 + $0x144] ss:$16 sps:$4 sm:$0xff]   ;;  %v9742_v21 = vld [vmem:[#allocation8 + $0x14c] ss:$16 sps:$4 sm:$0xff]  }
 0x16c   :  { %1670 = vmatprep.subr.bf16.mxu0 %v9648_v11  ;;  %1834 = vmatprep.subr.bf16.mxu1 %v9651_v23  ;;  %v9740_v11 = vld [vmem:[#allocation8 + $0x148] ss:$16 sps:$4 sm:$0xff]   ;;  %v9745_v23 = vld [vmem:[#allocation8 + $0x164] ss:$16 sps:$4 sm:$0xff]  }
 0x16f   :  { %1671 = vmatpush1.bf16.msra.mxu0 %v9646_v24  ;;  %1835 = vmatpush1.bf16.msra.mxu1 %v9649_v25  ;;  %v9748_v24 = vld [vmem:[#allocation8 + $0x16c] ss:$16 sps:$4 sm:$0xff]   ;;  %v9743_v25 = vld [vmem:[#allocation8 + $0x160] ss:$16 sps:$4 sm:$0xff]  }
 0x170   :  { %1672 = vmatprep.subr.bf16.mxu0 %v9654_v26  ;;  %1836 = vmatprep.subr.bf16.mxu1 %v9657_v27  ;;  %v9746_v26 = vld [vmem:[#allocation8 + $0x168] ss:$16 sps:$4 sm:$0xff]   ;;  %v9751_v27 = vld [vmem:[#allocation8 + $0x184] ss:$16 sps:$4 sm:$0xff]  }
 0x173   :  { %1673 = vmatpush1.bf16.msra.mxu0 %v9652_v28  ;;  %1837 = vmatpush1.bf16.msra.mxu1 %v9655_v29  ;;  %v9754_v28 = vld [vmem:[#allocation8 + $0x18c] ss:$16 sps:$4 sm:$0xff]   ;;  %v9749_v29 = vld [vmem:[#allocation8 + $0x180] ss:$16 sps:$4 sm:$0xff]  }
 0x174   :  { %1674 = vmatprep.subr.bf16.mxu0 %v9660_v30  ;;  %1838 = vmatprep.subr.bf16.mxu1 %v9663_v31  ;;  %v9752_v30 = vld [vmem:[#allocation8 + $0x188] ss:$16 sps:$4 sm:$0xff]   ;;  %v9757_v31 = vld [vmem:[#allocation8 + $0x1a4] ss:$16 sps:$4 sm:$0xff]  }
 0x177   :  { %1675 = vmatpush1.bf16.msra.mxu0 %v9658_v32  ;;  %1839 = vmatpush1.bf16.msra.mxu1 %v9661_v33  ;;  %v9760_v32 = vld [vmem:[#allocation8 + $0x1ac] ss:$16 sps:$4 sm:$0xff]   ;;  %v9755_v33 = vld [vmem:[#allocation8 + $0x1a0] ss:$16 sps:$4 sm:$0xff]  }
 0x178   :  { %1676 = vmatprep.subr.bf16.mxu0 %v9666_v34  ;;  %1840 = vmatprep.subr.bf16.mxu1 %v9669_v35  ;;  %v9758_v34 = vld [vmem:[#allocation8 + $0x1a8] ss:$16 sps:$4 sm:$0xff]   ;;  %v9763_v35 = vld [vmem:[#allocation8 + $0x1c4] ss:$16 sps:$4 sm:$0xff]  }
 0x17b   :  { %1677 = vmatpush1.bf16.msra.mxu0 %v9664_v36  ;;  %1841 = vmatpush1.bf16.msra.mxu1 %v9667_v37  ;;  %v9766_v36 = vld [vmem:[#allocation8 + $0x1cc] ss:$16 sps:$4 sm:$0xff]   ;;  %v9761_v37 = vld [vmem:[#allocation8 + $0x1c0] ss:$16 sps:$4 sm:$0xff]  }
 0x17c   :  { %1678 = vmatprep.subr.bf16.mxu0 %v9672_v38  ;;  %1842 = vmatprep.subr.bf16.mxu1 %v9675_v39  ;;  %v9764_v38 = vld [vmem:[#allocation8 + $0x1c8] ss:$16 sps:$4 sm:$0xff]   ;;  %v9769_v39 = vld [vmem:[#allocation8 + $0x1e4] ss:$16 sps:$4 sm:$0xff]  }
 0x17f   :  { %1679 = vmatpush1.bf16.msra.mxu0 %v9670_v40  ;;  %1843 = vmatpush1.bf16.msra.mxu1 %v9673_v41  ;;  %v9772_v40 = vld [vmem:[#allocation8 + $0x1ec] ss:$16 sps:$4 sm:$0xff]   ;;  %v9767_v41 = vld [vmem:[#allocation8 + $0x1e0] ss:$16 sps:$4 sm:$0xff]  }
 0x180   :  { %2667 = vmatprep.subr.bf16.mxu0 %v9679_v42  ;;  %2749 = vmatprep.subr.bf16.mxu1 %v9682_v43  ;;  %v9770_v42 = vld [vmem:[#allocation8 + $0x1e8] ss:$16 sps:$4 sm:$0xff]   ;;  %v9775_v43 = vld [vmem:[#allocation8 + $0x204] ss:$16 sps:$4 sm:$0xff]  }
 0x182   :  { %1697 = vmatmul.mubr.bf16.vlgmr.msra.gmra.mrb[0].mxu0 %v9676_v44  ;;  %1861 = vmatmul.mubr.bf16.vlgmr.msra.gmra.mrb[0].mxu1 %v9676_v44  ;;  %v9778_v44 = vld [vmem:[#allocation8 + $0x20c] ss:$16 sps:$4 sm:$0xff]  }
 0x183   :  { %2668 = vmatpush1.bf16.msra.mxu0 %v9677_v45  ;;  %2750 = vmatpush1.bf16.msra.mxu1 %v9680_v46  ;;  %v376_v45 = vlaneseq }
 0x184   :  { %2669 = vmatprep.subr.bf16.mxu0 %v9685_v47  ;;  %2751 = vmatprep.subr.bf16.mxu1 %v9688_v48  ;;  %v10420_v48 = vld [vmem:[#allocation7] sm:$0xf] }
 0x185   :  { %v10415_v46 = vshrl.u32 %v376_v45, 7  ;;  %v9835_v45 = vld [vmem:[#allocation8 + $0x344] ss:$16 sps:$4 sm:$0xff]  }
 0x187   :  { %2670 = vmatpush1.bf16.msra.mxu0 %v9683_v49  ;;  %2752 = vmatpush1.bf16.msra.mxu1 %v9686_v50  ;;  %v10418_v47 = vsub.s32 0, %v10415_v46  ;;  %v10423_v49 = vsub.s32 1, %v10415_v46  ;;  %v10426_v50 = vsub.s32 3, %v10415_v46 }
 0x188   :  { %2671 = vmatprep.subr.bf16.mxu0 %v9691_v51  ;;  %2753 = vmatprep.subr.bf16.mxu1 %v9694_v52 }
 0x189   :  { %v379_v51 = vrot.slane %v10420_v48, %v10418_v47  ;;  %v383_v52 = vrot.slane %v10420_v48, %v10423_v49 }
 0x18b   :  { %2672 = vmatpush1.bf16.msra.mxu0 %v9689_v53  ;;  %2754 = vmatpush1.bf16.msra.mxu1 %v9692_v54  ;;  %v391_v53 = vrot.slane %v10420_v48, %v10426_v50 }
 0x18c   :  { %2673 = vmatprep.subr.bf16.mxu0 %v9697_v55  ;;  %2755 = vmatprep.subr.bf16.mxu1 %v9700_v56 }
 0x18f   :  { %2674 = vmatpush1.bf16.msra.mxu0 %v9695_v57  ;;  %2756 = vmatpush1.bf16.msra.mxu1 %v9698_v58 }
 0x190   :  { %2675 = vmatprep.subr.bf16.mxu0 %v9703_v59  ;;  %2757 = vmatprep.subr.bf16.mxu1 %v9706_v60 }
 0x193   :  { %2676 = vmatpush1.bf16.msra.mxu0 %v9701_v61  ;;  %2758 = vmatpush1.bf16.msra.mxu1 %v9704_v62 }
 0x194   :  { %2677 = vmatprep.subr.bf16.mxu0 %v9709_v63  ;;  %2759 = vmatprep.subr.bf16.mxu1 %v9712_v0 }
 0x197   :  { %2678 = vmatpush1.bf16.msra.mxu0 %v9707_v1  ;;  %2760 = vmatpush1.bf16.msra.mxu1 %v9710_v2 }
 0x198   :  { %2679 = vmatprep.subr.bf16.mxu0 %v9715_v3  ;;  %2761 = vmatprep.subr.bf16.mxu1 %v9718_v4 }
 0x19b   :  { %2680 = vmatpush1.bf16.msra.mxu0 %v9713_v5  ;;  %2762 = vmatpush1.bf16.msra.mxu1 %v9716_v6  ;;  %v9773_v5 = vld [vmem:[#allocation8 + $0x200] ss:$16 sps:$4 sm:$0xff]   ;;  %v9776_v6 = vld [vmem:[#allocation8 + $0x208] ss:$16 sps:$4 sm:$0xff]  }
 0x19c   :  { %2681 = vmatprep.subr.bf16.mxu0 %v9721_v7  ;;  %2763 = vmatprep.subr.bf16.mxu1 %v9724_v8  ;;  %v9781_v8 = vld [vmem:[#allocation8 + $0x224] ss:$16 sps:$4 sm:$0xff]  }
 0x19f   :  { %2682 = vmatpush1.bf16.msra.mxu0 %v9719_v9  ;;  %2764 = vmatpush1.bf16.msra.mxu1 %v9722_v10  ;;  %v9784_v9 = vld [vmem:[#allocation8 + $0x22c] ss:$16 sps:$4 sm:$0xff]  }
 0x1a0   :  { %2683 = vmatprep.subr.bf16.mxu0 %v9727_v12  ;;  %2765 = vmatprep.subr.bf16.mxu1 %v9730_v13  ;;  %v9779_v12 = vld [vmem:[#allocation8 + $0x220] ss:$16 sps:$4 sm:$0xff]   ;;  %v9782_v13 = vld [vmem:[#allocation8 + $0x228] ss:$16 sps:$4 sm:$0xff]  }
 0x1a3   :  { %2684 = vmatpush1.bf16.msra.mxu0 %v9725_v14  ;;  %2766 = vmatpush1.bf16.msra.mxu1 %v9728_v15  ;;  %v9787_v14 = vld [vmem:[#allocation8 + $0x244] ss:$16 sps:$4 sm:$0xff]   ;;  %v9790_v15 = vld [vmem:[#allocation8 + $0x24c] ss:$16 sps:$4 sm:$0xff]  }
 0x1a4   :  { %2685 = vmatprep.subr.bf16.mxu0 %v9733_v16  ;;  %2767 = vmatprep.subr.bf16.mxu1 %v9736_v17  ;;  %v9785_v16 = vld [vmem:[#allocation8 + $0x240] ss:$16 sps:$4 sm:$0xff]   ;;  %v9788_v17 = vld [vmem:[#allocation8 + $0x248] ss:$16 sps:$4 sm:$0xff]  }
 0x1a7   :  { %2686 = vmatpush1.bf16.msra.mxu0 %v9731_v18  ;;  %2768 = vmatpush1.bf16.msra.mxu1 %v9734_v19  ;;  %v9793_v18 = vld [vmem:[#allocation8 + $0x264] ss:$16 sps:$4 sm:$0xff]   ;;  %v9796_v19 = vld [vmem:[#allocation8 + $0x26c] ss:$16 sps:$4 sm:$0xff]  }
 0x1a8   :  { %2687 = vmatprep.subr.bf16.mxu0 %v9739_v20  ;;  %2769 = vmatprep.subr.bf16.mxu1 %v9742_v21  ;;  %v9791_v20 = vld [vmem:[#allocation8 + $0x260] ss:$16 sps:$4 sm:$0xff]   ;;  %v9794_v21 = vld [vmem:[#allocation8 + $0x268] ss:$16 sps:$4 sm:$0xff]  }
 0x1ab   :  { %2688 = vmatpush1.bf16.msra.mxu0 %v9737_v22  ;;  %2770 = vmatpush1.bf16.msra.mxu1 %v9740_v11  ;;  %v9799_v22 = vld [vmem:[#allocation8 + $0x284] ss:$16 sps:$4 sm:$0xff]   ;;  %v9802_v11 = vld [vmem:[#allocation8 + $0x28c] ss:$16 sps:$4 sm:$0xff]  }
 0x1ac   :  { %2689 = vmatprep.subr.bf16.mxu0 %v9745_v23  ;;  %2771 = vmatprep.subr.bf16.mxu1 %v9748_v24  ;;  %v9797_v23 = vld [vmem:[#allocation8 + $0x280] ss:$16 sps:$4 sm:$0xff]   ;;  %v9800_v24 = vld [vmem:[#allocation8 + $0x288] ss:$16 sps:$4 sm:$0xff]  }
 0x1af   :  { %2690 = vmatpush1.bf16.msra.mxu0 %v9743_v25  ;;  %2772 = vmatpush1.bf16.msra.mxu1 %v9746_v26  ;;  %v9805_v25 = vld [vmem:[#allocation8 + $0x2a4] ss:$16 sps:$4 sm:$0xff]   ;;  %v9808_v26 = vld [vmem:[#allocation8 + $0x2ac] ss:$16 sps:$4 sm:$0xff]  }
 0x1b0   :  { %2691 = vmatprep.subr.bf16.mxu0 %v9751_v27  ;;  %2773 = vmatprep.subr.bf16.mxu1 %v9754_v28  ;;  %v9803_v27 = vld [vmem:[#allocation8 + $0x2a0] ss:$16 sps:$4 sm:$0xff]   ;;  %v9806_v28 = vld [vmem:[#allocation8 + $0x2a8] ss:$16 sps:$4 sm:$0xff]  }
 0x1b3   :  { %2692 = vmatpush1.bf16.msra.mxu0 %v9749_v29  ;;  %2774 = vmatpush1.bf16.msra.mxu1 %v9752_v30  ;;  %v9811_v29 = vld [vmem:[#allocation8 + $0x2c4] ss:$16 sps:$4 sm:$0xff]   ;;  %v9814_v30 = vld [vmem:[#allocation8 + $0x2cc] ss:$16 sps:$4 sm:$0xff]  }
 0x1b4   :  { %2693 = vmatprep.subr.bf16.mxu0 %v9757_v31  ;;  %2775 = vmatprep.subr.bf16.mxu1 %v9760_v32  ;;  %v9809_v31 = vld [vmem:[#allocation8 + $0x2c0] ss:$16 sps:$4 sm:$0xff]   ;;  %v9812_v32 = vld [vmem:[#allocation8 + $0x2c8] ss:$16 sps:$4 sm:$0xff]  }
 0x1b7   :  { %2694 = vmatpush1.bf16.msra.mxu0 %v9755_v33  ;;  %2776 = vmatpush1.bf16.msra.mxu1 %v9758_v34  ;;  %v9817_v33 = vld [vmem:[#allocation8 + $0x2e4] ss:$16 sps:$4 sm:$0xff]   ;;  %v9820_v34 = vld [vmem:[#allocation8 + $0x2ec] ss:$16 sps:$4 sm:$0xff]  }
 0x1b8   :  { %2695 = vmatprep.subr.bf16.mxu0 %v9763_v35  ;;  %2777 = vmatprep.subr.bf16.mxu1 %v9766_v36  ;;  %v9815_v35 = vld [vmem:[#allocation8 + $0x2e0] ss:$16 sps:$4 sm:$0xff]   ;;  %v9818_v36 = vld [vmem:[#allocation8 + $0x2e8] ss:$16 sps:$4 sm:$0xff]  }
 0x1bb   :  { %2696 = vmatpush1.bf16.msra.mxu0 %v9761_v37  ;;  %2778 = vmatpush1.bf16.msra.mxu1 %v9764_v38  ;;  %v9823_v37 = vld [vmem:[#allocation8 + $0x304] ss:$16 sps:$4 sm:$0xff]   ;;  %v9826_v38 = vld [vmem:[#allocation8 + $0x30c] ss:$16 sps:$4 sm:$0xff]  }
 0x1bc   :  { %2697 = vmatprep.subr.bf16.mxu0 %v9769_v39  ;;  %2779 = vmatprep.subr.bf16.mxu1 %v9772_v40  ;;  %v9821_v39 = vld [vmem:[#allocation8 + $0x300] ss:$16 sps:$4 sm:$0xff]   ;;  %v9824_v40 = vld [vmem:[#allocation8 + $0x308] ss:$16 sps:$4 sm:$0xff]  }
 0x1bf   :  { %2698 = vmatpush1.bf16.msra.mxu0 %v9767_v41  ;;  %2780 = vmatpush1.bf16.msra.mxu1 %v9770_v42  ;;  %v9829_v41 = vld [vmem:[#allocation8 + $0x324] ss:$16 sps:$4 sm:$0xff]   ;;  %v9832_v42 = vld [vmem:[#allocation8 + $0x32c] ss:$16 sps:$4 sm:$0xff]  }
 0x1c0   :  { %2708 = vmatprep.subr.bf16.mxu0 %v9775_v43  ;;  %2790 = vmatprep.subr.bf16.mxu1 %v9778_v44  ;;  %v9827_v43 = vld [vmem:[#allocation8 + $0x320] ss:$16 sps:$4 sm:$0xff]   ;;  %v9830_v44 = vld [vmem:[#allocation8 + $0x328] ss:$16 sps:$4 sm:$0xff]  }
 0x255   :  { %v1698_v54 = vpop.f32.mrb[0].mxu0  ;;  %v10434_v55 = vpop.f32.mrb[0].mxu1 }
 0x256   :  { %v9230_v56 = vadd.f32 %v1698_v54, %v379_v51  ;;  %v1700_v57 = vpop.f32.mrb[1].mxu0  ;;  %v1864_v58 = vpop.f32.mrb[1].mxu1  ;;  %v9838_v51 = vld [vmem:[#allocation8 + $0x34c] ss:$16 sps:$4 sm:$0xff]   ;;  %v9841_v54 = vld [vmem:[#allocation8 + $0x364] ss:$16 sps:$4 sm:$0xff]  }
 0x257   :  { %v9231_v59 = vadd.f32 %v1700_v57, %v383_v52  ;;  %v9233_v60 = vadd.f32 %v1864_v58, %v391_v53  ;;  %v1702_v61 = vpop.f32.mrb[2].mxu0  ;;  %v1866_v62 = vpop.f32.mrb[2].mxu1  ;;  %v9833_v52 = vld [vmem:[#allocation8 + $0x340] ss:$16 sps:$4 sm:$0xff]   ;;  %v9836_v53 = vld [vmem:[#allocation8 + $0x348] ss:$16 sps:$4 sm:$0xff]  }
 0x258   :  { %v1869_v63 = vmax.f32 %v9230_v56, 0.0  ;;  %v1703_v0 = vpop.f32.mrb[3].mxu0  ;;  %v1867_v1 = vpop.f32.mrb[3].mxu1  ;;  %v9844_v56 = vld [vmem:[#allocation8 + $0x36c] ss:$16 sps:$4 sm:$0xff]  }
 0x259   :  { %v1870_v2 = vmax.f32 %v9231_v59, 0.0  ;;  %v1872_v3 = vmax.f32 %v9233_v60, 0.0  ;;  %v9839_v57 = vld [vmem:[#allocation8 + $0x360] ss:$16 sps:$4 sm:$0xff]   ;;  %v9842_v58 = vld [vmem:[#allocation8 + $0x368] ss:$16 sps:$4 sm:$0xff]  }
 0x25a   :  { %v1873_v7 = vpack.c.bf16 %v1869_v63, %v1869_v63  ;;  %v9847_v59 = vld [vmem:[#allocation8 + $0x384] ss:$16 sps:$4 sm:$0xff]   ;;  %v9850_v60 = vld [vmem:[#allocation8 + $0x38c] ss:$16 sps:$4 sm:$0xff]   ;;  %v9845_v61 = vld [vmem:[#allocation8 + $0x380] ss:$16 sps:$4 sm:$0xff]  }
 0x25b   :  { %v1874_v4 = vpack.c.bf16 %v1870_v2, %v1870_v2  ;;  %v1876_v10 = vpack.c.bf16 %v1872_v3, %v1872_v3  ;;  %v9848_v62 = vld [vmem:[#allocation8 + $0x388] ss:$16 sps:$4 sm:$0xff]   ;;  %v10437_v63 = vsub.s32 2, %v10415_v46  ;;  %v9853_v0 = vld [vmem:[#allocation8 + $0x3a4] ss:$16 sps:$4 sm:$0xff]  }
 0x25c   :  { %v9856_v1 = vld [vmem:[#allocation8 + $0x3ac] ss:$16 sps:$4 sm:$0xff]   ;;  %v9851_v2 = vld [vmem:[#allocation8 + $0x3a0] ss:$16 sps:$4 sm:$0xff]   ;;  %v9854_v3 = vld [vmem:[#allocation8 + $0x3a8] ss:$16 sps:$4 sm:$0xff]  }
 0x25d   :  { %2699 = vmatprep.mubr.bf16.mxu0 %v1874_v4  ;;  %2781 = vmatprep.mubr.bf16.mxu1 %v1874_v4  ;;  %v387_v4 = vrot.slane %v10420_v48, %v10437_v63  ;;  %v9863_v48 = vld [vmem:[#allocation8 + $0x3e0] ss:$16 sps:$4 sm:$0xff]  }
 0x25e   :  { %2700 = vmatmul.mubr.bf16.vlgmr.msra.gmra.mrb[4].mxu0 %v1873_v7  ;;  %2782 = vmatmul.mubr.bf16.vlgmr.msra.gmra.mrb[4].mxu1 %v1873_v7  ;;  %v9857_v7 = vld [vmem:[#allocation8 + $0x3c0] ss:$16 sps:$4 sm:$0xff]  }
 0x25f   :  { %2709 = vmatpush1.bf16.msra.mxu0 %v9773_v5  ;;  %2791 = vmatpush1.bf16.msra.mxu1 %v9776_v6  ;;  %v9859_v5 = vld [vmem:[#allocation8 + $0x3c4] ss:$16 sps:$4 sm:$0xff]   ;;  %v9862_v6 = vld [vmem:[#allocation8 + $0x3cc] ss:$16 sps:$4 sm:$0xff]  }
 0x260   :  { %2740 = vmatprep.mubr.bf16.mxu0 %v1876_v10  ;;  %2822 = vmatprep.mubr.bf16.mxu1 %v1876_v10  ;;  %v9865_v10 = vld [vmem:[#allocation8 + $0x3e4] ss:$16 sps:$4 sm:$0xff]  }
 0x261   :  { %2710 = vmatprep.subr.bf16.mxu0 %v9781_v8  ;;  %2792 = vmatprep.subr.bf16.mxu1 %v9784_v9  ;;  %v9860_v8 = vld [vmem:[#allocation8 + $0x3c8] ss:$16 sps:$4 sm:$0xff]   ;;  %v9232_v9 = vadd.f32 %v10434_v55, %v387_v4  ;;  %v2856_v55 = vld [vmem:[#allocation11 + $0x88] sm:$0xff] }
 0x262   :  { %v2943_v4 = vld [vmem:[#allocation11 + $0x340] sm:$0xff] }
 0x263   :  { %2711 = vmatpush1.bf16.msra.mxu0 %v9779_v12  ;;  %2793 = vmatpush1.bf16.msra.mxu1 %v9782_v13  ;;  %v9868_v12 = vld [vmem:[#allocation8 + $0x3ec] ss:$16 sps:$4 sm:$0xff]   ;;  %v2839_v13 = vld [vmem:[#allocation11] sm:$0xff] }
 0x264   :  { %2712 = vmatprep.subr.bf16.mxu0 %v9787_v14  ;;  %2794 = vmatprep.subr.bf16.mxu1 %v9790_v15  ;;  %v2847_v14 = vld [vmem:[#allocation11 + $0x40] sm:$0xff]  ;;  %v2840_v15 = vld [vmem:[#allocation11 + $0x8] sm:$0xff] }
 0x267   :  { %2713 = vmatpush1.bf16.msra.mxu0 %v9785_v16  ;;  %2795 = vmatpush1.bf16.msra.mxu1 %v9788_v17  ;;  %v2848_v16 = vld [vmem:[#allocation11 + $0x48] sm:$0xff]  ;;  %v9866_v17 = vld [vmem:[#allocation8 + $0x3e8] ss:$16 sps:$4 sm:$0xff]  }
 0x268   :  { %2714 = vmatprep.subr.bf16.mxu0 %v9793_v18  ;;  %2796 = vmatprep.subr.bf16.mxu1 %v9796_v19  ;;  %v1871_v18 = vmax.f32 %v9232_v9, 0.0  ;;  %v8414_v19 = vcombine.high %v2839_v13, %v2847_v14 }
 0x26b   :  { %2715 = vmatpush1.bf16.msra.mxu0 %v9791_v20  ;;  %2797 = vmatpush1.bf16.msra.mxu1 %v9794_v21  ;;  %v8416_v20 = vcombine.high %v2840_v15, %v2848_v16  ;;  %v2855_v21 = vld [vmem:[#allocation11 + $0x80] sm:$0xff] }
 0x26c   :  { %2716 = vmatprep.subr.bf16.mxu0 %v9799_v22  ;;  %2798 = vmatprep.subr.bf16.mxu1 %v9802_v11  ;;  %v2863_v22 = vld [vmem:[#allocation11 + $0xc0] sm:$0xff]  ;;  %v2864_v11 = vld [vmem:[#allocation11 + $0xc8] sm:$0xff] }
 0x26f   :  { %2717 = vmatpush1.bf16.msra.mxu0 %v9797_v23  ;;  %2799 = vmatpush1.bf16.msra.mxu1 %v9800_v24  ;;  %v8413_v23 = vcombine.low %v2839_v13, %v2847_v14  ;;  %v8415_v24 = vcombine.low %v2840_v15, %v2848_v16  ;;  %v2959_v13 = vld [vmem:[#allocation11 + $0x3c0] sm:$0xff]  ;;  %v2952_v14 = vld [vmem:[#allocation11 + $0x388] sm:$0xff] }
 0x270   :  { %2718 = vmatprep.subr.bf16.mxu0 %v9805_v25  ;;  %2800 = vmatprep.subr.bf16.mxu1 %v9808_v26  ;;  %v1875_v25 = vpack.c.bf16 %v1871_v18, %v1871_v18  ;;  %v8430_v26 = vcombine.high %v2855_v21, %v2863_v22  ;;  %v2960_v15 = vld [vmem:[#allocation11 + $0x3c8] sm:$0xff] }
 0x271   :  { %v8528_v18 = vcombine.high %v2952_v14, %v2960_v15 }
 0x273   :  { %2719 = vmatpush1.bf16.msra.mxu0 %v9803_v27  ;;  %2801 = vmatpush1.bf16.msra.mxu1 %v9806_v28  ;;  %v8432_v27 = vcombine.high %v2856_v55, %v2864_v11  ;;  %v2871_v28 = vld [vmem:[#allocation11 + $0x100] sm:$0xff] }
 0x274   :  { %2720 = vmatprep.subr.bf16.mxu0 %v9811_v29  ;;  %2802 = vmatprep.subr.bf16.mxu1 %v9814_v30  ;;  %v2879_v29 = vld [vmem:[#allocation11 + $0x140] sm:$0xff]  ;;  %v2872_v30 = vld [vmem:[#allocation11 + $0x108] sm:$0xff] }
 0x277   :  { %2721 = vmatpush1.bf16.msra.mxu0 %v9809_v31  ;;  %2803 = vmatpush1.bf16.msra.mxu1 %v9812_v32  ;;  %v2880_v31 = vld [vmem:[#allocation11 + $0x148] sm:$0xff]  ;;  %v8429_v32 = vcombine.low %v2855_v21, %v2863_v22 }
 0x278   :  { %2722 = vmatprep.subr.bf16.mxu0 %v9817_v33  ;;  %2804 = vmatprep.subr.bf16.mxu1 %v9820_v34  ;;  %v8431_v33 = vcombine.low %v2856_v55, %v2864_v11  ;;  %v8446_v34 = vcombine.high %v2871_v28, %v2879_v29  ;;  %v2968_v21 = vld [vmem:[#allocation11 + $0x408] sm:$0xff]  ;;  %v8527_v11 = vcombine.low %v2952_v14, %v2960_v15 }
 0x279   :  { %v2976_v22 = vld [vmem:[#allocation11 + $0x448] sm:$0xff] }
 0x27a   :  { %v3072_v15 = vld [vmem:[#allocation11 + $0x748] sm:$0xff] }
 0x27b   :  { %2723 = vmatpush1.bf16.msra.mxu0 %v9815_v35  ;;  %2805 = vmatpush1.bf16.msra.mxu1 %v9818_v36  ;;  %v8448_v35 = vcombine.high %v2872_v30, %v2880_v31  ;;  %v2887_v36 = vld [vmem:[#allocation11 + $0x180] sm:$0xff] }
 0x27c   :  { %2724 = vmatprep.subr.bf16.mxu0 %v9823_v37  ;;  %2806 = vmatprep.subr.bf16.mxu1 %v9826_v38  ;;  %v2895_v37 = vld [vmem:[#allocation11 + $0x1c0] sm:$0xff]  ;;  %v2888_v38 = vld [vmem:[#allocation11 + $0x188] sm:$0xff] }
 0x27f   :  { %2725 = vmatpush1.bf16.msra.mxu0 %v9821_v39  ;;  %2807 = vmatpush1.bf16.msra.mxu1 %v9824_v40  ;;  %v2896_v39 = vld [vmem:[#allocation11 + $0x1c8] sm:$0xff]  ;;  %v8445_v40 = vcombine.low %v2871_v28, %v2879_v29 }
 0x280   :  { %2726 = vmatprep.subr.bf16.mxu0 %v9829_v41  ;;  %2808 = vmatprep.subr.bf16.mxu1 %v9832_v42  ;;  %v8447_v41 = vcombine.low %v2872_v30, %v2880_v31  ;;  %v8462_v42 = vcombine.high %v2887_v36, %v2895_v37  ;;  %v2992_v28 = vld [vmem:[#allocation11 + $0x4c8] sm:$0xff]  ;;  %v8543_v30 = vcombine.low %v2968_v21, %v2976_v22 }
 0x283   :  { %2727 = vmatpush1.bf16.msra.mxu0 %v9827_v43  ;;  %2809 = vmatpush1.bf16.msra.mxu1 %v9830_v44  ;;  %v8464_v43 = vcombine.high %v2888_v38, %v2896_v39  ;;  %v2903_v44 = vld [vmem:[#allocation11 + $0x200] sm:$0xff] }
 0x284   :  { %2728 = vmatprep.subr.bf16.mxu0 %v9835_v45  ;;  %2810 = vmatprep.subr.bf16.mxu1 %v9838_v51  ;;  %v2911_v45 = vld [vmem:[#allocation11 + $0x240] sm:$0xff]  ;;  %v2904_v51 = vld [vmem:[#allocation11 + $0x208] sm:$0xff] }
 0x287   :  { %2729 = vmatpush1.bf16.msra.mxu0 %v9833_v52  ;;  %2811 = vmatpush1.bf16.msra.mxu1 %v9836_v53  ;;  %v2912_v52 = vld [vmem:[#allocation11 + $0x248] sm:$0xff]  ;;  %v8461_v53 = vcombine.low %v2887_v36, %v2895_v37 }
 0x288   :  { %2730 = vmatprep.subr.bf16.mxu0 %v9841_v54  ;;  %2812 = vmatprep.subr.bf16.mxu1 %v9844_v56  ;;  %v8463_v54 = vcombine.low %v2888_v38, %v2896_v39  ;;  %v8478_v56 = vcombine.high %v2903_v44, %v2911_v45  ;;  %v3008_v36 = vld [vmem:[#allocation11 + $0x548] sm:$0xff] }
 0x28b   :  { %2731 = vmatpush1.bf16.msra.mxu0 %v9839_v57  ;;  %2813 = vmatpush1.bf16.msra.mxu1 %v9842_v58  ;;  %v8480_v57 = vcombine.high %v2904_v51, %v2912_v52  ;;  %v2919_v58 = vld [vmem:[#allocation11 + $0x280] sm:$0xff] }
 0x28c   :  { %2732 = vmatprep.subr.bf16.mxu0 %v9847_v59  ;;  %2814 = vmatprep.subr.bf16.mxu1 %v9850_v60  ;;  %v2927_v59 = vld [vmem:[#allocation11 + $0x2c0] sm:$0xff]  ;;  %v2920_v60 = vld [vmem:[#allocation11 + $0x288] sm:$0xff] }
 0x28f   :  { %2733 = vmatpush1.bf16.msra.mxu0 %v9845_v61  ;;  %2815 = vmatpush1.bf16.msra.mxu1 %v9848_v62  ;;  %v2928_v61 = vld [vmem:[#allocation11 + $0x2c8] sm:$0xff]  ;;  %v8477_v62 = vcombine.low %v2903_v44, %v2911_v45 }
 0x290   :  { %2734 = vmatprep.subr.bf16.mxu0 %v9853_v0  ;;  %2816 = vmatprep.subr.bf16.mxu1 %v9856_v1  ;;  %v8479_v0 = vcombine.low %v2904_v51, %v2912_v52  ;;  %v8494_v1 = vcombine.high %v2919_v58, %v2927_v59  ;;  %v3024_v44 = vld [vmem:[#allocation11 + $0x5c8] sm:$0xff] }
 0x293   :  { %2735 = vmatpush1.bf16.msra.mxu0 %v9851_v2  ;;  %2817 = vmatpush1.bf16.msra.mxu1 %v9854_v3  ;;  %v8496_v2 = vcombine.high %v2920_v60, %v2928_v61  ;;  %v2935_v3 = vld [vmem:[#allocation11 + $0x300] sm:$0xff] }
 0x294   :  { %2736 = vmatprep.subr.bf16.mxu0 %v9859_v5  ;;  %2818 = vmatprep.subr.bf16.mxu1 %v9862_v6  ;;  %v2936_v5 = vld [vmem:[#allocation11 + $0x308] sm:$0xff]  ;;  %v8510_v9 = vcombine.high %v2935_v3, %v2943_v4  ;;  %v8509_v16 = vcombine.low %v2935_v3, %v2943_v4 }
 0x295   :  { %v2944_v6 = vld [vmem:[#allocation11 + $0x348] sm:$0xff] }
 0x296   :  { %v3056_v3 = vld [vmem:[#allocation11 + $0x6c8] sm:$0xff] }
 0x297   :  { %2737 = vmatpush1.bf16.msra.mxu0 %v9857_v7  ;;  %2819 = vmatpush1.bf16.msra.mxu1 %v9860_v8  ;;  %v8493_v7 = vcombine.low %v2919_v58, %v2927_v59  ;;  %v8495_v8 = vcombine.low %v2920_v60, %v2928_v61  ;;  %v3040_v58 = vld [vmem:[#allocation11 + $0x648] sm:$0xff] }
 0x298   :  { %2738 = vmatprep.subr.bf16.mxu0 %v9865_v10  ;;  %2820 = vmatprep.subr.bf16.mxu1 %v9868_v12  ;;  %v8512_v10 = vcombine.high %v2936_v5, %v2944_v6  ;;  %v2951_v12 = vld [vmem:[#allocation11 + $0x380] sm:$0xff] }
 0x299   :  { %v8525_v55 = vcombine.low %v2951_v12, %v2959_v13 }
 0x29b   :  { %2739 = vmatpush1.bf16.msra.mxu0 %v9863_v48  ;;  %2821 = vmatpush1.bf16.msra.mxu1 %v9866_v17  ;;  %v8511_v48 = vcombine.low %v2936_v5, %v2944_v6  ;;  %v8526_v17 = vcombine.high %v2951_v12, %v2959_v13  ;;  %v3071_v12 = vld [vmem:[#allocation11 + $0x740] sm:$0xff]  ;;  %v3064_v13 = vld [vmem:[#allocation11 + $0x708] sm:$0xff] }
 0x29c   :  { %5995 = vmatprep.subr.bf16.mxu0 %v8414_v19  ;;  %6077 = vmatprep.subr.bf16.mxu1 %v8416_v20  ;;  %v2967_v19 = vld [vmem:[#allocation11 + $0x400] sm:$0xff] }
 0x29d   :  { %v2975_v20 = vld [vmem:[#allocation11 + $0x440] sm:$0xff] }
 0x29e   :  { %2741 = vmatmul.mubr.bf16.vlgmr.msra.gmra.mrb[4].mxu0 %v1875_v25  ;;  %2823 = vmatmul.mubr.bf16.vlgmr.msra.gmra.mrb[4].mxu1 %v1875_v25  ;;  %v2983_v25 = vld [vmem:[#allocation11 + $0x480] sm:$0xff]  ;;  %v8541_v29 = vcombine.low %v2967_v19, %v2975_v20 }
 0x29f   :  { %5996 = vmatpush1.bf16.msra.mxu0 %v8413_v23  ;;  %6078 = vmatpush1.bf16.msra.mxu1 %v8415_v24  ;;  %v8542_v23 = vcombine.high %v2967_v19, %v2975_v20  ;;  %v8544_v24 = vcombine.high %v2968_v21, %v2976_v22  ;;  %v3087_v19 = vld [vmem:[#allocation11 + $0x7c0] sm:$0xff]  ;;  %v3080_v20 = vld [vmem:[#allocation11 + $0x788] sm:$0xff] }
 0x2a0   :  { %5997 = vmatprep.subr.bf16.mxu0 %v8430_v26  ;;  %6079 = vmatprep.subr.bf16.mxu1 %v8432_v27  ;;  %v2991_v26 = vld [vmem:[#allocation11 + $0x4c0] sm:$0xff]  ;;  %v2984_v27 = vld [vmem:[#allocation11 + $0x488] sm:$0xff] }
 0x2a1   :  { %v8558_v31 = vcombine.high %v2983_v25, %v2991_v26  ;;  %v8557_v37 = vcombine.low %v2983_v25, %v2991_v26  ;;  %v8559_v38 = vcombine.low %v2984_v27, %v2992_v28  ;;  %v3088_v22 = vld [vmem:[#allocation11 + $0x7c8] sm:$0xff]  ;;  %v3103_v25 = vld [vmem:[#allocation11 + $0x840] sm:$0xff] }
 0x2a2   :  { %v3096_v26 = vld [vmem:[#allocation11 + $0x808] sm:$0xff] }
 0x2a3   :  { %5998 = vmatpush1.bf16.msra.mxu0 %v8429_v32  ;;  %6080 = vmatpush1.bf16.msra.mxu1 %v8431_v33  ;;  %v8560_v32 = vcombine.high %v2984_v27, %v2992_v28  ;;  %v2999_v33 = vld [vmem:[#allocation11 + $0x500] sm:$0xff]  ;;  %v3104_v28 = vld [vmem:[#allocation11 + $0x848] sm:$0xff] }
 0x2a4   :  { %5999 = vmatprep.subr.bf16.mxu0 %v8446_v34  ;;  %6081 = vmatprep.subr.bf16.mxu1 %v8448_v35  ;;  %v3007_v34 = vld [vmem:[#allocation11 + $0x540] sm:$0xff]  ;;  %v3000_v35 = vld [vmem:[#allocation11 + $0x508] sm:$0xff] }
 0x2a5   :  { %v8574_v39 = vcombine.high %v2999_v33, %v3007_v34  ;;  %v8573_v45 = vcombine.low %v2999_v33, %v3007_v34  ;;  %v8575_v51 = vcombine.low %v3000_v35, %v3008_v36 }
 0x2a7   :  { %6000 = vmatpush1.bf16.msra.mxu0 %v8445_v40  ;;  %6082 = vmatpush1.bf16.msra.mxu1 %v8447_v41  ;;  %v8576_v40 = vcombine.high %v3000_v35, %v3008_v36  ;;  %v3015_v41 = vld [vmem:[#allocation11 + $0x580] sm:$0xff] }
 0x2a8   :  { %6001 = vmatprep.subr.bf16.mxu0 %v8462_v42  ;;  %6083 = vmatprep.subr.bf16.mxu1 %v8464_v43  ;;  %v3023_v42 = vld [vmem:[#allocation11 + $0x5c0] sm:$0xff]  ;;  %v3016_v43 = vld [vmem:[#allocation11 + $0x588] sm:$0xff] }
 0x2a9   :  { %v8590_v52 = vcombine.high %v3015_v41, %v3023_v42  ;;  %v8589_v59 = vcombine.low %v3015_v41, %v3023_v42  ;;  %v8591_v60 = vcombine.low %v3016_v43, %v3024_v44 }
 0x2ab   :  { %6002 = vmatpush1.bf16.msra.mxu0 %v8461_v53  ;;  %6084 = vmatpush1.bf16.msra.mxu1 %v8463_v54  ;;  %v8592_v53 = vcombine.high %v3016_v43, %v3024_v44  ;;  %v3031_v54 = vld [vmem:[#allocation11 + $0x600] sm:$0xff] }
 0x2ac   :  { %6003 = vmatprep.subr.bf16.mxu0 %v8478_v56  ;;  %6085 = vmatprep.subr.bf16.mxu1 %v8480_v57  ;;  %v3039_v56 = vld [vmem:[#allocation11 + $0x640] sm:$0xff]  ;;  %v3032_v57 = vld [vmem:[#allocation11 + $0x608] sm:$0xff] }
 0x2ad   :  { %v8606_v61 = vcombine.high %v3031_v54, %v3039_v56  ;;  %v8605_v4 = vcombine.low %v3031_v54, %v3039_v56  ;;  %v8607_v5 = vcombine.low %v3032_v57, %v3040_v58  ;;  %v3111_v54 = vld [vmem:[#allocation11 + $0x880] sm:$0xff] }
 0x2af   :  { %6004 = vmatpush1.bf16.msra.mxu0 %v8477_v62  ;;  %6086 = vmatpush1.bf16.msra.mxu1 %v8479_v0  ;;  %v8608_v62 = vcombine.high %v3032_v57, %v3040_v58  ;;  %v3047_v0 = vld [vmem:[#allocation11 + $0x680] sm:$0xff]  ;;  %v3112_v58 = vld [vmem:[#allocation11 + $0x888] sm:$0xff] }
 0x2b0   :  { %6005 = vmatprep.subr.bf16.mxu0 %v8494_v1  ;;  %6087 = vmatprep.subr.bf16.mxu1 %v8496_v2  ;;  %v3055_v1 = vld [vmem:[#allocation11 + $0x6c0] sm:$0xff]  ;;  %v3048_v2 = vld [vmem:[#allocation11 + $0x688] sm:$0xff] }
 0x2b1   :  { %v8622_v6 = vcombine.high %v3047_v0, %v3055_v1  ;;  %v3119_v57 = vld [vmem:[#allocation11 + $0x8c0] sm:$0xff] }
 0x2b3   :  { %6006 = vmatpush1.bf16.msra.mxu0 %v8493_v7  ;;  %6088 = vmatpush1.bf16.msra.mxu1 %v8495_v8  ;;  %v8624_v7 = vcombine.high %v3048_v2, %v3056_v3  ;;  %v8621_v8 = vcombine.low %v3047_v0, %v3055_v1  ;;  %v8686_v0 = vcombine.high %v3111_v54, %v3119_v57 }
 0x2b4   :  { %6007 = vmatprep.subr.bf16.mxu0 %v8510_v9  ;;  %6089 = vmatprep.subr.bf16.mxu1 %v8512_v10  ;;  %v8623_v9 = vcombine.low %v3048_v2, %v3056_v3  ;;  %v3063_v10 = vld [vmem:[#allocation11 + $0x700] sm:$0xff]  ;;  %v3128_v3 = vld [vmem:[#allocation11 + $0x908] sm:$0xff] }
 0x2b5   :  { %v8638_v14 = vcombine.high %v3063_v10, %v3071_v12  ;;  %v3135_v2 = vld [vmem:[#allocation11 + $0x940] sm:$0xff] }
 0x2b7   :  { %6008 = vmatpush1.bf16.msra.mxu0 %v8509_v16  ;;  %6090 = vmatpush1.bf16.msra.mxu1 %v8511_v48  ;;  %v8637_v16 = vcombine.low %v3063_v10, %v3071_v12  ;;  %v8639_v48 = vcombine.low %v3064_v13, %v3072_v15  ;;  %v3143_v10 = vld [vmem:[#allocation11 + $0x980] sm:$0xff] }
 0x2b8   :  { %6009 = vmatprep.subr.bf16.mxu0 %v8526_v17  ;;  %6091 = vmatprep.subr.bf16.mxu1 %v8528_v18  ;;  %v8640_v17 = vcombine.high %v3064_v13, %v3072_v15  ;;  %v3079_v18 = vld [vmem:[#allocation11 + $0x780] sm:$0xff]  ;;  %v3144_v13 = vld [vmem:[#allocation11 + $0x988] sm:$0xff] }
 0x2b9   :  { %v8654_v21 = vcombine.high %v3079_v18, %v3087_v19  ;;  %v3151_v12 = vld [vmem:[#allocation11 + $0x9c0] sm:$0xff] }
 0x2bb   :  { %6010 = vmatpush1.bf16.msra.mxu0 %v8525_v55  ;;  %6092 = vmatpush1.bf16.msra.mxu1 %v8527_v11  ;;  %v8653_v55 = vcombine.low %v3079_v18, %v3087_v19  ;;  %v8655_v11 = vcombine.low %v3080_v20, %v3088_v22  ;;  %v3159_v18 = vld [vmem:[#allocation11 + $0xa00] sm:$0xff] }
 0x2bc   :  { %6011 = vmatprep.subr.bf16.mxu0 %v8542_v23  ;;  %6093 = vmatprep.subr.bf16.mxu1 %v8544_v24  ;;  %v8656_v23 = vcombine.high %v3080_v20, %v3088_v22  ;;  %v3095_v24 = vld [vmem:[#allocation11 + $0x800] sm:$0xff]  ;;  %v3160_v20 = vld [vmem:[#allocation11 + $0xa08] sm:$0xff]  ;;  %v8717_v22 = vcombine.low %v3143_v10, %v3151_v12 }
 0x2bd   :  { %v8670_v27 = vcombine.high %v3095_v24, %v3103_v25  ;;  %v3167_v19 = vld [vmem:[#allocation11 + $0xa40] sm:$0xff] }
 0x2bf   :  { %6012 = vmatpush1.bf16.msra.mxu0 %v8541_v29  ;;  %6094 = vmatpush1.bf16.msra.mxu1 %v8543_v30  ;;  %v8669_v29 = vcombine.low %v3095_v24, %v3103_v25  ;;  %v8671_v30 = vcombine.low %v3096_v26, %v3104_v28  ;;  %v3175_v24 = vld [vmem:[#allocation11 + $0xa80] sm:$0xff] }
 0x2c0   :  { %6013 = vmatprep.subr.bf16.mxu0 %v8558_v31  ;;  %6095 = vmatprep.subr.bf16.mxu1 %v8560_v32  ;;  %v8672_v31 = vcombine.high %v3096_v26, %v3104_v28  ;;  %v10442_v32 = vld [vmem:[#allocation10] sm:$0xf]  ;;  %v3183_v25 = vld [vmem:[#allocation11 + $0xac0] sm:$0xff]  ;;  %v3176_v26 = vld [vmem:[#allocation11 + $0xa88] sm:$0xff]  ;;  %v8733_v28 = vcombine.low %v3159_v18, %v3167_v19 }
 0x2c1   :  { %v2010_v33 = vrot.slane %v10442_v32, %v10418_v47  ;;  %v2014_v34 = vrot.slane %v10442_v32, %v10423_v49  ;;  %v2022_v35 = vrot.slane %v10442_v32, %v10426_v50 }
 0x2c3   :  { %6014 = vmatpush1.bf16.msra.mxu0 %v8557_v37  ;;  %6096 = vmatpush1.bf16.msra.mxu1 %v8559_v38 }
 0x2c4   :  { %6015 = vmatprep.subr.bf16.mxu0 %v8574_v39  ;;  %6097 = vmatprep.subr.bf16.mxu1 %v8576_v40 }
 0x2c7   :  { %6016 = vmatpush1.bf16.msra.mxu0 %v8573_v45  ;;  %6098 = vmatpush1.bf16.msra.mxu1 %v8575_v51 }
 0x2c8   :  { %6017 = vmatprep.subr.bf16.mxu0 %v8590_v52  ;;  %6099 = vmatprep.subr.bf16.mxu1 %v8592_v53 }
 0x2cb   :  { %6018 = vmatpush1.bf16.msra.mxu0 %v8589_v59  ;;  %6100 = vmatpush1.bf16.msra.mxu1 %v8591_v60  ;;  %v3120_v59 = vld [vmem:[#allocation11 + $0x8c8] sm:$0xff] }
 0x2cc   :  { %6019 = vmatprep.subr.bf16.mxu0 %v8606_v61  ;;  %6101 = vmatprep.subr.bf16.mxu1 %v8608_v62  ;;  %v3127_v62 = vld [vmem:[#allocation11 + $0x900] sm:$0xff]  ;;  %v8688_v1 = vcombine.high %v3112_v58, %v3120_v59 }
 0x2cd   :  { %v8701_v15 = vcombine.low %v3127_v62, %v3135_v2 }
 0x2cf   :  { %6020 = vmatpush1.bf16.msra.mxu0 %v8605_v4  ;;  %6102 = vmatpush1.bf16.msra.mxu1 %v8607_v5  ;;  %v3136_v4 = vld [vmem:[#allocation11 + $0x948] sm:$0xff] }
 0x2d0   :  { %6021 = vmatprep.subr.bf16.mxu0 %v8622_v6  ;;  %6103 = vmatprep.subr.bf16.mxu1 %v8624_v7  ;;  %v8685_v6 = vcombine.low %v3111_v54, %v3119_v57  ;;  %v8687_v7 = vcombine.low %v3112_v58, %v3120_v59  ;;  %v3231_v57 = vld [vmem:[#allocation11 + $0xc40] sm:$0xff]  ;;  %v3224_v58 = vld [vmem:[#allocation11 + $0xc08] sm:$0xff] }
 0x2d1   :  { %v3232_v59 = vld [vmem:[#allocation11 + $0xc48] sm:$0xff] }
 0x2d3   :  { %6022 = vmatpush1.bf16.msra.mxu0 %v8621_v8  ;;  %6104 = vmatpush1.bf16.msra.mxu1 %v8623_v9  ;;  %v8702_v8 = vcombine.high %v3127_v62, %v3135_v2  ;;  %v8704_v9 = vcombine.high %v3128_v3, %v3136_v4  ;;  %v8800_v2 = vcombine.high %v3224_v58, %v3232_v59 }
 0x2d4   :  { %6023 = vmatprep.subr.bf16.mxu0 %v8638_v14  ;;  %6105 = vmatprep.subr.bf16.mxu1 %v8640_v17  ;;  %v3152_v14 = vld [vmem:[#allocation11 + $0x9c8] sm:$0xff] }
 0x2d5   :  { %v8720_v17 = vcombine.high %v3144_v13, %v3152_v14 }
 0x2d7   :  { %6024 = vmatpush1.bf16.msra.mxu0 %v8637_v16  ;;  %6106 = vmatpush1.bf16.msra.mxu1 %v8639_v48  ;;  %v8703_v16 = vcombine.low %v3128_v3, %v3136_v4  ;;  %v8718_v48 = vcombine.high %v3143_v10, %v3151_v12  ;;  %v3239_v3 = vld [vmem:[#allocation11 + $0xc80] sm:$0xff] }
 0x2d8   :  { %6025 = vmatprep.subr.bf16.mxu0 %v8654_v21  ;;  %6107 = vmatprep.subr.bf16.mxu1 %v8656_v23  ;;  %v3168_v21 = vld [vmem:[#allocation11 + $0xa48] sm:$0xff]  ;;  %v3247_v4 = vld [vmem:[#allocation11 + $0xcc0] sm:$0xff] }
 0x2d9   :  { %v8736_v23 = vcombine.high %v3160_v20, %v3168_v21  ;;  %v8814_v10 = vcombine.high %v3239_v3, %v3247_v4 }
 0x2db   :  { %6026 = vmatpush1.bf16.msra.mxu0 %v8653_v55  ;;  %6108 = vmatpush1.bf16.msra.mxu1 %v8655_v11  ;;  %v8719_v55 = vcombine.low %v3144_v13, %v3152_v14  ;;  %v8734_v11 = vcombine.high %v3159_v18, %v3167_v19  ;;  %v3255_v13 = vld [vmem:[#allocation11 + $0xd00] sm:$0xff] }
 0x2dc   :  { %6036 = vmatprep.subr.bf16.mxu0 %v8670_v27  ;;  %6118 = vmatprep.subr.bf16.mxu1 %v8672_v31  ;;  %v3184_v27 = vld [vmem:[#allocation11 + $0xac8] sm:$0xff]  ;;  %v3263_v14 = vld [vmem:[#allocation11 + $0xd40] sm:$0xff] }
 0x2dd   :  { %v8752_v31 = vcombine.high %v3176_v26, %v3184_v27  ;;  %v8830_v18 = vcombine.high %v3255_v13, %v3263_v14 }
 0x371   :  { %v2742_v36 = vpop.f32.mrb[4].mxu0  ;;  %v10450_v37 = vpop.f32.mrb[4].mxu1 }
 0x372   :  { %v9234_v38 = vadd.f32 %v2742_v36, %v2010_v33  ;;  %v2744_v39 = vpop.f32.mrb[5].mxu0  ;;  %v2826_v40 = vpop.f32.mrb[5].mxu1  ;;  %v3191_v33 = vld [vmem:[#allocation11 + $0xb00] sm:$0xff]  ;;  %v3200_v36 = vld [vmem:[#allocation11 + $0xb48] sm:$0xff] }
 0x373   :  { %v9235_v41 = vadd.f32 %v2744_v39, %v2014_v34  ;;  %v9237_v42 = vadd.f32 %v2826_v40, %v2022_v35  ;;  %v2746_v43 = vpop.f32.mrb[6].mxu0  ;;  %v2828_v44 = vpop.f32.mrb[6].mxu1  ;;  %v3199_v34 = vld [vmem:[#allocation11 + $0xb40] sm:$0xff]  ;;  %v3192_v35 = vld [vmem:[#allocation11 + $0xb08] sm:$0xff]  ;;  %v8751_v39 = vcombine.low %v3176_v26, %v3184_v27 }
 0x374   :  { %v2831_v45 = vmax.f32 %v9234_v38, 0.0  ;;  %v2747_v51 = vpop.f32.mrb[7].mxu0  ;;  %v2829_v52 = vpop.f32.mrb[7].mxu1  ;;  %v8749_v38 = vcombine.low %v3175_v24, %v3183_v25  ;;  %v8766_v40 = vcombine.high %v3191_v33, %v3199_v34  ;;  %v3215_v43 = vld [vmem:[#allocation11 + $0xbc0] sm:$0xff]  ;;  %v3208_v44 = vld [vmem:[#allocation11 + $0xb88] sm:$0xff] }
 0x375   :  { %v2832_v53 = vmax.f32 %v9235_v41, 0.0  ;;  %v2834_v56 = vmax.f32 %v9237_v42, 0.0  ;;  %v8768_v41 = vcombine.high %v3192_v35, %v3200_v36  ;;  %v3207_v42 = vld [vmem:[#allocation11 + $0xb80] sm:$0xff]  ;;  %v8765_v51 = vcombine.low %v3191_v33, %v3199_v34 }
 0x376   :  { %v10454_v61 = vpack.c.bf16 %v2831_v45, %v2831_v45  ;;  %v3216_v45 = vld [vmem:[#allocation11 + $0xbc8] sm:$0xff]  ;;  %v8767_v52 = vcombine.low %v3192_v35, %v3200_v36  ;;  %v8781_v62 = vcombine.low %v3207_v42, %v3215_v43  ;;  %v3287_v26 = vld [vmem:[#allocation11 + $0xe00] sm:$0xff] }
 0x377   :  { %v10452_v60 = vpack.c.bf16 %v2832_v53, %v2832_v53  ;;  %v10458_v5 = vpack.c.bf16 %v2834_v56, %v2834_v56  ;;  %v8782_v53 = vcombine.high %v3207_v42, %v3215_v43  ;;  %v8784_v54 = vcombine.high %v3208_v44, %v3216_v45  ;;  %v3223_v56 = vld [vmem:[#allocation11 + $0xc00] sm:$0xff] }
 0x378   :  { %v3295_v27 = vld [vmem:[#allocation11 + $0xe40] sm:$0xff] }
 0x379   :  { %6027 = vmatprep.mubr.bf16.mxu0 %v10452_v60  ;;  %6109 = vmatprep.mubr.bf16.mxu1 %v10452_v60  ;;  %v8862_v33 = vcombine.high %v3287_v26, %v3295_v27  ;;  %v3303_v35 = vld [vmem:[#allocation11 + $0xe80] sm:$0xff] }
 0x37a   :  { %6028 = vmatmul.mubr.bf16.vlgmr.msra.gmra.mrb[8].mxu0 %v10454_v61  ;;  %6110 = vmatmul.mubr.bf16.vlgmr.msra.gmra.mrb[8].mxu1 %v10454_v61  ;;  %v3311_v36 = vld [vmem:[#allocation11 + $0xec0] sm:$0xff] }
 0x37b   :  { %6037 = vmatpush1.bf16.msra.mxu0 %v8669_v29  ;;  %6119 = vmatpush1.bf16.msra.mxu1 %v8671_v30  ;;  %v8735_v29 = vcombine.low %v3160_v20, %v3168_v21  ;;  %v8750_v30 = vcombine.high %v3175_v24, %v3183_v25  ;;  %v3271_v20 = vld [vmem:[#allocation11 + $0xd80] sm:$0xff]  ;;  %v8878_v42 = vcombine.high %v3303_v35, %v3311_v36 }
 0x37c   :  { %6068 = vmatprep.mubr.bf16.mxu0 %v10458_v5  ;;  %6150 = vmatprep.mubr.bf16.mxu1 %v10458_v5  ;;  %v3279_v21 = vld [vmem:[#allocation11 + $0xdc0] sm:$0xff] }
 0x37d   :  { %6038 = vmatprep.subr.bf16.mxu0 %v8686_v0  ;;  %6120 = vmatprep.subr.bf16.mxu1 %v8688_v1  ;;  %v8783_v0 = vcombine.low %v3208_v44, %v3216_v45  ;;  %v8798_v1 = vcombine.high %v3223_v56, %v3231_v57  ;;  %v8846_v24 = vcombine.high %v3271_v20, %v3279_v21  ;;  %v3319_v44 = vld [vmem:[#allocation11 + $0xf00] sm:$0xff] }
 0x37e   :  { %v3327_v45 = vld [vmem:[#allocation11 + $0xf40] sm:$0xff] }
 0x37f   :  { %6039 = vmatpush1.bf16.msra.mxu0 %v8685_v6  ;;  %6121 = vmatpush1.bf16.msra.mxu1 %v8687_v7  ;;  %v3240_v6 = vld [vmem:[#allocation11 + $0xc88] sm:$0xff] }
 0x380   :  { %6040 = vmatprep.subr.bf16.mxu0 %v8702_v8  ;;  %6122 = vmatprep.subr.bf16.mxu1 %v8704_v9  ;;  %v3248_v7 = vld [vmem:[#allocation11 + $0xcc8] sm:$0xff]  ;;  %v8797_v8 = vcombine.low %v3223_v56, %v3231_v57  ;;  %v8799_v9 = vcombine.low %v3224_v58, %v3232_v59  ;;  %v2018_v56 = vrot.slane %v10442_v32, %v10437_v63  ;;  %v3335_v59 = vld [vmem:[#allocation11 + $0xf80] sm:$0xff]  ;;  %v2849_v32 = vld [vmem:[#allocation11 + $0x50] sm:$0xff] }
 0x381   :  { %v8816_v12 = vcombine.high %v3240_v6, %v3248_v7  ;;  %v8894_v57 = vcombine.high %v3319_v44, %v3327_v45 }
 0x383   :  { %6041 = vmatpush1.bf16.msra.mxu0 %v8701_v15  ;;  %6123 = vmatpush1.bf16.msra.mxu1 %v8703_v16  ;;  %v3256_v15 = vld [vmem:[#allocation11 + $0xd08] sm:$0xff] }
 0x384   :  { %6042 = vmatprep.subr.bf16.mxu0 %v8718_v48  ;;  %6124 = vmatprep.subr.bf16.mxu1 %v8720_v17  ;;  %v3264_v16 = vld [vmem:[#allocation11 + $0xd48] sm:$0xff]  ;;  %v8813_v48 = vcombine.low %v3239_v3, %v3247_v4  ;;  %v8815_v17 = vcombine.low %v3240_v6, %v3248_v7  ;;  %v9236_v4 = vadd.f32 %v10450_v37, %v2018_v56  ;;  %v2858_v37 = vld [vmem:[#allocation11 + $0x98] sm:$0xff] }
 0x385   :  { %v8832_v19 = vcombine.high %v3256_v15, %v3264_v16  ;;  %v2922_v56 = vld [vmem:[#allocation11 + $0x298] sm:$0xff] }
 0x387   :  { %6043 = vmatpush1.bf16.msra.mxu0 %v8717_v22  ;;  %6125 = vmatpush1.bf16.msra.mxu1 %v8719_v55  ;;  %v3272_v22 = vld [vmem:[#allocation11 + $0xd88] sm:$0xff] }
 0x388   :  { %6044 = vmatprep.subr.bf16.mxu0 %v8734_v11  ;;  %6126 = vmatprep.subr.bf16.mxu1 %v8736_v23  ;;  %v3280_v55 = vld [vmem:[#allocation11 + $0xdc8] sm:$0xff]  ;;  %v8829_v11 = vcombine.low %v3255_v13, %v3263_v14  ;;  %v8831_v23 = vcombine.low %v3256_v15, %v3264_v16  ;;  %v2833_v14 = vmax.f32 %v9236_v4, 0.0  ;;  %v2946_v4 = vld [vmem:[#allocation11 + $0x358] sm:$0xff] }
 0x389   :  { %v8848_v25 = vcombine.high %v3272_v22, %v3280_v55 }
 0x38b   :  { %6045 = vmatpush1.bf16.msra.mxu0 %v8733_v28  ;;  %6127 = vmatpush1.bf16.msra.mxu1 %v8735_v29  ;;  %v3288_v28 = vld [vmem:[#allocation11 + $0xe08] sm:$0xff] }
 0x38c   :  { %6046 = vmatprep.subr.bf16.mxu0 %v8750_v30  ;;  %6128 = vmatprep.subr.bf16.mxu1 %v8752_v31  ;;  %v3296_v29 = vld [vmem:[#allocation11 + $0xe48] sm:$0xff]  ;;  %v8845_v30 = vcombine.low %v3271_v20, %v3279_v21  ;;  %v8847_v31 = vcombine.low %v3272_v22, %v3280_v55  ;;  %v10467_v20 = vpack.c.bf16 %v2833_v14, %v2833_v14 }
 0x38d   :  { %v8864_v34 = vcombine.high %v3288_v28, %v3296_v29 }
 0x38f   :  { %6047 = vmatpush1.bf16.msra.mxu0 %v8749_v38  ;;  %6129 = vmatpush1.bf16.msra.mxu1 %v8751_v39  ;;  %v3304_v38 = vld [vmem:[#allocation11 + $0xe88] sm:$0xff] }
 0x390   :  { %6048 = vmatprep.subr.bf16.mxu0 %v8766_v40  ;;  %6130 = vmatprep.subr.bf16.mxu1 %v8768_v41  ;;  %v3312_v39 = vld [vmem:[#allocation11 + $0xec8] sm:$0xff]  ;;  %v8861_v40 = vcombine.low %v3287_v26, %v3295_v27  ;;  %v8863_v41 = vcombine.low %v3288_v28, %v3296_v29 }
 0x391   :  { %v8880_v43 = vcombine.high %v3304_v38, %v3312_v39 }
 0x393   :  { %6049 = vmatpush1.bf16.msra.mxu0 %v8765_v51  ;;  %6131 = vmatpush1.bf16.msra.mxu1 %v8767_v52  ;;  %v3320_v51 = vld [vmem:[#allocation11 + $0xf08] sm:$0xff] }
 0x394   :  { %6050 = vmatprep.subr.bf16.mxu0 %v8782_v53  ;;  %6132 = vmatprep.subr.bf16.mxu1 %v8784_v54  ;;  %v3328_v52 = vld [vmem:[#allocation11 + $0xf48] sm:$0xff]  ;;  %v8877_v53 = vcombine.low %v3303_v35, %v3311_v36  ;;  %v8879_v54 = vcombine.low %v3304_v38, %v3312_v39 }
 0x395   :  { %v8896_v58 = vcombine.high %v3320_v51, %v3328_v52  ;;  %v8895_v3 = vcombine.low %v3320_v51, %v3328_v52 }
 0x397   :  { %6051 = vmatpush1.bf16.msra.mxu0 %v8781_v62  ;;  %6133 = vmatpush1.bf16.msra.mxu1 %v8783_v0  ;;  %v3343_v62 = vld [vmem:[#allocation11 + $0xfc0] sm:$0xff]  ;;  %v3336_v0 = vld [vmem:[#allocation11 + $0xf88] sm:$0xff] }
 0x398   :  { %6052 = vmatprep.subr.bf16.mxu0 %v8798_v1  ;;  %6134 = vmatprep.subr.bf16.mxu1 %v8800_v2  ;;  %v3344_v1 = vld [vmem:[#allocation11 + $0xfc8] sm:$0xff]  ;;  %v8893_v2 = vcombine.low %v3319_v44, %v3327_v45  ;;  %v8910_v6 = vcombine.high %v3335_v59, %v3343_v62 }
 0x399   :  { %v8912_v7 = vcombine.high %v3336_v0, %v3344_v1  ;;  %v8911_v13 = vcombine.low %v3336_v0, %v3344_v1  ;;  %v2937_v1 = vld [vmem:[#allocation11 + $0x310] sm:$0xff] }
 0x39b   :  { %6053 = vmatpush1.bf16.msra.mxu0 %v8797_v8  ;;  %6135 = vmatpush1.bf16.msra.mxu1 %v8799_v9  ;;  %v2841_v8 = vld [vmem:[#allocation11 + $0x10] sm:$0xff]  ;;  %v2842_v9 = vld [vmem:[#allocation11 + $0x18] sm:$0xff] }
 0x39c   :  { %6054 = vmatprep.subr.bf16.mxu0 %v8814_v10  ;;  %6136 = vmatprep.subr.bf16.mxu1 %v8816_v12  ;;  %v2850_v10 = vld [vmem:[#allocation11 + $0x58] sm:$0xff]  ;;  %v8909_v12 = vcombine.low %v3335_v59, %v3343_v62  ;;  %v8418_v15 = vcombine.high %v2841_v8, %v2849_v32 }
 0x39d   :  { %v8420_v16 = vcombine.high %v2842_v9, %v2850_v10  ;;  %v8419_v21 = vcombine.low %v2842_v9, %v2850_v10  ;;  %v2953_v9 = vld [vmem:[#allocation11 + $0x390] sm:$0xff] }
 0x39e   :  { %v2961_v10 = vld [vmem:[#allocation11 + $0x3d0] sm:$0xff] }
 0x39f   :  { %6055 = vmatpush1.bf16.msra.mxu0 %v8813_v48  ;;  %6137 = vmatpush1.bf16.msra.mxu1 %v8815_v17  ;;  %v2857_v48 = vld [vmem:[#allocation11 + $0x90] sm:$0xff] }
 0x3a0   :  { %6056 = vmatprep.subr.bf16.mxu0 %v8830_v18  ;;  %6138 = vmatprep.subr.bf16.mxu1 %v8832_v19  ;;  %v2865_v17 = vld [vmem:[#allocation11 + $0xd0] sm:$0xff]  ;;  %v2866_v18 = vld [vmem:[#allocation11 + $0xd8] sm:$0xff]  ;;  %v8417_v19 = vcombine.low %v2841_v8, %v2849_v32 }
 0x3a1   :  { %v8434_v22 = vcombine.high %v2857_v48, %v2865_v17  ;;  %v8436_v55 = vcombine.high %v2858_v37, %v2866_v18  ;;  %v8433_v26 = vcombine.low %v2857_v48, %v2865_v17  ;;  %v8435_v27 = vcombine.low %v2858_v37, %v2866_v18  ;;  %v2969_v17 = vld [vmem:[#allocation11 + $0x410] sm:$0xff]  ;;  %v2970_v18 = vld [vmem:[#allocation11 + $0x418] sm:$0xff] }
 0x3a2   :  { %v2977_v37 = vld [vmem:[#allocation11 + $0x450] sm:$0xff] }
 0x3a3   :  { %6057 = vmatpush1.bf16.msra.mxu0 %v8829_v11  ;;  %6139 = vmatpush1.bf16.msra.mxu1 %v8831_v23  ;;  %v2873_v11 = vld [vmem:[#allocation11 + $0x110] sm:$0xff] }
 0x3a4   :  { %6058 = vmatprep.subr.bf16.mxu0 %v8846_v24  ;;  %6140 = vmatprep.subr.bf16.mxu1 %v8848_v25  ;;  %v2881_v23 = vld [vmem:[#allocation11 + $0x150] sm:$0xff]  ;;  %v2874_v24 = vld [vmem:[#allocation11 + $0x118] sm:$0xff] }
 0x3a5   :  { %v2882_v25 = vld [vmem:[#allocation11 + $0x158] sm:$0xff]  ;;  %v8450_v28 = vcombine.high %v2873_v11, %v2881_v23  ;;  %v8449_v35 = vcombine.low %v2873_v11, %v2881_v23  ;;  %v2985_v23 = vld [vmem:[#allocation11 + $0x490] sm:$0xff] }
 0x3a6   :  { %v8452_v29 = vcombine.high %v2874_v24, %v2882_v25  ;;  %v8451_v36 = vcombine.low %v2874_v24, %v2882_v25  ;;  %v2993_v24 = vld [vmem:[#allocation11 + $0x4d0] sm:$0xff]  ;;  %v2986_v25 = vld [vmem:[#allocation11 + $0x498] sm:$0xff] }
 0x3a7   :  { %6059 = vmatpush1.bf16.msra.mxu0 %v8845_v30  ;;  %6141 = vmatpush1.bf16.msra.mxu1 %v8847_v31  ;;  %v2889_v30 = vld [vmem:[#allocation11 + $0x190] sm:$0xff] }
 0x3a8   :  { %6060 = vmatprep.subr.bf16.mxu0 %v8862_v33  ;;  %6142 = vmatprep.subr.bf16.mxu1 %v8864_v34  ;;  %v2897_v31 = vld [vmem:[#allocation11 + $0x1d0] sm:$0xff]  ;;  %v2890_v33 = vld [vmem:[#allocation11 + $0x198] sm:$0xff] }
 0x3a9   :  { %v2898_v34 = vld [vmem:[#allocation11 + $0x1d8] sm:$0xff]  ;;  %v8466_v38 = vcombine.high %v2889_v30, %v2897_v31  ;;  %v8465_v44 = vcombine.low %v2889_v30, %v2897_v31  ;;  %v3001_v31 = vld [vmem:[#allocation11 + $0x510] sm:$0xff] }
 0x3aa   :  { %v8468_v39 = vcombine.high %v2890_v33, %v2898_v34  ;;  %v8467_v45 = vcombine.low %v2890_v33, %v2898_v34  ;;  %v3009_v33 = vld [vmem:[#allocation11 + $0x550] sm:$0xff]  ;;  %v3002_v34 = vld [vmem:[#allocation11 + $0x518] sm:$0xff] }
 0x3ab   :  { %6061 = vmatpush1.bf16.msra.mxu0 %v8861_v40  ;;  %6143 = vmatpush1.bf16.msra.mxu1 %v8863_v41  ;;  %v2905_v40 = vld [vmem:[#allocation11 + $0x210] sm:$0xff] }
 0x3ac   :  { %6062 = vmatprep.subr.bf16.mxu0 %v8878_v42  ;;  %6144 = vmatprep.subr.bf16.mxu1 %v8880_v43  ;;  %v2913_v41 = vld [vmem:[#allocation11 + $0x250] sm:$0xff]  ;;  %v2906_v42 = vld [vmem:[#allocation11 + $0x218] sm:$0xff] }
 0x3ad   :  { %v2914_v43 = vld [vmem:[#allocation11 + $0x258] sm:$0xff]  ;;  %v8482_v51 = vcombine.high %v2905_v40, %v2913_v41 }
 0x3ae   :  { %v8484_v52 = vcombine.high %v2906_v42, %v2914_v43  ;;  %v8483_v59 = vcombine.low %v2906_v42, %v2914_v43  ;;  %v3025_v42 = vld [vmem:[#allocation11 + $0x5d0] sm:$0xff]  ;;  %v3018_v43 = vld [vmem:[#allocation11 + $0x598] sm:$0xff] }
 0x3af   :  { %6063 = vmatpush1.bf16.msra.mxu0 %v8877_v53  ;;  %6145 = vmatpush1.bf16.msra.mxu1 %v8879_v54  ;;  %v2921_v53 = vld [vmem:[#allocation11 + $0x290] sm:$0xff] }
 0x3b0   :  { %6064 = vmatprep.subr.bf16.mxu0 %v8894_v57  ;;  %6146 = vmatprep.subr.bf16.mxu1 %v8896_v58  ;;  %v2929_v54 = vld [vmem:[#allocation11 + $0x2d0] sm:$0xff]  ;;  %v2930_v57 = vld [vmem:[#allocation11 + $0x2d8] sm:$0xff]  ;;  %v8481_v58 = vcombine.low %v2905_v40, %v2913_v41 }
 0x3b1   :  { %v8498_v62 = vcombine.high %v2921_v53, %v2929_v54  ;;  %v8500_v0 = vcombine.high %v2922_v56, %v2930_v57  ;;  %v3017_v41 = vld [vmem:[#allocation11 + $0x590] sm:$0xff] }
 0x3b3   :  { %6065 = vmatpush1.bf16.msra.mxu0 %v8893_v2  ;;  %6147 = vmatpush1.bf16.msra.mxu1 %v8895_v3  ;;  %v2945_v2 = vld [vmem:[#allocation11 + $0x350] sm:$0xff]  ;;  %v2938_v3 = vld [vmem:[#allocation11 + $0x318] sm:$0xff] }
 0x3b4   :  { %6066 = vmatprep.subr.bf16.mxu0 %v8910_v6  ;;  %6148 = vmatprep.subr.bf16.mxu1 %v8912_v7  ;;  %v8497_v6 = vcombine.low %v2921_v53, %v2929_v54  ;;  %v8499_v7 = vcombine.low %v2922_v56, %v2930_v57  ;;  %v8514_v8 = vcombine.high %v2937_v1, %v2945_v2  ;;  %v3033_v54 = vld [vmem:[#allocation11 + $0x610] sm:$0xff]  ;;  %v3034_v57 = vld [vmem:[#allocation11 + $0x618] sm:$0xff] }
 0x3b5   :  { %v8516_v32 = vcombine.high %v2938_v3, %v2946_v4  ;;  %v8513_v14 = vcombine.low %v2937_v1, %v2945_v2  ;;  %v3041_v56 = vld [vmem:[#allocation11 + $0x650] sm:$0xff] }
 0x3b6   :  { %v3049_v2 = vld [vmem:[#allocation11 + $0x690] sm:$0xff] }
 0x3b7   :  { %6067 = vmatpush1.bf16.msra.mxu0 %v8909_v12  ;;  %6149 = vmatpush1.bf16.msra.mxu1 %v8911_v13  ;;  %v2954_v12 = vld [vmem:[#allocation11 + $0x398] sm:$0xff] }
 0x3b8   :  { %6159 = vmatprep.subr.bf16.mxu0 %v8418_v15  ;;  %6241 = vmatprep.subr.bf16.mxu1 %v8420_v16  ;;  %v2962_v13 = vld [vmem:[#allocation11 + $0x3d8] sm:$0xff]  ;;  %v8515_v15 = vcombine.low %v2938_v3, %v2946_v4  ;;  %v8530_v16 = vcombine.high %v2953_v9, %v2961_v10  ;;  %v3057_v3 = vld [vmem:[#allocation11 + $0x6d0] sm:$0xff] }
 0x3b9   :  { %v8532_v48 = vcombine.high %v2954_v12, %v2962_v13  ;;  %v3050_v4 = vld [vmem:[#allocation11 + $0x698] sm:$0xff] }
 0x3ba   :  { %6069 = vmatmul.mubr.bf16.vlgmr.msra.gmra.mrb[8].mxu0 %v10467_v20  ;;  %6151 = vmatmul.mubr.bf16.vlgmr.msra.gmra.mrb[8].mxu1 %v10467_v20 }
 0x3bb   :  { %6160 = vmatpush1.bf16.msra.mxu0 %v8417_v19  ;;  %6191 = vmatprep.mubr.bf16.mxu0 %v10452_v60  ;;  %v2978_v19 = vld [vmem:[#allocation11 + $0x458] sm:$0xff] }
 0x3bc   :  { %6242 = vmatpush1.bf16.msra.mxu1 %v8419_v21  ;;  %6273 = vmatprep.mubr.bf16.mxu1 %v10452_v60  ;;  %v8529_v21 = vcombine.low %v2953_v9, %v2961_v10  ;;  %v8548_v11 = vcombine.high %v2970_v18, %v2978_v19  ;;  %v3065_v10 = vld [vmem:[#allocation11 + $0x710] sm:$0xff] }
 0x3bd   :  { %6161 = vmatprep.subr.bf16.mxu0 %v8434_v22  ;;  %6243 = vmatprep.subr.bf16.mxu1 %v8436_v55  ;;  %v8531_v22 = vcombine.low %v2954_v12, %v2962_v13  ;;  %v8546_v55 = vcombine.high %v2969_v17, %v2977_v37  ;;  %v3073_v12 = vld [vmem:[#allocation11 + $0x750] sm:$0xff]  ;;  %v3066_v13 = vld [vmem:[#allocation11 + $0x718] sm:$0xff] }
 0x3bf   :  { %6162 = vmatpush1.bf16.msra.mxu0 %v8433_v26  ;;  %v2994_v26 = vld [vmem:[#allocation11 + $0x4d8] sm:$0xff] }
 0x3c0   :  { %6244 = vmatpush1.bf16.msra.mxu1 %v8435_v27  ;;  %6163 = vmatprep.subr.bf16.mxu0 %v8450_v28  ;;  %v8545_v27 = vcombine.low %v2969_v17, %v2977_v37  ;;  %v8547_v28 = vcombine.low %v2970_v18, %v2978_v19  ;;  %v8564_v30 = vcombine.high %v2986_v25, %v2994_v26  ;;  %v3081_v37 = vld [vmem:[#allocation11 + $0x790] sm:$0xff]  ;;  %v3082_v19 = vld [vmem:[#allocation11 + $0x798] sm:$0xff] }
 0x3c1   :  { %6245 = vmatprep.subr.bf16.mxu1 %v8452_v29  ;;  %v8562_v29 = vcombine.high %v2985_v23, %v2993_v24  ;;  %v3089_v18 = vld [vmem:[#allocation11 + $0x7d0] sm:$0xff] }
 0x3c3   :  { %6164 = vmatpush1.bf16.msra.mxu0 %v8449_v35  ;;  %v3010_v35 = vld [vmem:[#allocation11 + $0x558] sm:$0xff] }
 0x3c4   :  { %6246 = vmatpush1.bf16.msra.mxu1 %v8451_v36  ;;  %6165 = vmatprep.subr.bf16.mxu0 %v8466_v38  ;;  %v8561_v36 = vcombine.low %v2985_v23, %v2993_v24  ;;  %v8563_v38 = vcombine.low %v2986_v25, %v2994_v26  ;;  %v8580_v40 = vcombine.high %v3002_v34, %v3010_v35  ;;  %v3097_v24 = vld [vmem:[#allocation11 + $0x810] sm:$0xff]  ;;  %v3098_v26 = vld [vmem:[#allocation11 + $0x818] sm:$0xff] }
 0x3c5   :  { %6247 = vmatprep.subr.bf16.mxu1 %v8468_v39  ;;  %v8578_v39 = vcombine.high %v3001_v31, %v3009_v33  ;;  %v3105_v25 = vld [vmem:[#allocation11 + $0x850] sm:$0xff] }
 0x3c7   :  { %6166 = vmatpush1.bf16.msra.mxu0 %v8465_v44  ;;  %v3026_v44 = vld [vmem:[#allocation11 + $0x5d8] sm:$0xff] }
 0x3c8   :  { %6248 = vmatpush1.bf16.msra.mxu1 %v8467_v45  ;;  %6167 = vmatprep.subr.bf16.mxu0 %v8482_v51  ;;  %v8577_v45 = vcombine.low %v3001_v31, %v3009_v33  ;;  %v8579_v51 = vcombine.low %v3002_v34, %v3010_v35  ;;  %v8596_v53 = vcombine.high %v3018_v43, %v3026_v44  ;;  %v3113_v33 = vld [vmem:[#allocation11 + $0x890] sm:$0xff] }
 0x3c9   :  { %6249 = vmatprep.subr.bf16.mxu1 %v8484_v52  ;;  %v8594_v52 = vcombine.high %v3017_v41, %v3025_v42  ;;  %v3121_v34 = vld [vmem:[#allocation11 + $0x8d0] sm:$0xff]  ;;  %v8673_v35 = vcombine.low %v3097_v24, %v3105_v25 }
 0x3cb   :  { %6168 = vmatpush1.bf16.msra.mxu0 %v8481_v58  ;;  %v3042_v58 = vld [vmem:[#allocation11 + $0x658] sm:$0xff] }
 0x3cc   :  { %6250 = vmatpush1.bf16.msra.mxu1 %v8483_v59  ;;  %6169 = vmatprep.subr.bf16.mxu0 %v8498_v62  ;;  %v8593_v59 = vcombine.low %v3017_v41, %v3025_v42  ;;  %v8595_v62 = vcombine.low %v3018_v43, %v3026_v44  ;;  %v8612_v1 = vcombine.high %v3034_v57, %v3042_v58  ;;  %v3129_v41 = vld [vmem:[#allocation11 + $0x910] sm:$0xff]  ;;  %v3130_v44 = vld [vmem:[#allocation11 + $0x918] sm:$0xff] }
 0x3cd   :  { %6251 = vmatprep.subr.bf16.mxu1 %v8500_v0  ;;  %v8610_v0 = vcombine.high %v3033_v54, %v3041_v56  ;;  %v3137_v42 = vld [vmem:[#allocation11 + $0x950] sm:$0xff] }
 0x3cf   :  { %6170 = vmatpush1.bf16.msra.mxu0 %v8497_v6  ;;  %v3058_v6 = vld [vmem:[#allocation11 + $0x6d8] sm:$0xff] }
 0x3d0   :  { %6252 = vmatpush1.bf16.msra.mxu1 %v8499_v7  ;;  %6171 = vmatprep.subr.bf16.mxu0 %v8514_v8  ;;  %v8609_v7 = vcombine.low %v3033_v54, %v3041_v56  ;;  %v8611_v8 = vcombine.low %v3034_v57, %v3042_v58  ;;  %v8628_v9 = vcombine.high %v3050_v4, %v3058_v6  ;;  %v3145_v56 = vld [vmem:[#allocation11 + $0x990] sm:$0xff]  ;;  %v3146_v58 = vld [vmem:[#allocation11 + $0x998] sm:$0xff] }
 0x3d1   :  { %6253 = vmatprep.subr.bf16.mxu1 %v8516_v32  ;;  %v8626_v32 = vcombine.high %v3049_v2, %v3057_v3  ;;  %v3153_v57 = vld [vmem:[#allocation11 + $0x9d0] sm:$0xff] }
 0x3d3   :  { %6172 = vmatpush1.bf16.msra.mxu0 %v8513_v14  ;;  %v3074_v14 = vld [vmem:[#allocation11 + $0x758] sm:$0xff] }
 0x3d4   :  { %6254 = vmatpush1.bf16.msra.mxu1 %v8515_v15  ;;  %6173 = vmatprep.subr.bf16.mxu0 %v8530_v16  ;;  %v8625_v15 = vcombine.low %v3049_v2, %v3057_v3  ;;  %v8627_v16 = vcombine.low %v3050_v4, %v3058_v6  ;;  %v8644_v17 = vcombine.high %v3066_v13, %v3074_v14  ;;  %v3161_v3 = vld [vmem:[#allocation11 + $0xa10] sm:$0xff]  ;;  %v3162_v6 = vld [vmem:[#allocation11 + $0xa18] sm:$0xff] }
 0x3d5   :  { %6255 = vmatprep.subr.bf16.mxu1 %v8532_v48  ;;  %v8642_v48 = vcombine.high %v3065_v10, %v3073_v12  ;;  %v3169_v4 = vld [vmem:[#allocation11 + $0xa50] sm:$0xff] }
 0x3d7   :  { %6174 = vmatpush1.bf16.msra.mxu0 %v8529_v21  ;;  %v3090_v21 = vld [vmem:[#allocation11 + $0x7d8] sm:$0xff] }
 0x3d8   :  { %6256 = vmatpush1.bf16.msra.mxu1 %v8531_v22  ;;  %6175 = vmatprep.subr.bf16.mxu0 %v8546_v55  ;;  %v8641_v22 = vcombine.low %v3065_v10, %v3073_v12  ;;  %v8643_v55 = vcombine.low %v3066_v13, %v3074_v14  ;;  %v8660_v23 = vcombine.high %v3082_v19, %v3090_v21  ;;  %v3177_v12 = vld [vmem:[#allocation11 + $0xa90] sm:$0xff]  ;;  %v3178_v14 = vld [vmem:[#allocation11 + $0xa98] sm:$0xff] }
 0x3d9   :  { %6257 = vmatprep.subr.bf16.mxu1 %v8548_v11  ;;  %v8658_v11 = vcombine.high %v3081_v37, %v3089_v18  ;;  %v3185_v13 = vld [vmem:[#allocation11 + $0xad0] sm:$0xff] }
 0x3db   :  { %6176 = vmatpush1.bf16.msra.mxu0 %v8545_v27  ;;  %v3106_v27 = vld [vmem:[#allocation11 + $0x858] sm:$0xff] }
 0x3dc   :  { %6258 = vmatpush1.bf16.msra.mxu1 %v8547_v28  ;;  %6177 = vmatprep.subr.bf16.mxu0 %v8562_v29  ;;  %v8657_v28 = vcombine.low %v3081_v37, %v3089_v18  ;;  %v8659_v29 = vcombine.low %v3082_v19, %v3090_v21  ;;  %v8676_v31 = vcombine.high %v3098_v26, %v3106_v27  ;;  %v3193_v18 = vld [vmem:[#allocation11 + $0xb10] sm:$0xff]  ;;  %v3194_v21 = vld [vmem:[#allocation11 + $0xb18] sm:$0xff] }
 0x3dd   :  { %6259 = vmatprep.subr.bf16.mxu1 %v8564_v30  ;;  %v8674_v30 = vcombine.high %v3097_v24, %v3105_v25  ;;  %v3201_v19 = vld [vmem:[#allocation11 + $0xb50] sm:$0xff] }
 0x3de   :  { %v3209_v25 = vld [vmem:[#allocation11 + $0xb90] sm:$0xff] }
 0x3df   :  { %6178 = vmatpush1.bf16.msra.mxu0 %v8561_v36  ;;  %v3114_v36 = vld [vmem:[#allocation11 + $0x898] sm:$0xff] }
 0x3e0   :  { %6260 = vmatpush1.bf16.msra.mxu1 %v8563_v38  ;;  %6179 = vmatprep.subr.bf16.mxu0 %v8578_v39  ;;  %v3122_v38 = vld [vmem:[#allocation11 + $0x8d8] sm:$0xff]  ;;  %v8675_v39 = vcombine.low %v3098_v26, %v3106_v27  ;;  %v3217_v26 = vld [vmem:[#allocation11 + $0xbd0] sm:$0xff] }
 0x3e1   :  { %6261 = vmatprep.subr.bf16.mxu1 %v8580_v40  ;;  %v8690_v40 = vcombine.high %v3113_v33, %v3121_v34  ;;  %v8692_v43 = vcombine.high %v3114_v36, %v3122_v38  ;;  %v3210_v27 = vld [vmem:[#allocation11 + $0xb98] sm:$0xff] }
 0x3e3   :  { %6180 = vmatpush1.bf16.msra.mxu0 %v8577_v45  ;;  %v3138_v45 = vld [vmem:[#allocation11 + $0x958] sm:$0xff] }
 0x3e4   :  { %6262 = vmatpush1.bf16.msra.mxu1 %v8579_v51  ;;  %6181 = vmatprep.subr.bf16.mxu0 %v8594_v52  ;;  %v8689_v51 = vcombine.low %v3113_v33, %v3121_v34  ;;  %v8691_v52 = vcombine.low %v3114_v36, %v3122_v38  ;;  %v8708_v54 = vcombine.high %v3130_v44, %v3138_v45  ;;  %v3225_v34 = vld [vmem:[#allocation11 + $0xc10] sm:$0xff]  ;;  %v3226_v36 = vld [vmem:[#allocation11 + $0xc18] sm:$0xff] }
 0x3e5   :  { %6263 = vmatprep.subr.bf16.mxu1 %v8596_v53  ;;  %v8706_v53 = vcombine.high %v3129_v41, %v3137_v42  ;;  %v3234_v38 = vld [vmem:[#allocation11 + $0xc58] sm:$0xff] }
 0x3e7   :  { %6182 = vmatpush1.bf16.msra.mxu0 %v8593_v59  ;;  %v3154_v59 = vld [vmem:[#allocation11 + $0x9d8] sm:$0xff] }
 0x3e8   :  { %6264 = vmatpush1.bf16.msra.mxu1 %v8595_v62  ;;  %6183 = vmatprep.subr.bf16.mxu0 %v8610_v0  ;;  %v8705_v62 = vcombine.low %v3129_v41, %v3137_v42  ;;  %v8707_v0 = vcombine.low %v3130_v44, %v3138_v45  ;;  %v8724_v2 = vcombine.high %v3146_v58, %v3154_v59  ;;  %v3249_v44 = vld [vmem:[#allocation11 + $0xcd0] sm:$0xff]  ;;  %v3242_v45 = vld [vmem:[#allocation11 + $0xc98] sm:$0xff] }
 0x3e9   :  { %6265 = vmatprep.subr.bf16.mxu1 %v8612_v1  ;;  %v8722_v1 = vcombine.high %v3145_v56, %v3153_v57  ;;  %v8804_v42 = vcombine.high %v3226_v36, %v3234_v38 }
 0x3eb   :  { %6184 = vmatpush1.bf16.msra.mxu0 %v8609_v7  ;;  %v3170_v7 = vld [vmem:[#allocation11 + $0xa58] sm:$0xff] }
 0x3ec   :  { %6266 = vmatpush1.bf16.msra.mxu1 %v8611_v8  ;;  %6185 = vmatprep.subr.bf16.mxu0 %v8626_v32  ;;  %v8721_v8 = vcombine.low %v3145_v56, %v3153_v57  ;;  %v8723_v32 = vcombine.low %v3146_v58, %v3154_v59  ;;  %v8740_v10 = vcombine.high %v3162_v6, %v3170_v7  ;;  %v3257_v57 = vld [vmem:[#allocation11 + $0xd10] sm:$0xff]  ;;  %v3258_v59 = vld [vmem:[#allocation11 + $0xd18] sm:$0xff] }
 0x3ed   :  { %6267 = vmatprep.subr.bf16.mxu1 %v8628_v9  ;;  %v8738_v9 = vcombine.high %v3161_v3, %v3169_v4  ;;  %v3265_v58 = vld [vmem:[#allocation11 + $0xd50] sm:$0xff] }
 0x3ef   :  { %6186 = vmatpush1.bf16.msra.mxu0 %v8625_v15  ;;  %v3186_v15 = vld [vmem:[#allocation11 + $0xad8] sm:$0xff] }
 0x3f0   :  { %6268 = vmatpush1.bf16.msra.mxu1 %v8627_v16  ;;  %6187 = vmatprep.subr.bf16.mxu0 %v8642_v48  ;;  %v8737_v16 = vcombine.low %v3161_v3, %v3169_v4  ;;  %v8739_v48 = vcombine.low %v3162_v6, %v3170_v7  ;;  %v8756_v37 = vcombine.high %v3178_v14, %v3186_v15  ;;  %v3273_v4 = vld [vmem:[#allocation11 + $0xd90] sm:$0xff]  ;;  %v3274_v7 = vld [vmem:[#allocation11 + $0xd98] sm:$0xff] }
 0x3f1   :  { %6269 = vmatprep.subr.bf16.mxu1 %v8644_v17  ;;  %v8754_v17 = vcombine.high %v3177_v12, %v3185_v13  ;;  %v3281_v6 = vld [vmem:[#allocation11 + $0xdd0] sm:$0xff] }
 0x3f3   :  { %6188 = vmatpush1.bf16.msra.mxu0 %v8641_v22  ;;  %v3202_v22 = vld [vmem:[#allocation11 + $0xb58] sm:$0xff] }
 0x3f4   :  { %6270 = vmatpush1.bf16.msra.mxu1 %v8643_v55  ;;  %6189 = vmatprep.subr.bf16.mxu0 %v8658_v11  ;;  %v8753_v55 = vcombine.low %v3177_v12, %v3185_v13  ;;  %v8755_v11 = vcombine.low %v3178_v14, %v3186_v15  ;;  %v8772_v24 = vcombine.high %v3194_v21, %v3202_v22  ;;  %v3289_v13 = vld [vmem:[#allocation11 + $0xe10] sm:$0xff]  ;;  %v3290_v15 = vld [vmem:[#allocation11 + $0xe18] sm:$0xff] }
 0x3f5   :  { %6271 = vmatprep.subr.bf16.mxu1 %v8660_v23  ;;  %v8770_v23 = vcombine.high %v3193_v18, %v3201_v19  ;;  %v3297_v14 = vld [vmem:[#allocation11 + $0xe50] sm:$0xff] }
 0x3f7   :  { %6190 = vmatpush1.bf16.msra.mxu0 %v8657_v28  ;;  %v3218_v28 = vld [vmem:[#allocation11 + $0xbd8] sm:$0xff] }
 0x3f8   :  { %6272 = vmatpush1.bf16.msra.mxu1 %v8659_v29  ;;  %6200 = vmatprep.subr.bf16.mxu0 %v8674_v30  ;;  %v8769_v29 = vcombine.low %v3193_v18, %v3201_v19  ;;  %v8771_v30 = vcombine.low %v3194_v21, %v3202_v22  ;;  %v8788_v33 = vcombine.high %v3210_v27, %v3218_v28  ;;  %v3305_v19 = vld [vmem:[#allocation11 + $0xe90] sm:$0xff]  ;;  %v3306_v22 = vld [vmem:[#allocation11 + $0xe98] sm:$0xff] }
 0x3f9   :  { %6282 = vmatprep.subr.bf16.mxu1 %v8676_v31  ;;  %v8786_v31 = vcombine.high %v3209_v25, %v3217_v26  ;;  %v3313_v21 = vld [vmem:[#allocation11 + $0xed0] sm:$0xff] }
 0x3fa   :  { %6192 = vmatmul.mubr.bf16.vlgmr.msra.gmra.mrb[12].mxu0 %v10454_v61 }
 0x3fb   :  { %6274 = vmatmul.mubr.bf16.vlgmr.msra.gmra.mrb[12].mxu1 %v10454_v61  ;;  %6201 = vmatpush1.bf16.msra.mxu0 %v8673_v35  ;;  %v3233_v35 = vld [vmem:[#allocation11 + $0xc50] sm:$0xff] }
 0x3fc   :  { %6232 = vmatprep.mubr.bf16.mxu0 %v10458_v5  ;;  %6283 = vmatpush1.bf16.msra.mxu1 %v8675_v39  ;;  %v8785_v39 = vcombine.low %v3209_v25, %v3217_v26  ;;  %v8802_v41 = vcombine.high %v3225_v34, %v3233_v35  ;;  %v3321_v26 = vld [vmem:[#allocation11 + $0xf10] sm:$0xff] }
 0x3fd   :  { %6314 = vmatprep.mubr.bf16.mxu1 %v10458_v5  ;;  %6202 = vmatprep.subr.bf16.mxu0 %v8690_v40  ;;  %v8787_v40 = vcombine.low %v3210_v27, %v3218_v28  ;;  %v3329_v27 = vld [vmem:[#allocation11 + $0xf50] sm:$0xff]  ;;  %v3322_v28 = vld [vmem:[#allocation11 + $0xf18] sm:$0xff] }
 0x3fe   :  { %6284 = vmatprep.subr.bf16.mxu1 %v8692_v43  ;;  %v3241_v43 = vld [vmem:[#allocation11 + $0xc90] sm:$0xff] }
 0x3ff   :  { %6203 = vmatpush1.bf16.msra.mxu0 %v8689_v51  ;;  %v3250_v51 = vld [vmem:[#allocation11 + $0xcd8] sm:$0xff] }
 0x400   :  { %6285 = vmatpush1.bf16.msra.mxu1 %v8691_v52  ;;  %6204 = vmatprep.subr.bf16.mxu0 %v8706_v53  ;;  %v8801_v52 = vcombine.low %v3225_v34, %v3233_v35  ;;  %v8803_v53 = vcombine.low %v3226_v36, %v3234_v38  ;;  %v8820_v56 = vcombine.high %v3242_v45, %v3250_v51  ;;  %v3337_v35 = vld [vmem:[#allocation11 + $0xf90] sm:$0xff]  ;;  %v3338_v38 = vld [vmem:[#allocation11 + $0xf98] sm:$0xff] }
 0x401   :  { %6286 = vmatprep.subr.bf16.mxu1 %v8708_v54  ;;  %v8818_v54 = vcombine.high %v3241_v43, %v3249_v44  ;;  %v3345_v36 = vld [vmem:[#allocation11 + $0xfd0] sm:$0xff] }
 0x403   :  { %6205 = vmatpush1.bf16.msra.mxu0 %v8705_v62  ;;  %v3266_v62 = vld [vmem:[#allocation11 + $0xd58] sm:$0xff] }
 0x404   :  { %6287 = vmatpush1.bf16.msra.mxu1 %v8707_v0  ;;  %6206 = vmatprep.subr.bf16.mxu0 %v8722_v1  ;;  %v8817_v0 = vcombine.low %v3241_v43, %v3249_v44  ;;  %v8819_v1 = vcombine.low %v3242_v45, %v3250_v51  ;;  %v8836_v3 = vcombine.high %v3258_v59, %v3266_v62  ;;  %v2843_v44 = vld [vmem:[#allocation11 + $0x20] sm:$0xff]  ;;  %v2844_v51 = vld [vmem:[#allocation11 + $0x28] sm:$0xff] }
 0x405   :  { %6288 = vmatprep.subr.bf16.mxu1 %v8724_v2  ;;  %v8834_v2 = vcombine.high %v3257_v57, %v3265_v58  ;;  %v2851_v45 = vld [vmem:[#allocation11 + $0x60] sm:$0xff] }
 0x407   :  { %6207 = vmatpush1.bf16.msra.mxu0 %v8721_v8  ;;  %v3282_v8 = vld [vmem:[#allocation11 + $0xdd8] sm:$0xff] }
 0x408   :  { %6289 = vmatpush1.bf16.msra.mxu1 %v8723_v32  ;;  %6208 = vmatprep.subr.bf16.mxu0 %v8738_v9  ;;  %v8833_v32 = vcombine.low %v3257_v57, %v3265_v58  ;;  %v8835_v9 = vcombine.low %v3258_v59, %v3266_v62  ;;  %v8852_v12 = vcombine.high %v3274_v7, %v3282_v8  ;;  %v2859_v58 = vld [vmem:[#allocation11 + $0xa0] sm:$0xff] }
 0x409   :  { %6290 = vmatprep.subr.bf16.mxu1 %v8740_v10  ;;  %v8850_v10 = vcombine.high %v3273_v4, %v3281_v6  ;;  %v2867_v59 = vld [vmem:[#allocation11 + $0xe0] sm:$0xff]  ;;  %v8421_v62 = vcombine.low %v2843_v44, %v2851_v45 }
 0x40b   :  { %6209 = vmatpush1.bf16.msra.mxu0 %v8737_v16  ;;  %v3298_v16 = vld [vmem:[#allocation11 + $0xe58] sm:$0xff] }
 0x40c   :  { %6291 = vmatpush1.bf16.msra.mxu1 %v8739_v48  ;;  %6210 = vmatprep.subr.bf16.mxu0 %v8754_v17  ;;  %v8849_v48 = vcombine.low %v3273_v4, %v3281_v6  ;;  %v8851_v17 = vcombine.low %v3274_v7, %v3282_v8  ;;  %v8868_v18 = vcombine.high %v3290_v15, %v3298_v16  ;;  %v2875_v4 = vld [vmem:[#allocation11 + $0x120] sm:$0xff]  ;;  %v2876_v8 = vld [vmem:[#allocation11 + $0x128] sm:$0xff] }
 0x40d   :  { %6292 = vmatprep.subr.bf16.mxu1 %v8756_v37  ;;  %v8866_v37 = vcombine.high %v3289_v13, %v3297_v14  ;;  %v2883_v6 = vld [vmem:[#allocation11 + $0x160] sm:$0xff] }
 0x40f   :  { %6211 = vmatpush1.bf16.msra.mxu0 %v8753_v55  ;;  %v3314_v55 = vld [vmem:[#allocation11 + $0xed8] sm:$0xff] }
 0x410   :  { %6293 = vmatpush1.bf16.msra.mxu1 %v8755_v11  ;;  %6212 = vmatprep.subr.bf16.mxu0 %v8770_v23  ;;  %v8865_v11 = vcombine.low %v3289_v13, %v3297_v14  ;;  %v8867_v23 = vcombine.low %v3290_v15, %v3298_v16  ;;  %v8884_v25 = vcombine.high %v3306_v22, %v3314_v55  ;;  %v2891_v14 = vld [vmem:[#allocation11 + $0x1a0] sm:$0xff]  ;;  %v2892_v16 = vld [vmem:[#allocation11 + $0x1a8] sm:$0xff] }
 0x411   :  { %6294 = vmatprep.subr.bf16.mxu1 %v8772_v24  ;;  %v8882_v24 = vcombine.high %v3305_v19, %v3313_v21  ;;  %v2899_v15 = vld [vmem:[#allocation11 + $0x1e0] sm:$0xff] }
 0x413   :  { %6213 = vmatpush1.bf16.msra.mxu0 %v8769_v29  ;;  %v3330_v29 = vld [vmem:[#allocation11 + $0xf58] sm:$0xff] }
 0x414   :  { %6295 = vmatpush1.bf16.msra.mxu1 %v8771_v30  ;;  %6214 = vmatprep.subr.bf16.mxu0 %v8786_v31  ;;  %v8881_v30 = vcombine.low %v3305_v19, %v3313_v21  ;;  %v8883_v31 = vcombine.low %v3306_v22, %v3314_v55  ;;  %v8900_v34 = vcombine.high %v3322_v28, %v3330_v29  ;;  %v2907_v21 = vld [vmem:[#allocation11 + $0x220] sm:$0xff]  ;;  %v2908_v55 = vld [vmem:[#allocation11 + $0x228] sm:$0xff] }
 0x415   :  { %6296 = vmatprep.subr.bf16.mxu1 %v8788_v33  ;;  %v8898_v33 = vcombine.high %v3321_v26, %v3329_v27  ;;  %v2915_v22 = vld [vmem:[#allocation11 + $0x260] sm:$0xff] }
 0x417   :  { %6215 = vmatpush1.bf16.msra.mxu0 %v8785_v39  ;;  %v3346_v39 = vld [vmem:[#allocation11 + $0xfd8] sm:$0xff] }
 0x418   :  { %6297 = vmatpush1.bf16.msra.mxu1 %v8787_v40  ;;  %6216 = vmatprep.subr.bf16.mxu0 %v8802_v41  ;;  %v8897_v40 = vcombine.low %v3321_v26, %v3329_v27  ;;  %v8899_v41 = vcombine.low %v3322_v28, %v3330_v29  ;;  %v8916_v43 = vcombine.high %v3338_v38, %v3346_v39  ;;  %v2923_v27 = vld [vmem:[#allocation11 + $0x2a0] sm:$0xff]  ;;  %v2924_v29 = vld [vmem:[#allocation11 + $0x2a8] sm:$0xff] }
 0x419   :  { %6298 = vmatprep.subr.bf16.mxu1 %v8804_v42  ;;  %v8914_v42 = vcombine.high %v3337_v35, %v3345_v36  ;;  %v2931_v28 = vld [vmem:[#allocation11 + $0x2e0] sm:$0xff] }
 0x41b   :  { %6217 = vmatpush1.bf16.msra.mxu0 %v8801_v52  ;;  %v2852_v52 = vld [vmem:[#allocation11 + $0x68] sm:$0xff] }
 0x41c   :  { %6299 = vmatpush1.bf16.msra.mxu1 %v8803_v53  ;;  %6218 = vmatprep.subr.bf16.mxu0 %v8818_v54  ;;  %v8913_v53 = vcombine.low %v3337_v35, %v3345_v36  ;;  %v8915_v54 = vcombine.low %v3338_v38, %v3346_v39  ;;  %v8424_v57 = vcombine.high %v2844_v51, %v2852_v52  ;;  %v2939_v36 = vld [vmem:[#allocation11 + $0x320] sm:$0xff]  ;;  %v2940_v39 = vld [vmem:[#allocation11 + $0x328] sm:$0xff] }
 0x41d   :  { %6300 = vmatprep.subr.bf16.mxu1 %v8820_v56  ;;  %v8422_v56 = vcombine.high %v2843_v44, %v2851_v45  ;;  %v2947_v38 = vld [vmem:[#allocation11 + $0x360] sm:$0xff] }
 0x41e   :  { %v2955_v45 = vld [vmem:[#allocation11 + $0x3a0] sm:$0xff] }
 0x41f   :  { %6219 = vmatpush1.bf16.msra.mxu0 %v8817_v0  ;;  %v2860_v0 = vld [vmem:[#allocation11 + $0xa8] sm:$0xff] }
 0x420   :  { %6301 = vmatpush1.bf16.msra.mxu1 %v8819_v1  ;;  %6220 = vmatprep.subr.bf16.mxu0 %v8834_v2  ;;  %v2868_v1 = vld [vmem:[#allocation11 + $0xe8] sm:$0xff]  ;;  %v8423_v2 = vcombine.low %v2844_v51, %v2852_v52  ;;  %v2963_v51 = vld [vmem:[#allocation11 + $0x3e0] sm:$0xff] }
 0x421   :  { %6302 = vmatprep.subr.bf16.mxu1 %v8836_v3  ;;  %v8438_v3 = vcombine.high %v2859_v58, %v2867_v59  ;;  %v8440_v7 = vcombine.high %v2860_v0, %v2868_v1  ;;  %v2956_v52 = vld [vmem:[#allocation11 + $0x3a8] sm:$0xff] }
 0x423   :  { %6221 = vmatpush1.bf16.msra.mxu0 %v8833_v32  ;;  %v2884_v32 = vld [vmem:[#allocation11 + $0x168] sm:$0xff] }
 0x424   :  { %6303 = vmatpush1.bf16.msra.mxu1 %v8835_v9  ;;  %6222 = vmatprep.subr.bf16.mxu0 %v8850_v10  ;;  %v8437_v9 = vcombine.low %v2859_v58, %v2867_v59  ;;  %v8439_v10 = vcombine.low %v2860_v0, %v2868_v1  ;;  %v8456_v13 = vcombine.high %v2876_v8, %v2884_v32  ;;  %v2971_v59 = vld [vmem:[#allocation11 + $0x420] sm:$0xff]  ;;  %v2972_v0 = vld [vmem:[#allocation11 + $0x428] sm:$0xff] }
 0x425   :  { %6304 = vmatprep.subr.bf16.mxu1 %v8852_v12  ;;  %v8454_v12 = vcombine.high %v2875_v4, %v2883_v6  ;;  %v2980_v1 = vld [vmem:[#allocation11 + $0x468] sm:$0xff] }
 0x427   :  { %6223 = vmatpush1.bf16.msra.mxu0 %v8849_v48  ;;  %v2900_v48 = vld [vmem:[#allocation11 + $0x1e8] sm:$0xff] }
 0x428   :  { %6305 = vmatpush1.bf16.msra.mxu1 %v8851_v17  ;;  %6224 = vmatprep.subr.bf16.mxu0 %v8866_v37  ;;  %v8453_v17 = vcombine.low %v2875_v4, %v2883_v6  ;;  %v8455_v37 = vcombine.low %v2876_v8, %v2884_v32  ;;  %v8472_v19 = vcombine.high %v2892_v16, %v2900_v48  ;;  %v2995_v8 = vld [vmem:[#allocation11 + $0x4e0] sm:$0xff]  ;;  %v2988_v32 = vld [vmem:[#allocation11 + $0x4a8] sm:$0xff] }
 0x429   :  { %6306 = vmatprep.subr.bf16.mxu1 %v8868_v18  ;;  %v8470_v18 = vcombine.high %v2891_v14, %v2899_v15  ;;  %v8552_v6 = vcombine.high %v2972_v0, %v2980_v1 }
 0x42b   :  { %6225 = vmatpush1.bf16.msra.mxu0 %v8865_v11  ;;  %v2916_v11 = vld [vmem:[#allocation11 + $0x268] sm:$0xff] }
 0x42c   :  { %6307 = vmatpush1.bf16.msra.mxu1 %v8867_v23  ;;  %6226 = vmatprep.subr.bf16.mxu0 %v8882_v24  ;;  %v8469_v23 = vcombine.low %v2891_v14, %v2899_v15  ;;  %v8471_v24 = vcombine.low %v2892_v16, %v2900_v48  ;;  %v8488_v26 = vcombine.high %v2908_v55, %v2916_v11  ;;  %v3003_v15 = vld [vmem:[#allocation11 + $0x520] sm:$0xff]  ;;  %v3004_v48 = vld [vmem:[#allocation11 + $0x528] sm:$0xff] }
 0x42d   :  { %6308 = vmatprep.subr.bf16.mxu1 %v8884_v25  ;;  %v8486_v25 = vcombine.high %v2907_v21, %v2915_v22  ;;  %v3011_v16 = vld [vmem:[#allocation11 + $0x560] sm:$0xff] }
 0x42f   :  { %6227 = vmatpush1.bf16.msra.mxu0 %v8881_v30  ;;  %v2932_v30 = vld [vmem:[#allocation11 + $0x2e8] sm:$0xff] }
 0x430   :  { %6309 = vmatpush1.bf16.msra.mxu1 %v8883_v31  ;;  %6228 = vmatprep.subr.bf16.mxu0 %v8898_v33  ;;  %v8485_v31 = vcombine.low %v2907_v21, %v2915_v22  ;;  %v8487_v33 = vcombine.low %v2908_v55, %v2916_v11  ;;  %v8504_v35 = vcombine.high %v2924_v29, %v2932_v30  ;;  %v3019_v22 = vld [vmem:[#allocation11 + $0x5a0] sm:$0xff]  ;;  %v3020_v11 = vld [vmem:[#allocation11 + $0x5a8] sm:$0xff] }
 0x431   :  { %6310 = vmatprep.subr.bf16.mxu1 %v8900_v34  ;;  %v8502_v34 = vcombine.high %v2923_v27, %v2931_v28  ;;  %v3027_v55 = vld [vmem:[#allocation11 + $0x5e0] sm:$0xff] }
 0x433   :  { %6229 = vmatpush1.bf16.msra.mxu0 %v8897_v40  ;;  %v2948_v40 = vld [vmem:[#allocation11 + $0x368] sm:$0xff] }
 0x434   :  { %6311 = vmatpush1.bf16.msra.mxu1 %v8899_v41  ;;  %6230 = vmatprep.subr.bf16.mxu0 %v8914_v42  ;;  %v8501_v41 = vcombine.low %v2923_v27, %v2931_v28  ;;  %v8503_v42 = vcombine.low %v2924_v29, %v2932_v30  ;;  %v8520_v44 = vcombine.high %v2940_v39, %v2948_v40  ;;  %v3035_v28 = vld [vmem:[#allocation11 + $0x620] sm:$0xff]  ;;  %v3036_v30 = vld [vmem:[#allocation11 + $0x628] sm:$0xff] }
 0x435   :  { %6312 = vmatprep.subr.bf16.mxu1 %v8916_v43  ;;  %v8518_v43 = vcombine.high %v2939_v36, %v2947_v38  ;;  %v3043_v29 = vld [vmem:[#allocation11 + $0x660] sm:$0xff] }
 0x437   :  { %6231 = vmatpush1.bf16.msra.mxu0 %v8913_v53  ;;  %v2964_v53 = vld [vmem:[#allocation11 + $0x3e8] sm:$0xff] }
 0x438   :  { %6313 = vmatpush1.bf16.msra.mxu1 %v8915_v54  ;;  %6323 = vmatprep.subr.bf16.mxu0 %v8422_v56  ;;  %v8517_v54 = vcombine.low %v2939_v36, %v2947_v38  ;;  %v8519_v56 = vcombine.low %v2940_v39, %v2948_v40  ;;  %v8536_v58 = vcombine.high %v2956_v52, %v2964_v53  ;;  %v3051_v38 = vld [vmem:[#allocation11 + $0x6a0] sm:$0xff]  ;;  %v3052_v40 = vld [vmem:[#allocation11 + $0x6a8] sm:$0xff] }
 0x439   :  { %6405 = vmatprep.subr.bf16.mxu1 %v8424_v57  ;;  %v8534_v57 = vcombine.high %v2955_v45, %v2963_v51  ;;  %v3059_v39 = vld [vmem:[#allocation11 + $0x6e0] sm:$0xff] }
 0x43a   :  { %6233 = vmatmul.mubr.bf16.vlgmr.msra.gmra.mrb[12].mxu0 %v10467_v20 }
 0x43b   :  { %6315 = vmatmul.mubr.bf16.vlgmr.msra.gmra.mrb[12].mxu1 %v10467_v20  ;;  %6324 = vmatpush1.bf16.msra.mxu0 %v8421_v62  ;;  %v2979_v62 = vld [vmem:[#allocation11 + $0x460] sm:$0xff] }
 0x43c   :  { %6355 = vmatprep.mubr.bf16.mxu0 %v10452_v60  ;;  %6406 = vmatpush1.bf16.msra.mxu1 %v8423_v2  ;;  %v8533_v2 = vcombine.low %v2955_v45, %v2963_v51  ;;  %v8550_v4 = vcombine.high %v2971_v59, %v2979_v62  ;;  %v3067_v51 = vld [vmem:[#allocation11 + $0x720] sm:$0xff] }
 0x43d   :  { %6437 = vmatprep.mubr.bf16.mxu1 %v10452_v60  ;;  %6325 = vmatprep.subr.bf16.mxu0 %v8438_v3  ;;  %v8535_v3 = vcombine.low %v2956_v52, %v2964_v53  ;;  %v3075_v52 = vld [vmem:[#allocation11 + $0x760] sm:$0xff]  ;;  %v3068_v53 = vld [vmem:[#allocation11 + $0x728] sm:$0xff] }
 0x43e   :  { %6407 = vmatprep.subr.bf16.mxu1 %v8440_v7  ;;  %v2987_v7 = vld [vmem:[#allocation11 + $0x4a0] sm:$0xff] }
 0x43f   :  { %6326 = vmatpush1.bf16.msra.mxu0 %v8437_v9  ;;  %v2996_v9 = vld [vmem:[#allocation11 + $0x4e8] sm:$0xff] }
 0x440   :  { %6408 = vmatpush1.bf16.msra.mxu1 %v8439_v10  ;;  %6327 = vmatprep.subr.bf16.mxu0 %v8454_v12  ;;  %v8549_v10 = vcombine.low %v2971_v59, %v2979_v62  ;;  %v8551_v12 = vcombine.low %v2972_v0, %v2980_v1  ;;  %v8568_v14 = vcombine.high %v2988_v32, %v2996_v9  ;;  %v3083_v62 = vld [vmem:[#allocation11 + $0x7a0] sm:$0xff]  ;;  %v3084_v1 = vld [vmem:[#allocation11 + $0x7a8] sm:$0xff] }
 0x441   :  { %6409 = vmatprep.subr.bf16.mxu1 %v8456_v13  ;;  %v8566_v13 = vcombine.high %v2987_v7, %v2995_v8  ;;  %v3091_v0 = vld [vmem:[#allocation11 + $0x7e0] sm:$0xff] }
 0x443   :  { %6328 = vmatpush1.bf16.msra.mxu0 %v8453_v17  ;;  %v3012_v17 = vld [vmem:[#allocation11 + $0x568] sm:$0xff] }
 0x444   :  { %6410 = vmatpush1.bf16.msra.mxu1 %v8455_v37  ;;  %6329 = vmatprep.subr.bf16.mxu0 %v8470_v18  ;;  %v8565_v37 = vcombine.low %v2987_v7, %v2995_v8  ;;  %v8567_v18 = vcombine.low %v2988_v32, %v2996_v9  ;;  %v8584_v21 = vcombine.high %v3004_v48, %v3012_v17  ;;  %v3099_v8 = vld [vmem:[#allocation11 + $0x820] sm:$0xff]  ;;  %v3100_v9 = vld [vmem:[#allocation11 + $0x828] sm:$0xff] }
 0x445   :  { %6411 = vmatprep.subr.bf16.mxu1 %v8472_v19  ;;  %v8582_v19 = vcombine.high %v3003_v15, %v3011_v16  ;;  %v3107_v32 = vld [vmem:[#allocation11 + $0x860] sm:$0xff] }
 0x447   :  { %6330 = vmatpush1.bf16.msra.mxu0 %v8469_v23  ;;  %v3028_v23 = vld [vmem:[#allocation11 + $0x5e8] sm:$0xff] }
 0x448   :  { %6412 = vmatpush1.bf16.msra.mxu1 %v8471_v24  ;;  %6331 = vmatprep.subr.bf16.mxu0 %v8486_v25  ;;  %v8581_v24 = vcombine.low %v3003_v15, %v3011_v16  ;;  %v8583_v25 = vcombine.low %v3004_v48, %v3012_v17  ;;  %v8600_v27 = vcombine.high %v3020_v11, %v3028_v23  ;;  %v3115_v16 = vld [vmem:[#allocation11 + $0x8a0] sm:$0xff] }
 0x449   :  { %6413 = vmatprep.subr.bf16.mxu1 %v8488_v26  ;;  %v8598_v26 = vcombine.high %v3019_v22, %v3027_v55  ;;  %v3123_v48 = vld [vmem:[#allocation11 + $0x8e0] sm:$0xff]  ;;  %v8677_v17 = vcombine.low %v3099_v8, %v3107_v32 }
 0x44b   :  { %6332 = vmatpush1.bf16.msra.mxu0 %v8485_v31  ;;  %v3044_v31 = vld [vmem:[#allocation11 + $0x668] sm:$0xff] }
 0x44c   :  { %6414 = vmatpush1.bf16.msra.mxu1 %v8487_v33  ;;  %6333 = vmatprep.subr.bf16.mxu0 %v8502_v34  ;;  %v8597_v33 = vcombine.low %v3019_v22, %v3027_v55  ;;  %v8599_v34 = vcombine.low %v3020_v11, %v3028_v23  ;;  %v8616_v36 = vcombine.high %v3036_v30, %v3044_v31  ;;  %v3131_v22 = vld [vmem:[#allocation11 + $0x920] sm:$0xff]  ;;  %v3132_v23 = vld [vmem:[#allocation11 + $0x928] sm:$0xff] }
 0x44d   :  { %6415 = vmatprep.subr.bf16.mxu1 %v8504_v35  ;;  %v8614_v35 = vcombine.high %v3035_v28, %v3043_v29  ;;  %v3139_v55 = vld [vmem:[#allocation11 + $0x960] sm:$0xff] }
 0x44f   :  { %6334 = vmatpush1.bf16.msra.mxu0 %v8501_v41  ;;  %v3060_v41 = vld [vmem:[#allocation11 + $0x6e8] sm:$0xff] }
 0x450   :  { %6416 = vmatpush1.bf16.msra.mxu1 %v8503_v42  ;;  %6335 = vmatprep.subr.bf16.mxu0 %v8518_v43  ;;  %v8613_v42 = vcombine.low %v3035_v28, %v3043_v29  ;;  %v8615_v43 = vcombine.low %v3036_v30, %v3044_v31  ;;  %v8632_v45 = vcombine.high %v3052_v40, %v3060_v41  ;;  %v3147_v29 = vld [vmem:[#allocation11 + $0x9a0] sm:$0xff]  ;;  %v3148_v31 = vld [vmem:[#allocation11 + $0x9a8] sm:$0xff] }
 0x451   :  { %6417 = vmatprep.subr.bf16.mxu1 %v8520_v44  ;;  %v8630_v44 = vcombine.high %v3051_v38, %v3059_v39  ;;  %v3155_v30 = vld [vmem:[#allocation11 + $0x9e0] sm:$0xff] }
 0x453   :  { %6336 = vmatpush1.bf16.msra.mxu0 %v8517_v54  ;;  %v3076_v54 = vld [vmem:[#allocation11 + $0x768] sm:$0xff] }
 0x454   :  { %6418 = vmatpush1.bf16.msra.mxu1 %v8519_v56  ;;  %6337 = vmatprep.subr.bf16.mxu0 %v8534_v57  ;;  %v8629_v56 = vcombine.low %v3051_v38, %v3059_v39  ;;  %v8631_v57 = vcombine.low %v3052_v40, %v3060_v41  ;;  %v8648_v59 = vcombine.high %v3068_v53, %v3076_v54  ;;  %v3163_v39 = vld [vmem:[#allocation11 + $0xa20] sm:$0xff]  ;;  %v3164_v41 = vld [vmem:[#allocation11 + $0xa28] sm:$0xff] }
 0x455   :  { %6419 = vmatprep.subr.bf16.mxu1 %v8536_v58  ;;  %v8646_v58 = vcombine.high %v3067_v51, %v3075_v52  ;;  %v3171_v40 = vld [vmem:[#allocation11 + $0xa60] sm:$0xff] }
 0x457   :  { %6338 = vmatpush1.bf16.msra.mxu0 %v8533_v2  ;;  %v3092_v2 = vld [vmem:[#allocation11 + $0x7e8] sm:$0xff] }
 0x458   :  { %6420 = vmatpush1.bf16.msra.mxu1 %v8535_v3  ;;  %6339 = vmatprep.subr.bf16.mxu0 %v8550_v4  ;;  %v8645_v3 = vcombine.low %v3067_v51, %v3075_v52  ;;  %v8647_v4 = vcombine.low %v3068_v53, %v3076_v54  ;;  %v8664_v7 = vcombine.high %v3084_v1, %v3092_v2  ;;  %v3179_v52 = vld [vmem:[#allocation11 + $0xaa0] sm:$0xff]  ;;  %v3180_v54 = vld [vmem:[#allocation11 + $0xaa8] sm:$0xff] }
 0x459   :  { %6421 = vmatprep.subr.bf16.mxu1 %v8552_v6  ;;  %v8662_v6 = vcombine.high %v3083_v62, %v3091_v0  ;;  %v3187_v53 = vld [vmem:[#allocation11 + $0xae0] sm:$0xff] }
 0x45b   :  { %6340 = vmatpush1.bf16.msra.mxu0 %v8549_v10  ;;  %v3108_v10 = vld [vmem:[#allocation11 + $0x868] sm:$0xff] }
 0x45c   :  { %6422 = vmatpush1.bf16.msra.mxu1 %v8551_v12  ;;  %6341 = vmatprep.subr.bf16.mxu0 %v8566_v13  ;;  %v8661_v12 = vcombine.low %v3083_v62, %v3091_v0  ;;  %v8663_v13 = vcombine.low %v3084_v1, %v3092_v2  ;;  %v8680_v15 = vcombine.high %v3100_v9, %v3108_v10  ;;  %v3195_v0 = vld [vmem:[#allocation11 + $0xb20] sm:$0xff]  ;;  %v3196_v2 = vld [vmem:[#allocation11 + $0xb28] sm:$0xff] }
 0x45d   :  { %6423 = vmatprep.subr.bf16.mxu1 %v8568_v14  ;;  %v8678_v14 = vcombine.high %v3099_v8, %v3107_v32  ;;  %v3203_v1 = vld [vmem:[#allocation11 + $0xb60] sm:$0xff] }
 0x45f   :  { %6342 = vmatpush1.bf16.msra.mxu0 %v8565_v37  ;;  %v3116_v37 = vld [vmem:[#allocation11 + $0x8a8] sm:$0xff] }
 0x460   :  { %6424 = vmatpush1.bf16.msra.mxu1 %v8567_v18  ;;  %6343 = vmatprep.subr.bf16.mxu0 %v8582_v19  ;;  %v3124_v18 = vld [vmem:[#allocation11 + $0x8e8] sm:$0xff]  ;;  %v8679_v19 = vcombine.low %v3100_v9, %v3108_v10  ;;  %v3211_v10 = vld [vmem:[#allocation11 + $0xba0] sm:$0xff] }
 0x461   :  { %6425 = vmatprep.subr.bf16.mxu1 %v8584_v21  ;;  %v8694_v21 = vcombine.high %v3115_v16, %v3123_v48  ;;  %v8696_v11 = vcombine.high %v3116_v37, %v3124_v18 }
 0x463   :  { %6344 = vmatpush1.bf16.msra.mxu0 %v8581_v24  ;;  %v3140_v24 = vld [vmem:[#allocation11 + $0x968] sm:$0xff] }
 0x464   :  { %6426 = vmatpush1.bf16.msra.mxu1 %v8583_v25  ;;  %6345 = vmatprep.subr.bf16.mxu0 %v8598_v26  ;;  %v8693_v25 = vcombine.low %v3115_v16, %v3123_v48  ;;  %v8695_v26 = vcombine.low %v3116_v37, %v3124_v18  ;;  %v8712_v28 = vcombine.high %v3132_v23, %v3140_v24  ;;  %v3220_v16 = vld [vmem:[#allocation11 + $0xbe8] sm:$0xff] }
 0x465   :  { %6427 = vmatprep.subr.bf16.mxu1 %v8600_v27  ;;  %v8710_v27 = vcombine.high %v3131_v22, %v3139_v55  ;;  %v8773_v37 = vcombine.low %v3195_v0, %v3203_v1 }
 0x467   :  { %6346 = vmatpush1.bf16.msra.mxu0 %v8597_v33  ;;  %v3156_v33 = vld [vmem:[#allocation11 + $0x9e8] sm:$0xff] }
 0x468   :  { %6428 = vmatpush1.bf16.msra.mxu1 %v8599_v34  ;;  %6347 = vmatprep.subr.bf16.mxu0 %v8614_v35  ;;  %v8709_v34 = vcombine.low %v3131_v22, %v3139_v55  ;;  %v8711_v35 = vcombine.low %v3132_v23, %v3140_v24  ;;  %v8728_v38 = vcombine.high %v3148_v31, %v3156_v33  ;;  %v3235_v23 = vld [vmem:[#allocation11 + $0xc60] sm:$0xff]  ;;  %v3228_v24 = vld [vmem:[#allocation11 + $0xc28] sm:$0xff] }
 0x469   :  { %6429 = vmatprep.subr.bf16.mxu1 %v8616_v36  ;;  %v8726_v36 = vcombine.high %v3147_v29, %v3155_v30 }
 0x46b   :  { %6348 = vmatpush1.bf16.msra.mxu0 %v8613_v42  ;;  %v3172_v42 = vld [vmem:[#allocation11 + $0xa68] sm:$0xff] }
 0x46c   :  { %6430 = vmatpush1.bf16.msra.mxu1 %v8615_v43  ;;  %6349 = vmatprep.subr.bf16.mxu0 %v8630_v44  ;;  %v8725_v43 = vcombine.low %v3147_v29, %v3155_v30  ;;  %v8727_v44 = vcombine.low %v3148_v31, %v3156_v33  ;;  %v8744_v51 = vcombine.high %v3164_v41, %v3172_v42  ;;  %v3243_v30 = vld [vmem:[#allocation11 + $0xca0] sm:$0xff]  ;;  %v3244_v33 = vld [vmem:[#allocation11 + $0xca8] sm:$0xff] }
 0x46d   :  { %6431 = vmatprep.subr.bf16.mxu1 %v8632_v45  ;;  %v8742_v45 = vcombine.high %v3163_v39, %v3171_v40  ;;  %v3251_v31 = vld [vmem:[#allocation11 + $0xce0] sm:$0xff] }
 0x46f   :  { %6350 = vmatpush1.bf16.msra.mxu0 %v8629_v56  ;;  %v3188_v56 = vld [vmem:[#allocation11 + $0xae8] sm:$0xff] }
 0x470   :  { %6432 = vmatpush1.bf16.msra.mxu1 %v8631_v57  ;;  %6351 = vmatprep.subr.bf16.mxu0 %v8646_v58  ;;  %v8741_v57 = vcombine.low %v3163_v39, %v3171_v40  ;;  %v8743_v58 = vcombine.low %v3164_v41, %v3172_v42  ;;  %v8760_v62 = vcombine.high %v3180_v54, %v3188_v56  ;;  %v3259_v40 = vld [vmem:[#allocation11 + $0xd20] sm:$0xff]  ;;  %v3260_v42 = vld [vmem:[#allocation11 + $0xd28] sm:$0xff] }
 0x471   :  { %6433 = vmatprep.subr.bf16.mxu1 %v8648_v59  ;;  %v8758_v59 = vcombine.high %v3179_v52, %v3187_v53  ;;  %v3267_v41 = vld [vmem:[#allocation11 + $0xd60] sm:$0xff] }
 0x473   :  { %6352 = vmatpush1.bf16.msra.mxu0 %v8645_v3  ;;  %v3204_v3 = vld [vmem:[#allocation11 + $0xb68] sm:$0xff] }
 0x474   :  { %6434 = vmatpush1.bf16.msra.mxu1 %v8647_v4  ;;  %6353 = vmatprep.subr.bf16.mxu0 %v8662_v6  ;;  %v8757_v4 = vcombine.low %v3179_v52, %v3187_v53  ;;  %v8759_v6 = vcombine.low %v3180_v54, %v3188_v56  ;;  %v8776_v9 = vcombine.high %v3196_v2, %v3204_v3  ;;  %v3275_v53 = vld [vmem:[#allocation11 + $0xda0] sm:$0xff]  ;;  %v3276_v56 = vld [vmem:[#allocation11 + $0xda8] sm:$0xff] }
 0x475   :  { %6435 = vmatprep.subr.bf16.mxu1 %v8664_v7  ;;  %v8774_v7 = vcombine.high %v3195_v0, %v3203_v1  ;;  %v3283_v54 = vld [vmem:[#allocation11 + $0xde0] sm:$0xff] }
 0x476   :  { %v3291_v1 = vld [vmem:[#allocation11 + $0xe20] sm:$0xff] }
 0x477   :  { %6354 = vmatpush1.bf16.msra.mxu0 %v8661_v12  ;;  %v3219_v12 = vld [vmem:[#allocation11 + $0xbe0] sm:$0xff] }
 0x478   :  { %6436 = vmatpush1.bf16.msra.mxu1 %v8663_v13  ;;  %6364 = vmatprep.subr.bf16.mxu0 %v8678_v14  ;;  %v8790_v22 = vcombine.high %v3211_v10, %v3219_v12 }
 0x479   :  { %6446 = vmatprep.subr.bf16.mxu1 %v8680_v15  ;;  %v3212_v15 = vld [vmem:[#allocation11 + $0xba8] sm:$0xff] }
 0x47a   :  { %6356 = vmatmul.mubr.bf16.vlgmr.msra.gmra.mrb[16].mxu0 %v10454_v61  ;;  %v8792_v55 = vcombine.high %v3212_v15, %v3220_v16 }
 0x47b   :  { %6438 = vmatmul.mubr.bf16.vlgmr.msra.gmra.mrb[16].mxu1 %v10454_v61  ;;  %6365 = vmatpush1.bf16.msra.mxu0 %v8677_v17 }
 0x47c   :  { %6396 = vmatprep.mubr.bf16.mxu0 %v10458_v5  ;;  %6447 = vmatpush1.bf16.msra.mxu1 %v8679_v19 }
 0x47d   :  { %6478 = vmatprep.mubr.bf16.mxu1 %v10458_v5  ;;  %6366 = vmatprep.subr.bf16.mxu0 %v8694_v21  ;;  %v8775_v21 = vcombine.low %v3196_v2, %v3204_v3  ;;  %v3299_v2 = vld [vmem:[#allocation11 + $0xe60] sm:$0xff]  ;;  %v3292_v3 = vld [vmem:[#allocation11 + $0xe28] sm:$0xff] }
 0x47e   :  { %6448 = vmatprep.subr.bf16.mxu1 %v8696_v11  ;;  %v3227_v11 = vld [vmem:[#allocation11 + $0xc20] sm:$0xff] }
 0x47f   :  { %6367 = vmatpush1.bf16.msra.mxu0 %v8693_v25  ;;  %v3236_v25 = vld [vmem:[#allocation11 + $0xc68] sm:$0xff] }
 0x480   :  { %6449 = vmatpush1.bf16.msra.mxu1 %v8695_v26  ;;  %6368 = vmatprep.subr.bf16.mxu0 %v8710_v27  ;;  %v8789_v26 = vcombine.low %v3211_v10, %v3219_v12  ;;  %v8791_v27 = vcombine.low %v3212_v15, %v3220_v16  ;;  %v8808_v29 = vcombine.high %v3228_v24, %v3236_v25  ;;  %v3307_v12 = vld [vmem:[#allocation11 + $0xea0] sm:$0xff]  ;;  %v3308_v16 = vld [vmem:[#allocation11 + $0xea8] sm:$0xff] }
 0x481   :  { %6450 = vmatprep.subr.bf16.mxu1 %v8712_v28  ;;  %v8806_v28 = vcombine.high %v3227_v11, %v3235_v23  ;;  %v3315_v15 = vld [vmem:[#allocation11 + $0xee0] sm:$0xff] }
 0x483   :  { %6369 = vmatpush1.bf16.msra.mxu0 %v8709_v34  ;;  %v3252_v34 = vld [vmem:[#allocation11 + $0xce8] sm:$0xff] }
 0x484   :  { %6451 = vmatpush1.bf16.msra.mxu1 %v8711_v35  ;;  %6370 = vmatprep.subr.bf16.mxu0 %v8726_v36  ;;  %v8805_v35 = vcombine.low %v3227_v11, %v3235_v23  ;;  %v8807_v36 = vcombine.low %v3228_v24, %v3236_v25  ;;  %v8824_v39 = vcombine.high %v3244_v33, %v3252_v34  ;;  %v3332_v11 = vld [vmem:[#allocation11 + $0xf68] sm:$0xff] }
 0x485   :  { %6452 = vmatprep.subr.bf16.mxu1 %v8728_v38  ;;  %v8822_v38 = vcombine.high %v3243_v30, %v3251_v31  ;;  %v8885_v23 = vcombine.low %v3307_v12, %v3315_v15 }
 0x487   :  { %6371 = vmatpush1.bf16.msra.mxu0 %v8725_v43  ;;  %v3268_v43 = vld [vmem:[#allocation11 + $0xd68] sm:$0xff] }
 0x488   :  { %6453 = vmatpush1.bf16.msra.mxu1 %v8727_v44  ;;  %6372 = vmatprep.subr.bf16.mxu0 %v8742_v45  ;;  %v8821_v44 = vcombine.low %v3243_v30, %v3251_v31  ;;  %v8823_v45 = vcombine.low %v3244_v33, %v3252_v34  ;;  %v8840_v52 = vcombine.high %v3260_v42, %v3268_v43  ;;  %v3348_v30 = vld [vmem:[#allocation11 + $0xfe8] sm:$0xff] }
 0x489   :  { %6454 = vmatprep.subr.bf16.mxu1 %v8744_v51  ;;  %v8838_v51 = vcombine.high %v3259_v40, %v3267_v41 }
 0x48b   :  { %6373 = vmatpush1.bf16.msra.mxu0 %v8741_v57  ;;  %v3284_v57 = vld [vmem:[#allocation11 + $0xde8] sm:$0xff] }
 0x48c   :  { %6455 = vmatpush1.bf16.msra.mxu1 %v8743_v58  ;;  %6374 = vmatprep.subr.bf16.mxu0 %v8758_v59  ;;  %v8837_v58 = vcombine.low %v3259_v40, %v3267_v41  ;;  %v8839_v59 = vcombine.low %v3260_v42, %v3268_v43  ;;  %v8856_v0 = vcombine.high %v3276_v56, %v3284_v57  ;;  %v2854_v40 = vld [vmem:[#allocation11 + $0x78] sm:$0xff] }
 0x48d   :  { %v10485_v8 = vpop.f32.mrb[8].mxu0  ;;  %v10487_v32 = vpop.f32.mrb[8].mxu1  ;;  %6456 = vmatprep.subr.bf16.mxu1 %v8760_v62  ;;  %v8854_v62 = vcombine.high %v3275_v53, %v3283_v54 }
 0x48e   :  { %v10489_v13 = vpop.f32.mrb[9].mxu0  ;;  %v10491_v14 = vpop.f32.mrb[9].mxu1 }
 0x48f   :  { %v6074_v48 = vpop.f32.mrb[10].mxu0  ;;  %v6156_v17 = vpop.f32.mrb[10].mxu1  ;;  %6375 = vmatpush1.bf16.msra.mxu0 %v8757_v4  ;;  %v3300_v4 = vld [vmem:[#allocation11 + $0xe68] sm:$0xff] }
 0x490   :  { %6457 = vmatpush1.bf16.msra.mxu1 %v8759_v6  ;;  %v6075_v18 = vpop.f32.mrb[11].mxu0  ;;  %v6157_v19 = vpop.f32.mrb[11].mxu1  ;;  %6376 = vmatprep.subr.bf16.mxu0 %v8774_v7  ;;  %v8853_v6 = vcombine.low %v3275_v53, %v3283_v54  ;;  %v8855_v7 = vcombine.low %v3276_v56, %v3284_v57  ;;  %v8872_v10 = vcombine.high %v3292_v3, %v3300_v4  ;;  %v3316_v48 = vld [vmem:[#allocation11 + $0xee8] sm:$0xff]  ;;  %v2862_v53 = vld [vmem:[#allocation11 + $0xb8] sm:$0xff] }
 0x491   :  { %6458 = vmatprep.subr.bf16.mxu1 %v8776_v9  ;;  %v8870_v9 = vcombine.high %v3291_v1, %v3299_v2  ;;  %v8869_v17 = vcombine.low %v3291_v1, %v3299_v2  ;;  %v8886_v18 = vcombine.high %v3307_v12, %v3315_v15  ;;  %v8888_v19 = vcombine.high %v3308_v16, %v3316_v48  ;;  %v2870_v54 = vld [vmem:[#allocation11 + $0xf8] sm:$0xff] }
 0x492   :  { %v8887_v24 = vcombine.low %v3308_v16, %v3316_v48  ;;  %v2886_v1 = vld [vmem:[#allocation11 + $0x178] sm:$0xff] }
 0x493   :  { %6377 = vmatpush1.bf16.msra.mxu0 %v8773_v37  ;;  %v8871_v37 = vcombine.low %v3292_v3, %v3300_v4  ;;  %v8443_v3 = vcombine.low %v2862_v53, %v2870_v54  ;;  %v2902_v12 = vld [vmem:[#allocation11 + $0x1f8] sm:$0xff] }
 0x494   :  { %6459 = vmatpush1.bf16.msra.mxu1 %v8775_v21  ;;  %6378 = vmatprep.subr.bf16.mxu0 %v8790_v22  ;;  %v3323_v21 = vld [vmem:[#allocation11 + $0xf20] sm:$0xff] }
 0x495   :  { %6460 = vmatprep.subr.bf16.mxu1 %v8792_v55  ;;  %v3331_v22 = vld [vmem:[#allocation11 + $0xf60] sm:$0xff]  ;;  %v3324_v55 = vld [vmem:[#allocation11 + $0xf28] sm:$0xff] }
 0x496   :  { %v8902_v25 = vcombine.high %v3323_v21, %v3331_v22  ;;  %v8901_v31 = vcombine.low %v3323_v21, %v3331_v22  ;;  %v8903_v33 = vcombine.low %v3324_v55, %v3332_v11  ;;  %v2918_v21 = vld [vmem:[#allocation11 + $0x278] sm:$0xff] }
 0x497   :  { %6379 = vmatpush1.bf16.msra.mxu0 %v8789_v26  ;;  %v8904_v26 = vcombine.high %v3324_v55, %v3332_v11 }
 0x498   :  { %6461 = vmatpush1.bf16.msra.mxu1 %v8791_v27  ;;  %6380 = vmatprep.subr.bf16.mxu0 %v8806_v28  ;;  %v3339_v27 = vld [vmem:[#allocation11 + $0xfa0] sm:$0xff] }
 0x499   :  { %6462 = vmatprep.subr.bf16.mxu1 %v8808_v29  ;;  %v3347_v28 = vld [vmem:[#allocation11 + $0xfe0] sm:$0xff]  ;;  %v3340_v29 = vld [vmem:[#allocation11 + $0xfa8] sm:$0xff] }
 0x49a   :  { %v8918_v34 = vcombine.high %v3339_v27, %v3347_v28  ;;  %v8917_v41 = vcombine.low %v3339_v27, %v3347_v28  ;;  %v8919_v42 = vcombine.low %v3340_v29, %v3348_v30 }
 0x49b   :  { %6381 = vmatpush1.bf16.msra.mxu0 %v8805_v35  ;;  %v8920_v35 = vcombine.high %v3340_v29, %v3348_v30 }
 0x49c   :  { %6463 = vmatpush1.bf16.msra.mxu1 %v8807_v36  ;;  %6382 = vmatprep.subr.bf16.mxu0 %v8822_v38  ;;  %v2845_v36 = vld [vmem:[#allocation11 + $0x30] sm:$0xff] }
 0x49d   :  { %6464 = vmatprep.subr.bf16.mxu1 %v8824_v39  ;;  %v2853_v38 = vld [vmem:[#allocation11 + $0x70] sm:$0xff]  ;;  %v2846_v39 = vld [vmem:[#allocation11 + $0x38] sm:$0xff] }
 0x49e   :  { %v8426_v43 = vcombine.high %v2845_v36, %v2853_v38  ;;  %v8427_v56 = vcombine.low %v2846_v39, %v2854_v40 }
 0x49f   :  { %6383 = vmatpush1.bf16.msra.mxu0 %v8821_v44  ;;  %v8428_v44 = vcombine.high %v2846_v39, %v2854_v40 }
 0x4a0   :  { %6465 = vmatpush1.bf16.msra.mxu1 %v8823_v45  ;;  %6384 = vmatprep.subr.bf16.mxu0 %v8838_v51  ;;  %v2861_v45 = vld [vmem:[#allocation11 + $0xb0] sm:$0xff] }
 0x4a1   :  { %6466 = vmatprep.subr.bf16.mxu1 %v8840_v52  ;;  %v2869_v51 = vld [vmem:[#allocation11 + $0xf0] sm:$0xff]  ;;  %v8425_v52 = vcombine.low %v2845_v36, %v2853_v38 }
 0x4a2   :  { %v8442_v57 = vcombine.high %v2861_v45, %v2869_v51  ;;  %v8441_v2 = vcombine.low %v2861_v45, %v2869_v51 }
 0x4a3   :  { %6385 = vmatpush1.bf16.msra.mxu0 %v8837_v58  ;;  %v2877_v58 = vld [vmem:[#allocation11 + $0x130] sm:$0xff] }
 0x4a4   :  { %6467 = vmatpush1.bf16.msra.mxu1 %v8839_v59  ;;  %6386 = vmatprep.subr.bf16.mxu0 %v8854_v62  ;;  %v2885_v59 = vld [vmem:[#allocation11 + $0x170] sm:$0xff]  ;;  %v8444_v62 = vcombine.high %v2862_v53, %v2870_v54 }
 0x4a5   :  { %6468 = vmatprep.subr.bf16.mxu1 %v8856_v0  ;;  %v2878_v0 = vld [vmem:[#allocation11 + $0x138] sm:$0xff]  ;;  %v8458_v4 = vcombine.high %v2877_v58, %v2885_v59  ;;  %v8457_v15 = vcombine.low %v2877_v58, %v2885_v59  ;;  %v2973_v54 = vld [vmem:[#allocation11 + $0x430] sm:$0xff] }
 0x4a6   :  { %v8459_v16 = vcombine.low %v2878_v0, %v2886_v1  ;;  %v2982_v58 = vld [vmem:[#allocation11 + $0x478] sm:$0xff] }
 0x4a7   :  { %6387 = vmatpush1.bf16.msra.mxu0 %v8853_v6  ;;  %v8460_v6 = vcombine.high %v2878_v0, %v2886_v1 }
 0x4a8   :  { %6469 = vmatpush1.bf16.msra.mxu1 %v8855_v7  ;;  %6388 = vmatprep.subr.bf16.mxu0 %v8870_v9  ;;  %v2893_v7 = vld [vmem:[#allocation11 + $0x1b0] sm:$0xff] }
 0x4a9   :  { %6470 = vmatprep.subr.bf16.mxu1 %v8872_v10  ;;  %v2901_v9 = vld [vmem:[#allocation11 + $0x1f0] sm:$0xff]  ;;  %v2894_v10 = vld [vmem:[#allocation11 + $0x1b8] sm:$0xff] }
 0x4aa   :  { %v8474_v48 = vcombine.high %v2893_v7, %v2901_v9  ;;  %v8475_v22 = vcombine.low %v2894_v10, %v2902_v12 }
 0x4ab   :  { %6389 = vmatpush1.bf16.msra.mxu0 %v8869_v17  ;;  %v8476_v17 = vcombine.high %v2894_v10, %v2902_v12 }
 0x4ac   :  { %6471 = vmatpush1.bf16.msra.mxu1 %v8871_v37  ;;  %6390 = vmatprep.subr.bf16.mxu0 %v8886_v18  ;;  %v2909_v37 = vld [vmem:[#allocation11 + $0x230] sm:$0xff] }
 0x4ad   :  { %6472 = vmatprep.subr.bf16.mxu1 %v8888_v19  ;;  %v2917_v18 = vld [vmem:[#allocation11 + $0x270] sm:$0xff]  ;;  %v2910_v19 = vld [vmem:[#allocation11 + $0x238] sm:$0xff] }
 0x4ae   :  { %v8490_v55 = vcombine.high %v2909_v37, %v2917_v18  ;;  %v8492_v11 = vcombine.high %v2910_v19, %v2918_v21  ;;  %v8489_v27 = vcombine.low %v2909_v37, %v2917_v18  ;;  %v8491_v28 = vcombine.low %v2910_v19, %v2918_v21 }
 0x4af   :  { %6391 = vmatpush1.bf16.msra.mxu0 %v8885_v23  ;;  %v2925_v23 = vld [vmem:[#allocation11 + $0x2b0] sm:$0xff] }
 0x4b0   :  { %6473 = vmatpush1.bf16.msra.mxu1 %v8887_v24  ;;  %6392 = vmatprep.subr.bf16.mxu0 %v8902_v25  ;;  %v2933_v24 = vld [vmem:[#allocation11 + $0x2f0] sm:$0xff]  ;;  %v2926_v25 = vld [vmem:[#allocation11 + $0x2b8] sm:$0xff] }
 0x4b1   :  { %6474 = vmatprep.subr.bf16.mxu1 %v8904_v26  ;;  %v2934_v26 = vld [vmem:[#allocation11 + $0x2f8] sm:$0xff]  ;;  %v8506_v29 = vcombine.high %v2925_v23, %v2933_v24  ;;  %v8505_v36 = vcombine.low %v2925_v23, %v2933_v24 }
 0x4b2   :  { %v8508_v30 = vcombine.high %v2926_v25, %v2934_v26  ;;  %v8507_v38 = vcombine.low %v2926_v25, %v2934_v26 }
 0x4b3   :  { %6393 = vmatpush1.bf16.msra.mxu0 %v8901_v31  ;;  %v2941_v31 = vld [vmem:[#allocation11 + $0x330] sm:$0xff] }
 0x4b4   :  { %6475 = vmatpush1.bf16.msra.mxu1 %v8903_v33  ;;  %6394 = vmatprep.subr.bf16.mxu0 %v8918_v34  ;;  %v2949_v33 = vld [vmem:[#allocation11 + $0x370] sm:$0xff]  ;;  %v2942_v34 = vld [vmem:[#allocation11 + $0x338] sm:$0xff] }
 0x4b5   :  { %6476 = vmatprep.subr.bf16.mxu1 %v8920_v35  ;;  %v2950_v35 = vld [vmem:[#allocation11 + $0x378] sm:$0xff]  ;;  %v8522_v39 = vcombine.high %v2941_v31, %v2949_v33  ;;  %v8521_v45 = vcombine.low %v2941_v31, %v2949_v33 }
 0x4b6   :  { %v8524_v40 = vcombine.high %v2942_v34, %v2950_v35  ;;  %v8523_v51 = vcombine.low %v2942_v34, %v2950_v35 }
 0x4b7   :  { %6395 = vmatpush1.bf16.msra.mxu0 %v8917_v41  ;;  %v2957_v41 = vld [vmem:[#allocation11 + $0x3b0] sm:$0xff] }
 0x4b8   :  { %6477 = vmatpush1.bf16.msra.mxu1 %v8919_v42  ;;  %6487 = vmatprep.subr.bf16.mxu0 %v8426_v43  ;;  %v2965_v42 = vld [vmem:[#allocation11 + $0x3f0] sm:$0xff]  ;;  %v2958_v43 = vld [vmem:[#allocation11 + $0x3b8] sm:$0xff] }
 0x4b9   :  { %6569 = vmatprep.subr.bf16.mxu1 %v8428_v44  ;;  %v2966_v44 = vld [vmem:[#allocation11 + $0x3f8] sm:$0xff]  ;;  %v8537_v59 = vcombine.low %v2957_v41, %v2965_v42 }
 0x4ba   :  { %6397 = vmatmul.mubr.bf16.vlgmr.msra.gmra.mrb[16].mxu0 %v10467_v20  ;;  %v8540_v53 = vcombine.high %v2958_v43, %v2966_v44 }
 0x4bb   :  { %6479 = vmatmul.mubr.bf16.vlgmr.msra.gmra.mrb[16].mxu1 %v10467_v20  ;;  %6488 = vmatpush1.bf16.msra.mxu0 %v8425_v52  ;;  %v8538_v52 = vcombine.high %v2957_v41, %v2965_v42 }
 0x4bc   :  { %6519 = vmatprep.mubr.bf16.mxu0 %v10452_v60  ;;  %6570 = vmatpush1.bf16.msra.mxu1 %v8427_v56  ;;  %v2981_v56 = vld [vmem:[#allocation11 + $0x470] sm:$0xff] }
 0x4bd   :  { %6601 = vmatprep.mubr.bf16.mxu1 %v10452_v60  ;;  %6489 = vmatprep.subr.bf16.mxu0 %v8442_v57  ;;  %v8473_v60 = vcombine.low %v2893_v7, %v2901_v9  ;;  %v2974_v57 = vld [vmem:[#allocation11 + $0x438] sm:$0xff]  ;;  %v8554_v0 = vcombine.high %v2973_v54, %v2981_v56  ;;  %v8553_v7 = vcombine.low %v2973_v54, %v2981_v56 }
 0x4be   :  { %6571 = vmatprep.subr.bf16.mxu1 %v8444_v62  ;;  %v8539_v62 = vcombine.low %v2958_v43, %v2966_v44  ;;  %v8556_v1 = vcombine.high %v2974_v57, %v2982_v58  ;;  %v8555_v9 = vcombine.low %v2974_v57, %v2982_v58 }
 0x4bf   :  { %6490 = vmatpush1.bf16.msra.mxu0 %v8441_v2  ;;  %v2989_v2 = vld [vmem:[#allocation11 + $0x4b0] sm:$0xff] }
 0x4c0   :  { %6572 = vmatpush1.bf16.msra.mxu1 %v8443_v3  ;;  %6491 = vmatprep.subr.bf16.mxu0 %v8458_v4  ;;  %v2997_v3 = vld [vmem:[#allocation11 + $0x4f0] sm:$0xff]  ;;  %v2990_v4 = vld [vmem:[#allocation11 + $0x4b8] sm:$0xff] }
 0x4c1   :  { %6573 = vmatprep.subr.bf16.mxu1 %v8460_v6  ;;  %v2998_v6 = vld [vmem:[#allocation11 + $0x4f8] sm:$0xff]  ;;  %v8570_v10 = vcombine.high %v2989_v2, %v2997_v3  ;;  %v8569_v37 = vcombine.low %v2989_v2, %v2997_v3 }
 0x4c2   :  { %v8572_v12 = vcombine.high %v2990_v4, %v2998_v6  ;;  %v8571_v18 = vcombine.low %v2990_v4, %v2998_v6 }
 0x4c3   :  { %6492 = vmatpush1.bf16.msra.mxu0 %v8457_v15  ;;  %v3005_v15 = vld [vmem:[#allocation11 + $0x530] sm:$0xff] }
 0x4c4   :  { %6574 = vmatpush1.bf16.msra.mxu1 %v8459_v16  ;;  %6493 = vmatprep.subr.bf16.mxu0 %v8474_v48  ;;  %v3013_v16 = vld [vmem:[#allocation11 + $0x570] sm:$0xff]  ;;  %v3006_v48 = vld [vmem:[#allocation11 + $0x538] sm:$0xff] }
 0x4c5   :  { %6575 = vmatprep.subr.bf16.mxu1 %v8476_v17  ;;  %v3014_v17 = vld [vmem:[#allocation11 + $0x578] sm:$0xff]  ;;  %v8586_v19 = vcombine.high %v3005_v15, %v3013_v16  ;;  %v8585_v23 = vcombine.low %v3005_v15, %v3013_v16 }
 0x4c6   :  { %v8588_v21 = vcombine.high %v3006_v48, %v3014_v17  ;;  %v8587_v24 = vcombine.low %v3006_v48, %v3014_v17 }
 0x4c7   :  { %6494 = vmatpush1.bf16.msra.mxu0 %v8473_v60  ;;  %v3021_v60 = vld [vmem:[#allocation11 + $0x5b0] sm:$0xff] }
 0x4c8   :  { %6576 = vmatpush1.bf16.msra.mxu1 %v8475_v22  ;;  %6495 = vmatprep.subr.bf16.mxu0 %v8490_v55  ;;  %v3029_v22 = vld [vmem:[#allocation11 + $0x5f0] sm:$0xff]  ;;  %v3022_v55 = vld [vmem:[#allocation11 + $0x5b8] sm:$0xff] }
 0x4c9   :  { %6577 = vmatprep.subr.bf16.mxu1 %v8492_v11  ;;  %v3030_v11 = vld [vmem:[#allocation11 + $0x5f8] sm:$0xff]  ;;  %v8602_v25 = vcombine.high %v3021_v60, %v3029_v22  ;;  %v8601_v31 = vcombine.low %v3021_v60, %v3029_v22 }
 0x4ca   :  { %v8604_v26 = vcombine.high %v3022_v55, %v3030_v11  ;;  %v8603_v33 = vcombine.low %v3022_v55, %v3030_v11  ;;  %v3126_v60 = vld [vmem:[#allocation11 + $0x8f8] sm:$0xff]  ;;  %v3133_v11 = vld [vmem:[#allocation11 + $0x930] sm:$0xff] }
 0x4cb   :  { %6496 = vmatpush1.bf16.msra.mxu0 %v8489_v27  ;;  %v3037_v27 = vld [vmem:[#allocation11 + $0x630] sm:$0xff] }
 0x4cc   :  { %6578 = vmatpush1.bf16.msra.mxu1 %v8491_v28  ;;  %6497 = vmatprep.subr.bf16.mxu0 %v8506_v29  ;;  %v3045_v28 = vld [vmem:[#allocation11 + $0x670] sm:$0xff]  ;;  %v3038_v29 = vld [vmem:[#allocation11 + $0x638] sm:$0xff] }
 0x4cd   :  { %6579 = vmatprep.subr.bf16.mxu1 %v8508_v30  ;;  %v3046_v30 = vld [vmem:[#allocation11 + $0x678] sm:$0xff]  ;;  %v8618_v34 = vcombine.high %v3037_v27, %v3045_v28  ;;  %v8617_v41 = vcombine.low %v3037_v27, %v3045_v28 }
 0x4ce   :  { %v8620_v35 = vcombine.high %v3038_v29, %v3046_v30  ;;  %v8619_v42 = vcombine.low %v3038_v29, %v3046_v30 }
 0x4cf   :  { %6498 = vmatpush1.bf16.msra.mxu0 %v8505_v36  ;;  %v3053_v36 = vld [vmem:[#allocation11 + $0x6b0] sm:$0xff] }
 0x4d0   :  { %6580 = vmatpush1.bf16.msra.mxu1 %v8507_v38  ;;  %6499 = vmatprep.subr.bf16.mxu0 %v8522_v39  ;;  %v3061_v38 = vld [vmem:[#allocation11 + $0x6f0] sm:$0xff]  ;;  %v3054_v39 = vld [vmem:[#allocation11 + $0x6b8] sm:$0xff] }
 0x4d1   :  { %6581 = vmatprep.subr.bf16.mxu1 %v8524_v40  ;;  %v3062_v40 = vld [vmem:[#allocation11 + $0x6f8] sm:$0xff]  ;;  %v8634_v43 = vcombine.high %v3053_v36, %v3061_v38  ;;  %v8633_v54 = vcombine.low %v3053_v36, %v3061_v38 }
 0x4d2   :  { %v8636_v44 = vcombine.high %v3054_v39, %v3062_v40  ;;  %v8635_v56 = vcombine.low %v3054_v39, %v3062_v40  ;;  %v3165_v40 = vld [vmem:[#allocation11 + $0xa30] sm:$0xff] }
 0x4d3   :  { %6500 = vmatpush1.bf16.msra.mxu0 %v8521_v45  ;;  %v3069_v45 = vld [vmem:[#allocation11 + $0x730] sm:$0xff] }
 0x4d4   :  { %6582 = vmatpush1.bf16.msra.mxu1 %v8523_v51  ;;  %6501 = vmatprep.subr.bf16.mxu0 %v8538_v52  ;;  %v3077_v51 = vld [vmem:[#allocation11 + $0x770] sm:$0xff]  ;;  %v3070_v52 = vld [vmem:[#allocation11 + $0x738] sm:$0xff] }
 0x4d5   :  { %6583 = vmatprep.subr.bf16.mxu1 %v8540_v53  ;;  %v3078_v53 = vld [vmem:[#allocation11 + $0x778] sm:$0xff]  ;;  %v8650_v57 = vcombine.high %v3069_v45, %v3077_v51  ;;  %v8649_v2 = vcombine.low %v3069_v45, %v3077_v51 }
 0x4d6   :  { %v8652_v58 = vcombine.high %v3070_v52, %v3078_v53  ;;  %v8651_v3 = vcombine.low %v3070_v52, %v3078_v53  ;;  %v3181_v52 = vld [vmem:[#allocation11 + $0xab0] sm:$0xff] }
 0x4d7   :  { %6502 = vmatpush1.bf16.msra.mxu0 %v8537_v59  ;;  %v3085_v59 = vld [vmem:[#allocation11 + $0x7b0] sm:$0xff] }
 0x4d8   :  { %6584 = vmatpush1.bf16.msra.mxu1 %v8539_v62  ;;  %6503 = vmatprep.subr.bf16.mxu0 %v8554_v0  ;;  %v3093_v62 = vld [vmem:[#allocation11 + $0x7f0] sm:$0xff]  ;;  %v3086_v0 = vld [vmem:[#allocation11 + $0x7b8] sm:$0xff] }
 0x4d9   :  { %6585 = vmatprep.subr.bf16.mxu1 %v8556_v1  ;;  %v3094_v1 = vld [vmem:[#allocation11 + $0x7f8] sm:$0xff]  ;;  %v8666_v4 = vcombine.high %v3085_v59, %v3093_v62  ;;  %v8665_v15 = vcombine.low %v3085_v59, %v3093_v62  ;;  %v3189_v53 = vld [vmem:[#allocation11 + $0xaf0] sm:$0xff] }
 0x4da   :  { %v8668_v6 = vcombine.high %v3086_v0, %v3094_v1  ;;  %v8667_v16 = vcombine.low %v3086_v0, %v3094_v1  ;;  %v8762_v59 = vcombine.high %v3181_v52, %v3189_v53  ;;  %v3197_v0 = vld [vmem:[#allocation11 + $0xb30] sm:$0xff] }
 0x4db   :  { %6504 = vmatpush1.bf16.msra.mxu0 %v8553_v7  ;;  %v3101_v7 = vld [vmem:[#allocation11 + $0x830] sm:$0xff] }
 0x4dc   :  { %6586 = vmatpush1.bf16.msra.mxu1 %v8555_v9  ;;  %6505 = vmatprep.subr.bf16.mxu0 %v8570_v10  ;;  %v3109_v9 = vld [vmem:[#allocation11 + $0x870] sm:$0xff]  ;;  %v3102_v10 = vld [vmem:[#allocation11 + $0x838] sm:$0xff] }
 0x4dd   :  { %6587 = vmatprep.subr.bf16.mxu1 %v8572_v12  ;;  %v3110_v12 = vld [vmem:[#allocation11 + $0x878] sm:$0xff]  ;;  %v8682_v48 = vcombine.high %v3101_v7, %v3109_v9  ;;  %v3205_v1 = vld [vmem:[#allocation11 + $0xb70] sm:$0xff] }
 0x4de   :  { %v8684_v17 = vcombine.high %v3102_v10, %v3110_v12  ;;  %v8683_v22 = vcombine.low %v3102_v10, %v3110_v12  ;;  %v3213_v12 = vld [vmem:[#allocation11 + $0xbb0] sm:$0xff] }
 0x4df   :  { %6506 = vmatpush1.bf16.msra.mxu0 %v8569_v37  ;;  %v3117_v37 = vld [vmem:[#allocation11 + $0x8b0] sm:$0xff] }
 0x4e0   :  { %6588 = vmatpush1.bf16.msra.mxu1 %v8571_v18  ;;  %6507 = vmatprep.subr.bf16.mxu0 %v8586_v19  ;;  %v3125_v18 = vld [vmem:[#allocation11 + $0x8f0] sm:$0xff]  ;;  %v8681_v19 = vcombine.low %v3101_v7, %v3109_v9  ;;  %v8778_v7 = vcombine.high %v3197_v0, %v3205_v1 }
 0x4e1   :  { %6589 = vmatprep.subr.bf16.mxu1 %v8588_v21  ;;  %v3118_v21 = vld [vmem:[#allocation11 + $0x8b8] sm:$0xff]  ;;  %v8698_v55 = vcombine.high %v3117_v37, %v3125_v18  ;;  %v8697_v27 = vcombine.low %v3117_v37, %v3125_v18 }
 0x4e2   :  { %v8699_v28 = vcombine.low %v3118_v21, %v3126_v60  ;;  %v3222_v37 = vld [vmem:[#allocation11 + $0xbf8] sm:$0xff] }
 0x4e3   :  { %6508 = vmatpush1.bf16.msra.mxu0 %v8585_v23  ;;  %v3141_v23 = vld [vmem:[#allocation11 + $0x970] sm:$0xff] }
 0x4e4   :  { %6590 = vmatpush1.bf16.msra.mxu1 %v8587_v24  ;;  %6509 = vmatprep.subr.bf16.mxu0 %v8602_v25  ;;  %v8700_v24 = vcombine.high %v3118_v21, %v3126_v60  ;;  %v3134_v25 = vld [vmem:[#allocation11 + $0x938] sm:$0xff]  ;;  %v8714_v29 = vcombine.high %v3133_v11, %v3141_v23  ;;  %v8713_v36 = vcombine.low %v3133_v11, %v3141_v23 }
 0x4e5   :  { %6591 = vmatprep.subr.bf16.mxu1 %v8604_v26  ;;  %v3142_v26 = vld [vmem:[#allocation11 + $0x978] sm:$0xff]  ;;  %v8777_v21 = vcombine.low %v3197_v0, %v3205_v1 }
 0x4e6   :  { %v8716_v30 = vcombine.high %v3134_v25, %v3142_v26 }
 0x4e7   :  { %6510 = vmatpush1.bf16.msra.mxu0 %v8601_v31  ;;  %v3149_v31 = vld [vmem:[#allocation11 + $0x9b0] sm:$0xff] }
 0x4e8   :  { %6592 = vmatpush1.bf16.msra.mxu1 %v8603_v33  ;;  %6511 = vmatprep.subr.bf16.mxu0 %v8618_v34  ;;  %v3157_v33 = vld [vmem:[#allocation11 + $0x9f0] sm:$0xff]  ;;  %v3150_v34 = vld [vmem:[#allocation11 + $0x9b8] sm:$0xff] }
 0x4e9   :  { %6593 = vmatprep.subr.bf16.mxu1 %v8620_v35  ;;  %v3158_v35 = vld [vmem:[#allocation11 + $0x9f8] sm:$0xff]  ;;  %v8730_v38 = vcombine.high %v3149_v31, %v3157_v33 }
 0x4ea   :  { %v8732_v39 = vcombine.high %v3150_v34, %v3158_v35 }
 0x4eb   :  { %6512 = vmatpush1.bf16.msra.mxu0 %v8617_v41  ;;  %v3173_v41 = vld [vmem:[#allocation11 + $0xa70] sm:$0xff] }
 0x4ec   :  { %6594 = vmatpush1.bf16.msra.mxu1 %v8619_v42  ;;  %6513 = vmatprep.subr.bf16.mxu0 %v8634_v43  ;;  %v3166_v42 = vld [vmem:[#allocation11 + $0xa38] sm:$0xff]  ;;  %v8746_v45 = vcombine.high %v3165_v40, %v3173_v41 }
 0x4ed   :  { %6595 = vmatprep.subr.bf16.mxu1 %v8636_v44  ;;  %v3174_v43 = vld [vmem:[#allocation11 + $0xa78] sm:$0xff]  ;;  %v8731_v44 = vcombine.low %v3150_v34, %v3158_v35  ;;  %v3245_v34 = vld [vmem:[#allocation11 + $0xcb0] sm:$0xff] }
 0x4ee   :  { %v8748_v51 = vcombine.high %v3166_v42, %v3174_v43  ;;  %v3253_v35 = vld [vmem:[#allocation11 + $0xcf0] sm:$0xff] }
 0x4ef   :  { %6514 = vmatpush1.bf16.msra.mxu0 %v8633_v54  ;;  %v3182_v54 = vld [vmem:[#allocation11 + $0xab8] sm:$0xff] }
 0x4f0   :  { %6596 = vmatpush1.bf16.msra.mxu1 %v8635_v56  ;;  %6515 = vmatprep.subr.bf16.mxu0 %v8650_v57  ;;  %v3190_v56 = vld [vmem:[#allocation11 + $0xaf8] sm:$0xff]  ;;  %v8745_v57 = vcombine.low %v3165_v40, %v3173_v41  ;;  %v8826_v40 = vcombine.high %v3245_v34, %v3253_v35 }
 0x4f1   :  { %6597 = vmatprep.subr.bf16.mxu1 %v8652_v58  ;;  %v8747_v58 = vcombine.low %v3166_v42, %v3174_v43  ;;  %v8764_v62 = vcombine.high %v3182_v54, %v3190_v56  ;;  %v3261_v42 = vld [vmem:[#allocation11 + $0xd30] sm:$0xff] }
 0x4f2   :  { %v3269_v43 = vld [vmem:[#allocation11 + $0xd70] sm:$0xff] }
 0x4f3   :  { %6516 = vmatpush1.bf16.msra.mxu0 %v8649_v2  ;;  %v3198_v2 = vld [vmem:[#allocation11 + $0xb38] sm:$0xff] }
 0x4f4   :  { %6598 = vmatpush1.bf16.msra.mxu1 %v8651_v3  ;;  %6517 = vmatprep.subr.bf16.mxu0 %v8666_v4  ;;  %v3206_v3 = vld [vmem:[#allocation11 + $0xb78] sm:$0xff]  ;;  %v8761_v4 = vcombine.low %v3181_v52, %v3189_v53  ;;  %v8842_v52 = vcombine.high %v3261_v42, %v3269_v43 }
 0x4f5   :  { %6599 = vmatprep.subr.bf16.mxu1 %v8668_v6  ;;  %v8763_v6 = vcombine.low %v3182_v54, %v3190_v56  ;;  %v8780_v10 = vcombine.high %v3198_v2, %v3206_v3  ;;  %v3277_v54 = vld [vmem:[#allocation11 + $0xdb0] sm:$0xff] }
 0x4f6   :  { %v3285_v56 = vld [vmem:[#allocation11 + $0xdf0] sm:$0xff] }
 0x4f7   :  { %6518 = vmatpush1.bf16.msra.mxu0 %v8665_v15  ;;  %v3221_v15 = vld [vmem:[#allocation11 + $0xbf0] sm:$0xff]  ;;  %v8858_v0 = vcombine.high %v3277_v54, %v3285_v56 }
 0x4f8   :  { %6600 = vmatpush1.bf16.msra.mxu1 %v8667_v16  ;;  %6528 = vmatprep.subr.bf16.mxu0 %v8682_v48  ;;  %v8794_v11 = vcombine.high %v3213_v12, %v3221_v15 }
 0x4f9   :  { %6610 = vmatprep.subr.bf16.mxu1 %v8684_v17  ;;  %v3214_v17 = vld [vmem:[#allocation11 + $0xbb8] sm:$0xff] }
 0x4fa   :  { %6520 = vmatmul.mubr.bf16.vlgmr.msra.gmra.mrb[20].mxu0 %v10454_v61 }
 0x4fb   :  { %6602 = vmatmul.mubr.bf16.vlgmr.msra.gmra.mrb[20].mxu1 %v10454_v61  ;;  %6529 = vmatpush1.bf16.msra.mxu0 %v8681_v19  ;;  %v8715_v61 = vcombine.low %v3134_v25, %v3142_v26  ;;  %v3229_v25 = vld [vmem:[#allocation11 + $0xc30] sm:$0xff] }
 0x4fc   :  { %6560 = vmatprep.mubr.bf16.mxu0 %v10458_v5  ;;  %6611 = vmatpush1.bf16.msra.mxu1 %v8683_v22  ;;  %v3237_v26 = vld [vmem:[#allocation11 + $0xc70] sm:$0xff] }
 0x4fd   :  { %6642 = vmatprep.mubr.bf16.mxu1 %v10458_v5  ;;  %6530 = vmatprep.subr.bf16.mxu0 %v8698_v55  ;;  %v8729_v5 = vcombine.low %v3149_v31, %v3157_v33  ;;  %v8779_v55 = vcombine.low %v3198_v2, %v3206_v3  ;;  %v8810_v31 = vcombine.high %v3229_v25, %v3237_v26  ;;  %v3293_v2 = vld [vmem:[#allocation11 + $0xe30] sm:$0xff] }
 0x4fe   :  { %6612 = vmatprep.subr.bf16.mxu1 %v8700_v24  ;;  %v8796_v24 = vcombine.high %v3214_v17, %v3222_v37  ;;  %v3301_v3 = vld [vmem:[#allocation11 + $0xe70] sm:$0xff] }
 0x4ff   :  { %6531 = vmatpush1.bf16.msra.mxu0 %v8697_v27  ;;  %v3230_v27 = vld [vmem:[#allocation11 + $0xc38] sm:$0xff] }
 0x500   :  { %6613 = vmatpush1.bf16.msra.mxu1 %v8699_v28  ;;  %6532 = vmatprep.subr.bf16.mxu0 %v8714_v29  ;;  %v3238_v28 = vld [vmem:[#allocation11 + $0xc78] sm:$0xff]  ;;  %v8793_v29 = vcombine.low %v3213_v12, %v3221_v15  ;;  %v8874_v12 = vcombine.high %v3293_v2, %v3301_v3 }
 0x501   :  { %6614 = vmatprep.subr.bf16.mxu1 %v8716_v30  ;;  %v8795_v30 = vcombine.low %v3214_v17, %v3222_v37  ;;  %v8812_v33 = vcombine.high %v3230_v27, %v3238_v28  ;;  %v3309_v17 = vld [vmem:[#allocation11 + $0xeb0] sm:$0xff] }
 0x502   :  { %v3317_v37 = vld [vmem:[#allocation11 + $0xef0] sm:$0xff] }
 0x503   :  { %6533 = vmatpush1.bf16.msra.mxu0 %v8713_v36  ;;  %v3246_v36 = vld [vmem:[#allocation11 + $0xcb8] sm:$0xff] }
 0x504   :  { %6615 = vmatpush1.bf16.msra.mxu1 %v8715_v61  ;;  %6534 = vmatprep.subr.bf16.mxu0 %v8730_v38  ;;  %v3254_v61 = vld [vmem:[#allocation11 + $0xcf8] sm:$0xff]  ;;  %v8809_v38 = vcombine.low %v3229_v25, %v3237_v26 }
 0x505   :  { %6616 = vmatprep.subr.bf16.mxu1 %v8732_v39  ;;  %v8811_v39 = vcombine.low %v3230_v27, %v3238_v28  ;;  %v8828_v41 = vcombine.high %v3246_v36, %v3254_v61  ;;  %v3326_v25 = vld [vmem:[#allocation11 + $0xf38] sm:$0xff]  ;;  %v10509_v27 = vld [vmem:[#allocation13] sm:$0xff]  ;;  %v8889_v28 = vcombine.low %v3309_v17, %v3317_v37 }
 0x506   :  { %v3334_v26 = vld [vmem:[#allocation11 + $0xf78] sm:$0xff] }
 0x507   :  { %6535 = vmatpush1.bf16.msra.mxu0 %v8729_v5  ;;  %v3262_v5 = vld [vmem:[#allocation11 + $0xd38] sm:$0xff] }
 0x508   :  { %6617 = vmatpush1.bf16.msra.mxu1 %v8731_v44  ;;  %6536 = vmatprep.subr.bf16.mxu0 %v8746_v45  ;;  %v3270_v44 = vld [vmem:[#allocation11 + $0xd78] sm:$0xff]  ;;  %v8825_v45 = vcombine.low %v3245_v34, %v3253_v35  ;;  %v3349_v34 = vld [vmem:[#allocation11 + $0xff0] sm:$0xff]  ;;  %v3362_v35 = vrot.slane %v10509_v27, %v10423_v49 }
 0x509   :  { %6618 = vmatprep.subr.bf16.mxu1 %v8748_v51  ;;  %v8827_v51 = vcombine.low %v3246_v36, %v3254_v61  ;;  %v8844_v53 = vcombine.high %v3262_v5, %v3270_v44  ;;  %v3342_v36 = vld [vmem:[#allocation11 + $0xfb8] sm:$0xff] }
 0x50a   :  { %v3350_v61 = vld [vmem:[#allocation11 + $0xff8] sm:$0xff] }
 0x50b   :  { %6537 = vmatpush1.bf16.msra.mxu0 %v8745_v57  ;;  %v3278_v57 = vld [vmem:[#allocation11 + $0xdb8] sm:$0xff] }
 0x50c   :  { %6619 = vmatpush1.bf16.msra.mxu1 %v8747_v58  ;;  %6538 = vmatprep.subr.bf16.mxu0 %v8762_v59  ;;  %v3286_v58 = vld [vmem:[#allocation11 + $0xdf8] sm:$0xff]  ;;  %v8841_v59 = vcombine.low %v3261_v42, %v3269_v43  ;;  %v8924_v42 = vcombine.high %v3342_v36, %v3350_v61  ;;  %v9239_v43 = vadd.f32 %v10489_v13, %v3362_v35 }
 0x50d   :  { %v10501_v9 = vpop.f32.mrb[12].mxu0  ;;  %6620 = vmatprep.subr.bf16.mxu1 %v8764_v62  ;;  %v8843_v62 = vcombine.low %v3262_v5, %v3270_v44  ;;  %v8860_v1 = vcombine.high %v3278_v57, %v3286_v58 }
 0x50e   :  { %v10503_v16 = vpop.f32.mrb[12].mxu1  ;;  %v10505_v48 = vpop.f32.mrb[13].mxu0 }
 0x50f   :  { %v10507_v18 = vpop.f32.mrb[13].mxu1  ;;  %v6238_v19 = vpop.f32.mrb[14].mxu0  ;;  %6539 = vmatpush1.bf16.msra.mxu0 %v8761_v4  ;;  %v3294_v4 = vld [vmem:[#allocation11 + $0xe38] sm:$0xff] }
 0x510   :  { %v6320_v60 = vpop.f32.mrb[14].mxu1  ;;  %6621 = vmatpush1.bf16.msra.mxu1 %v8763_v6  ;;  %v6239_v22 = vpop.f32.mrb[15].mxu0  ;;  %6540 = vmatprep.subr.bf16.mxu0 %v8778_v7  ;;  %v3302_v6 = vld [vmem:[#allocation11 + $0xe78] sm:$0xff]  ;;  %v8857_v7 = vcombine.low %v3277_v54, %v3285_v56  ;;  %v9871_v56 = vld [vmem:[#allocation14] sm:$0xff]  }
 0x511   :  { %v6321_v23 = vpop.f32.mrb[15].mxu1  ;;  %6622 = vmatprep.subr.bf16.mxu1 %v8780_v10  ;;  %v8859_v10 = vcombine.low %v3278_v57, %v3286_v58  ;;  %v8876_v15 = vcombine.high %v3294_v4, %v3302_v6  ;;  %v3310_v19 = vld [vmem:[#allocation11 + $0xeb8] sm:$0xff]  ;;  %v8873_v60 = vcombine.low %v3293_v2, %v3301_v3  ;;  %v8875_v22 = vcombine.low %v3294_v4, %v3302_v6  ;;  %v9872_v57 = vld [vmem:[#allocation14 + $0x80] sm:$0xff]   ;;  %v9878_v2 = vld [vmem:[#allocation14 + $0xd0] sm:$0xff]  }
 0x512   :  { %v3325_v23 = vld [vmem:[#allocation11 + $0xf30] sm:$0xff]  ;;  %v9873_v58 = vld [vmem:[#allocation14 + $0x48] sm:$0xff]   ;;  %v9879_v3 = vld [vmem:[#allocation14 + $0x10] sm:$0xff]  }
 0x513   :  { %6541 = vmatpush1.bf16.msra.mxu0 %v8777_v21  ;;  %v3318_v21 = vld [vmem:[#allocation11 + $0xef8] sm:$0xff]  ;;  %v9880_v4 = vld [vmem:[#allocation14 + $0x90] sm:$0xff]   ;;  %v9881_v6 = vld [vmem:[#allocation14 + $0x58] sm:$0xff]  }
 0x514   :  { %6623 = vmatpush1.bf16.msra.mxu1 %v8779_v55  ;;  %6542 = vmatprep.subr.bf16.mxu0 %v8794_v11  ;;  %v8890_v55 = vcombine.high %v3309_v17, %v3317_v37  ;;  %v8892_v11 = vcombine.high %v3310_v19, %v3318_v21  ;;  %v9887_v17 = vld [vmem:[#allocation14 + $0x20] sm:$0xff]  }
 0x515   :  { %6624 = vmatprep.subr.bf16.mxu1 %v8796_v24  ;;  %v3333_v24 = vld [vmem:[#allocation11 + $0xf70] sm:$0xff] }
 0x516   :  { %v9888_v37 = vld [vmem:[#allocation14 + $0xa0] sm:$0xff]  }
 0x517   :  { %6543 = vmatpush1.bf16.msra.mxu0 %v8793_v29  ;;  %v8891_v29 = vcombine.low %v3310_v19, %v3318_v21  ;;  %v9889_v19 = vld [vmem:[#allocation14 + $0x68] sm:$0xff]  }
 0x518   :  { %6625 = vmatpush1.bf16.msra.mxu1 %v8795_v30  ;;  %6544 = vmatprep.subr.bf16.mxu0 %v8810_v31  ;;  %v8906_v30 = vcombine.high %v3325_v23, %v3333_v24  ;;  %v8908_v31 = vcombine.high %v3326_v25, %v3334_v26  ;;  %v9890_v21 = vld [vmem:[#allocation14 + $0xe8] sm:$0xff]  }
 0x519   :  { %6626 = vmatprep.subr.bf16.mxu1 %v8812_v33  ;;  %v3341_v33 = vld [vmem:[#allocation11 + $0xfb0] sm:$0xff] }
 0x51a   :  { %v8921_v44 = vcombine.low %v3341_v33, %v3349_v34 }
 0x51b   :  { %6545 = vmatpush1.bf16.msra.mxu0 %v8809_v38  ;;  %v3370_v38 = vrot.slane %v10509_v27, %v10426_v50 }
 0x51c   :  { %6627 = vmatpush1.bf16.msra.mxu1 %v8811_v39  ;;  %6546 = vmatprep.subr.bf16.mxu0 %v8826_v40  ;;  %v8905_v39 = vcombine.low %v3325_v23, %v3333_v24  ;;  %v8907_v40 = vcombine.low %v3326_v25, %v3334_v26  ;;  %v9892_v23 = vld [vmem:[#allocation14 + $0xa8] sm:$0xff]   ;;  %v9893_v24 = vld [vmem:[#allocation14 + $0x70] sm:$0xff]   ;;  %v3366_v25 = vrot.slane %v10509_v27, %v10437_v63 }
 0x51d   :  { %6628 = vmatprep.subr.bf16.mxu1 %v8828_v41  ;;  %v8922_v41 = vcombine.high %v3341_v33, %v3349_v34  ;;  %v9241_v5 = vadd.f32 %v10491_v14, %v3370_v38  ;;  %v9874_v14 = vld [vmem:[#allocation14 + $0xc8] sm:$0xff]   ;;  %v9894_v26 = vld [vmem:[#allocation14 + $0xf0] sm:$0xff]   ;;  %v9897_v34 = vld [vmem:[#allocation14 + $0x78] sm:$0xff]  }
 0x51e   :  { %v9896_v33 = vld [vmem:[#allocation14 + $0xb0] sm:$0xff]   ;;  %v9240_v35 = vadd.f32 %v10487_v32, %v3366_v25  ;;  %v9903_v32 = vld [vmem:[#allocation14 + $0x100] sm:$0xff]  }
 0x51f   :  { %6547 = vmatpush1.bf16.msra.mxu0 %v8825_v45  ;;  %v8923_v45 = vcombine.low %v3342_v36, %v3350_v61  ;;  %v6654_v54 = vmax.f32 %v9241_v5, 0.0  ;;  %v9898_v36 = vld [vmem:[#allocation14 + $0xf8] sm:$0xff]   ;;  %v9928_v25 = vld [vmem:[#allocation14 + $0x1b0] sm:$0xff]  }
 0x520   :  { %6629 = vmatpush1.bf16.msra.mxu1 %v8827_v51  ;;  %6548 = vmatprep.subr.bf16.mxu0 %v8842_v52  ;;  %v9869_v51 = vld [vmem:[#allocation14 + $0x40] sm:$0xff]  }
 0x521   :  { %6630 = vmatprep.subr.bf16.mxu1 %v8844_v53  ;;  %v9870_v52 = vld [vmem:[#allocation14 + $0xc0] sm:$0xff]   ;;  %v6652_v53 = vmax.f32 %v9239_v43, 0.0 }
 0x522   :  { %v9902_v43 = vld [vmem:[#allocation14 + $0x1c0] sm:$0xff]  }
 0x523   :  { %6549 = vmatpush1.bf16.msra.mxu0 %v8841_v59  ;;  %v6668_v13 = vpack.c.bf16 %v6652_v53, %v6652_v53  ;;  %v6670_v59 = vpack.c.bf16 %v6654_v54, %v6654_v54  ;;  %v9906_v53 = vld [vmem:[#allocation14 + $0x1c8] sm:$0xff]  }
 0x524   :  { %6631 = vmatpush1.bf16.msra.mxu1 %v8843_v62  ;;  %6550 = vmatprep.subr.bf16.mxu0 %v8858_v0  ;;  %v9875_v62 = vld [vmem:[#allocation14 + $0x8] sm:$0xff]  }
 0x525   :  { %6632 = vmatprep.subr.bf16.mxu1 %v8860_v1  ;;  %v9876_v0 = vld [vmem:[#allocation14 + $0x88] sm:$0xff]   ;;  %v9877_v1 = vld [vmem:[#allocation14 + $0x50] sm:$0xff]  }
 0x527   :  { %6551 = vmatpush1.bf16.msra.mxu0 %v8857_v7  ;;  %v9882_v7 = vld [vmem:[#allocation14 + $0xd8] sm:$0xff]  }
 0x528   :  { %6633 = vmatpush1.bf16.msra.mxu1 %v8859_v10  ;;  %6552 = vmatprep.subr.bf16.mxu0 %v8874_v12  ;;  %v9884_v10 = vld [vmem:[#allocation14 + $0x98] sm:$0xff]   ;;  %v9885_v12 = vld [vmem:[#allocation14 + $0x60] sm:$0xff]  }
 0x529   :  { %6634 = vmatprep.subr.bf16.mxu1 %v8876_v15  ;;  %v9886_v15 = vld [vmem:[#allocation14 + $0xe0] sm:$0xff]  }
 0x52b   :  { %6553 = vmatpush1.bf16.msra.mxu0 %v8873_v60  ;;  %v3377_v60 = vsub.s32 5, %v10415_v46 }
 0x52c   :  { %6635 = vmatpush1.bf16.msra.mxu1 %v8875_v22  ;;  %6554 = vmatprep.subr.bf16.mxu0 %v8890_v55  ;;  %v3385_v22 = vsub.s32 7, %v10415_v46  ;;  %v9891_v55 = vld [vmem:[#allocation14 + $0x28] sm:$0xff]  }
 0x52d   :  { %6636 = vmatprep.subr.bf16.mxu1 %v8892_v11  ;;  %v3358_v11 = vrot.slane %v10509_v27, %v10418_v47 }
 0x52f   :  { %6555 = vmatpush1.bf16.msra.mxu0 %v8889_v28  ;;  %v3378_v28 = vrot.slane %v10509_v27, %v3377_v60 }
 0x530   :  { %6637 = vmatpush1.bf16.msra.mxu1 %v8891_v29  ;;  %6556 = vmatprep.subr.bf16.mxu0 %v8906_v30  ;;  %v3386_v29 = vrot.slane %v10509_v27, %v3385_v22  ;;  %v9895_v30 = vld [vmem:[#allocation14 + $0x30] sm:$0xff]  }
 0x531   :  { %6638 = vmatprep.subr.bf16.mxu1 %v8908_v31  ;;  %v9238_v31 = vadd.f32 %v10485_v8, %v3358_v11  ;;  %v9243_v61 = vadd.f32 %v10505_v48, %v3378_v28  ;;  %v6653_v8 = vmax.f32 %v9240_v35, 0.0  ;;  %v9904_v48 = vld [vmem:[#allocation14 + $0x180] sm:$0xff]   ;;  %v9926_v11 = vld [vmem:[#allocation14 + $0x1f0] sm:$0xff]  }
 0x532   :  { %v9245_v38 = vadd.f32 %v10507_v18, %v3386_v29  ;;  %v9905_v18 = vld [vmem:[#allocation14 + $0x148] sm:$0xff]   ;;  %v9930_v29 = vld [vmem:[#allocation14 + $0x1f8] sm:$0xff]   ;;  %v9934_v35 = vld [vmem:[#allocation14 + $0x2c0] sm:$0xff]  }
 0x533   :  { %6557 = vmatpush1.bf16.msra.mxu0 %v8905_v39  ;;  %v9899_v39 = vld [vmem:[#allocation14 + $0x38] sm:$0xff]   ;;  %v6656_v5 = vmax.f32 %v9243_v61, 0.0  ;;  %v9936_v61 = vld [vmem:[#allocation14 + $0x280] sm:$0xff]  }
 0x534   :  { %6639 = vmatpush1.bf16.msra.mxu1 %v8907_v40  ;;  %6558 = vmatprep.subr.bf16.mxu0 %v8922_v41  ;;  %v6651_v40 = vmax.f32 %v9238_v31, 0.0  ;;  %v9900_v41 = vld [vmem:[#allocation14 + $0xb8] sm:$0xff]  }
 0x535   :  { %6640 = vmatprep.subr.bf16.mxu1 %v8924_v42  ;;  %v9901_v42 = vld [vmem:[#allocation14 + $0x140] sm:$0xff]  }
 0x537   :  { %6559 = vmatpush1.bf16.msra.mxu0 %v8921_v44  ;;  %v6658_v44 = vmax.f32 %v9245_v38, 0.0  ;;  %v9937_v38 = vld [vmem:[#allocation14 + $0x248] sm:$0xff]  }
 0x538   :  { %6641 = vmatpush1.bf16.msra.mxu1 %v8923_v45  ;;  %9054 = vmatprep.subr.bf16.mxu0 %v9869_v51  ;;  %v6667_v45 = vpack.c.bf16 %v6651_v40, %v6651_v40  ;;  %v6669_v51 = vpack.c.bf16 %v6653_v8, %v6653_v8  ;;  %v9939_v40 = vld [vmem:[#allocation14 + $0x208] sm:$0xff]   ;;  %v9942_v8 = vld [vmem:[#allocation14 + $0x2d0] sm:$0xff]  }
 0x539   :  { %9076 = vmatprep.subr.bf16.mxu1 %v9870_v52  ;;  %v6672_v52 = vpack.c.bf16 %v6656_v5, %v6656_v5  ;;  %v6674_v54 = vpack.c.bf16 %v6658_v44, %v6658_v44  ;;  %v9944_v5 = vld [vmem:[#allocation14 + $0x290] sm:$0xff]   ;;  %v9945_v44 = vld [vmem:[#allocation14 + $0x258] sm:$0xff]  }
 0x53a   :  { %6561 = vmatmul.mubr.bf16.vlgmr.msra.gmra.mrb[20].mxu0 %v10467_v20 }
 0x53b   :  { %6643 = vmatmul.mubr.bf16.vlgmr.msra.gmra.mrb[20].mxu1 %v10467_v20  ;;  %9055 = vmatpush3.bf16.msra.mxu0 %v9871_v56  ;;  %v9883_v20 = vld [vmem:[#allocation14 + $0x18] sm:$0xff]   ;;  %v9907_v56 = vld [vmem:[#allocation14 + $0x108] sm:$0xff]  }
 0x53c   :  { %7746 = vmatprep.mubr.bf16.mxu0 %v6668_v13  ;;  %9077 = vmatpush3.bf16.msra.mxu1 %v9872_v57  ;;  %v9908_v57 = vld [vmem:[#allocation14 + $0x188] sm:$0xff]   ;;  %v9910_v13 = vld [vmem:[#allocation14 + $0x1d0] sm:$0xff]  }
 0x53d   :  { %7786 = vmatprep.mubr.bf16.mxu1 %v6670_v59  ;;  %9056 = vmatprep.subr.bf16.mxu0 %v9873_v58  ;;  %v9909_v58 = vld [vmem:[#allocation14 + $0x150] sm:$0xff]  }
 0x53e   :  { %9078 = vmatprep.subr.bf16.mxu1 %v9874_v14  ;;  %v9911_v14 = vld [vmem:[#allocation14 + $0x110] sm:$0xff]  }
 0x53f   :  { %9057 = vmatpush3.bf16.msra.mxu0 %v9875_v62  ;;  %v9912_v59 = vld [vmem:[#allocation14 + $0x190] sm:$0xff]   ;;  %v9913_v62 = vld [vmem:[#allocation14 + $0x158] sm:$0xff]  }
 0x540   :  { %9079 = vmatpush3.bf16.msra.mxu1 %v9876_v0  ;;  %9058 = vmatprep.subr.bf16.mxu0 %v9877_v1  ;;  %v9914_v0 = vld [vmem:[#allocation14 + $0x1d8] sm:$0xff]  }
 0x541   :  { %9080 = vmatprep.subr.bf16.mxu1 %v9878_v2  ;;  %v9915_v1 = vld [vmem:[#allocation14 + $0x118] sm:$0xff]  }
 0x542   :  { %v9916_v2 = vld [vmem:[#allocation14 + $0x198] sm:$0xff]  }
 0x543   :  { %9059 = vmatpush3.bf16.msra.mxu0 %v9879_v3  ;;  %v9917_v3 = vld [vmem:[#allocation14 + $0x160] sm:$0xff]  }
 0x544   :  { %9081 = vmatpush3.bf16.msra.mxu1 %v9880_v4  ;;  %9060 = vmatprep.subr.bf16.mxu0 %v9881_v6  ;;  %v9918_v4 = vld [vmem:[#allocation14 + $0x1e0] sm:$0xff]  }
 0x545   :  { %9082 = vmatprep.subr.bf16.mxu1 %v9882_v7  ;;  %v9919_v6 = vld [vmem:[#allocation14 + $0x120] sm:$0xff]   ;;  %v3373_v7 = vsub.s32 4, %v10415_v46 }
 0x547   :  { %9061 = vmatpush3.bf16.msra.mxu0 %v9883_v20  ;;  %v9920_v20 = vld [vmem:[#allocation14 + $0x1a0] sm:$0xff]  }
 0x548   :  { %9083 = vmatpush3.bf16.msra.mxu1 %v9884_v10  ;;  %9062 = vmatprep.subr.bf16.mxu0 %v9885_v12  ;;  %v9921_v10 = vld [vmem:[#allocation14 + $0x168] sm:$0xff]   ;;  %v3381_v12 = vsub.s32 6, %v10415_v46 }
 0x549   :  { %9084 = vmatprep.subr.bf16.mxu1 %v9886_v15  ;;  %v9922_v15 = vld [vmem:[#allocation14 + $0x1e8] sm:$0xff]  }
 0x54b   :  { %9063 = vmatpush3.bf16.msra.mxu0 %v9887_v17  ;;  %v9923_v17 = vld [vmem:[#allocation14 + $0x128] sm:$0xff]  }
 0x54c   :  { %9085 = vmatpush3.bf16.msra.mxu1 %v9888_v37  ;;  %9064 = vmatprep.subr.bf16.mxu0 %v9889_v19  ;;  %v3374_v37 = vrot.slane %v10509_v27, %v3373_v7  ;;  %v9924_v19 = vld [vmem:[#allocation14 + $0x1a8] sm:$0xff]  }
 0x54d   :  { %9086 = vmatprep.subr.bf16.mxu1 %v9890_v21  ;;  %v9925_v21 = vld [vmem:[#allocation14 + $0x170] sm:$0xff]  }
 0x54f   :  { %9065 = vmatpush3.bf16.msra.mxu0 %v9891_v55  ;;  %v3382_v55 = vrot.slane %v10509_v27, %v3381_v12  ;;  %v9932_v27 = vld [vmem:[#allocation14 + $0x1b8] sm:$0xff]  }
 0x550   :  { %9087 = vmatpush3.bf16.msra.mxu1 %v9892_v23  ;;  %9066 = vmatprep.subr.bf16.mxu0 %v9893_v24  ;;  %v9927_v23 = vld [vmem:[#allocation14 + $0x130] sm:$0xff]   ;;  %v9242_v24 = vadd.f32 %v10501_v9, %v3374_v37  ;;  %v9935_v9 = vld [vmem:[#allocation14 + $0x200] sm:$0xff]  }
 0x551   :  { %9088 = vmatprep.subr.bf16.mxu1 %v9894_v26  ;;  %v9929_v26 = vld [vmem:[#allocation14 + $0x178] sm:$0xff]   ;;  %v9244_v28 = vadd.f32 %v10503_v16, %v3382_v55 }
 0x552   :  { %v6655_v31 = vmax.f32 %v9242_v24, 0.0 }
 0x553   :  { %9067 = vmatpush3.bf16.msra.mxu0 %v9895_v30  ;;  %v9931_v30 = vld [vmem:[#allocation14 + $0x138] sm:$0xff]  }
 0x554   :  { %9089 = vmatpush3.bf16.msra.mxu1 %v9896_v33  ;;  %9068 = vmatprep.subr.bf16.mxu0 %v9897_v34  ;;  %v9933_v33 = vld [vmem:[#allocation14 + $0x240] sm:$0xff]   ;;  %v6657_v34 = vmax.f32 %v9244_v28, 0.0 }
 0x555   :  { %9090 = vmatprep.subr.bf16.mxu1 %v9898_v36  ;;  %v6671_v36 = vpack.c.bf16 %v6655_v31, %v6655_v31  ;;  %v9965_v31 = vld [vmem:[#allocation14 + $0x340] sm:$0xff]  }
 0x556   :  { %v6673_v16 = vpack.c.bf16 %v6657_v34, %v6657_v34  ;;  %v9967_v34 = vld [vmem:[#allocation14 + $0x300] sm:$0xff]  }
 0x557   :  { %9069 = vmatpush3.bf16.msra.mxu0 %v9899_v39  ;;  %v9938_v39 = vld [vmem:[#allocation14 + $0x2c8] sm:$0xff]  }
 0x558   :  { %9091 = vmatpush3.bf16.msra.mxu1 %v9900_v41  ;;  %9098 = vmatprep.subr.bf16.mxu0 %v9901_v42  ;;  %v9940_v41 = vld [vmem:[#allocation14 + $0x288] sm:$0xff]   ;;  %v9941_v42 = vld [vmem:[#allocation14 + $0x250] sm:$0xff]  }
 0x559   :  { %9120 = vmatprep.subr.bf16.mxu1 %v9902_v43  ;;  %v9943_v43 = vld [vmem:[#allocation14 + $0x210] sm:$0xff]  }
 0x55a   :  { %7747 = vmatmul.mubr.bf16.vlgmr.msra.gmra.mrb[24].mxu0 %v6667_v45  ;;  %v9947_v45 = vld [vmem:[#allocation14 + $0x218] sm:$0xff]  }
 0x55b   :  { %7787 = vmatmul.mubr.bf16.vlgmr.msra.gmra.mrb[24].mxu1 %v6669_v51  ;;  %9099 = vmatpush3.bf16.msra.mxu0 %v9903_v32  ;;  %v9946_v32 = vld [vmem:[#allocation14 + $0x2d8] sm:$0xff]   ;;  %v9949_v51 = vld [vmem:[#allocation14 + $0x260] sm:$0xff]  }
 0x55c   :  { %7826 = vmatprep.mubr.bf16.mxu0 %v6672_v52  ;;  %9121 = vmatpush3.bf16.msra.mxu1 %v9904_v48  ;;  %v9948_v48 = vld [vmem:[#allocation14 + $0x298] sm:$0xff]   ;;  %v9951_v52 = vld [vmem:[#allocation14 + $0x220] sm:$0xff]  }
 0x55d   :  { %7866 = vmatprep.mubr.bf16.mxu1 %v6674_v54  ;;  %9100 = vmatprep.subr.bf16.mxu0 %v9905_v18  ;;  %v9950_v18 = vld [vmem:[#allocation14 + $0x2e0] sm:$0xff]   ;;  %v10545_v54 = vld [vmem:[#allocation13 + $0x8] sm:$0xff] }
 0x55e   :  { %9122 = vmatprep.subr.bf16.mxu1 %v9906_v53  ;;  %v9952_v53 = vld [vmem:[#allocation14 + $0x2a0] sm:$0xff]  }
 0x55f   :  { %9101 = vmatpush3.bf16.msra.mxu0 %v9907_v56  ;;  %v9953_v56 = vld [vmem:[#allocation14 + $0x268] sm:$0xff]  }
 0x560   :  { %9123 = vmatpush3.bf16.msra.mxu1 %v9908_v57  ;;  %9102 = vmatprep.subr.bf16.mxu0 %v9909_v58  ;;  %v9954_v57 = vld [vmem:[#allocation14 + $0x2e8] sm:$0xff]   ;;  %v3394_v58 = vrot.slane %v10545_v54, %v10423_v49 }
 0x561   :  { %9124 = vmatprep.subr.bf16.mxu1 %v9910_v13  ;;  %v9955_v13 = vld [vmem:[#allocation14 + $0x228] sm:$0xff]  }
 0x563   :  { %9103 = vmatpush3.bf16.msra.mxu0 %v9911_v14  ;;  %v3390_v14 = vrot.slane %v10545_v54, %v10418_v47 }
 0x564   :  { %9125 = vmatpush3.bf16.msra.mxu1 %v9912_v59  ;;  %9104 = vmatprep.subr.bf16.mxu0 %v9913_v62  ;;  %v3402_v59 = vrot.slane %v10545_v54, %v10426_v50  ;;  %v9956_v62 = vld [vmem:[#allocation14 + $0x2a8] sm:$0xff]  }
 0x565   :  { %9126 = vmatprep.subr.bf16.mxu1 %v9914_v0  ;;  %v9957_v0 = vld [vmem:[#allocation14 + $0x270] sm:$0xff]  }
 0x567   :  { %9105 = vmatpush3.bf16.msra.mxu0 %v9915_v1 }
 0x568   :  { %9127 = vmatpush3.bf16.msra.mxu1 %v9916_v2  ;;  %9106 = vmatprep.subr.bf16.mxu0 %v9917_v3  ;;  %v3398_v2 = vrot.slane %v10545_v54, %v10437_v63  ;;  %v9958_v3 = vld [vmem:[#allocation14 + $0x2f0] sm:$0xff]  }
 0x569   :  { %9128 = vmatprep.subr.bf16.mxu1 %v9918_v4 }
 0x56b   :  { %9107 = vmatpush3.bf16.msra.mxu0 %v9919_v6 }
 0x56c   :  { %9129 = vmatpush3.bf16.msra.mxu1 %v9920_v20  ;;  %9108 = vmatprep.subr.bf16.mxu0 %v9921_v10 }
 0x56d   :  { %9130 = vmatprep.subr.bf16.mxu1 %v9922_v15  ;;  %v9959_v15 = vld [vmem:[#allocation14 + $0x230] sm:$0xff]  }
 0x56f   :  { %9109 = vmatpush3.bf16.msra.mxu0 %v9923_v17 }
 0x570   :  { %9131 = vmatpush3.bf16.msra.mxu1 %v9924_v19  ;;  %9110 = vmatprep.subr.bf16.mxu0 %v9925_v21  ;;  %v9960_v19 = vld [vmem:[#allocation14 + $0x2b0] sm:$0xff]   ;;  %v9961_v21 = vld [vmem:[#allocation14 + $0x278] sm:$0xff]  }
 0x571   :  { %9132 = vmatprep.subr.bf16.mxu1 %v9926_v11 }
 0x573   :  { %9111 = vmatpush3.bf16.msra.mxu0 %v9927_v23  ;;  %v9962_v23 = vld [vmem:[#allocation14 + $0x2f8] sm:$0xff]  }
 0x574   :  { %9133 = vmatpush3.bf16.msra.mxu1 %v9928_v25  ;;  %9112 = vmatprep.subr.bf16.mxu0 %v9929_v26  ;;  %v9963_v26 = vld [vmem:[#allocation14 + $0x238] sm:$0xff]  }
 0x575   :  { %9134 = vmatprep.subr.bf16.mxu1 %v9930_v29 }
 0x577   :  { %9113 = vmatpush3.bf16.msra.mxu0 %v9931_v30  ;;  %v9964_v30 = vld [vmem:[#allocation14 + $0x2b8] sm:$0xff]  }
 0x578   :  { %9135 = vmatpush3.bf16.msra.mxu1 %v9932_v27  ;;  %9142 = vmatprep.subr.bf16.mxu0 %v9933_v33  ;;  %v9966_v33 = vld [vmem:[#allocation14 + $0x3c0] sm:$0xff]  }
 0x579   :  { %9164 = vmatprep.subr.bf16.mxu1 %v9934_v35 }
 0x57a   :  { %7827 = vmatmul.mubr.bf16.vlgmr.msra.gmra.mrb[28].mxu0 %v6671_v36  ;;  %v9969_v36 = vld [vmem:[#allocation14 + $0x348] sm:$0xff]  }
 0x57b   :  { %7867 = vmatmul.mubr.bf16.vlgmr.msra.gmra.mrb[28].mxu1 %v6673_v16  ;;  %9143 = vmatpush3.bf16.msra.mxu0 %v9935_v9  ;;  %v9968_v9 = vld [vmem:[#allocation14 + $0x380] sm:$0xff]   ;;  %v9971_v16 = vld [vmem:[#allocation14 + $0x308] sm:$0xff]  }
 0x57c   :  { %9165 = vmatpush3.bf16.msra.mxu1 %v9936_v61  ;;  %9144 = vmatprep.subr.bf16.mxu0 %v9937_v38  ;;  %v9970_v38 = vld [vmem:[#allocation14 + $0x3c8] sm:$0xff]  }
 0x57d   :  { %9166 = vmatprep.subr.bf16.mxu1 %v9938_v39  ;;  %v9972_v39 = vld [vmem:[#allocation14 + $0x388] sm:$0xff]  }
 0x57f   :  { %9145 = vmatpush3.bf16.msra.mxu0 %v9939_v40  ;;  %v9973_v40 = vld [vmem:[#allocation14 + $0x350] sm:$0xff]  }
 0x580   :  { %9167 = vmatpush3.bf16.msra.mxu1 %v9940_v41  ;;  %9146 = vmatprep.subr.bf16.mxu0 %v9941_v42  ;;  %v9974_v41 = vld [vmem:[#allocation14 + $0x3d0] sm:$0xff]  }
 0x581   :  { %9168 = vmatprep.subr.bf16.mxu1 %v9942_v8  ;;  %v9975_v42 = vld [vmem:[#allocation14 + $0x310] sm:$0xff]  }
 0x582   :  { %v9976_v8 = vld [vmem:[#allocation14 + $0x390] sm:$0xff]  }
 0x583   :  { %9147 = vmatpush3.bf16.msra.mxu0 %v9943_v43  ;;  %v9977_v43 = vld [vmem:[#allocation14 + $0x358] sm:$0xff]  }
 0x584   :  { %9169 = vmatpush3.bf16.msra.mxu1 %v9944_v5  ;;  %9148 = vmatprep.subr.bf16.mxu0 %v9945_v44  ;;  %v9978_v5 = vld [vmem:[#allocation14 + $0x3d8] sm:$0xff]  }
 0x585   :  { %9170 = vmatprep.subr.bf16.mxu1 %v9946_v32  ;;  %v9979_v44 = vld [vmem:[#allocation14 + $0x318] sm:$0xff]  }
 0x586   :  { %v9980_v32 = vld [vmem:[#allocation14 + $0x398] sm:$0xff]  }
 0x587   :  { %9149 = vmatpush3.bf16.msra.mxu0 %v9947_v45  ;;  %v9981_v45 = vld [vmem:[#allocation14 + $0x360] sm:$0xff]  }
 0x588   :  { %9171 = vmatpush3.bf16.msra.mxu1 %v9948_v48  ;;  %9150 = vmatprep.subr.bf16.mxu0 %v9949_v51  ;;  %v9982_v48 = vld [vmem:[#allocation14 + $0x3e0] sm:$0xff]  }
 0x589   :  { %9172 = vmatprep.subr.bf16.mxu1 %v9950_v18  ;;  %v9983_v51 = vld [vmem:[#allocation14 + $0x320] sm:$0xff]  }
 0x58a   :  { %v9984_v18 = vld [vmem:[#allocation14 + $0x3a0] sm:$0xff]  }
 0x58b   :  { %9151 = vmatpush3.bf16.msra.mxu0 %v9951_v52  ;;  %v9985_v52 = vld [vmem:[#allocation14 + $0x368] sm:$0xff]  }
 0x58c   :  { %9173 = vmatpush3.bf16.msra.mxu1 %v9952_v53  ;;  %9152 = vmatprep.subr.bf16.mxu0 %v9953_v56  ;;  %v9986_v53 = vld [vmem:[#allocation14 + $0x3e8] sm:$0xff]  }
 0x58d   :  { %v6398_v1 = vpop.f32.mrb[16].mxu0  ;;  %9174 = vmatprep.subr.bf16.mxu1 %v9954_v57  ;;  %v9987_v56 = vld [vmem:[#allocation14 + $0x328] sm:$0xff]  }
 0x58e   :  { %v6480_v4 = vpop.f32.mrb[16].mxu1  ;;  %v6400_v6 = vpop.f32.mrb[17].mxu0  ;;  %v9246_v47 = vadd.f32 %v6398_v1, %v3390_v14  ;;  %v9988_v57 = vld [vmem:[#allocation14 + $0x3a8] sm:$0xff]   ;;  %v9991_v14 = vld [vmem:[#allocation14 + $0x330] sm:$0xff]   ;;  %v9995_v1 = vld [vmem:[#allocation14 + $0x338] sm:$0xff]  }
 0x58f   :  { %v9247_v49 = vadd.f32 %v6400_v6, %v3394_v58  ;;  %v6482_v20 = vpop.f32.mrb[17].mxu1  ;;  %v6402_v10 = vpop.f32.mrb[18].mxu0  ;;  %9153 = vmatpush3.bf16.msra.mxu0 %v9955_v13  ;;  %v9248_v55 = vadd.f32 %v6480_v4, %v3398_v2  ;;  %v9989_v58 = vld [vmem:[#allocation14 + $0x370] sm:$0xff]   ;;  %v9996_v2 = vld [vmem:[#allocation14 + $0x3b8] sm:$0xff]   ;;  %v3414_v4 = vrot.slane %v10545_v54, %v3381_v12  ;;  %v3410_v6 = vrot.slane %v10545_v54, %v3377_v60 }
 0x590   :  { %v9249_v17 = vadd.f32 %v6482_v20, %v3402_v59  ;;  %v6484_v37 = vpop.f32.mrb[18].mxu1  ;;  %9175 = vmatpush3.bf16.msra.mxu1 %v9956_v62  ;;  %v6403_v50 = vpop.f32.mrb[19].mxu0  ;;  %9154 = vmatprep.subr.bf16.mxu0 %v9957_v0  ;;  %v6659_v28 = vmax.f32 %v9246_v47, 0.0  ;;  %v9990_v13 = vld [vmem:[#allocation14 + $0x3f0] sm:$0xff]   ;;  %v9993_v62 = vld [vmem:[#allocation14 + $0x378] sm:$0xff]  }
 0x591   :  { %v6660_v11 = vmax.f32 %v9247_v49, 0.0  ;;  %v6485_v63 = vpop.f32.mrb[19].mxu1  ;;  %9176 = vmatprep.subr.bf16.mxu1 %v9958_v3  ;;  %v6661_v27 = vmax.f32 %v9248_v55, 0.0  ;;  %v9992_v59 = vld [vmem:[#allocation14 + $0x3b0] sm:$0xff]   ;;  %v9994_v0 = vld [vmem:[#allocation14 + $0x3f8] sm:$0xff]   ;;  %v3406_v3 = vrot.slane %v10545_v54, %v3373_v7  ;;  %v3418_v49 = vrot.slane %v10545_v54, %v3385_v22 }
 0x592   :  { %v6662_v24 = vmax.f32 %v9249_v17, 0.0  ;;  %v6675_v35 = vpack.c.bf16 %v6659_v28, %v6659_v28  ;;  %v8925_v28 = vld [vmem:[#allocation16] ss:$0 sm:$0xff] }
 0x593   :  { %v6676_v25 = vpack.c.bf16 %v6660_v11, %v6660_v11  ;;  %9155 = vmatpush3.bf16.msra.mxu0 %v9959_v15  ;;  %v6677_v61 = vpack.c.bf16 %v6661_v27, %v6661_v27 }
 0x594   :  { %v6678_v29 = vpack.c.bf16 %v6662_v24, %v6662_v24  ;;  %9177 = vmatpush3.bf16.msra.mxu1 %v9960_v19  ;;  %9156 = vmatprep.subr.bf16.mxu0 %v9961_v21 }
 0x595   :  { %7906 = vmatprep.mubr.bf16.mxu0 %v6676_v25  ;;  %9178 = vmatprep.subr.bf16.mxu1 %v9962_v23 }
 0x596   :  { %7946 = vmatprep.mubr.bf16.mxu1 %v6678_v29 }
 0x597   :  { %9157 = vmatpush3.bf16.msra.mxu0 %v9963_v26 }
 0x598   :  { %9179 = vmatpush3.bf16.msra.mxu1 %v9964_v30  ;;  %9186 = vmatprep.subr.bf16.mxu0 %v9965_v31 }
 0x599   :  { %9208 = vmatprep.subr.bf16.mxu1 %v9966_v33 }
 0x59a   :  { %7907 = vmatmul.mubr.bf16.vlgmr.msra.gmra.mrb[32].mxu0 %v6675_v35 }
 0x59b   :  { %7947 = vmatmul.mubr.bf16.vlgmr.msra.gmra.mrb[32].mxu1 %v6677_v61  ;;  %9187 = vmatpush3.bf16.msra.mxu0 %v9967_v34 }
 0x59c   :  { %9209 = vmatpush3.bf16.msra.mxu1 %v9968_v9  ;;  %9188 = vmatprep.subr.bf16.mxu0 %v9969_v36 }
 0x59d   :  { %9210 = vmatprep.subr.bf16.mxu1 %v9970_v38 }
 0x59f   :  { %9189 = vmatpush3.bf16.msra.mxu0 %v9971_v16 }
 0x5a0   :  { %9211 = vmatpush3.bf16.msra.mxu1 %v9972_v39  ;;  %9190 = vmatprep.subr.bf16.mxu0 %v9973_v40 }
 0x5a1   :  { %9212 = vmatprep.subr.bf16.mxu1 %v9974_v41 }
 0x5a3   :  { %9191 = vmatpush3.bf16.msra.mxu0 %v9975_v42 }
 0x5a4   :  { %9213 = vmatpush3.bf16.msra.mxu1 %v9976_v8  ;;  %9192 = vmatprep.subr.bf16.mxu0 %v9977_v43 }
 0x5a5   :  { %9214 = vmatprep.subr.bf16.mxu1 %v9978_v5 }
 0x5a7   :  { %9193 = vmatpush3.bf16.msra.mxu0 %v9979_v44 }
 0x5a8   :  { %9215 = vmatpush3.bf16.msra.mxu1 %v9980_v32  ;;  %9194 = vmatprep.subr.bf16.mxu0 %v9981_v45 }
 0x5a9   :  { %9216 = vmatprep.subr.bf16.mxu1 %v9982_v48 }
 0x5ab   :  { %9195 = vmatpush3.bf16.msra.mxu0 %v9983_v51 }
 0x5ac   :  { %9217 = vmatpush3.bf16.msra.mxu1 %v9984_v18  ;;  %9196 = vmatprep.subr.bf16.mxu0 %v9985_v52 }
 0x5ad   :  { %9218 = vmatprep.subr.bf16.mxu1 %v9986_v53 }
 0x5af   :  { %9197 = vmatpush3.bf16.msra.mxu0 %v9987_v56 }
 0x5b0   :  { %9219 = vmatpush3.bf16.msra.mxu1 %v9988_v57  ;;  %9198 = vmatprep.subr.bf16.mxu0 %v9989_v58 }
 0x5b1   :  { %9220 = vmatprep.subr.bf16.mxu1 %v9990_v13 }
 0x5b3   :  { %9199 = vmatpush3.bf16.msra.mxu0 %v9991_v14 }
 0x5b4   :  { %9221 = vmatpush3.bf16.msra.mxu1 %v9992_v59  ;;  %9200 = vmatprep.subr.bf16.mxu0 %v9993_v62 }
 0x5b5   :  { %9222 = vmatprep.subr.bf16.mxu1 %v9994_v0 }
 0x5b7   :  { %9201 = vmatpush3.bf16.msra.mxu0 %v9995_v1 }
 0x5b8   :  { %9223 = vmatpush3.bf16.msra.mxu1 %v9996_v2 }
 0x60d   :  { %v6562_v20 = vpop.f32.mrb[20].mxu0 }
 0x60e   :  { %v9250_v10 = vadd.f32 %v6562_v20, %v3406_v3  ;;  %v6644_v15 = vpop.f32.mrb[20].mxu1  ;;  %v6564_v47 = vpop.f32.mrb[21].mxu0 }
 0x60f   :  { %v9252_v17 = vadd.f32 %v6644_v15, %v3414_v4  ;;  %v9251_v37 = vadd.f32 %v6564_v47, %v3410_v6  ;;  %v6646_v50 = vpop.f32.mrb[21].mxu1  ;;  %v6566_v7 = vpop.f32.mrb[22].mxu0 }
 0x610   :  { %v6663_v19 = vmax.f32 %v9250_v10, 0.0  ;;  %v9253_v21 = vadd.f32 %v6646_v50, %v3418_v49  ;;  %v6648_v55 = vpop.f32.mrb[22].mxu1  ;;  %v6567_v12 = vpop.f32.mrb[23].mxu0 }
 0x611   :  { %v6665_v11 = vmax.f32 %v9252_v17, 0.0  ;;  %v6664_v63 = vmax.f32 %v9251_v37, 0.0  ;;  %v6649_v23 = vpop.f32.mrb[23].mxu1 }
 0x612   :  { %v6666_v60 = vmax.f32 %v9253_v21, 0.0  ;;  %v6679_v46 = vpack.c.bf16 %v6663_v19, %v6663_v19 }
 0x613   :  { %v6680_v24 = vpack.c.bf16 %v6664_v63, %v6664_v63  ;;  %v6681_v22 = vpack.c.bf16 %v6665_v11, %v6665_v11 }
 0x614   :  { %v6682_v25 = vpack.c.bf16 %v6666_v60, %v6666_v60 }
 0x615   :  { %7986 = vmatprep.mubr.bf16.mxu0 %v6680_v24 }
 0x616   :  { %8026 = vmatprep.mubr.bf16.mxu1 %v6682_v25  ;;  %7987 = vmatmul.mubr.bf16.vlgmr.msra.gmra.mrb[36].mxu0 %v6679_v46 }
 0x617   :  { %8027 = vmatmul.mubr.bf16.vlgmr.msra.gmra.mrb[36].mxu1 %v6681_v22 }
 0x62d   :  { %v9070_v54 = vpop.f32.mrb[24].mxu0 }
 0x62e   :  { %v9092_v26 = vpop.f32.mrb[24].mxu1  ;;  %v9071_v29 = vpop.f32.mrb[25].mxu0 }
 0x62f   :  { %v9072_v30 = vadd.f32 %v9071_v29, %v9070_v54  ;;  %v9093_v31 = vpop.f32.mrb[25].mxu1  ;;  %v9073_v27 = vpop.f32.mrb[26].mxu0 }
 0x630   :  { %v9094_v33 = vadd.f32 %v9093_v31, %v9092_v26  ;;  %v9095_v34 = vpop.f32.mrb[26].mxu1  ;;  %v9074_v35 = vpop.f32.mrb[27].mxu0 }
 0x631   :  { %v7749_v9 = vadd.f32 %v9072_v30, %v8925_v28  ;;  %v9096_v36 = vpop.f32.mrb[27].mxu1 }
 0x633   :  { %v7789_v61 = vadd.f32 %v9094_v33, %v7749_v9 }
 0x64d   :  { %v9114_v38 = vpop.f32.mrb[28].mxu0 }
 0x64e   :  { %v9136_v16 = vpop.f32.mrb[28].mxu1  ;;  %v9115_v39 = vpop.f32.mrb[29].mxu0 }
 0x64f   :  { %v9116_v40 = vadd.f32 %v9115_v39, %v9114_v38  ;;  %v9137_v41 = vpop.f32.mrb[29].mxu1  ;;  %v9117_v42 = vpop.f32.mrb[30].mxu0 }
 0x650   :  { %v9138_v8 = vadd.f32 %v9137_v41, %v9136_v16  ;;  %v9139_v43 = vpop.f32.mrb[30].mxu1  ;;  %v9118_v5 = vpop.f32.mrb[31].mxu0 }
 0x651   :  { %v7829_v44 = vadd.f32 %v9116_v40, %v7789_v61  ;;  %v9140_v32 = vpop.f32.mrb[31].mxu1 }
 0x653   :  { %v7869_v45 = vadd.f32 %v9138_v8, %v7829_v44 }
 0x66d   :  { %v9158_v48 = vpop.f32.mrb[32].mxu0 }
 0x66e   :  { %v9180_v51 = vpop.f32.mrb[32].mxu1  ;;  %v9159_v18 = vpop.f32.mrb[33].mxu0 }
 0x66f   :  { %v9160_v52 = vadd.f32 %v9159_v18, %v9158_v48  ;;  %v9181_v53 = vpop.f32.mrb[33].mxu1  ;;  %v9161_v56 = vpop.f32.mrb[34].mxu0 }
 0x670   :  { %v9182_v57 = vadd.f32 %v9181_v53, %v9180_v51  ;;  %v9183_v58 = vpop.f32.mrb[34].mxu1  ;;  %v9162_v13 = vpop.f32.mrb[35].mxu0 }
 0x671   :  { %v7909_v14 = vadd.f32 %v9160_v52, %v7869_v45  ;;  %v9184_v59 = vpop.f32.mrb[35].mxu1 }
 0x673   :  { %v7949_v62 = vadd.f32 %v9182_v57, %v7909_v14 }
 0x6e9   :  { %v9202_v0 = vpop.f32.mrb[36].mxu0 }
 0x6ea   :  { %v9224_v1 = vpop.f32.mrb[36].mxu1  ;;  %v9203_v2 = vpop.f32.mrb[37].mxu0 }
 0x6eb   :  { %v9204_v3 = vadd.f32 %v9203_v2, %v9202_v0  ;;  %v9225_v4 = vpop.f32.mrb[37].mxu1  ;;  %v9205_v6 = vpop.f32.mrb[38].mxu0 }
 0x6ec   :  { %v9226_v49 = vadd.f32 %v9225_v4, %v9224_v1  ;;  %v9227_v20 = vpop.f32.mrb[38].mxu1  ;;  %v9206_v10 = vpop.f32.mrb[39].mxu0 }
 0x6ed   :  { %v7989_v15 = vadd.f32 %v9204_v3, %v7949_v62  ;;  %v9228_v47 = vpop.f32.mrb[39].mxu1 }
 0x6ef   :  { %v8029_v17 = vadd.f32 %v9226_v49, %v7989_v15 }
 0x6f1   :  { %8034 = vst [vmem:[#allocation17] sm:$0xff] %v8029_v17 }
 0x6f2   :  { %10206 = shalt.err (!%p10203_p6)
}
 0x6f3   :  { %s10207_s21 = scalar_lea.hbm %s10588_s9, 128 }
 0x6f4   :  { %p10208_p7 = scmp.ne.s32.totalorder %s10588_s9, %s10207_s21  ;;  %p10211_p8 = scmp.lt.u32.totalorder %s10207_s21, %s10588_s9 }
 0x6f6   :  { %p10213_p9 = pnand %p10211_p8, %p10208_p7 }
 0x6f8   :  { %10216 = shalt.err (!%p10213_p9)
}
 0x6f9   :  { %8044 = dma.vmem_to_hbm [thread:$0]  %s8042_s3, 128, %s10588_s9, [#allocation4]  }
 0x6fa   :  { %10227 = dma.done.wait [#allocation4], 128  }
 0x6fb   :  { %10228 = vsyncadd [#allocation4], 4294967168 }
 0x6fc   :  { %8048 = vsyncpa [#allocation3], 1 }
 0x6fd   :  { %8049 = vsyncpa [#allocation6], 1 }
 0x6fe   :  { %8050 = vsyncpa [#allocation9], 1 }
 0x6ff   :  { %8051 = vsyncpa [#allocation12], 1 }
 0x700   :  { %8052 = vsyncpa [#allocation15], 1 }
 0x701   :  { %8053 = vsyncpa [#allocation4], 1 }

</bundles_post_ra>
